<compile_context>
chip_gen: v7x
topology: tpu7x:2x2x1
jax: 0.10.0
libtpu: 0.0.40
codegen_flags: <defaults>
</compile_context>

<pallas_src>
import functools

import jax
import jax.numpy as jnp
from jax.experimental import pallas as pl
from jax.experimental.pallas import tpu as pltpu


def _round_up(x: int, m: int) -> int:
    return (x + m - 1) // m * m


# ----------------------------- Pallas kernel --------------------------------
def cdecoder_kernel(
    z_ref,              # [TB, L]     bf16  latent codes
    y_ref,              # [TB, 1]     int32 class ids
    w1z_ref,            # [L, 256]    bf16  W1 rows for z
    cls_ref,            # [NCP, 256]  f32   embed @ W1[latent:,:] + b1 (padded rows)
    w2_ref, b2_ref,     # [256, 512]  bf16, [1, 512]  f32
    w3_ref, b3_ref,     # [512, 1024] bf16, [1, 1024] f32
    w4_ref, b4_ref,     # [1024, OUTP] bf16, [1, OUTP] f32 (zero-padded cols)
    out_ref,            # [TB, OUTP]  f32
):
    tb = z_ref.shape[0]
    ncp = cls_ref.shape[0]

    # Fused embedding "gather": one-hot(y) @ cls_table == cls_table[y] exactly
    # (products with 0.0 / 1.0 are exact), done on the MXU.
    lane_ids = jax.lax.broadcasted_iota(jnp.int32, (tb, ncp), 1)
    one_hot = (lane_ids == y_ref[...]).astype(jnp.float32)

    # Layer 1: z @ W1z + (embed(y) @ W1cls + b1), then ReLU.
    h = jnp.dot(z_ref[...], w1z_ref[...], preferred_element_type=jnp.float32)
    h = h + jnp.dot(one_hot, cls_ref[...], preferred_element_type=jnp.float32)
    h = jnp.maximum(h, 0.0)

    h = jnp.maximum(
        jnp.dot(h.astype(jnp.bfloat16), w2_ref[...],
                preferred_element_type=jnp.float32) + b2_ref[...], 0.0)
    h = jnp.maximum(
        jnp.dot(h.astype(jnp.bfloat16), w3_ref[...],
                preferred_element_type=jnp.float32) + b3_ref[...], 0.0)
    out_ref[...] = jnp.tanh(
        jnp.dot(h.astype(jnp.bfloat16), w4_ref[...],
                preferred_element_type=jnp.float32) + b4_ref[...])


# ------------------------------ Parameters -----------------------------------
def make_params(key, latent_dim, output_dim, num_classes):
    """Deterministic f32 params, PyTorch-like layout (weights stored [in, out])."""
    dims = [
        ("embed", (num_classes, num_classes)),
        ("w1", (latent_dim + num_classes, 256)), ("b1", (1, 256)),
        ("w2", (256, 512)), ("b2", (1, 512)),
        ("w3", (512, 1024)), ("b3", (1, 1024)),
        ("w4", (1024, output_dim)), ("b4", (1, output_dim)),
    ]
    params = {}
    keys = jax.random.split(key, len(dims))
    for k, (name, shape) in zip(keys, dims):
        if name == "embed":
            params[name] = jax.random.normal(k, shape, dtype=jnp.float32)
        else:
            fan_in = shape[0] if name.startswith("w") else shape[1]
            bound = 1.0 / jnp.sqrt(jnp.float32(fan_in))
            params[name] = jax.random.uniform(
                k, shape, dtype=jnp.float32, minval=-bound, maxval=bound)
    return params


def prepare_params(params, latent_dim):
    """One-time conversion to kernel storage format.

    - W1 split into a z-part (bf16, [latent,256]) and a class table
      cls_table[c] = embed[c] @ W1[latent:,:] + b1 (f32, rows padded to 128).
    - W2/W3/W4 in bf16; W4/b4 columns zero-padded to a multiple of 128.
    - Biases b2/b3/b4 in f32.
    """
    num_classes = params["embed"].shape[0]
    w1 = params["w1"]
    w1z = w1[:latent_dim].astype(jnp.bfloat16)                   # [L, 256]
    cls_table = params["embed"] @ w1[latent_dim:] + params["b1"]  # [NC, 256] f32
    ncp = _round_up(num_classes, 128)
    if ncp != num_classes:
        cls_table = jnp.pad(cls_table, ((0, ncp - num_classes), (0, 0)))

    out_dim = params["w4"].shape[1]
    out_pad = _round_up(out_dim, 128)
    w4 = params["w4"].astype(jnp.bfloat16)
    b4 = params["b4"].astype(jnp.float32)
    if out_pad != out_dim:
        w4 = jnp.pad(w4, ((0, 0), (0, out_pad - out_dim)))
        b4 = jnp.pad(b4, ((0, 0), (0, out_pad - out_dim)))

    return {
        "w1z": w1z,
        "cls": cls_table.astype(jnp.float32),
        "w2": params["w2"].astype(jnp.bfloat16), "b2": params["b2"].astype(jnp.float32),
        "w3": params["w3"].astype(jnp.bfloat16), "b3": params["b3"].astype(jnp.float32),
        "w4": w4, "b4": b4,
    }


# ------------------------------ Forward --------------------------------------
@functools.partial(
    jax.jit, static_argnames=("out_dim", "tile_b", "single_buffer_weights"))
def cdecoder_forward(prepped, z, y, *, out_dim, tile_b=256,
                     single_buffer_weights=True):
    B, lat = z.shape
    z = z.astype(jnp.bfloat16)                 # halves activation DMA
    y = y.astype(jnp.int32).reshape(B, 1)      # class ids as a VMEM column

    out_pad = prepped["w4"].shape[1]
    ncp = prepped["cls"].shape[0]

    # Batch tiling: >= 2 grid steps for large B (v7x has 2 TCs), single step
    # for tiny B (don't duplicate the weight fetch). Sublane-aligned tiles.
    if B >= 128:
        tb = min(tile_b, _round_up(-(-B // 2), 8))
    else:
        tb = min(tile_b, _round_up(B, 8))
    b_pad = _round_up(B, tb)
    if b_pad != B:
        z = jnp.pad(z, ((0, b_pad - B), (0, 0)))
        y = jnp.pad(y, ((0, b_pad - B), (0, 0)))
    grid = (b_pad // tb,)

    def _wspec(shape):
        # Weights/biases have a constant index_map -> resident in VMEM across
        # all grid steps; single-buffer them to reclaim the dead second copy.
        if single_buffer_weights:
            return pl.BlockSpec(shape, lambda i: (0, 0),
                                pipeline_mode=pl.Buffered(1))
        return pl.BlockSpec(shape, lambda i: (0, 0))

    out = pl.pallas_call(
        cdecoder_kernel,
        out_shape=jax.ShapeDtypeStruct((b_pad, out_pad), jnp.float32),
        grid_spec=pltpu.PrefetchScalarGridSpec(
            num_scalar_prefetch=0,
            grid=grid,
            in_specs=[
                pl.BlockSpec((tb, lat), lambda i: (i, 0)),   # z (bf16)
                pl.BlockSpec((tb, 1), lambda i: (i, 0)),     # y ids (int32)
                _wspec((lat, 256)),
                _wspec((ncp, 256)),
                _wspec((256, 512)), _wspec((1, 512)),
                _wspec((512, 1024)), _wspec((1, 1024)),
                _wspec((1024, out_pad)), _wspec((1, out_pad)),
            ],
            out_specs=pl.BlockSpec((tb, out_pad), lambda i: (i, 0)),
        ),
        compiler_params=pltpu.CompilerParams(
            dimension_semantics=("parallel",),
            vmem_limit_bytes=32 << 20,
        ),
    )(z, y, prepped["w1z"], prepped["cls"], prepped["w2"], prepped["b2"],
      prepped["w3"], prepped["b3"], prepped["w4"], prepped["b4"])

    return out[:B, :out_dim]


# ------------------------------ References ------------------------------------
def cdecoder_reference(params, z, y):
    """Plain-JAX f32 reference of the PyTorch forward."""
    y_emb = jnp.take(params["embed"], y, axis=0)
    h = jnp.concatenate([z, y_emb], axis=1)
    h = jnp.maximum(h @ params["w1"] + params["b1"], 0.0)
    h = jnp.maximum(h @ params["w2"] + params["b2"], 0.0)
    h = jnp.maximum(h @ params["w3"] + params["b3"], 0.0)
    return jnp.tanh(h @ params["w4"] + params["b4"])


def cdecoder_reference_matched(params, z, y, latent_dim):
    """Same math as the kernel (bf16 weights, f32 accumulation, fused class
    table gathered per example) for a tight numerical comparison."""
    w1z = params["w1"][:latent_dim].astype(jnp.bfloat16)
    cls_table = params["embed"] @ params["w1"][latent_dim:] + params["b1"]
    h = jnp.dot(z.astype(jnp.bfloat16), w1z, preferred_element_type=jnp.float32)
    h = jnp.maximum(h + cls_table[y], 0.0)
    for wk, bk in (("w2", "b2"), ("w3", "b3")):
        h = jnp.maximum(
            jnp.dot(h.astype(jnp.bfloat16), params[wk].astype(jnp.bfloat16),
                    preferred_element_type=jnp.float32) + params[bk], 0.0)
    return jnp.tanh(
        jnp.dot(h.astype(jnp.bfloat16), params["w4"].astype(jnp.bfloat16),
                preferred_element_type=jnp.float32) + params["b4"])


if __name__ == "__main__":
    # Small shapes consistent with the module (MNIST-style decoder).
    batch = 8
    latent_dim = 8
    output_dim = 784
    num_classes = 10

    key = jax.random.PRNGKey(0)
    kp, kz, ky = jax.random.split(key, 3)
    params = make_params(kp, latent_dim, output_dim, num_classes)
    z = jax.random.normal(kz, (batch, latent_dim), dtype=jnp.float32)
    y = jax.random.randint(ky, (batch,), 0, num_classes, dtype=jnp.int32)

    prepped = prepare_params(params, latent_dim)

    try:
        out = jax.block_until_ready(
            cdecoder_forward(prepped, z, y, out_dim=output_dim))
    except Exception:
        # Fallback: JAX build without single-buffer (Buffered(1)) support on
        # resident weight specs -> use default double-buffered BlockSpecs.
        out = jax.block_until_ready(
            cdecoder_forward(prepped, z, y, out_dim=output_dim,
                             single_buffer_weights=False))

    ref_matched = cdecoder_reference_matched(params, z, y, latent_dim)
    ref_f32 = cdecoder_reference(params, z, y)

    assert out.shape == (batch, output_dim)
    assert bool(jnp.all(jnp.isfinite(out)))
    assert jnp.allclose(out, ref_matched, atol=2e-3, rtol=2e-3)
    assert jnp.allclose(out, ref_f32, atol=5e-2, rtol=5e-2)

    print("KERNEL_OK")
</pallas_src>

<mosaic_0001>
module attributes {stable_mosaic.version = 11 : i64} {
  func.func @cdecoder_kernel(%arg0: i32, %arg1: memref<8x8xbf16, #tpu.memory_space<vmem>>, %arg2: memref<8x1xi32, #tpu.memory_space<vmem>>, %arg3: memref<8x256xbf16, #tpu.memory_space<vmem>>, %arg4: memref<128x256xf32, #tpu.memory_space<vmem>>, %arg5: memref<256x512xbf16, #tpu.memory_space<vmem>>, %arg6: memref<1x512xf32, #tpu.memory_space<vmem>>, %arg7: memref<512x1024xbf16, #tpu.memory_space<vmem>>, %arg8: memref<1x1024xf32, #tpu.memory_space<vmem>>, %arg9: memref<1024x896xbf16, #tpu.memory_space<vmem>>, %arg10: memref<1x896xf32, #tpu.memory_space<vmem>>, %arg11: memref<8x896xf32, #tpu.memory_space<vmem>>) attributes {dimension_semantics = [#tpu.dimension_semantics<parallel>], iteration_bounds = array<i64: 1>, scalar_prefetch = 0 : i64, scratch_operands = 0 : i64, tpu.core_type = #tpu.core_type<tc>, window_params = [{transform_indices = @transform_0, window_bounds = array<i64: 8, 8>}, {transform_indices = @transform_1, window_bounds = array<i64: 8, 1>}, {pipeline_mode = #tpu.pipeline_mode<synchronous>, transform_indices = @transform_2, window_bounds = array<i64: 8, 256>}, {pipeline_mode = #tpu.pipeline_mode<synchronous>, transform_indices = @transform_3, window_bounds = array<i64: 128, 256>}, {pipeline_mode = #tpu.pipeline_mode<synchronous>, transform_indices = @transform_4, window_bounds = array<i64: 256, 512>}, {pipeline_mode = #tpu.pipeline_mode<synchronous>, transform_indices = @transform_5, window_bounds = array<i64: 1, 512>}, {pipeline_mode = #tpu.pipeline_mode<synchronous>, transform_indices = @transform_6, window_bounds = array<i64: 512, 1024>}, {pipeline_mode = #tpu.pipeline_mode<synchronous>, transform_indices = @transform_7, window_bounds = array<i64: 1, 1024>}, {pipeline_mode = #tpu.pipeline_mode<synchronous>, transform_indices = @transform_8, window_bounds = array<i64: 1024, 896>}, {pipeline_mode = #tpu.pipeline_mode<synchronous>, transform_indices = @transform_9, window_bounds = array<i64: 1, 896>}, {transform_indices = @transform_10, window_bounds = array<i64: 8, 896>}]} {
    %0 = tpu.iota {dimensions = array<i32: 1>} : vector<8x128xi32>
    %c0 = arith.constant 0 : index
    %c0_0 = arith.constant 0 : index
    %1 = vector.load %arg2[%c0, %c0_0] : memref<8x1xi32, #tpu.memory_space<vmem>>, vector<8x1xi32>
    %2 = vector.broadcast %1 : vector<8x1xi32> to vector<8x128xi32>
    %3 = arith.cmpi eq, %0, %2 : vector<8x128xi32>
    %4 = arith.extui %3 : vector<8x128xi1> to vector<8x128xi32>
    %5 = arith.sitofp %4 : vector<8x128xi32> to vector<8x128xf32>
    %c0_1 = arith.constant 0 : index
    %c0_2 = arith.constant 0 : index
    %6 = vector.load %arg1[%c0_1, %c0_2] : memref<8x8xbf16, #tpu.memory_space<vmem>>, vector<8x8xbf16>
    %c0_3 = arith.constant 0 : index
    %c0_4 = arith.constant 0 : index
    %7 = vector.load %arg3[%c0_3, %c0_4] : memref<8x256xbf16, #tpu.memory_space<vmem>>, vector<8x256xbf16>
    %cst = arith.constant dense<0.000000e+00> : vector<8x256xf32>
    %8 = tpu.matmul %6, %7, %cst {dimension_numbers = #tpu.dot_dimension_numbers<[1], [0], [0], [1], [0, 0, 1, 1], [], []>} : vector<8x8xbf16>, vector<8x256xbf16>, vector<8x256xf32> -> vector<8x256xf32>
    %c0_5 = arith.constant 0 : index
    %c0_6 = arith.constant 0 : index
    %9 = vector.load %arg4[%c0_5, %c0_6] : memref<128x256xf32, #tpu.memory_space<vmem>>, vector<128x256xf32>
    %cst_7 = arith.constant dense<0.000000e+00> : vector<8x256xf32>
    %10 = tpu.matmul %5, %9, %cst_7 {dimension_numbers = #tpu.dot_dimension_numbers<[1], [0], [0], [1], [0, 0, 1, 1], [], []>} : vector<8x128xf32>, vector<128x256xf32>, vector<8x256xf32> -> vector<8x256xf32>
    %11 = arith.addf %8, %10 : vector<8x256xf32>
    %cst_8 = arith.constant 0.000000e+00 : f32
    %12 = vector.broadcast %cst_8 : f32 to vector<8x256xf32>
    %13 = arith.maximumf %11, %12 : vector<8x256xf32>
    %14 = arith.truncf %13 : vector<8x256xf32> to vector<8x256xbf16>
    %c0_9 = arith.constant 0 : index
    %c0_10 = arith.constant 0 : index
    %15 = vector.load %arg5[%c0_9, %c0_10] : memref<256x512xbf16, #tpu.memory_space<vmem>>, vector<256x512xbf16>
    %cst_11 = arith.constant dense<0.000000e+00> : vector<8x512xf32>
    %16 = tpu.matmul %14, %15, %cst_11 {dimension_numbers = #tpu.dot_dimension_numbers<[1], [0], [0], [1], [0, 0, 1, 1], [], []>} : vector<8x256xbf16>, vector<256x512xbf16>, vector<8x512xf32> -> vector<8x512xf32>
    %c0_12 = arith.constant 0 : index
    %c0_13 = arith.constant 0 : index
    %17 = vector.load %arg6[%c0_12, %c0_13] : memref<1x512xf32, #tpu.memory_space<vmem>>, vector<1x512xf32>
    %18 = vector.broadcast %17 : vector<1x512xf32> to vector<8x512xf32>
    %19 = arith.addf %16, %18 : vector<8x512xf32>
    %cst_14 = arith.constant 0.000000e+00 : f32
    %20 = vector.broadcast %cst_14 : f32 to vector<8x512xf32>
    %21 = arith.maximumf %19, %20 : vector<8x512xf32>
    %22 = arith.truncf %21 : vector<8x512xf32> to vector<8x512xbf16>
    %c0_15 = arith.constant 0 : index
    %c0_16 = arith.constant 0 : index
    %23 = vector.load %arg7[%c0_15, %c0_16] : memref<512x1024xbf16, #tpu.memory_space<vmem>>, vector<512x1024xbf16>
    %cst_17 = arith.constant dense<0.000000e+00> : vector<8x1024xf32>
    %24 = tpu.matmul %22, %23, %cst_17 {dimension_numbers = #tpu.dot_dimension_numbers<[1], [0], [0], [1], [0, 0, 1, 1], [], []>} : vector<8x512xbf16>, vector<512x1024xbf16>, vector<8x1024xf32> -> vector<8x1024xf32>
    %c0_18 = arith.constant 0 : index
    %c0_19 = arith.constant 0 : index
    %25 = vector.load %arg8[%c0_18, %c0_19] : memref<1x1024xf32, #tpu.memory_space<vmem>>, vector<1x1024xf32>
    %26 = vector.broadcast %25 : vector<1x1024xf32> to vector<8x1024xf32>
    %27 = arith.addf %24, %26 : vector<8x1024xf32>
    %cst_20 = arith.constant 0.000000e+00 : f32
    %28 = vector.broadcast %cst_20 : f32 to vector<8x1024xf32>
    %29 = arith.maximumf %27, %28 : vector<8x1024xf32>
    %30 = arith.truncf %29 : vector<8x1024xf32> to vector<8x1024xbf16>
    %c0_21 = arith.constant 0 : index
    %c0_22 = arith.constant 0 : index
    %31 = vector.load %arg9[%c0_21, %c0_22] : memref<1024x896xbf16, #tpu.memory_space<vmem>>, vector<1024x896xbf16>
    %cst_23 = arith.constant dense<0.000000e+00> : vector<8x896xf32>
    %32 = tpu.matmul %30, %31, %cst_23 {dimension_numbers = #tpu.dot_dimension_numbers<[1], [0], [0], [1], [0, 0, 1, 1], [], []>} : vector<8x1024xbf16>, vector<1024x896xbf16>, vector<8x896xf32> -> vector<8x896xf32>
    %c0_24 = arith.constant 0 : index
    %c0_25 = arith.constant 0 : index
    %33 = vector.load %arg10[%c0_24, %c0_25] : memref<1x896xf32, #tpu.memory_space<vmem>>, vector<1x896xf32>
    %34 = vector.broadcast %33 : vector<1x896xf32> to vector<8x896xf32>
    %35 = arith.addf %32, %34 : vector<8x896xf32>
    %36 = math.tanh %35 : vector<8x896xf32>
    %c0_26 = arith.constant 0 : index
    %c0_27 = arith.constant 0 : index
    %37 = vector.load %arg11[%c0_26, %c0_27] : memref<8x896xf32, #tpu.memory_space<vmem>>, vector<8x896xf32>
    tpu.vector_store %arg11[%c0_26, %c0_27], %36 {strides = array<i32>} : memref<8x896xf32, #tpu.memory_space<vmem>>, vector<8x896xf32>,
    return
  }
  func.func @transform_0(%arg0: i32) -> (i32, i32) {
    %c0_i32 = arith.constant 0 : i32
    %c0_i32_0 = arith.constant 0 : i32
    return %arg0, %c0_i32 : i32, i32
  }
  func.func @transform_1(%arg0: i32) -> (i32, i32) {
    %c0_i32 = arith.constant 0 : i32
    %c0_i32_0 = arith.constant 0 : i32
    return %arg0, %c0_i32 : i32, i32
  }
  func.func @transform_2(%arg0: i32) -> (i32, i32) {
    %c0_i32 = arith.constant 0 : i32
    %c0_i32_0 = arith.constant 0 : i32
    %c0_i32_1 = arith.constant 0 : i32
    return %c0_i32, %c0_i32_0 : i32, i32
  }
  func.func @transform_3(%arg0: i32) -> (i32, i32) {
    %c0_i32 = arith.constant 0 : i32
    %c0_i32_0 = arith.constant 0 : i32
    %c0_i32_1 = arith.constant 0 : i32
    return %c0_i32, %c0_i32_0 : i32, i32
  }
  func.func @transform_4(%arg0: i32) -> (i32, i32) {
    %c0_i32 = arith.constant 0 : i32
    %c0_i32_0 = arith.constant 0 : i32
    %c0_i32_1 = arith.constant 0 : i32
    return %c0_i32, %c0_i32_0 : i32, i32
  }
  func.func @transform_5(%arg0: i32) -> (i32, i32) {
    %c0_i32 = arith.constant 0 : i32
    %c0_i32_0 = arith.constant 0 : i32
    %c0_i32_1 = arith.constant 0 : i32
    return %c0_i32, %c0_i32_0 : i32, i32
  }
  func.func @transform_6(%arg0: i32) -> (i32, i32) {
    %c0_i32 = arith.constant 0 : i32
    %c0_i32_0 = arith.constant 0 : i32
    %c0_i32_1 = arith.constant 0 : i32
    return %c0_i32, %c0_i32_0 : i32, i32
  }
  func.func @transform_7(%arg0: i32) -> (i32, i32) {
    %c0_i32 = arith.constant 0 : i32
    %c0_i32_0 = arith.constant 0 : i32
    %c0_i32_1 = arith.constant 0 : i32
    return %c0_i32, %c0_i32_0 : i32, i32
  }
  func.func @transform_8(%arg0: i32) -> (i32, i32) {
    %c0_i32 = arith.constant 0 : i32
    %c0_i32_0 = arith.constant 0 : i32
    %c0_i32_1 = arith.constant 0 : i32
    return %c0_i32, %c0_i32_0 : i32, i32
  }
  func.func @transform_9(%arg0: i32) -> (i32, i32) {
    %c0_i32 = arith.constant 0 : i32
    %c0_i32_0 = arith.constant 0 : i32
    %c0_i32_1 = arith.constant 0 : i32
    return %c0_i32, %c0_i32_0 : i32, i32
  }
  func.func @transform_10(%arg0: i32) -> (i32, i32) {
    %c0_i32 = arith.constant 0 : i32
    %c0_i32_0 = arith.constant 0 : i32
    return %arg0, %c0_i32 : i32, i32
  }
}

module attributes {stable_mosaic.version = 11 : i64} {
  func.func @cdecoder_kernel(%arg0: i32, %arg1: memref<8x8xbf16, #tpu.memory_space<vmem>>, %arg2: memref<8x1xi32, #tpu.memory_space<vmem>>, %arg3: memref<8x256xbf16, #tpu.memory_space<vmem>>, %arg4: memref<128x256xf32, #tpu.memory_space<vmem>>, %arg5: memref<256x512xbf16, #tpu.memory_space<vmem>>, %arg6: memref<1x512xf32, #tpu.memory_space<vmem>>, %arg7: memref<512x1024xbf16, #tpu.memory_space<vmem>>, %arg8: memref<1x1024xf32, #tpu.memory_space<vmem>>, %arg9: memref<1024x896xbf16, #tpu.memory_space<vmem>>, %arg10: memref<1x896xf32, #tpu.memory_space<vmem>>, %arg11: memref<8x896xf32, #tpu.memory_space<vmem>>) attributes {dimension_semantics = [#tpu.dimension_semantics<parallel>], iteration_bounds = array<i64: 1>, scalar_prefetch = 0 : i64, scratch_operands = 0 : i64, tpu.core_type = #tpu.core_type<tc>, window_params = [{transform_indices = @transform_0, window_bounds = array<i64: 8, 8>}, {transform_indices = @transform_1, window_bounds = array<i64: 8, 1>}, {pipeline_mode = #tpu.pipeline_mode<synchronous>, transform_indices = @transform_2, window_bounds = array<i64: 8, 256>}, {pipeline_mode = #tpu.pipeline_mode<synchronous>, transform_indices = @transform_3, window_bounds = array<i64: 128, 256>}, {pipeline_mode = #tpu.pipeline_mode<synchronous>, transform_indices = @transform_4, window_bounds = array<i64: 256, 512>}, {pipeline_mode = #tpu.pipeline_mode<synchronous>, transform_indices = @transform_5, window_bounds = array<i64: 1, 512>}, {pipeline_mode = #tpu.pipeline_mode<synchronous>, transform_indices = @transform_6, window_bounds = array<i64: 512, 1024>}, {pipeline_mode = #tpu.pipeline_mode<synchronous>, transform_indices = @transform_7, window_bounds = array<i64: 1, 1024>}, {pipeline_mode = #tpu.pipeline_mode<synchronous>, transform_indices = @transform_8, window_bounds = array<i64: 1024, 896>}, {pipeline_mode = #tpu.pipeline_mode<synchronous>, transform_indices = @transform_9, window_bounds = array<i64: 1, 896>}, {transform_indices = @transform_10, window_bounds = array<i64: 8, 896>}]} {
    %0 = tpu.iota {dimensions = array<i32: 1>} : vector<8x128xi32>
    %c0 = arith.constant 0 : index
    %c0_0 = arith.constant 0 : index
    %1 = vector.load %arg2[%c0, %c0_0] : memref<8x1xi32, #tpu.memory_space<vmem>>, vector<8x1xi32>
    %2 = vector.broadcast %1 : vector<8x1xi32> to vector<8x128xi32>
    %3 = arith.cmpi eq, %0, %2 : vector<8x128xi32>
    %4 = arith.extui %3 : vector<8x128xi1> to vector<8x128xi32>
    %5 = arith.sitofp %4 : vector<8x128xi32> to vector<8x128xf32>
    %c0_1 = arith.constant 0 : index
    %c0_2 = arith.constant 0 : index
    %6 = vector.load %arg1[%c0_1, %c0_2] : memref<8x8xbf16, #tpu.memory_space<vmem>>, vector<8x8xbf16>
    %c0_3 = arith.constant 0 : index
    %c0_4 = arith.constant 0 : index
    %7 = vector.load %arg3[%c0_3, %c0_4] : memref<8x256xbf16, #tpu.memory_space<vmem>>, vector<8x256xbf16>
    %cst = arith.constant dense<0.000000e+00> : vector<8x256xf32>
    %8 = tpu.matmul %6, %7, %cst {dimension_numbers = #tpu.dot_dimension_numbers<[1], [0], [0], [1], [0, 0, 1, 1], [], []>} : vector<8x8xbf16>, vector<8x256xbf16>, vector<8x256xf32> -> vector<8x256xf32>
    %c0_5 = arith.constant 0 : index
    %c0_6 = arith.constant 0 : index
    %9 = vector.load %arg4[%c0_5, %c0_6] : memref<128x256xf32, #tpu.memory_space<vmem>>, vector<128x256xf32>
    %cst_7 = arith.constant dense<0.000000e+00> : vector<8x256xf32>
    %10 = tpu.matmul %5, %9, %cst_7 {dimension_numbers = #tpu.dot_dimension_numbers<[1], [0], [0], [1], [0, 0, 1, 1], [], []>} : vector<8x128xf32>, vector<128x256xf32>, vector<8x256xf32> -> vector<8x256xf32>
    %11 = arith.addf %8, %10 : vector<8x256xf32>
    %cst_8 = arith.constant 0.000000e+00 : f32
    %12 = vector.broadcast %cst_8 : f32 to vector<8x256xf32>
    %13 = arith.maximumf %11, %12 : vector<8x256xf32>
    %14 = arith.truncf %13 : vector<8x256xf32> to vector<8x256xbf16>
    %c0_9 = arith.constant 0 : index
    %c0_10 = arith.constant 0 : index
    %15 = vector.load %arg5[%c0_9, %c0_10] : memref<256x512xbf16, #tpu.memory_space<vmem>>, vector<256x512xbf16>
    %cst_11 = arith.constant dense<0.000000e+00> : vector<8x512xf32>
    %16 = tpu.matmul %14, %15, %cst_11 {dimension_numbers = #tpu.dot_dimension_numbers<[1], [0], [0], [1], [0, 0, 1, 1], [], []>} : vector<8x256xbf16>, vector<256x512xbf16>, vector<8x512xf32> -> vector<8x512xf32>
    %c0_12 = arith.constant 0 : index
    %c0_13 = arith.constant 0 : index
    %17 = vector.load %arg6[%c0_12, %c0_13] : memref<1x512xf32, #tpu.memory_space<vmem>>, vector<1x512xf32>
    %18 = vector.broadcast %17 : vector<1x512xf32> to vector<8x512xf32>
    %19 = arith.addf %16, %18 : vector<8x512xf32>
    %cst_14 = arith.constant 0.000000e+00 : f32
    %20 = vector.broadcast %cst_14 : f32 to vector<8x512xf32>
    %21 = arith.maximumf %19, %20 : vector<8x512xf32>
    %22 = arith.truncf %21 : vector<8x512xf32> to vector<8x512xbf16>
    %c0_15 = arith.constant 0 : index
    %c0_16 = arith.constant 0 : index
    %23 = vector.load %arg7[%c0_15, %c0_16] : memref<512x1024xbf16, #tpu.memory_space<vmem>>, vector<512x1024xbf16>
    %cst_17 = arith.constant dense<0.000000e+00> : vector<8x1024xf32>
    %24 = tpu.matmul %22, %23, %cst_17 {dimension_numbers = #tpu.dot_dimension_numbers<[1], [0], [0], [1], [0, 0, 1, 1], [], []>} : vector<8x512xbf16>, vector<512x1024xbf16>, vector<8x1024xf32> -> vector<8x1024xf32>
    %c0_18 = arith.constant 0 : index
    %c0_19 = arith.constant 0 : index
    %25 = vector.load %arg8[%c0_18, %c0_19] : memref<1x1024xf32, #tpu.memory_space<vmem>>, vector<1x1024xf32>
    %26 = vector.broadcast %25 : vector<1x1024xf32> to vector<8x1024xf32>
    %27 = arith.addf %24, %26 : vector<8x1024xf32>
    %cst_20 = arith.constant 0.000000e+00 : f32
    %28 = vector.broadcast %cst_20 : f32 to vector<8x1024xf32>
    %29 = arith.maximumf %27, %28 : vector<8x1024xf32>
    %30 = arith.truncf %29 : vector<8x1024xf32> to vector<8x1024xbf16>
    %c0_21 = arith.constant 0 : index
    %c0_22 = arith.constant 0 : index
    %31 = vector.load %arg9[%c0_21, %c0_22] : memref<1024x896xbf16, #tpu.memory_space<vmem>>, vector<1024x896xbf16>
    %cst_23 = arith.constant dense<0.000000e+00> : vector<8x896xf32>
    %32 = tpu.matmul %30, %31, %cst_23 {dimension_numbers = #tpu.dot_dimension_numbers<[1], [0], [0], [1], [0, 0, 1, 1], [], []>} : vector<8x1024xbf16>, vector<1024x896xbf16>, vector<8x896xf32> -> vector<8x896xf32>
    %c0_24 = arith.constant 0 : index
    %c0_25 = arith.constant 0 : index
    %33 = vector.load %arg10[%c0_24, %c0_25] : memref<1x896xf32, #tpu.memory_space<vmem>>, vector<1x896xf32>
    %34 = vector.broadcast %33 : vector<1x896xf32> to vector<8x896xf32>
    %35 = arith.addf %32, %34 : vector<8x896xf32>
    %36 = math.tanh %35 : vector<8x896xf32>
    %c0_26 = arith.constant 0 : index
    %c0_27 = arith.constant 0 : index
    %37 = vector.load %arg11[%c0_26, %c0_27] : memref<8x896xf32, #tpu.memory_space<vmem>>, vector<8x896xf32>
    tpu.vector_store %arg11[%c0_26, %c0_27], %36 {strides = array<i32>} : memref<8x896xf32, #tpu.memory_space<vmem>>, vector<8x896xf32>,
    return
  }
  func.func @transform_0(%arg0: i32) -> (i32, i32) {
    %c0_i32 = arith.constant 0 : i32
    %c0_i32_0 = arith.constant 0 : i32
    return %arg0, %c0_i32 : i32, i32
  }
  func.func @transform_1(%arg0: i32) -> (i32, i32) {
    %c0_i32 = arith.constant 0 : i32
    %c0_i32_0 = arith.constant 0 : i32
    return %arg0, %c0_i32 : i32, i32
  }
  func.func @transform_2(%arg0: i32) -> (i32, i32) {
    %c0_i32 = arith.constant 0 : i32
    %c0_i32_0 = arith.constant 0 : i32
    %c0_i32_1 = arith.constant 0 : i32
    return %c0_i32, %c0_i32_0 : i32, i32
  }
  func.func @transform_3(%arg0: i32) -> (i32, i32) {
    %c0_i32 = arith.constant 0 : i32
    %c0_i32_0 = arith.constant 0 : i32
    %c0_i32_1 = arith.constant 0 : i32
    return %c0_i32, %c0_i32_0 : i32, i32
  }
  func.func @transform_4(%arg0: i32) -> (i32, i32) {
    %c0_i32 = arith.constant 0 : i32
    %c0_i32_0 = arith.constant 0 : i32
    %c0_i32_1 = arith.constant 0 : i32
    return %c0_i32, %c0_i32_0 : i32, i32
  }
  func.func @transform_5(%arg0: i32) -> (i32, i32) {
    %c0_i32 = arith.constant 0 : i32
    %c0_i32_0 = arith.constant 0 : i32
    %c0_i32_1 = arith.constant 0 : i32
    return %c0_i32, %c0_i32_0 : i32, i32
  }
  func.func @transform_6(%arg0: i32) -> (i32, i32) {
    %c0_i32 = arith.constant 0 : i32
    %c0_i32_0 = arith.constant 0 : i32
    %c0_i32_1 = arith.constant 0 : i32
    return %c0_i32, %c0_i32_0 : i32, i32
  }
  func.func @transform_7(%arg0: i32) -> (i32, i32) {
    %c0_i32 = arith.constant 0 : i32
    %c0_i32_0 = arith.constant 0 : i32
    %c0_i32_1 = arith.constant 0 : i32
    return %c0_i32, %c0_i32_0 : i32, i32
  }
  func.func @transform_8(%arg0: i32) -> (i32, i32) {
    %c0_i32 = arith.constant 0 : i32
    %c0_i32_0 = arith.constant 0 : i32
    %c0_i32_1 = arith.constant 0 : i32
    return %c0_i32, %c0_i32_0 : i32, i32
  }
  func.func @transform_9(%arg0: i32) -> (i32, i32) {
    %c0_i32 = arith.constant 0 : i32
    %c0_i32_0 = arith.constant 0 : i32
    %c0_i32_1 = arith.constant 0 : i32
    return %c0_i32, %c0_i32_0 : i32, i32
  }
  func.func @transform_10(%arg0: i32) -> (i32, i32) {
    %c0_i32 = arith.constant 0 : i32
    %c0_i32_0 = arith.constant 0 : i32
    return %arg0, %c0_i32 : i32, i32
  }
}

</mosaic_0001>

<bundles_post_ra>
// kernel: cdecoder_forward.1
= control target key start
LH: loop header
LB: loop body
LE: loop exit
PB: predicated region body
PF: predicated region fallthrough
CT: control target
= control target key end

     0   :  { %15 = vsyncpa [#allocation3], 0  ;;  %s8582_s0 = inlined_call_operand.vmem [shape: bf16[8,8], index: 0, kind: input, shape index: {}]   ;;  %s8583_s1 = inlined_call_operand.vmem [shape: s32[8,1], index: 1, kind: input, shape index: {}]   ;;  %s8584_s2 = inlined_call_operand.hbm [shape: bf16[8,256], index: 2, kind: input, shape index: {}]   ;;  %s8585_s3 = inlined_call_operand.hbm [shape: f32[128,256], index: 3, kind: input, shape index: {}]   ;;  %s8586_s4 = inlined_call_operand.hbm [shape: bf16[256,512], index: 4, kind: input, shape index: {}]   ;;  %s8587_s5 = inlined_call_operand.hbm [shape: f32[1,512], index: 5, kind: input, shape index: {}]   ;;  %s8588_s6 = inlined_call_operand.hbm [shape: bf16[512,1024], index: 6, kind: input, shape index: {}]   ;;  %s8589_s7 = inlined_call_operand.hbm [shape: f32[1,1024], index: 7, kind: input, shape index: {}]   ;;  %s8590_s8 = inlined_call_operand.hbm [shape: bf16[1024,896], index: 8, kind: input, shape index: {}]   ;;  %s8591_s9 = inlined_call_operand.hbm [shape: f32[1,896], index: 9, kind: input, shape index: {}]   ;;  %s8592_s10 = inlined_call_operand.hbm [shape: f32[8,896], index: 10, kind: output, shape index: {}]  }
   0x1   :  { %16 = vsyncpa [#allocation6], 0 }
   0x2   :  { %17 = vsyncpa [#allocation9], 0 }
   0x3   :  { %18 = vsyncpa [#allocation12], 0 }
   0x4   :  { %19 = vsyncpa [#allocation15], 0 }
   0x5   :  { %20 = vsyncpa [#allocation4], 0  ;;  %s8210_s13 = smov [#allocation5]   ;;  %s8000_s17 = scalar_lea.hbm %s8585_s3, 4096 }
   0x6   :  { %s40_s14 = sshll.u32 %s8210_s13, 4  ;;  %p8001_p0 = scmp.ne.s32.totalorder %s8585_s3, %s8000_s17  ;;  %s41_s14 = int_to_ptr.vmem [resolvable:$true] %s40_s14 }
   0x7   :  { %p8004_p1 = scmp.lt.u32.totalorder %s8000_s17, %s8585_s3 }
   0x9   :  { %p8006_p2 = pnand %p8004_p1, %p8001_p0 }
   0xb   :  { %8009 = shalt.err (!%p8006_p2)
}
   0xc   :  { %s8010_s22 = scalar_lea.vmem %s41_s14, 4096  ;;  %p8015_p4 = scmp.lt.s32.totalorder %s41_s14, %s41_s14 }
   0xd   :  { %p8011_p3 = scmp.ne.s32.totalorder %s41_s14, %s8010_s22  ;;  %p8016_p5 = scmp.lt.s32.totalorder %s8010_s22, %s8010_s22 }
   0xf   :  { %p8017_p6 = por %p8016_p5, %p8015_p4 }
  0x11   :  { %p8018_p7 = pnand %p8017_p6, %p8011_p3 }
  0x13   :  { %8021 = shalt.err (!%p8018_p7)
}
  0x14   :  { %s8211_s23 = smov 256   ;;  %s8212_s24 = smov 16  }
  0x15   :  { %46 = dma.hbm_to_vmem [thread:$0]  %s8585_s3, 4096, %s41_s14, [#allocation6], %s8211_s23, %s8211_s23, %s8212_s24  }
  0x16   :  { %s8213_s27 = smov [#allocation8]   ;;  %s8214_s29 = smov [#allocation11]  }
  0x17   :  { %s65_s28 = sshll.u32 %s8213_s27, 4  ;;  %s87_s30 = sshll.u32 %s8214_s29, 4  ;;  %s66_s28 = int_to_ptr.vmem [resolvable:$true] %s65_s28  ;;  %s88_s30 = int_to_ptr.vmem [resolvable:$true] %s87_s30 }
  0x18   :  { %s8022_s13 = scalar_lea.hbm %s8587_s5, 64 }
  0x19   :  { %p8023_p8 = scmp.ne.s32.totalorder %s8587_s5, %s8022_s13  ;;  %p8026_p9 = scmp.lt.u32.totalorder %s8022_s13, %s8587_s5 }
  0x1b   :  { %p8028_p10 = pnand %p8026_p9, %p8023_p8 }
  0x1d   :  { %8031 = shalt.err (!%p8028_p10)
}
  0x1e   :  { %s8032_s3 = scalar_lea.vmem %s66_s28, 64  ;;  %p8037_p12 = scmp.lt.s32.totalorder %s66_s28, %s66_s28 }
  0x1f   :  { %p8033_p11 = scmp.ne.s32.totalorder %s66_s28, %s8032_s3  ;;  %p8038_p13 = scmp.lt.s32.totalorder %s8032_s3, %s8032_s3 }
  0x21   :  { %p8039_p0 = por %p8038_p13, %p8037_p12 }
  0x23   :  { %p8040_p1 = pnand %p8039_p0, %p8033_p11 }
  0x25   :  { %8043 = shalt.err (!%p8040_p1)
}
  0x26   :  { %68 = dma.hbm_to_vmem [thread:$0]  %s8587_s5, 64, %s66_s28, [#allocation9]  }
  0x27   :  { %s8044_s22 = scalar_lea.hbm %s8589_s7, 128 }
  0x28   :  { %p8045_p2 = scmp.ne.s32.totalorder %s8589_s7, %s8044_s22  ;;  %p8048_p3 = scmp.lt.u32.totalorder %s8044_s22, %s8589_s7 }
  0x2a   :  { %p8050_p4 = pnand %p8048_p3, %p8045_p2 }
  0x2c   :  { %8053 = shalt.err (!%p8050_p4)
}
  0x2d   :  { %s8054_s11 = scalar_lea.vmem %s88_s30, 128  ;;  %p8059_p6 = scmp.lt.s32.totalorder %s88_s30, %s88_s30 }
  0x2e   :  { %p8055_p5 = scmp.ne.s32.totalorder %s88_s30, %s8054_s11  ;;  %p8060_p7 = scmp.lt.s32.totalorder %s8054_s11, %s8054_s11 }
  0x30   :  { %p8061_p8 = por %p8060_p7, %p8059_p6 }
  0x32   :  { %p8062_p9 = pnand %p8061_p8, %p8055_p5 }
  0x34   :  { %8065 = shalt.err (!%p8062_p9)
}
  0x35   :  { %90 = dma.hbm_to_vmem [thread:$0]  %s8589_s7, 128, %s88_s30, [#allocation12]  }
  0x36   :  { %s8215_s12 = smov [#allocation2]   ;;  %s8216_s15 = smov [#allocation7]  }
  0x37   :  { %s31_s13 = sshll.u32 %s8215_s12, 4  ;;  %s52_s16 = sshll.u32 %s8216_s15, 4  ;;  %s32_s13 = int_to_ptr.vmem [resolvable:$true] %s31_s13  ;;  %s53_s16 = int_to_ptr.vmem [resolvable:$true] %s52_s16 }
  0x38   :  { %s8066_s3 = scalar_lea.hbm %s8584_s2, 128 }
  0x39   :  { %p8067_p10 = scmp.ne.s32.totalorder %s8584_s2, %s8066_s3  ;;  %p8070_p11 = scmp.lt.u32.totalorder %s8066_s3, %s8584_s2 }
  0x3b   :  { %p8072_p12 = pnand %p8070_p11, %p8067_p10 }
  0x3d   :  { %8075 = shalt.err (!%p8072_p12)
}
  0x3e   :  { %s8076_s7 = scalar_lea.vmem %s32_s13, 128  ;;  %p8081_p0 = scmp.lt.s32.totalorder %s32_s13, %s32_s13 }
  0x3f   :  { %p8077_p13 = scmp.ne.s32.totalorder %s32_s13, %s8076_s7  ;;  %p8082_p1 = scmp.lt.s32.totalorder %s8076_s7, %s8076_s7 }
  0x41   :  { %p8083_p2 = por %p8082_p1, %p8081_p0 }
  0x43   :  { %p8084_p3 = pnand %p8083_p2, %p8077_p13 }
  0x45   :  { %8087 = shalt.err (!%p8084_p3)
}
  0x46   :  { %34 = dma.hbm_to_vmem [thread:$0]  %s8584_s2, 128, %s32_s13, [#allocation3]  }
  0x47   :  { %s8088_s27 = scalar_lea.hbm %s8586_s4, 8192 }
  0x48   :  { %p8089_p4 = scmp.ne.s32.totalorder %s8586_s4, %s8088_s27  ;;  %p8092_p5 = scmp.lt.u32.totalorder %s8088_s27, %s8586_s4 }
  0x4a   :  { %p8094_p6 = pnand %p8092_p5, %p8089_p4 }
  0x4c   :  { %8097 = shalt.err (!%p8094_p6)
}
  0x4d   :  { %s8098_s12 = scalar_lea.vmem %s53_s16, 8192  ;;  %p8103_p8 = scmp.lt.s32.totalorder %s53_s16, %s53_s16 }
  0x4e   :  { %p8099_p7 = scmp.ne.s32.totalorder %s53_s16, %s8098_s12  ;;  %p8104_p9 = scmp.lt.s32.totalorder %s8098_s12, %s8098_s12 }
  0x50   :  { %p8105_p10 = por %p8104_p9, %p8103_p8 }
  0x52   :  { %p8106_p11 = pnand %p8105_p10, %p8099_p7 }
  0x54   :  { %8109 = shalt.err (!%p8106_p11)
}
  0x55   :  { %58 = dma.hbm_to_vmem [thread:$0]  %s8586_s4, 8192, %s53_s16, [#allocation6], %s8211_s23, %s8211_s23, %s8212_s24  }
  0x56   :  { %s8217_s15 = smov [#allocation10]   ;;  %s8110_s14 = scalar_lea.hbm %s8588_s6, 32768 }
  0x57   :  { %s74_s17 = sshll.u32 %s8217_s15, 4  ;;  %p8111_p12 = scmp.ne.s32.totalorder %s8588_s6, %s8110_s14  ;;  %s75_s17 = int_to_ptr.vmem [resolvable:$true] %s74_s17 }
  0x58   :  { %p8114_p13 = scmp.lt.u32.totalorder %s8110_s14, %s8588_s6 }
  0x5a   :  { %p8116_p0 = pnand %p8114_p13, %p8111_p12 }
  0x5c   :  { %8119 = shalt.err (!%p8116_p0)
}
  0x5d   :  { %s8120_s30 = scalar_lea.vmem %s75_s17, 32768  ;;  %p8125_p2 = scmp.lt.s32.totalorder %s75_s17, %s75_s17 }
  0x5e   :  { %p8121_p1 = scmp.ne.s32.totalorder %s75_s17, %s8120_s30  ;;  %p8126_p3 = scmp.lt.s32.totalorder %s8120_s30, %s8120_s30 }
  0x60   :  { %p8127_p4 = por %p8126_p3, %p8125_p2 }
  0x62   :  { %p8128_p5 = pnand %p8127_p4, %p8121_p1 }
  0x64   :  { %8131 = shalt.err (!%p8128_p5)
}
  0x65   :  { %s8218_s4 = smov 512   ;;  %s8219_s23 = smov 32  }
  0x66   :  { %80 = dma.hbm_to_vmem [thread:$0]  %s8588_s6, 32768, %s75_s17, [#allocation9], %s8218_s4, %s8218_s4, %s8219_s23  }
  0x67   :  { %s8220_s22 = smov [#allocation13]   ;;  %s8132_s29 = scalar_lea.hbm %s8590_s8, 57344 }
  0x68   :  { %s96_s25 = sshll.u32 %s8220_s22, 4  ;;  %p8133_p6 = scmp.ne.s32.totalorder %s8590_s8, %s8132_s29  ;;  %s97_s25 = int_to_ptr.vmem [resolvable:$true] %s96_s25 }
  0x69   :  { %p8136_p7 = scmp.lt.u32.totalorder %s8132_s29, %s8590_s8 }
  0x6b   :  { %p8138_p8 = pnand %p8136_p7, %p8133_p6 }
  0x6d   :  { %8141 = shalt.err (!%p8138_p8)
}
  0x6e   :  { %s8142_s2 = scalar_lea.vmem %s97_s25, 57344  ;;  %p8147_p10 = scmp.lt.s32.totalorder %s97_s25, %s97_s25 }
  0x6f   :  { %p8143_p9 = scmp.ne.s32.totalorder %s97_s25, %s8142_s2  ;;  %p8148_p11 = scmp.lt.s32.totalorder %s8142_s2, %s8142_s2 }
  0x71   :  { %p8149_p12 = por %p8148_p11, %p8147_p10 }
  0x73   :  { %p8150_p13 = pnand %p8149_p12, %p8143_p9 }
  0x75   :  { %8153 = shalt.err (!%p8150_p13)
}
  0x76   :  { %s8221_s6 = smov 448   ;;  %s8222_s13 = smov 28  }
  0x77   :  { %102 = dma.hbm_to_vmem [thread:$0]  %s8590_s8, 57344, %s97_s25, [#allocation12], %s8221_s6, %s8221_s6, %s8222_s13  }
  0x78   :  { %s8223_s18 = smov [#allocation14]   ;;  %s8154_s20 = scalar_lea.hbm %s8591_s9, 112 }
  0x79   :  { %s109_s3 = sshll.u32 %s8223_s18, 4  ;;  %p8155_p0 = scmp.ne.s32.totalorder %s8591_s9, %s8154_s20  ;;  %s110_s3 = int_to_ptr.vmem [resolvable:$true] %s109_s3 }
  0x7a   :  { %p8158_p1 = scmp.lt.u32.totalorder %s8154_s20, %s8591_s9 }
  0x7c   :  { %p8160_p2 = pnand %p8158_p1, %p8155_p0 }
  0x7e   :  { %8163 = shalt.err (!%p8160_p2)
}
  0x7f   :  { %s8164_s23 = scalar_lea.vmem %s110_s3, 112  ;;  %s8168_s8 = scalar_lea.vmem %s110_s3, 128 }
  0x80   :  { %p8165_p3 = scmp.ne.s32.totalorder %s110_s3, %s8164_s23  ;;  %p8169_p4 = scmp.lt.s32.totalorder %s110_s3, %s110_s3 }
  0x81   :  { %p8170_p5 = scmp.lt.s32.totalorder %s8168_s8, %s8164_s23 }
  0x83   :  { %p8171_p6 = por %p8170_p5, %p8169_p4 }
  0x85   :  { %p8172_p7 = pnand %p8171_p6, %p8165_p3 }
  0x87   :  { %8175 = shalt.err (!%p8172_p7)
}
  0x88   :  { %112 = dma.hbm_to_vmem [thread:$0]  %s8591_s9, 112, %s110_s3, [#allocation15]  }
  0x89   :  { %8198 = dma.done.wait [#allocation3], 128  }
  0x8a   :  { %8199 = vsyncadd [#allocation3], 4294967168 }
  0x8b   :  { %8200 = dma.done.wait [#allocation6], 12288  }
  0x8c   :  { %8201 = vsyncadd [#allocation6], 4294955008 }
  0x8d   :  { %8202 = dma.done.wait [#allocation9], 32832  }
  0x8e   :  { %8203 = vsyncadd [#allocation9], 4294934464 }
  0x8f   :  { %8204 = dma.done.wait [#allocation12], 57472  }
  0x90   :  { %8205 = vsyncadd [#allocation12], 4294909824 }
  0x91   :  { %8206 = dma.done.wait [#allocation15], 112  }
  0x92   :  { %8207 = vsyncadd [#allocation15], 4294967184  ;;  %v8224_v0 = vmov 0   ;;  %v140_v1 = vld [vmem:[%s8583_s1] sm:$0xff]  ;;  %v150_v2 = vld [vmem:[#allocation5 + $0x8] sm:$0xff]  ;;  %v8225_v8 = vmov 0.0   ;;  %v138_v57 = vlaneseq }
  0x93   :  { %7247 = vset.pattern.permute.xlu0 %v8224_v0  ;;  %300 = vmatprep.mubr.bf16.mxu1 %v8224_v0  ;;  %v152_v3 = vld [vmem:[#allocation5 + $0x18] sm:$0xff]  ;;  %v149_v5 = vld [vmem:[#allocation5] sm:$0xff]  ;;  %v151_v6 = vld [vmem:[#allocation5 + $0x10] sm:$0xff]  ;;  %vm261_vm0 = vcmask 1043456   ;;  %vm257_vm1 = vcmask 64512   ;;  %v8226_v63 = vmov 1.0  }
  0x94   :  { %142 = vperm.xlu0 %7247, %v140_v1   ;;  %v7131_v4 = vpack.c.bf16 %v152_v3, %v150_v2  ;;  %v154_v7 = vld [vmem:[#allocation5 + $0x28] sm:$0xff]  ;;  %245 = vmatprep.mubr.f32.mxu0 %v8225_v8  ;;  %v7133_v9 = vpack.c.bf16 %v151_v6, %v149_v5  ;;  %v156_v10 = vld [vmem:[#allocation5 + $0x38] sm:$0xff]  ;;  %v153_v11 = vld [vmem:[#allocation5 + $0x20] sm:$0xff]  ;;  %v139_v58 = vand.u32 127, %v138_v57 }
  0x95   :  { %v155_v12 = vld [vmem:[#allocation5 + $0x30] sm:$0xff]  ;;  %v7135_v13 = vpack.c.bf16 %v156_v10, %v154_v7  ;;  %v158_v14 = vld [vmem:[#allocation5 + $0x48] sm:$0xff]  ;;  %v160_v15 = vld [vmem:[#allocation5 + $0x58] sm:$0xff] }
  0x96   :  { %7132 = vmatprep.subr.bf16.mxu0 %v7131_v4  ;;  %v7137_v16 = vpack.c.bf16 %v155_v12, %v153_v11  ;;  %v7139_v17 = vpack.c.bf16 %v160_v15, %v158_v14  ;;  %v157_v18 = vld [vmem:[#allocation5 + $0x40] sm:$0xff]  ;;  %v159_v19 = vld [vmem:[#allocation5 + $0x50] sm:$0xff]  ;;  %v162_v20 = vld [vmem:[#allocation5 + $0x68] sm:$0xff] }
  0x97   :  { %7134 = vmatpush1.bf16.msra.mxu0 %v7133_v9  ;;  %v164_v21 = vld [vmem:[#allocation5 + $0x78] sm:$0xff]  ;;  %v7141_v22 = vpack.c.bf16 %v159_v19, %v157_v18  ;;  %v161_v24 = vld [vmem:[#allocation5 + $0x60] sm:$0xff]  ;;  %v163_v25 = vld [vmem:[#allocation5 + $0x70] sm:$0xff] }
  0x98   :  { %7136 = vmatprep.subr.bf16.mxu0 %v7135_v13  ;;  %v7143_v23 = vpack.c.bf16 %v164_v21, %v162_v20  ;;  %v148_v26 = vld [vmem:[#allocation2] sm:$0xff]  ;;  %v166_v27 = vld [vmem:[#allocation5 + $0x88] sm:$0xff]  ;;  %v165_v31 = vld [vmem:[#allocation5 + $0x80] sm:$0xff]  ;;  %v7145_v32 = vpack.c.bf16 %v163_v25, %v161_v24 }
  0x99   :  { %v168_v28 = vld [vmem:[#allocation5 + $0x98] sm:$0xff]  ;;  %v6272_v29 = vcombine.high %v148_v26, %v148_v26  ;;  %v6271_v30 = vcombine.low %v148_v26, %v148_v26  ;;  %v167_v33 = vld [vmem:[#allocation5 + $0x90] sm:$0xff]  ;;  %v170_v34 = vld [vmem:[#allocation5 + $0xa8] sm:$0xff] }
  0x9a   :  { %v7147_v36 = vpack.c.bf16 %v168_v28, %v166_v27  ;;  %v147_v37 = vld [vmem:[%s8582_s0] sm:$0xf]  ;;  %v7149_v39 = vpack.c.bf16 %v167_v33, %v165_v31  ;;  %v169_v40 = vld [vmem:[#allocation5 + $0xa0] sm:$0xff]  ;;  %v171_v41 = vld [vmem:[#allocation5 + $0xb0] sm:$0xff]  ;;  %s8227_s0 = smov [#allocation16]  }
  0x9b   :  { %7138 = vmatpush1.bf16.msra.mxu0 %v7137_v16  ;;  %6273 = vmatprep.subr.msk.bf16.mxu1 %vm261_vm0, %v6272_v29  ;;  %v263_v35 = vsel %vm261_vm0, %v6271_v30, 0  ;;  %v172_v38 = vld [vmem:[#allocation5 + $0xb8] sm:$0xff]  ;;  %v174_v43 = vld [vmem:[#allocation5 + $0xc8] sm:$0xff]  ;;  %v173_v45 = vld [vmem:[#allocation5 + $0xc0] sm:$0xff]  ;;  %v7153_v47 = vpack.c.bf16 %v171_v41, %v169_v40  ;;  %s6256_s26 = sshll.u32 %s8227_s0, 4  ;;  %s6257_s26 = int_to_ptr.vmem [resolvable:$true] %s6256_s26 }
  0x9c   :  { %7140 = vmatprep.subr.bf16.mxu0 %v7139_v17  ;;  %269 = vmatpush1.bf16.msra.mxu1 %v263_v35  ;;  %v7151_v42 = vpack.c.bf16 %v172_v38, %v170_v34  ;;  %v176_v44 = vld [vmem:[#allocation5 + $0xd8] sm:$0xff]  ;;  %v175_v46 = vld [vmem:[#allocation5 + $0xd0] sm:$0xff]  ;;  %v178_v48 = vld [vmem:[#allocation5 + $0xe8] sm:$0xff]  ;;  %s8176_s27 = scalar_lea.vmem %s6257_s26, 896  ;;  %p8181_p9 = scmp.lt.s32.totalorder %s6257_s26, %s6257_s26 }
  0x9d   :  { %v180_v49 = vld [vmem:[#allocation5 + $0xf8] sm:$0xff]  ;;  %v7155_v50 = vpack.c.bf16 %v176_v44, %v174_v43  ;;  %v177_v51 = vld [vmem:[#allocation5 + $0xe0] sm:$0xff]  ;;  %v179_v52 = vld [vmem:[#allocation5 + $0xf0] sm:$0xff]  ;;  %v7157_v53 = vpack.c.bf16 %v175_v46, %v173_v45  ;;  %p8177_p8 = scmp.ne.s32.totalorder %s6257_s26, %s8176_s27  ;;  %p8182_p10 = scmp.lt.s32.totalorder %s8176_s27, %s8176_s27 }
  0x9e   :  { %v7159_v54 = vpack.c.bf16 %v180_v49, %v178_v48  ;;  %v7252_v55 = vld [vmem:[#allocation7 + $0x4] ss:$16 sps:$4 sm:$0xff]   ;;  %v7161_v56 = vpack.c.bf16 %v179_v52, %v177_v51  ;;  %v7250_v59 = vld [vmem:[#allocation7] ss:$16 sps:$4 sm:$0xff]   ;;  %v7300_v28 = vld [vmem:[#allocation7 + $0xc] ss:$16 sps:$4 sm:$0xff]  }
  0x9f   :  { %7142 = vmatpush1.bf16.msra.mxu0 %v7141_v22  ;;  %6274 = vmatmul.mubr.msk.bf16.vlgmr.msra.gmra.mrb[0].mxu1 %vm257_vm1, %v147_v37  ;;  %v7255_v60 = vld [vmem:[#allocation7 + $0x24] ss:$16 sps:$4 sm:$0xff]   ;;  %v7253_v62 = vld [vmem:[#allocation7 + $0x20] ss:$16 sps:$4 sm:$0xff]   ;;  %p8183_p11 = por %p8182_p10, %p8181_p9 }
  0xa0   :  { %7144 = vmatprep.subr.bf16.mxu0 %v7143_v23  ;;  %v7258_v0 = vld [vmem:[#allocation7 + $0x44] ss:$16 sps:$4 sm:$0xff]   ;;  %v7256_v1 = vld [vmem:[#allocation7 + $0x40] ss:$16 sps:$4 sm:$0xff]  }
  0xa1   :  { %v7261_v2 = vld [vmem:[#allocation7 + $0x64] ss:$16 sps:$4 sm:$0xff]   ;;  %v7259_v3 = vld [vmem:[#allocation7 + $0x60] ss:$16 sps:$4 sm:$0xff]   ;;  %p8184_p12 = pnand %p8183_p11, %p8177_p8 }
  0xa2   :  { %v7264_v4 = vld [vmem:[#allocation7 + $0x84] ss:$16 sps:$4 sm:$0xff]   ;;  %v7262_v5 = vld [vmem:[#allocation7 + $0x80] ss:$16 sps:$4 sm:$0xff]  }
  0xa3   :  { %7146 = vmatpush1.bf16.msra.mxu0 %v7145_v32  ;;  %v7267_v6 = vld [vmem:[#allocation7 + $0xa4] ss:$16 sps:$4 sm:$0xff]   ;;  %v7265_v7 = vld [vmem:[#allocation7 + $0xa0] ss:$16 sps:$4 sm:$0xff]  }
  0xa4   :  { %7148 = vmatprep.subr.bf16.mxu0 %v7147_v36  ;;  %v7270_v8 = vld [vmem:[#allocation7 + $0xc4] ss:$16 sps:$4 sm:$0xff]   ;;  %v7268_v9 = vld [vmem:[#allocation7 + $0xc0] ss:$16 sps:$4 sm:$0xff]  }
  0xa5   :  { %v7273_v10 = vld [vmem:[#allocation7 + $0xe4] ss:$16 sps:$4 sm:$0xff]   ;;  %v7271_v11 = vld [vmem:[#allocation7 + $0xe0] ss:$16 sps:$4 sm:$0xff]  }
  0xa6   :  { %v7276_v12 = vld [vmem:[#allocation7 + $0x104] ss:$16 sps:$4 sm:$0xff]   ;;  %v7274_v13 = vld [vmem:[#allocation7 + $0x100] ss:$16 sps:$4 sm:$0xff]  }
  0xa7   :  { %7150 = vmatpush1.bf16.msra.mxu0 %v7149_v39  ;;  %v7279_v14 = vld [vmem:[#allocation7 + $0x124] ss:$16 sps:$4 sm:$0xff]   ;;  %v7277_v15 = vld [vmem:[#allocation7 + $0x120] ss:$16 sps:$4 sm:$0xff]  }
  0xa8   :  { %7152 = vmatprep.subr.bf16.mxu0 %v7151_v42  ;;  %v7282_v16 = vld [vmem:[#allocation7 + $0x144] ss:$16 sps:$4 sm:$0xff]   ;;  %v7280_v17 = vld [vmem:[#allocation7 + $0x140] ss:$16 sps:$4 sm:$0xff]  }
  0xa9   :  { %v7285_v18 = vld [vmem:[#allocation7 + $0x164] ss:$16 sps:$4 sm:$0xff]   ;;  %v7283_v19 = vld [vmem:[#allocation7 + $0x160] ss:$16 sps:$4 sm:$0xff]  }
  0xaa   :  { %v7288_v20 = vld [vmem:[#allocation7 + $0x184] ss:$16 sps:$4 sm:$0xff]   ;;  %v7286_v21 = vld [vmem:[#allocation7 + $0x180] ss:$16 sps:$4 sm:$0xff]  }
  0xab   :  { %7154 = vmatpush1.bf16.msra.mxu0 %v7153_v47  ;;  %v7291_v22 = vld [vmem:[#allocation7 + $0x1a4] ss:$16 sps:$4 sm:$0xff]   ;;  %v7289_v23 = vld [vmem:[#allocation7 + $0x1a0] ss:$16 sps:$4 sm:$0xff]  }
  0xac   :  { %7156 = vmatprep.subr.bf16.mxu0 %v7155_v50  ;;  %v7294_v24 = vld [vmem:[#allocation7 + $0x1c4] ss:$16 sps:$4 sm:$0xff]   ;;  %v7292_v25 = vld [vmem:[#allocation7 + $0x1c0] ss:$16 sps:$4 sm:$0xff]  }
  0xad   :  { %v7297_v26 = vld [vmem:[#allocation7 + $0x1e4] ss:$16 sps:$4 sm:$0xff]   ;;  %v7295_v27 = vld [vmem:[#allocation7 + $0x1e0] ss:$16 sps:$4 sm:$0xff]  }
  0xae   :  { %v809_v33 = vld [vmem:[#allocation10] sm:$0xff] }
  0xaf   :  { %7158 = vmatpush1.bf16.msra.mxu0 %v7157_v53  ;;  %v813_v34 = vld [vmem:[#allocation10 + $0x20] sm:$0xff] }
  0xb0   :  { %7160 = vmatprep.subr.bf16.mxu0 %v7159_v54  ;;  %v6339_v35 = vcombine.low %v809_v33, %v813_v34  ;;  %v6340_v36 = vcombine.high %v809_v33, %v813_v34  ;;  %v817_v37 = vld [vmem:[#allocation10 + $0x40] sm:$0xff] }
  0xb1   :  { %v821_v38 = vld [vmem:[#allocation10 + $0x60] sm:$0xff] }
  0xb2   :  { %v6348_v39 = vcombine.high %v817_v37, %v821_v38  ;;  %2387 = vmatprep.subr.bf16.mxu1 %v6340_v36  ;;  %v6347_v40 = vcombine.low %v817_v37, %v821_v38  ;;  %v825_v41 = vld [vmem:[#allocation10 + $0x80] sm:$0xff]  ;;  %v7303_v37 = vld [vmem:[#allocation7 + $0x2c] ss:$16 sps:$4 sm:$0xff]  }
  0xb3   :  { %7162 = vmatpush1.bf16.msra.mxu0 %v7161_v56  ;;  %2388 = vmatpush1.bf16.msra.mxu1 %v6339_v35  ;;  %v829_v42 = vld [vmem:[#allocation10 + $0xa0] sm:$0xff] }
  0xb4   :  { %719 = vmatprep.subr.bf16.mxu0 %v7252_v55  ;;  %2389 = vmatprep.subr.bf16.mxu1 %v6348_v39  ;;  %v6356_v43 = vcombine.high %v825_v41, %v829_v42  ;;  %v6355_v44 = vcombine.low %v825_v41, %v829_v42  ;;  %v833_v45 = vld [vmem:[#allocation10 + $0xc0] sm:$0xff]  ;;  %v7306_v39 = vld [vmem:[#allocation7 + $0x4c] ss:$16 sps:$4 sm:$0xff]  }
  0xb5   :  { %v837_v46 = vld [vmem:[#allocation10 + $0xe0] sm:$0xff]  ;;  %v7312_v41 = vld [vmem:[#allocation7 + $0x8c] ss:$16 sps:$4 sm:$0xff]  }
  0xb6   :  { %v6364_v47 = vcombine.high %v833_v45, %v837_v46  ;;  %v6363_v48 = vcombine.low %v833_v45, %v837_v46  ;;  %v841_v49 = vld [vmem:[#allocation10 + $0x100] sm:$0xff]  ;;  %v7318_v45 = vld [vmem:[#allocation7 + $0xcc] ss:$16 sps:$4 sm:$0xff]  }
  0xb7   :  { %2390 = vmatpush1.bf16.msra.mxu1 %v6347_v40  ;;  %v845_v50 = vld [vmem:[#allocation10 + $0x120] sm:$0xff]  ;;  %v7309_v40 = vld [vmem:[#allocation7 + $0x6c] ss:$16 sps:$4 sm:$0xff]  }
  0xb8   :  { %2391 = vmatprep.subr.bf16.mxu1 %v6356_v43  ;;  %v6372_v51 = vcombine.high %v841_v49, %v845_v50  ;;  %v6371_v52 = vcombine.low %v841_v49, %v845_v50  ;;  %v849_v53 = vld [vmem:[#allocation10 + $0x140] sm:$0xff]  ;;  %v7315_v43 = vld [vmem:[#allocation7 + $0xac] ss:$16 sps:$4 sm:$0xff]  }
  0xb9   :  { %v853_v54 = vld [vmem:[#allocation10 + $0x160] sm:$0xff]  ;;  %v7324_v49 = vld [vmem:[#allocation7 + $0x10c] ss:$16 sps:$4 sm:$0xff]  }
  0xba   :  { %v6380_v55 = vcombine.high %v849_v53, %v853_v54  ;;  %v6379_v56 = vcombine.low %v849_v53, %v853_v54  ;;  %v7298_v35 = vld [vmem:[#allocation7 + $0x8] ss:$16 sps:$4 sm:$0xff]   ;;  %v7330_v53 = vld [vmem:[#allocation7 + $0x14c] ss:$16 sps:$4 sm:$0xff]  }
  0xbb   :  { %2392 = vmatpush1.bf16.msra.mxu1 %v6355_v44  ;;  %v7301_v38 = vld [vmem:[#allocation7 + $0x28] ss:$16 sps:$4 sm:$0xff]  }
  0xbc   :  { %2393 = vmatprep.subr.bf16.mxu1 %v6364_v47  ;;  %v7310_v42 = vld [vmem:[#allocation7 + $0x88] ss:$16 sps:$4 sm:$0xff]   ;;  %v7321_v47 = vld [vmem:[#allocation7 + $0xec] ss:$16 sps:$4 sm:$0xff]  }
  0xbd   :  { %v7313_v44 = vld [vmem:[#allocation7 + $0xa8] ss:$16 sps:$4 sm:$0xff]  }
  0xbe   :  { %v7316_v46 = vld [vmem:[#allocation7 + $0xc8] ss:$16 sps:$4 sm:$0xff]  }
  0xbf   :  { %2394 = vmatpush1.bf16.msra.mxu1 %v6363_v48  ;;  %v7319_v48 = vld [vmem:[#allocation7 + $0xe8] ss:$16 sps:$4 sm:$0xff]  }
  0xc0   :  { %2395 = vmatprep.subr.bf16.mxu1 %v6372_v51  ;;  %v7322_v50 = vld [vmem:[#allocation7 + $0x108] ss:$16 sps:$4 sm:$0xff]   ;;  %v7327_v51 = vld [vmem:[#allocation7 + $0x12c] ss:$16 sps:$4 sm:$0xff]  }
  0xc1   :  { %v7328_v54 = vld [vmem:[#allocation7 + $0x148] ss:$16 sps:$4 sm:$0xff]  }
  0xc3   :  { %2396 = vmatpush1.bf16.msra.mxu1 %v6371_v52  ;;  %v7325_v52 = vld [vmem:[#allocation7 + $0x128] ss:$16 sps:$4 sm:$0xff]  }
  0xc4   :  { %2397 = vmatprep.subr.bf16.mxu1 %v6380_v55  ;;  %v7333_v55 = vld [vmem:[#allocation7 + $0x16c] ss:$16 sps:$4 sm:$0xff]  }
  0xc7   :  { %2398 = vmatpush1.bf16.msra.mxu1 %v6379_v56  ;;  %v7331_v56 = vld [vmem:[#allocation7 + $0x168] ss:$16 sps:$4 sm:$0xff]  }
 0x113   :  { %v143_v61 = vpop.permute.xlu0 %142 }
 0x114   :  { %vm144_vm2 = vcmp.eq.s32.totalorder %v139_v58, %v143_v61  ;;  %v857_v58 = vld [vmem:[#allocation10 + $0x180] sm:$0xff] }
 0x115   :  { %6270 = vmatmul.mubr.msk.f32.vlgmr.msra.gmra.mrb[0].mxu0 %vm144_vm2, %v8226_v63  ;;  %v869_v63 = vld [vmem:[#allocation10 + $0x1e0] sm:$0xff] }
 0x116   :  { %720 = vmatpush1.bf16.msra.mxu0 %v7250_v59  ;;  %v861_v59 = vld [vmem:[#allocation10 + $0x1a0] sm:$0xff] }
 0x117   :  { %721 = vmatprep.subr.bf16.mxu0 %v7255_v60  ;;  %v6388_v60 = vcombine.high %v857_v58, %v861_v59  ;;  %v6387_v61 = vcombine.low %v857_v58, %v861_v59  ;;  %v7336_v58 = vld [vmem:[#allocation7 + $0x18c] ss:$16 sps:$4 sm:$0xff]   ;;  %v7334_v59 = vld [vmem:[#allocation7 + $0x188] ss:$16 sps:$4 sm:$0xff]  }
 0x119   :  { %2399 = vmatprep.subr.bf16.mxu1 %v6388_v60  ;;  %v7339_v60 = vld [vmem:[#allocation7 + $0x1ac] ss:$16 sps:$4 sm:$0xff]  }
 0x11a   :  { %722 = vmatpush1.bf16.msra.mxu0 %v7253_v62  ;;  %v865_v62 = vld [vmem:[#allocation10 + $0x1c0] sm:$0xff]  ;;  %2400 = vmatpush1.bf16.msra.mxu1 %v6387_v61 }
 0x11b   :  { %723 = vmatprep.subr.bf16.mxu0 %v7258_v0  ;;  %v6396_v0 = vcombine.high %v865_v62, %v869_v63  ;;  %v7337_v61 = vld [vmem:[#allocation7 + $0x1a8] ss:$16 sps:$4 sm:$0xff]  }
 0x11d   :  { %2401 = vmatprep.subr.bf16.mxu1 %v6396_v0  ;;  %v7345_v0 = vld [vmem:[#allocation7 + $0x1ec] ss:$16 sps:$4 sm:$0xff]  }
 0x11e   :  { %724 = vmatpush1.bf16.msra.mxu0 %v7256_v1  ;;  %v6395_v1 = vcombine.low %v865_v62, %v869_v63  ;;  %v7342_v62 = vld [vmem:[#allocation7 + $0x1cc] ss:$16 sps:$4 sm:$0xff]   ;;  %v7340_v63 = vld [vmem:[#allocation7 + $0x1c8] ss:$16 sps:$4 sm:$0xff]  }
 0x11f   :  { %725 = vmatprep.subr.bf16.mxu0 %v7261_v2  ;;  %v873_v2 = vld [vmem:[#allocation10 + $0x200] sm:$0xff] }
 0x120   :  { %2402 = vmatpush1.bf16.msra.mxu1 %v6395_v1  ;;  %v810_v1 = vld [vmem:[#allocation10 + $0x8] sm:$0xff] }
 0x122   :  { %726 = vmatpush1.bf16.msra.mxu0 %v7259_v3  ;;  %v877_v3 = vld [vmem:[#allocation10 + $0x220] sm:$0xff] }
 0x123   :  { %727 = vmatprep.subr.bf16.mxu0 %v7264_v4  ;;  %v6404_v4 = vcombine.high %v873_v2, %v877_v3 }
 0x125   :  { %2403 = vmatprep.subr.bf16.mxu1 %v6404_v4 }
 0x126   :  { %728 = vmatpush1.bf16.msra.mxu0 %v7262_v5  ;;  %v6403_v5 = vcombine.low %v873_v2, %v877_v3  ;;  %v814_v2 = vld [vmem:[#allocation10 + $0x28] sm:$0xff]  ;;  %v7343_v3 = vld [vmem:[#allocation7 + $0x1e8] ss:$16 sps:$4 sm:$0xff]  }
 0x127   :  { %729 = vmatprep.subr.bf16.mxu0 %v7267_v6  ;;  %v881_v6 = vld [vmem:[#allocation10 + $0x240] sm:$0xff]  ;;  %v6342_v4 = vcombine.high %v810_v1, %v814_v2 }
 0x128   :  { %2404 = vmatpush1.bf16.msra.mxu1 %v6403_v5  ;;  %v818_v5 = vld [vmem:[#allocation10 + $0x48] sm:$0xff] }
 0x12a   :  { %730 = vmatpush1.bf16.msra.mxu0 %v7265_v7  ;;  %v885_v7 = vld [vmem:[#allocation10 + $0x260] sm:$0xff] }
 0x12b   :  { %731 = vmatprep.subr.bf16.mxu0 %v7270_v8  ;;  %v6412_v8 = vcombine.high %v881_v6, %v885_v7 }
 0x12d   :  { %2405 = vmatprep.subr.bf16.mxu1 %v6412_v8 }
 0x12e   :  { %732 = vmatpush1.bf16.msra.mxu0 %v7268_v9  ;;  %v6411_v9 = vcombine.low %v881_v6, %v885_v7  ;;  %v822_v6 = vld [vmem:[#allocation10 + $0x68] sm:$0xff]  ;;  %v6341_v7 = vcombine.low %v810_v1, %v814_v2 }
 0x12f   :  { %733 = vmatprep.subr.bf16.mxu0 %v7273_v10  ;;  %v889_v10 = vld [vmem:[#allocation10 + $0x280] sm:$0xff]  ;;  %v6350_v8 = vcombine.high %v818_v5, %v822_v6  ;;  %v906_v1 = vld [vmem:[#allocation10 + $0x308] sm:$0xff] }
 0x130   :  { %2406 = vmatpush1.bf16.msra.mxu1 %v6411_v9  ;;  %v826_v9 = vld [vmem:[#allocation10 + $0x88] sm:$0xff] }
 0x131   :  { %v910_v2 = vld [vmem:[#allocation10 + $0x328] sm:$0xff] }
 0x132   :  { %734 = vmatpush1.bf16.msra.mxu0 %v7271_v11  ;;  %v893_v11 = vld [vmem:[#allocation10 + $0x2a0] sm:$0xff] }
 0x133   :  { %735 = vmatprep.subr.bf16.mxu0 %v7276_v12  ;;  %v6420_v12 = vcombine.high %v889_v10, %v893_v11 }
 0x135   :  { %2407 = vmatprep.subr.bf16.mxu1 %v6420_v12 }
 0x136   :  { %736 = vmatpush1.bf16.msra.mxu0 %v7274_v13  ;;  %v6419_v13 = vcombine.low %v889_v10, %v893_v11  ;;  %v830_v10 = vld [vmem:[#allocation10 + $0xa8] sm:$0xff]  ;;  %v6349_v11 = vcombine.low %v818_v5, %v822_v6 }
 0x137   :  { %737 = vmatprep.subr.bf16.mxu0 %v7279_v14  ;;  %v897_v14 = vld [vmem:[#allocation10 + $0x2c0] sm:$0xff]  ;;  %v6358_v12 = vcombine.high %v826_v9, %v830_v10  ;;  %v914_v5 = vld [vmem:[#allocation10 + $0x348] sm:$0xff] }
 0x138   :  { %2408 = vmatpush1.bf16.msra.mxu1 %v6419_v13  ;;  %v834_v13 = vld [vmem:[#allocation10 + $0xc8] sm:$0xff] }
 0x139   :  { %v918_v6 = vld [vmem:[#allocation10 + $0x368] sm:$0xff] }
 0x13a   :  { %738 = vmatpush1.bf16.msra.mxu0 %v7277_v15  ;;  %v901_v15 = vld [vmem:[#allocation10 + $0x2e0] sm:$0xff] }
 0x13b   :  { %739 = vmatprep.subr.bf16.mxu0 %v7282_v16  ;;  %v6428_v16 = vcombine.high %v897_v14, %v901_v15 }
 0x13d   :  { %2409 = vmatprep.subr.bf16.mxu1 %v6428_v16 }
 0x13e   :  { %740 = vmatpush1.bf16.msra.mxu0 %v7280_v17  ;;  %v6427_v17 = vcombine.low %v897_v14, %v901_v15  ;;  %v838_v14 = vld [vmem:[#allocation10 + $0xe8] sm:$0xff]  ;;  %v6357_v15 = vcombine.low %v826_v9, %v830_v10 }
 0x13f   :  { %741 = vmatprep.subr.bf16.mxu0 %v7285_v18  ;;  %v905_v18 = vld [vmem:[#allocation10 + $0x300] sm:$0xff]  ;;  %v6366_v16 = vcombine.high %v834_v13, %v838_v14  ;;  %v922_v9 = vld [vmem:[#allocation10 + $0x388] sm:$0xff] }
 0x140   :  { %2410 = vmatpush1.bf16.msra.mxu1 %v6427_v17  ;;  %v842_v17 = vld [vmem:[#allocation10 + $0x108] sm:$0xff] }
 0x141   :  { %v926_v10 = vld [vmem:[#allocation10 + $0x3a8] sm:$0xff] }
 0x142   :  { %742 = vmatpush1.bf16.msra.mxu0 %v7283_v19  ;;  %v909_v19 = vld [vmem:[#allocation10 + $0x320] sm:$0xff] }
 0x143   :  { %743 = vmatprep.subr.bf16.mxu0 %v7288_v20  ;;  %v6436_v20 = vcombine.high %v905_v18, %v909_v19 }
 0x145   :  { %2411 = vmatprep.subr.bf16.mxu1 %v6436_v20 }
 0x146   :  { %744 = vmatpush1.bf16.msra.mxu0 %v7286_v21  ;;  %v6435_v21 = vcombine.low %v905_v18, %v909_v19  ;;  %v846_v18 = vld [vmem:[#allocation10 + $0x128] sm:$0xff]  ;;  %v6365_v19 = vcombine.low %v834_v13, %v838_v14 }
 0x147   :  { %745 = vmatprep.subr.bf16.mxu0 %v7291_v22  ;;  %v913_v22 = vld [vmem:[#allocation10 + $0x340] sm:$0xff]  ;;  %v6374_v20 = vcombine.high %v842_v17, %v846_v18  ;;  %v930_v13 = vld [vmem:[#allocation10 + $0x3c8] sm:$0xff] }
 0x148   :  { %2412 = vmatpush1.bf16.msra.mxu1 %v6435_v21  ;;  %v850_v21 = vld [vmem:[#allocation10 + $0x148] sm:$0xff] }
 0x149   :  { %v934_v14 = vld [vmem:[#allocation10 + $0x3e8] sm:$0xff] }
 0x14a   :  { %746 = vmatpush1.bf16.msra.mxu0 %v7289_v23  ;;  %v917_v23 = vld [vmem:[#allocation10 + $0x360] sm:$0xff] }
 0x14b   :  { %747 = vmatprep.subr.bf16.mxu0 %v7294_v24  ;;  %v6444_v24 = vcombine.high %v913_v22, %v917_v23 }
 0x14d   :  { %2413 = vmatprep.subr.bf16.mxu1 %v6444_v24 }
 0x14e   :  { %748 = vmatpush1.bf16.msra.mxu0 %v7292_v25  ;;  %v6443_v25 = vcombine.low %v913_v22, %v917_v23  ;;  %v854_v22 = vld [vmem:[#allocation10 + $0x168] sm:$0xff]  ;;  %v6373_v23 = vcombine.low %v842_v17, %v846_v18  ;;  %v6461_v17 = vcombine.low %v930_v13, %v934_v14 }
 0x14f   :  { %749 = vmatprep.subr.bf16.mxu0 %v7297_v26  ;;  %v6382_v24 = vcombine.high %v850_v21, %v854_v22 }
 0x150   :  { %2414 = vmatpush1.bf16.msra.mxu1 %v6443_v25  ;;  %v858_v25 = vld [vmem:[#allocation10 + $0x188] sm:$0xff] }
 0x152   :  { %750 = vmatpush1.bf16.msra.mxu0 %v7295_v27 }
 0x153   :  { %760 = vmatprep.subr.bf16.mxu0 %v7300_v28 }
 0x172   :  { %v8392_v29 = vpop.f32.mrb[0].mxu1 }
 0x173   :  { %v8394_v30 = vpop.f32.mrb[1].mxu1 }
 0x174   :  { %v306_v31 = vpop.f32.mrb[2].mxu1 }
 0x175   :  { %v307_v32 = vpop.f32.mrb[3].mxu1 }
 0x1e8   :  { %v247_v26 = vpop.f32.mrb[0].mxu0 }
 0x1e9   :  { %v303_v27 = vadd.f32 %v8392_v29, %v247_v26  ;;  %v249_v28 = vpop.f32.mrb[1].mxu0  ;;  %v7304_v29 = vld [vmem:[#allocation7 + $0x48] ss:$16 sps:$4 sm:$0xff]   ;;  %v862_v26 = vld [vmem:[#allocation10 + $0x1a8] sm:$0xff] }
 0x1ea   :  { %v305_v31 = vadd.f32 %v8394_v30, %v249_v28  ;;  %v7307_v30 = vld [vmem:[#allocation7 + $0x68] ss:$16 sps:$4 sm:$0xff]  }
 0x1eb   :  { %v309_v32 = vmax.f32 %v303_v27, 0.0  ;;  %v6381_v27 = vcombine.low %v850_v21, %v854_v22  ;;  %v921_v28 = vld [vmem:[#allocation10 + $0x380] sm:$0xff]  ;;  %v8424_v21 = vld [vmem:[#allocation8] sm:$0xf] }
 0x1ec   :  { %v310_v33 = vmax.f32 %v305_v31, 0.0  ;;  %v925_v31 = vld [vmem:[#allocation10 + $0x3a0] sm:$0xff] }
 0x1ed   :  { %v8398_v36 = vpack.c.bf16 %v309_v32, %v309_v32  ;;  %v6390_v32 = vcombine.high %v858_v25, %v862_v26 }
 0x1ee   :  { %v312_v34 = vpack.c.bf16 %v310_v33, %v310_v33  ;;  %v6452_v33 = vcombine.high %v921_v28, %v925_v31 }
 0x1f0   :  { %751 = vmatprep.mubr.bf16.mxu0 %v312_v34  ;;  %2415 = vmatprep.subr.bf16.mxu1 %v6452_v33  ;;  %v945_v33 = vld [vmem:[#allocation10 + $0x440] sm:$0xff] }
 0x1f1   :  { %752 = vmatmul.mubr.bf16.vlgmr.msra.gmra.mrb[4].mxu0 %v8398_v36 }
 0x1f2   :  { %761 = vmatpush1.bf16.msra.mxu0 %v7298_v35  ;;  %792 = vmatprep.mubr.bf16.mxu0 %v312_v34  ;;  %v866_v34 = vld [vmem:[#allocation10 + $0x1c8] sm:$0xff] }
 0x1f3   :  { %762 = vmatprep.subr.bf16.mxu0 %v7303_v37  ;;  %v870_v35 = vld [vmem:[#allocation10 + $0x1e8] sm:$0xff]  ;;  %v6389_v37 = vcombine.low %v858_v25, %v862_v26 }
 0x1f6   :  { %763 = vmatpush1.bf16.msra.mxu0 %v7301_v38  ;;  %v929_v38 = vld [vmem:[#allocation10 + $0x3c0] sm:$0xff] }
 0x1f7   :  { %764 = vmatprep.subr.bf16.mxu0 %v7306_v39  ;;  %v933_v39 = vld [vmem:[#allocation10 + $0x3e0] sm:$0xff] }
 0x1fa   :  { %765 = vmatpush1.bf16.msra.mxu0 %v7304_v29  ;;  %v6398_v29 = vcombine.high %v866_v34, %v870_v35 }
 0x1fb   :  { %766 = vmatprep.subr.bf16.mxu0 %v7309_v40  ;;  %v6460_v40 = vcombine.high %v929_v38, %v933_v39 }
 0x1fe   :  { %767 = vmatpush1.bf16.msra.mxu0 %v7307_v30  ;;  %v874_v30 = vld [vmem:[#allocation10 + $0x208] sm:$0xff] }
 0x1ff   :  { %768 = vmatprep.subr.bf16.mxu0 %v7312_v41  ;;  %v878_v41 = vld [vmem:[#allocation10 + $0x228] sm:$0xff] }
 0x202   :  { %769 = vmatpush1.bf16.msra.mxu0 %v7310_v42  ;;  %v6459_v42 = vcombine.low %v929_v38, %v933_v39 }
 0x203   :  { %770 = vmatprep.subr.bf16.mxu0 %v7315_v43  ;;  %v6397_v43 = vcombine.low %v866_v34, %v870_v35  ;;  %v949_v35 = vld [vmem:[#allocation10 + $0x460] sm:$0xff] }
 0x206   :  { %771 = vmatpush1.bf16.msra.mxu0 %v7313_v44  ;;  %v8402_v44 = vld [vmem:[#allocation10 + $0x400] sm:$0xff] }
 0x207   :  { %772 = vmatprep.subr.bf16.mxu0 %v7318_v45  ;;  %v8404_v45 = vld [vmem:[#allocation10 + $0x420] sm:$0xff] }
 0x20a   :  { %773 = vmatpush1.bf16.msra.mxu0 %v7316_v46  ;;  %v8406_v46 = vld [vmem:[#allocation10 + $0x408] sm:$0xff] }
 0x20b   :  { %774 = vmatprep.subr.bf16.mxu0 %v7321_v47  ;;  %v6406_v47 = vcombine.high %v874_v30, %v878_v41 }
 0x20e   :  { %775 = vmatpush1.bf16.msra.mxu0 %v7319_v48  ;;  %v6468_v48 = vcombine.high %v8402_v44, %v8404_v45 }
 0x20f   :  { %776 = vmatprep.subr.bf16.mxu0 %v7324_v49  ;;  %v8410_v49 = vld [vmem:[#allocation10 + $0x428] sm:$0xff] }
 0x210   :  { %v6470_v18 = vcombine.high %v8406_v46, %v8410_v49 }
 0x212   :  { %777 = vmatpush1.bf16.msra.mxu0 %v7322_v50  ;;  %v882_v50 = vld [vmem:[#allocation10 + $0x248] sm:$0xff] }
 0x213   :  { %778 = vmatprep.subr.bf16.mxu0 %v7327_v51  ;;  %v886_v51 = vld [vmem:[#allocation10 + $0x268] sm:$0xff] }
 0x216   :  { %779 = vmatpush1.bf16.msra.mxu0 %v7325_v52  ;;  %v6467_v52 = vcombine.low %v8402_v44, %v8404_v45 }
 0x217   :  { %780 = vmatprep.subr.bf16.mxu0 %v7330_v53  ;;  %v6469_v53 = vcombine.low %v8406_v46, %v8410_v49  ;;  %v969_v46 = vld [vmem:[#allocation10 + $0x500] sm:$0xff] }
 0x218   :  { %v973_v49 = vld [vmem:[#allocation10 + $0x520] sm:$0xff] }
 0x21a   :  { %781 = vmatpush1.bf16.msra.mxu0 %v7328_v54  ;;  %v6405_v54 = vcombine.low %v874_v30, %v878_v41  ;;  %v953_v30 = vld [vmem:[#allocation10 + $0x480] sm:$0xff] }
 0x21b   :  { %782 = vmatprep.subr.bf16.mxu0 %v7333_v55  ;;  %v6414_v55 = vcombine.high %v882_v50, %v886_v51  ;;  %v957_v41 = vld [vmem:[#allocation10 + $0x4a0] sm:$0xff] }
 0x21e   :  { %783 = vmatpush1.bf16.msra.mxu0 %v7331_v56  ;;  %v890_v56 = vld [vmem:[#allocation10 + $0x288] sm:$0xff] }
 0x21f   :  { %784 = vmatprep.subr.bf16.mxu0 %v7336_v58  ;;  %v894_v58 = vld [vmem:[#allocation10 + $0x2a8] sm:$0xff] }
 0x222   :  { %785 = vmatpush1.bf16.msra.mxu0 %v7334_v59  ;;  %v6413_v59 = vcombine.low %v882_v50, %v886_v51  ;;  %v6484_v50 = vcombine.high %v953_v30, %v957_v41 }
 0x223   :  { %786 = vmatprep.subr.bf16.mxu0 %v7339_v60  ;;  %v6422_v60 = vcombine.high %v890_v56, %v894_v58 }
 0x226   :  { %787 = vmatpush1.bf16.msra.mxu0 %v7337_v61  ;;  %v898_v61 = vld [vmem:[#allocation10 + $0x2c8] sm:$0xff] }
 0x227   :  { %788 = vmatprep.subr.bf16.mxu0 %v7342_v62  ;;  %v902_v62 = vld [vmem:[#allocation10 + $0x2e8] sm:$0xff] }
 0x22a   :  { %789 = vmatpush1.bf16.msra.mxu0 %v7340_v63  ;;  %v6421_v63 = vcombine.low %v890_v56, %v894_v58  ;;  %v962_v56 = vld [vmem:[#allocation10 + $0x4c8] sm:$0xff] }
 0x22b   :  { %790 = vmatprep.subr.bf16.mxu0 %v7345_v0  ;;  %v6430_v0 = vcombine.high %v898_v61, %v902_v62  ;;  %v966_v58 = vld [vmem:[#allocation10 + $0x4e8] sm:$0xff] }
 0x22c   :  { %v6494_v45 = vcombine.high %v962_v56, %v966_v58 }
 0x22e   :  { %791 = vmatpush1.bf16.msra.mxu0 %v7343_v3  ;;  %v6429_v3 = vcombine.low %v898_v61, %v902_v62  ;;  %v6493_v62 = vcombine.low %v962_v56, %v966_v58 }
 0x22f   :  { %2469 = vmatprep.subr.bf16.mxu0 %v6342_v4  ;;  %v6438_v4 = vcombine.high %v906_v1, %v910_v2 }
 0x231   :  { %793 = vmatmul.mubr.bf16.vlgmr.msra.gmra.mrb[8].mxu0 %v8398_v36  ;;  %v6451_v36 = vcombine.low %v921_v28, %v925_v31 }
 0x232   :  { %2470 = vmatpush1.bf16.msra.mxu0 %v6341_v7  ;;  %v6437_v7 = vcombine.low %v906_v1, %v910_v2  ;;  %v977_v1 = vld [vmem:[#allocation10 + $0x540] sm:$0xff] }
 0x233   :  { %2471 = vmatprep.subr.bf16.mxu0 %v6350_v8  ;;  %2416 = vmatpush1.bf16.msra.mxu1 %v6451_v36  ;;  %v6446_v8 = vcombine.high %v914_v5, %v918_v6  ;;  %v946_v36 = vld [vmem:[#allocation10 + $0x448] sm:$0xff]  ;;  %v981_v2 = vld [vmem:[#allocation10 + $0x560] sm:$0xff] }
 0x234   :  { %2417 = vmatprep.subr.bf16.mxu1 %v6460_v40 }
 0x236   :  { %2472 = vmatpush1.bf16.msra.mxu0 %v6349_v11  ;;  %v6445_v11 = vcombine.low %v914_v5, %v918_v6  ;;  %v6499_v5 = vcombine.low %v969_v46, %v973_v49 }
 0x237   :  { %2473 = vmatprep.subr.bf16.mxu0 %v6358_v12  ;;  %2418 = vmatpush1.bf16.msra.mxu1 %v6459_v42  ;;  %v6454_v12 = vcombine.high %v922_v9, %v926_v10  ;;  %v954_v42 = vld [vmem:[#allocation10 + $0x488] sm:$0xff] }
 0x238   :  { %2428 = vmatprep.subr.bf16.mxu1 %v6468_v48 }
 0x23a   :  { %2474 = vmatpush1.bf16.msra.mxu0 %v6357_v15  ;;  %v6453_v15 = vcombine.low %v922_v9, %v926_v10  ;;  %v985_v9 = vld [vmem:[#allocation10 + $0x580] sm:$0xff] }
 0x23b   :  { %2475 = vmatprep.subr.bf16.mxu0 %v6366_v16  ;;  %v6462_v16 = vcombine.high %v930_v13, %v934_v14  ;;  %v989_v10 = vld [vmem:[#allocation10 + $0x5a0] sm:$0xff]  ;;  %v6507_v13 = vcombine.low %v977_v1, %v981_v2 }
 0x23e   :  { %2476 = vmatpush1.bf16.msra.mxu0 %v6365_v19  ;;  %v8419_v19 = vshrl.u32 %v138_v57, 7 }
 0x23f   :  { %2477 = vmatprep.subr.bf16.mxu0 %v6374_v20 }
 0x240   :  { %v8422_v20 = vsub.s32 0, %v8419_v19  ;;  %v8427_v22 = vsub.s32 1, %v8419_v19 }
 0x242   :  { %2478 = vmatpush1.bf16.msra.mxu0 %v6373_v23  ;;  %v382_v23 = vrot.slane %v8424_v21, %v8422_v20 }
 0x243   :  { %2479 = vmatprep.subr.bf16.mxu0 %v6382_v24  ;;  %v386_v24 = vrot.slane %v8424_v21, %v8427_v22 }
 0x246   :  { %2480 = vmatpush1.bf16.msra.mxu0 %v6381_v27 }
 0x247   :  { %2481 = vmatprep.subr.bf16.mxu0 %v6390_v32 }
 0x24a   :  { %2482 = vmatpush1.bf16.msra.mxu0 %v6389_v37  ;;  %v950_v37 = vld [vmem:[#allocation10 + $0x468] sm:$0xff] }
 0x24b   :  { %2483 = vmatprep.subr.bf16.mxu0 %v6398_v29  ;;  %v6476_v29 = vcombine.high %v945_v33, %v949_v35  ;;  %v6478_v40 = vcombine.high %v946_v36, %v950_v37  ;;  %v6477_v48 = vcombine.low %v946_v36, %v950_v37 }
 0x24e   :  { %2484 = vmatpush1.bf16.msra.mxu0 %v6397_v43  ;;  %v958_v43 = vld [vmem:[#allocation10 + $0x4a8] sm:$0xff] }
 0x24f   :  { %2485 = vmatprep.subr.bf16.mxu0 %v6406_v47  ;;  %v6475_v47 = vcombine.low %v945_v33, %v949_v35  ;;  %v6486_v51 = vcombine.high %v954_v42, %v958_v43  ;;  %v1006_v33 = vld [vmem:[#allocation10 + $0x628] sm:$0xff] }
 0x252   :  { %2486 = vmatpush1.bf16.msra.mxu0 %v6405_v54  ;;  %v961_v54 = vld [vmem:[#allocation10 + $0x4c0] sm:$0xff] }
 0x253   :  { %2487 = vmatprep.subr.bf16.mxu0 %v6414_v55  ;;  %v965_v55 = vld [vmem:[#allocation10 + $0x4e0] sm:$0xff] }
 0x254   :  { %v6492_v44 = vcombine.high %v961_v54, %v965_v55  ;;  %v6491_v61 = vcombine.low %v961_v54, %v965_v55  ;;  %v1018_v54 = vld [vmem:[#allocation10 + $0x688] sm:$0xff] }
 0x255   :  { %v1022_v55 = vld [vmem:[#allocation10 + $0x6a8] sm:$0xff] }
 0x256   :  { %2488 = vmatpush1.bf16.msra.mxu0 %v6413_v59  ;;  %v6483_v59 = vcombine.low %v953_v30, %v957_v41  ;;  %v1010_v30 = vld [vmem:[#allocation10 + $0x648] sm:$0xff] }
 0x257   :  { %2489 = vmatprep.subr.bf16.mxu0 %v6422_v60  ;;  %v6485_v60 = vcombine.low %v954_v42, %v958_v43  ;;  %v1014_v41 = vld [vmem:[#allocation10 + $0x668] sm:$0xff] }
 0x258   :  { %v6541_v58 = vcombine.low %v1010_v30, %v1014_v41 }
 0x25a   :  { %2490 = vmatpush1.bf16.msra.mxu0 %v6421_v63  ;;  %v6500_v63 = vcombine.high %v969_v46, %v973_v49  ;;  %v1026_v46 = vld [vmem:[#allocation10 + $0x6c8] sm:$0xff] }
 0x25b   :  { %2491 = vmatprep.subr.bf16.mxu0 %v6430_v0  ;;  %v1030_v49 = vld [vmem:[#allocation10 + $0x6e8] sm:$0xff] }
 0x25e   :  { %2492 = vmatpush1.bf16.msra.mxu0 %v6429_v3  ;;  %v978_v3 = vld [vmem:[#allocation10 + $0x548] sm:$0xff] }
 0x25f   :  { %2493 = vmatprep.subr.bf16.mxu0 %v6438_v4  ;;  %v982_v4 = vld [vmem:[#allocation10 + $0x568] sm:$0xff] }
 0x260   :  { %v6509_v14 = vcombine.low %v978_v3, %v982_v4 }
 0x262   :  { %2494 = vmatpush1.bf16.msra.mxu0 %v6437_v7  ;;  %v6508_v7 = vcombine.high %v977_v1, %v981_v2  ;;  %v1034_v1 = vld [vmem:[#allocation10 + $0x708] sm:$0xff] }
 0x263   :  { %2495 = vmatprep.subr.bf16.mxu0 %v6446_v8  ;;  %v6510_v8 = vcombine.high %v978_v3, %v982_v4  ;;  %v1038_v2 = vld [vmem:[#allocation10 + $0x728] sm:$0xff]  ;;  %v6557_v4 = vcombine.low %v1026_v46, %v1030_v49 }
 0x266   :  { %2496 = vmatpush1.bf16.msra.mxu0 %v6445_v11  ;;  %v986_v11 = vld [vmem:[#allocation10 + $0x588] sm:$0xff] }
 0x267   :  { %2497 = vmatprep.subr.bf16.mxu0 %v6454_v12  ;;  %v990_v12 = vld [vmem:[#allocation10 + $0x5a8] sm:$0xff] }
 0x26a   :  { %2498 = vmatpush1.bf16.msra.mxu0 %v6453_v15  ;;  %v6516_v15 = vcombine.high %v985_v9, %v989_v10 }
 0x26b   :  { %2499 = vmatprep.subr.bf16.mxu0 %v6462_v16  ;;  %v6518_v16 = vcombine.high %v986_v11, %v990_v12 }
 0x26e   :  { %2500 = vmatpush1.bf16.msra.mxu0 %v6461_v17  ;;  %v993_v17 = vld [vmem:[#allocation10 + $0x5c0] sm:$0xff] }
 0x26f   :  { %2510 = vmatprep.subr.bf16.mxu0 %v6470_v18  ;;  %v997_v18 = vld [vmem:[#allocation10 + $0x5e0] sm:$0xff] }
 0x2c4   :  { %v753_v25 = vpop.f32.mrb[4].mxu0 }
 0x2c5   :  { %v754_v26 = vadd.f32 %v753_v25, %v382_v23  ;;  %v755_v27 = vpop.f32.mrb[5].mxu0  ;;  %v994_v23 = vld [vmem:[#allocation10 + $0x5c8] sm:$0xff]  ;;  %v6515_v25 = vcombine.low %v985_v9, %v989_v10 }
 0x2c6   :  { %v756_v28 = vadd.f32 %v755_v27, %v386_v24  ;;  %v757_v57 = vpop.f32.mrb[6].mxu0  ;;  %v998_v24 = vld [vmem:[#allocation10 + $0x5e8] sm:$0xff]  ;;  %v6524_v27 = vcombine.high %v993_v17, %v997_v18 }
 0x2c7   :  { %v801_v31 = vmax.f32 %v754_v26, 0.0  ;;  %v758_v32 = vpop.f32.mrb[7].mxu0  ;;  %v6517_v26 = vcombine.low %v986_v11, %v990_v12  ;;  %v1001_v57 = vld [vmem:[#allocation10 + $0x600] sm:$0xff]  ;;  %v6525_v35 = vcombine.low %v994_v23, %v998_v24  ;;  %v1042_v9 = vld [vmem:[#allocation10 + $0x748] sm:$0xff]  ;;  %v6565_v12 = vcombine.low %v1034_v1, %v1038_v2 }
 0x2c8   :  { %v802_v34 = vmax.f32 %v756_v28, 0.0  ;;  %v6526_v28 = vcombine.high %v994_v23, %v998_v24  ;;  %v1002_v32 = vld [vmem:[#allocation10 + $0x608] sm:$0xff]  ;;  %v8448_v23 = vsub.s32 2, %v8419_v19 }
 0x2c9   :  { %v8435_v39 = vpack.c.bf16 %v801_v31, %v801_v31  ;;  %v1005_v31 = vld [vmem:[#allocation10 + $0x620] sm:$0xff]  ;;  %v6534_v37 = vcombine.high %v1002_v32, %v1006_v33  ;;  %v6533_v43 = vcombine.low %v1002_v32, %v1006_v33  ;;  %v1046_v10 = vld [vmem:[#allocation10 + $0x768] sm:$0xff] }
 0x2ca   :  { %v8433_v38 = vpack.c.bf16 %v802_v34, %v802_v34  ;;  %v6523_v34 = vcombine.low %v993_v17, %v997_v18  ;;  %v6532_v36 = vcombine.high %v1001_v57, %v1005_v31  ;;  %v6531_v42 = vcombine.low %v1001_v57, %v1005_v31  ;;  %v1050_v17 = vld [vmem:[#allocation10 + $0x788] sm:$0xff]  ;;  %v1057_v57 = vld [vmem:[#allocation10 + $0x7c0] sm:$0xff] }
 0x2cb   :  { %v1054_v18 = vld [vmem:[#allocation10 + $0x7a8] sm:$0xff]  ;;  %v1061_v31 = vld [vmem:[#allocation10 + $0x7e0] sm:$0xff] }
 0x2cc   :  { %2419 = vmatprep.mubr.bf16.mxu1 %v8433_v38  ;;  %2501 = vmatprep.mubr.bf16.mxu0 %v8433_v38  ;;  %v1058_v32 = vld [vmem:[#allocation10 + $0x7c8] sm:$0xff] }
 0x2cd   :  { %2420 = vmatmul.mubr.bf16.vlgmr.msra.gmra.mrb[4].mxu1 %v8435_v39  ;;  %2502 = vmatmul.mubr.bf16.vlgmr.msra.gmra.mrb[12].mxu0 %v8435_v39  ;;  %v1062_v33 = vld [vmem:[#allocation10 + $0x7e8] sm:$0xff] }
 0x2ce   :  { %2429 = vmatpush1.bf16.msra.mxu1 %v6467_v52  ;;  %2511 = vmatpush1.bf16.msra.mxu0 %v6469_v53  ;;  %v970_v52 = vld [vmem:[#allocation10 + $0x508] sm:$0xff] }
 0x2cf   :  { %2430 = vmatprep.subr.bf16.mxu1 %v6476_v29  ;;  %2512 = vmatprep.subr.bf16.mxu0 %v6478_v40  ;;  %v974_v53 = vld [vmem:[#allocation10 + $0x528] sm:$0xff]  ;;  %v1009_v29 = vld [vmem:[#allocation10 + $0x640] sm:$0xff] }
 0x2d0   :  { %v6502_v0 = vcombine.high %v970_v52, %v974_v53  ;;  %v6501_v6 = vcombine.low %v970_v52, %v974_v53  ;;  %v1013_v40 = vld [vmem:[#allocation10 + $0x660] sm:$0xff]  ;;  %v6549_v53 = vcombine.low %v1018_v54, %v1022_v55 }
 0x2d1   :  { %v6539_v56 = vcombine.low %v1009_v29, %v1013_v40 }
 0x2d2   :  { %2431 = vmatpush1.bf16.msra.mxu1 %v6475_v47  ;;  %2513 = vmatpush1.bf16.msra.mxu0 %v6477_v48  ;;  %v6540_v47 = vcombine.high %v1009_v29, %v1013_v40  ;;  %v6542_v48 = vcombine.high %v1010_v30, %v1014_v41  ;;  %v6588_v29 = vcombine.high %v1057_v57, %v1061_v31  ;;  %v811_v30 = vld [vmem:[#allocation10 + $0x10] sm:$0xff] }
 0x2d3   :  { %2432 = vmatprep.subr.bf16.mxu1 %v6484_v50  ;;  %2514 = vmatprep.subr.bf16.mxu0 %v6486_v51  ;;  %v1017_v50 = vld [vmem:[#allocation10 + $0x680] sm:$0xff]  ;;  %v6590_v40 = vcombine.high %v1058_v32, %v1062_v33 }
 0x2d4   :  { %v1021_v51 = vld [vmem:[#allocation10 + $0x6a0] sm:$0xff] }
 0x2d5   :  { %v6547_v52 = vcombine.low %v1017_v50, %v1021_v51 }
 0x2d6   :  { %2433 = vmatpush1.bf16.msra.mxu1 %v6483_v59  ;;  %2515 = vmatpush1.bf16.msra.mxu0 %v6485_v60  ;;  %v6548_v59 = vcombine.high %v1017_v50, %v1021_v51  ;;  %v6550_v60 = vcombine.high %v1018_v54, %v1022_v55  ;;  %v6587_v55 = vcombine.low %v1057_v57, %v1061_v31 }
 0x2d7   :  { %2434 = vmatprep.subr.bf16.mxu1 %v6492_v44  ;;  %2516 = vmatprep.subr.bf16.mxu0 %v6494_v45  ;;  %v1025_v44 = vld [vmem:[#allocation10 + $0x6c0] sm:$0xff] }
 0x2d8   :  { %v1029_v45 = vld [vmem:[#allocation10 + $0x6e0] sm:$0xff] }
 0x2d9   :  { %v6555_v3 = vcombine.low %v1025_v44, %v1029_v45 }
 0x2da   :  { %2435 = vmatpush1.bf16.msra.mxu1 %v6491_v61  ;;  %2517 = vmatpush1.bf16.msra.mxu0 %v6493_v62  ;;  %v6556_v61 = vcombine.high %v1025_v44, %v1029_v45  ;;  %v6558_v62 = vcombine.high %v1026_v46, %v1030_v49  ;;  %v819_v45 = vld [vmem:[#allocation10 + $0x50] sm:$0xff]  ;;  %v820_v49 = vld [vmem:[#allocation10 + $0x58] sm:$0xff] }
 0x2db   :  { %2436 = vmatprep.subr.bf16.mxu1 %v6500_v63  ;;  %2518 = vmatprep.subr.bf16.mxu0 %v6502_v0  ;;  %v1033_v63 = vld [vmem:[#allocation10 + $0x700] sm:$0xff]  ;;  %v823_v46 = vld [vmem:[#allocation10 + $0x70] sm:$0xff] }
 0x2dc   :  { %v1037_v0 = vld [vmem:[#allocation10 + $0x720] sm:$0xff] }
 0x2dd   :  { %v6563_v11 = vcombine.low %v1033_v63, %v1037_v0 }
 0x2de   :  { %2437 = vmatpush1.bf16.msra.mxu1 %v6499_v5  ;;  %2519 = vmatpush1.bf16.msra.mxu0 %v6501_v6  ;;  %v6564_v5 = vcombine.high %v1033_v63, %v1037_v0  ;;  %v6566_v6 = vcombine.high %v1034_v1, %v1038_v2  ;;  %v6352_v0 = vcombine.high %v819_v45, %v823_v46  ;;  %v827_v2 = vld [vmem:[#allocation10 + $0x90] sm:$0xff] }
 0x2df   :  { %2438 = vmatprep.subr.bf16.mxu1 %v6508_v7  ;;  %2520 = vmatprep.subr.bf16.mxu0 %v6510_v8  ;;  %v1041_v7 = vld [vmem:[#allocation10 + $0x740] sm:$0xff] }
 0x2e0   :  { %v1045_v8 = vld [vmem:[#allocation10 + $0x760] sm:$0xff] }
 0x2e1   :  { %v6571_v24 = vcombine.low %v1041_v7, %v1045_v8 }
 0x2e2   :  { %2439 = vmatpush1.bf16.msra.mxu1 %v6507_v13  ;;  %2521 = vmatpush1.bf16.msra.mxu0 %v6509_v14  ;;  %v6572_v13 = vcombine.high %v1041_v7, %v1045_v8  ;;  %v6574_v14 = vcombine.high %v1042_v9, %v1046_v10 }
 0x2e3   :  { %2440 = vmatprep.subr.bf16.mxu1 %v6516_v15  ;;  %2522 = vmatprep.subr.bf16.mxu0 %v6518_v16  ;;  %v1049_v15 = vld [vmem:[#allocation10 + $0x780] sm:$0xff] }
 0x2e4   :  { %v1053_v16 = vld [vmem:[#allocation10 + $0x7a0] sm:$0xff] }
 0x2e6   :  { %2441 = vmatpush1.bf16.msra.mxu1 %v6515_v25  ;;  %2523 = vmatpush1.bf16.msra.mxu0 %v6517_v26  ;;  %v6573_v25 = vcombine.low %v1042_v9, %v1046_v10  ;;  %v8451_v26 = vsub.s32 3, %v8419_v19  ;;  %v835_v10 = vld [vmem:[#allocation10 + $0xd0] sm:$0xff] }
 0x2e7   :  { %2442 = vmatprep.subr.bf16.mxu1 %v6524_v27  ;;  %2524 = vmatprep.subr.bf16.mxu0 %v6526_v28  ;;  %v6580_v27 = vcombine.high %v1049_v15, %v1053_v16  ;;  %v6582_v28 = vcombine.high %v1050_v17, %v1054_v18 }
 0x2ea   :  { %2443 = vmatpush1.bf16.msra.mxu1 %v6523_v34  ;;  %2525 = vmatpush1.bf16.msra.mxu0 %v6525_v35  ;;  %v390_v34 = vrot.slane %v8424_v21, %v8448_v23  ;;  %v394_v35 = vrot.slane %v8424_v21, %v8451_v26 }
 0x2eb   :  { %2444 = vmatprep.subr.bf16.mxu1 %v6532_v36  ;;  %2526 = vmatprep.subr.bf16.mxu0 %v6534_v37  ;;  %v6579_v36 = vcombine.low %v1049_v15, %v1053_v16  ;;  %v6581_v37 = vcombine.low %v1050_v17, %v1054_v18  ;;  %v843_v18 = vld [vmem:[#allocation10 + $0x110] sm:$0xff] }
 0x2ee   :  { %2445 = vmatpush1.bf16.msra.mxu1 %v6531_v42  ;;  %2527 = vmatpush1.bf16.msra.mxu0 %v6533_v43  ;;  %v815_v42 = vld [vmem:[#allocation10 + $0x30] sm:$0xff]  ;;  %v812_v43 = vld [vmem:[#allocation10 + $0x18] sm:$0xff] }
 0x2ef   :  { %2446 = vmatprep.subr.bf16.mxu1 %v6540_v47  ;;  %2528 = vmatprep.subr.bf16.mxu0 %v6542_v48  ;;  %v816_v47 = vld [vmem:[#allocation10 + $0x38] sm:$0xff] }
 0x2f0   :  { %v6345_v63 = vcombine.low %v812_v43, %v816_v47 }
 0x2f2   :  { %2447 = vmatpush1.bf16.msra.mxu1 %v6539_v56  ;;  %2529 = vmatpush1.bf16.msra.mxu0 %v6541_v58  ;;  %v6589_v56 = vcombine.low %v1058_v32, %v1062_v33  ;;  %v851_v32 = vld [vmem:[#allocation10 + $0x150] sm:$0xff] }
 0x2f3   :  { %2448 = vmatprep.subr.bf16.mxu1 %v6548_v59  ;;  %2530 = vmatprep.subr.bf16.mxu0 %v6550_v60  ;;  %v6344_v59 = vcombine.high %v811_v30, %v815_v42  ;;  %v6346_v60 = vcombine.high %v812_v43, %v816_v47  ;;  %v855_v33 = vld [vmem:[#allocation10 + $0x170] sm:$0xff]  ;;  %v864_v43 = vld [vmem:[#allocation10 + $0x1b8] sm:$0xff] }
 0x2f4   :  { %v6383_v47 = vcombine.low %v851_v32, %v855_v33 }
 0x2f6   :  { %2449 = vmatpush1.bf16.msra.mxu1 %v6547_v52  ;;  %2531 = vmatpush1.bf16.msra.mxu0 %v6549_v53  ;;  %v824_v52 = vld [vmem:[#allocation10 + $0x78] sm:$0xff] }
 0x2f7   :  { %2450 = vmatprep.subr.bf16.mxu1 %v6556_v61  ;;  %2532 = vmatprep.subr.bf16.mxu0 %v6558_v62  ;;  %v6343_v61 = vcombine.low %v811_v30, %v815_v42  ;;  %v6354_v1 = vcombine.high %v820_v49, %v824_v52  ;;  %v6353_v7 = vcombine.low %v820_v49, %v824_v52  ;;  %v859_v30 = vld [vmem:[#allocation10 + $0x190] sm:$0xff]  ;;  %v860_v42 = vld [vmem:[#allocation10 + $0x198] sm:$0xff] }
 0x2f8   :  { %v876_v49 = vld [vmem:[#allocation10 + $0x218] sm:$0xff] }
 0x2f9   :  { %v880_v52 = vld [vmem:[#allocation10 + $0x238] sm:$0xff] }
 0x2fa   :  { %2451 = vmatpush1.bf16.msra.mxu1 %v6555_v3  ;;  %2533 = vmatpush1.bf16.msra.mxu0 %v6557_v4  ;;  %v831_v3 = vld [vmem:[#allocation10 + $0xb0] sm:$0xff]  ;;  %v828_v4 = vld [vmem:[#allocation10 + $0x98] sm:$0xff] }
 0x2fb   :  { %2452 = vmatprep.subr.bf16.mxu1 %v6564_v5  ;;  %2534 = vmatprep.subr.bf16.mxu0 %v6566_v6  ;;  %v832_v5 = vld [vmem:[#allocation10 + $0xb8] sm:$0xff]  ;;  %v6351_v6 = vcombine.low %v819_v45, %v823_v46  ;;  %v6360_v8 = vcombine.high %v827_v2, %v831_v3  ;;  %v875_v45 = vld [vmem:[#allocation10 + $0x210] sm:$0xff] }
 0x2fc   :  { %v6362_v9 = vcombine.high %v828_v4, %v832_v5  ;;  %v6361_v15 = vcombine.low %v828_v4, %v832_v5  ;;  %v879_v46 = vld [vmem:[#allocation10 + $0x230] sm:$0xff]  ;;  %v884_v4 = vld [vmem:[#allocation10 + $0x258] sm:$0xff] }
 0x2fd   :  { %v888_v5 = vld [vmem:[#allocation10 + $0x278] sm:$0xff] }
 0x2fe   :  { %2453 = vmatpush1.bf16.msra.mxu1 %v6563_v11  ;;  %2535 = vmatpush1.bf16.msra.mxu0 %v6565_v12  ;;  %v839_v11 = vld [vmem:[#allocation10 + $0xf0] sm:$0xff]  ;;  %v836_v12 = vld [vmem:[#allocation10 + $0xd8] sm:$0xff] }
 0x2ff   :  { %2454 = vmatprep.subr.bf16.mxu1 %v6572_v13  ;;  %2536 = vmatprep.subr.bf16.mxu0 %v6574_v14  ;;  %v840_v13 = vld [vmem:[#allocation10 + $0xf8] sm:$0xff]  ;;  %v6359_v14 = vcombine.low %v827_v2, %v831_v3  ;;  %v6368_v16 = vcombine.high %v835_v10, %v839_v11  ;;  %v883_v2 = vld [vmem:[#allocation10 + $0x250] sm:$0xff] }
 0x300   :  { %v6370_v17 = vcombine.high %v836_v12, %v840_v13  ;;  %v887_v3 = vld [vmem:[#allocation10 + $0x270] sm:$0xff] }
 0x302   :  { %2455 = vmatpush1.bf16.msra.mxu1 %v6571_v24  ;;  %2537 = vmatpush1.bf16.msra.mxu0 %v6573_v25  ;;  %v847_v24 = vld [vmem:[#allocation10 + $0x130] sm:$0xff]  ;;  %v848_v25 = vld [vmem:[#allocation10 + $0x138] sm:$0xff] }
 0x303   :  { %2456 = vmatprep.subr.bf16.mxu1 %v6580_v27  ;;  %2538 = vmatprep.subr.bf16.mxu0 %v6582_v28  ;;  %v6367_v27 = vcombine.low %v835_v10, %v839_v11  ;;  %v6369_v28 = vcombine.low %v836_v12, %v840_v13  ;;  %v6376_v57 = vcombine.high %v843_v18, %v847_v24  ;;  %v891_v10 = vld [vmem:[#allocation10 + $0x290] sm:$0xff]  ;;  %v892_v12 = vld [vmem:[#allocation10 + $0x298] sm:$0xff] }
 0x304   :  { %v794_v41 = vpop.f32.mrb[8].mxu0  ;;  %v895_v11 = vld [vmem:[#allocation10 + $0x2b0] sm:$0xff]  ;;  %v896_v13 = vld [vmem:[#allocation10 + $0x2b8] sm:$0xff] }
 0x305   :  { %v795_v48 = vadd.f32 %v794_v41, %v390_v34  ;;  %v796_v50 = vpop.f32.mrb[9].mxu0  ;;  %v852_v34 = vld [vmem:[#allocation10 + $0x158] sm:$0xff]  ;;  %v863_v41 = vld [vmem:[#allocation10 + $0x1b0] sm:$0xff] }
 0x306   :  { %v797_v51 = vadd.f32 %v796_v50, %v394_v35  ;;  %v798_v54 = vpop.f32.mrb[10].mxu0  ;;  %2457 = vmatpush1.bf16.msra.mxu1 %v6579_v36  ;;  %2539 = vmatpush1.bf16.msra.mxu0 %v6581_v37  ;;  %v856_v35 = vld [vmem:[#allocation10 + $0x178] sm:$0xff]  ;;  %v6375_v36 = vcombine.low %v843_v18, %v847_v24  ;;  %v6392_v50 = vcombine.high %v859_v30, %v863_v41  ;;  %v899_v18 = vld [vmem:[#allocation10 + $0x2d0] sm:$0xff] }
 0x307   :  { %v803_v21 = vmax.f32 %v795_v48, 0.0  ;;  %v799_v58 = vpop.f32.mrb[11].mxu0  ;;  %2458 = vmatprep.subr.bf16.mxu1 %v6588_v29  ;;  %2540 = vmatprep.subr.bf16.mxu0 %v6590_v40  ;;  %v6384_v29 = vcombine.high %v851_v32, %v855_v33  ;;  %v6386_v40 = vcombine.high %v852_v34, %v856_v35  ;;  %v6385_v48 = vcombine.low %v852_v34, %v856_v35  ;;  %v867_v54 = vld [vmem:[#allocation10 + $0x1d0] sm:$0xff]  ;;  %v908_v34 = vld [vmem:[#allocation10 + $0x318] sm:$0xff] }
 0x308   :  { %v804_v44 = vmax.f32 %v797_v51, 0.0  ;;  %v6394_v51 = vcombine.high %v860_v42, %v864_v43  ;;  %v6391_v58 = vcombine.low %v859_v30, %v863_v41  ;;  %v903_v24 = vld [vmem:[#allocation10 + $0x2f0] sm:$0xff]  ;;  %v912_v35 = vld [vmem:[#allocation10 + $0x338] sm:$0xff] }
 0x309   :  { %v8459_v62 = vpack.c.bf16 %v803_v21, %v803_v21  ;;  %v872_v21 = vld [vmem:[#allocation10 + $0x1f8] sm:$0xff]  ;;  %v907_v32 = vld [vmem:[#allocation10 + $0x310] sm:$0xff] }
 0x30a   :  { %v8457_v53 = vpack.c.bf16 %v804_v44, %v804_v44  ;;  %2459 = vmatpush1.bf16.msra.mxu1 %v6587_v55  ;;  %2541 = vmatpush1.bf16.msra.mxu0 %v6589_v56  ;;  %v871_v55 = vld [vmem:[#allocation10 + $0x1f0] sm:$0xff]  ;;  %v868_v56 = vld [vmem:[#allocation10 + $0x1d8] sm:$0xff] }
 0x30b   :  { %2551 = vmatprep.subr.bf16.mxu1 %v6344_v59  ;;  %2633 = vmatprep.subr.bf16.mxu0 %v6346_v60  ;;  %v6393_v59 = vcombine.low %v860_v42, %v864_v43  ;;  %v6400_v60 = vcombine.high %v867_v54, %v871_v55  ;;  %v6402_v44 = vcombine.high %v868_v56, %v872_v21  ;;  %v911_v33 = vld [vmem:[#allocation10 + $0x330] sm:$0xff]  ;;  %v916_v42 = vld [vmem:[#allocation10 + $0x358] sm:$0xff] }
 0x30c   :  { %2460 = vmatprep.mubr.bf16.mxu1 %v8457_v53  ;;  %2542 = vmatprep.mubr.bf16.mxu0 %v8457_v53  ;;  %v915_v30 = vld [vmem:[#allocation10 + $0x350] sm:$0xff]  ;;  %v920_v43 = vld [vmem:[#allocation10 + $0x378] sm:$0xff] }
 0x30d   :  { %2461 = vmatmul.mubr.bf16.vlgmr.msra.gmra.mrb[4].mxu1 %v8459_v62  ;;  %2543 = vmatmul.mubr.bf16.vlgmr.msra.gmra.mrb[12].mxu0 %v8459_v62  ;;  %v919_v41 = vld [vmem:[#allocation10 + $0x370] sm:$0xff] }
 0x30e   :  { %2552 = vmatpush1.bf16.msra.mxu1 %v6343_v61  ;;  %2583 = vmatprep.mubr.bf16.mxu1 %v8433_v38  ;;  %v6399_v61 = vcombine.low %v867_v54, %v871_v55  ;;  %v923_v54 = vld [vmem:[#allocation10 + $0x390] sm:$0xff] }
 0x30f   :  { %2634 = vmatpush1.bf16.msra.mxu0 %v6345_v63  ;;  %2665 = vmatprep.mubr.bf16.mxu0 %v8433_v38  ;;  %v844_v38 = vld [vmem:[#allocation10 + $0x118] sm:$0xff]  ;;  %v6401_v63 = vcombine.low %v868_v56, %v872_v21  ;;  %v927_v55 = vld [vmem:[#allocation10 + $0x3b0] sm:$0xff] }
 0x310   :  { %2553 = vmatprep.subr.bf16.mxu1 %v6352_v0  ;;  %2635 = vmatprep.subr.bf16.mxu0 %v6354_v1  ;;  %v6378_v31 = vcombine.high %v844_v38, %v848_v25  ;;  %v6377_v37 = vcombine.low %v844_v38, %v848_v25  ;;  %v6408_v0 = vcombine.high %v875_v45, %v879_v46  ;;  %v900_v38 = vld [vmem:[#allocation10 + $0x2d8] sm:$0xff] }
 0x311   :  { %v6410_v1 = vcombine.high %v876_v49, %v880_v52  ;;  %v904_v25 = vld [vmem:[#allocation10 + $0x2f8] sm:$0xff] }
 0x312   :  { %2554 = vmatpush1.bf16.msra.mxu1 %v6351_v6  ;;  %v6407_v6 = vcombine.low %v875_v45, %v879_v46  ;;  %v924_v56 = vld [vmem:[#allocation10 + $0x398] sm:$0xff]  ;;  %v931_v45 = vld [vmem:[#allocation10 + $0x3d0] sm:$0xff] }
 0x313   :  { %2636 = vmatpush1.bf16.msra.mxu0 %v6353_v7  ;;  %2555 = vmatprep.subr.bf16.mxu1 %v6360_v8  ;;  %v6409_v7 = vcombine.low %v876_v49, %v880_v52  ;;  %v6416_v8 = vcombine.high %v883_v2, %v887_v3  ;;  %v928_v21 = vld [vmem:[#allocation10 + $0x3b8] sm:$0xff]  ;;  %v935_v46 = vld [vmem:[#allocation10 + $0x3f0] sm:$0xff] }
 0x314   :  { %2637 = vmatprep.subr.bf16.mxu0 %v6362_v9  ;;  %v6418_v9 = vcombine.high %v884_v4, %v888_v5  ;;  %v932_v49 = vld [vmem:[#allocation10 + $0x3d8] sm:$0xff] }
 0x315   :  { %v936_v52 = vld [vmem:[#allocation10 + $0x3f8] sm:$0xff] }
 0x316   :  { %2556 = vmatpush1.bf16.msra.mxu1 %v6359_v14  ;;  %v6415_v14 = vcombine.low %v883_v2, %v887_v3  ;;  %v939_v2 = vld [vmem:[#allocation10 + $0x410] sm:$0xff] }
 0x317   :  { %2638 = vmatpush1.bf16.msra.mxu0 %v6361_v15  ;;  %2557 = vmatprep.subr.bf16.mxu1 %v6368_v16  ;;  %v6417_v15 = vcombine.low %v884_v4, %v888_v5  ;;  %v6424_v16 = vcombine.high %v891_v10, %v895_v11  ;;  %v943_v3 = vld [vmem:[#allocation10 + $0x430] sm:$0xff]  ;;  %v940_v4 = vld [vmem:[#allocation10 + $0x418] sm:$0xff] }
 0x318   :  { %2639 = vmatprep.subr.bf16.mxu0 %v6370_v17  ;;  %v6426_v17 = vcombine.high %v892_v12, %v896_v13  ;;  %v944_v5 = vld [vmem:[#allocation10 + $0x438] sm:$0xff] }
 0x31a   :  { %2558 = vmatpush1.bf16.msra.mxu1 %v6367_v27  ;;  %v6423_v27 = vcombine.low %v891_v10, %v895_v11  ;;  %v947_v10 = vld [vmem:[#allocation10 + $0x450] sm:$0xff] }
 0x31b   :  { %2640 = vmatpush1.bf16.msra.mxu0 %v6369_v28  ;;  %2559 = vmatprep.subr.bf16.mxu1 %v6376_v57  ;;  %v6425_v28 = vcombine.low %v892_v12, %v896_v13  ;;  %v6432_v57 = vcombine.high %v899_v18, %v903_v24  ;;  %v951_v11 = vld [vmem:[#allocation10 + $0x470] sm:$0xff]  ;;  %v6471_v12 = vcombine.low %v939_v2, %v943_v3  ;;  %v948_v13 = vld [vmem:[#allocation10 + $0x458] sm:$0xff] }
 0x31c   :  { %2641 = vmatprep.subr.bf16.mxu0 %v6378_v31  ;;  %v6434_v31 = vcombine.high %v900_v38, %v904_v25 }
 0x31e   :  { %2560 = vmatpush1.bf16.msra.mxu1 %v6375_v36  ;;  %v6431_v36 = vcombine.low %v899_v18, %v903_v24  ;;  %v959_v18 = vld [vmem:[#allocation10 + $0x4b0] sm:$0xff] }
 0x31f   :  { %2642 = vmatpush1.bf16.msra.mxu0 %v6377_v37  ;;  %2561 = vmatprep.subr.bf16.mxu1 %v6384_v29  ;;  %v6433_v37 = vcombine.low %v900_v38, %v904_v25  ;;  %v6440_v29 = vcombine.high %v907_v32, %v911_v33  ;;  %v956_v38 = vld [vmem:[#allocation10 + $0x498] sm:$0xff] }
 0x320   :  { %2643 = vmatprep.subr.bf16.mxu0 %v6386_v40  ;;  %v6442_v40 = vcombine.high %v908_v34, %v912_v35  ;;  %v960_v25 = vld [vmem:[#allocation10 + $0x4b8] sm:$0xff] }
 0x322   :  { %2562 = vmatpush1.bf16.msra.mxu1 %v6383_v47  ;;  %v6439_v47 = vcombine.low %v907_v32, %v911_v33  ;;  %v963_v32 = vld [vmem:[#allocation10 + $0x4d0] sm:$0xff] }
 0x323   :  { %2644 = vmatpush1.bf16.msra.mxu0 %v6385_v48  ;;  %2563 = vmatprep.subr.bf16.mxu1 %v6392_v50  ;;  %v6441_v48 = vcombine.low %v908_v34, %v912_v35  ;;  %v6448_v50 = vcombine.high %v915_v30, %v919_v41  ;;  %v967_v33 = vld [vmem:[#allocation10 + $0x4f0] sm:$0xff]  ;;  %v964_v34 = vld [vmem:[#allocation10 + $0x4d8] sm:$0xff] }
 0x324   :  { %2645 = vmatprep.subr.bf16.mxu0 %v6394_v51  ;;  %v6450_v51 = vcombine.high %v916_v42, %v920_v43  ;;  %v968_v35 = vld [vmem:[#allocation10 + $0x4f8] sm:$0xff] }
 0x326   :  { %2564 = vmatpush1.bf16.msra.mxu1 %v6391_v58  ;;  %v6447_v58 = vcombine.low %v915_v30, %v919_v41  ;;  %v975_v30 = vld [vmem:[#allocation10 + $0x530] sm:$0xff]  ;;  %v972_v41 = vld [vmem:[#allocation10 + $0x518] sm:$0xff] }
 0x327   :  { %2646 = vmatpush1.bf16.msra.mxu0 %v6393_v59  ;;  %2565 = vmatprep.subr.bf16.mxu1 %v6400_v60  ;;  %v6449_v59 = vcombine.low %v916_v42, %v920_v43  ;;  %v6456_v60 = vcombine.high %v923_v54, %v927_v55  ;;  %v976_v42 = vld [vmem:[#allocation10 + $0x538] sm:$0xff]  ;;  %v6497_v43 = vcombine.low %v964_v34, %v968_v35 }
 0x328   :  { %2647 = vmatprep.subr.bf16.mxu0 %v6402_v44  ;;  %v6458_v44 = vcombine.high %v924_v56, %v928_v21 }
 0x32a   :  { %2566 = vmatpush1.bf16.msra.mxu1 %v6399_v61  ;;  %v6455_v61 = vcombine.low %v923_v54, %v927_v55  ;;  %v980_v54 = vld [vmem:[#allocation10 + $0x558] sm:$0xff] }
 0x32b   :  { %2648 = vmatpush1.bf16.msra.mxu0 %v6401_v63  ;;  %2567 = vmatprep.subr.bf16.mxu1 %v6408_v0  ;;  %v6457_v63 = vcombine.low %v924_v56, %v928_v21  ;;  %v6464_v0 = vcombine.high %v931_v45, %v935_v46  ;;  %v984_v55 = vld [vmem:[#allocation10 + $0x578] sm:$0xff]  ;;  %v6505_v21 = vcombine.low %v972_v41, %v976_v42 }
 0x32c   :  { %2649 = vmatprep.subr.bf16.mxu0 %v6410_v1  ;;  %v6466_v1 = vcombine.high %v932_v49, %v936_v52 }
 0x32e   :  { %2568 = vmatpush1.bf16.msra.mxu1 %v6407_v6  ;;  %v6463_v6 = vcombine.low %v931_v45, %v935_v46  ;;  %v988_v45 = vld [vmem:[#allocation10 + $0x598] sm:$0xff] }
 0x32f   :  { %2650 = vmatpush1.bf16.msra.mxu0 %v6409_v7  ;;  %2569 = vmatprep.subr.bf16.mxu1 %v6416_v8  ;;  %v6465_v7 = vcombine.low %v932_v49, %v936_v52  ;;  %v6472_v8 = vcombine.high %v939_v2, %v943_v3  ;;  %v992_v46 = vld [vmem:[#allocation10 + $0x5b8] sm:$0xff]  ;;  %v6513_v52 = vcombine.low %v980_v54, %v984_v55 }
 0x330   :  { %2651 = vmatprep.subr.bf16.mxu0 %v6418_v9  ;;  %v6474_v9 = vcombine.high %v940_v4, %v944_v5  ;;  %v996_v2 = vld [vmem:[#allocation10 + $0x5d8] sm:$0xff] }
 0x331   :  { %v1000_v3 = vld [vmem:[#allocation10 + $0x5f8] sm:$0xff] }
 0x332   :  { %2570 = vmatpush1.bf16.msra.mxu1 %v6415_v14  ;;  %v952_v14 = vld [vmem:[#allocation10 + $0x478] sm:$0xff] }
 0x333   :  { %2652 = vmatpush1.bf16.msra.mxu0 %v6417_v15  ;;  %2571 = vmatprep.subr.bf16.mxu1 %v6424_v16  ;;  %v6473_v15 = vcombine.low %v940_v4, %v944_v5  ;;  %v6480_v16 = vcombine.high %v947_v10, %v951_v11  ;;  %v6482_v24 = vcombine.high %v948_v13, %v952_v14 }
 0x334   :  { %2653 = vmatprep.subr.bf16.mxu0 %v6426_v17  ;;  %v955_v17 = vld [vmem:[#allocation10 + $0x490] sm:$0xff]  ;;  %v6521_v5 = vcombine.low %v988_v45, %v992_v46 }
 0x336   :  { %2572 = vmatpush1.bf16.msra.mxu1 %v6423_v27  ;;  %v6479_v27 = vcombine.low %v947_v10, %v951_v11  ;;  %v1004_v10 = vld [vmem:[#allocation10 + $0x618] sm:$0xff] }
 0x337   :  { %2654 = vmatpush1.bf16.msra.mxu0 %v6425_v28  ;;  %2573 = vmatprep.subr.bf16.mxu1 %v6432_v57  ;;  %v6481_v28 = vcombine.low %v948_v13, %v952_v14  ;;  %v6488_v57 = vcombine.high %v955_v17, %v959_v18  ;;  %v1008_v11 = vld [vmem:[#allocation10 + $0x638] sm:$0xff]  ;;  %v6529_v13 = vcombine.low %v996_v2, %v1000_v3 }
 0x338   :  { %2655 = vmatprep.subr.bf16.mxu0 %v6434_v31  ;;  %v6490_v31 = vcombine.high %v956_v38, %v960_v25 }
 0x33a   :  { %2574 = vmatpush1.bf16.msra.mxu1 %v6431_v36  ;;  %v6487_v36 = vcombine.low %v955_v17, %v959_v18  ;;  %v1015_v17 = vld [vmem:[#allocation10 + $0x670] sm:$0xff]  ;;  %v1012_v18 = vld [vmem:[#allocation10 + $0x658] sm:$0xff] }
 0x33b   :  { %2656 = vmatpush1.bf16.msra.mxu0 %v6433_v37  ;;  %2575 = vmatprep.subr.bf16.mxu1 %v6440_v29  ;;  %v6496_v37 = vcombine.high %v963_v32, %v967_v33  ;;  %v6498_v29 = vcombine.high %v964_v34, %v968_v35 }
 0x33c   :  { %2657 = vmatprep.subr.bf16.mxu0 %v6442_v40  ;;  %v971_v40 = vld [vmem:[#allocation10 + $0x510] sm:$0xff] }
 0x33d   :  { %v6503_v56 = vcombine.low %v971_v40, %v975_v30 }
 0x33e   :  { %2576 = vmatpush1.bf16.msra.mxu1 %v6439_v47  ;;  %v6504_v47 = vcombine.high %v971_v40, %v975_v30  ;;  %v1028_v40 = vld [vmem:[#allocation10 + $0x6d8] sm:$0xff] }
 0x33f   :  { %2658 = vmatpush1.bf16.msra.mxu0 %v6441_v48  ;;  %2577 = vmatprep.subr.bf16.mxu1 %v6448_v50  ;;  %v6506_v48 = vcombine.high %v972_v41, %v976_v42  ;;  %v979_v50 = vld [vmem:[#allocation10 + $0x550] sm:$0xff]  ;;  %v1032_v30 = vld [vmem:[#allocation10 + $0x6f8] sm:$0xff] }
 0x340   :  { %2659 = vmatprep.subr.bf16.mxu0 %v6450_v51  ;;  %v983_v51 = vld [vmem:[#allocation10 + $0x570] sm:$0xff] }
 0x341   :  { %v6511_v49 = vcombine.low %v979_v50, %v983_v51 }
 0x342   :  { %2578 = vmatpush1.bf16.msra.mxu1 %v6447_v58  ;;  %v6512_v58 = vcombine.high %v979_v50, %v983_v51  ;;  %v1036_v50 = vld [vmem:[#allocation10 + $0x718] sm:$0xff] }
 0x343   :  { %2660 = vmatpush1.bf16.msra.mxu0 %v6449_v59  ;;  %2579 = vmatprep.subr.bf16.mxu1 %v6456_v60  ;;  %v6514_v59 = vcombine.high %v980_v54, %v984_v55  ;;  %v987_v60 = vld [vmem:[#allocation10 + $0x590] sm:$0xff]  ;;  %v1040_v51 = vld [vmem:[#allocation10 + $0x738] sm:$0xff]  ;;  %v6561_v55 = vcombine.low %v1028_v40, %v1032_v30 }
 0x344   :  { %2661 = vmatprep.subr.bf16.mxu0 %v6458_v44  ;;  %v991_v44 = vld [vmem:[#allocation10 + $0x5b0] sm:$0xff] }
 0x345   :  { %v6519_v4 = vcombine.low %v987_v60, %v991_v44 }
 0x346   :  { %2580 = vmatpush1.bf16.msra.mxu1 %v6455_v61  ;;  %v6520_v61 = vcombine.high %v987_v60, %v991_v44  ;;  %v1044_v60 = vld [vmem:[#allocation10 + $0x758] sm:$0xff] }
 0x347   :  { %2662 = vmatpush1.bf16.msra.mxu0 %v6457_v63  ;;  %2581 = vmatprep.subr.bf16.mxu1 %v6464_v0  ;;  %v6522_v63 = vcombine.high %v988_v45, %v992_v46  ;;  %v995_v0 = vld [vmem:[#allocation10 + $0x5d0] sm:$0xff]  ;;  %v1048_v44 = vld [vmem:[#allocation10 + $0x778] sm:$0xff]  ;;  %v6569_v46 = vcombine.low %v1036_v50, %v1040_v51 }
 0x348   :  { %2663 = vmatprep.subr.bf16.mxu0 %v6466_v1  ;;  %v999_v1 = vld [vmem:[#allocation10 + $0x5f0] sm:$0xff] }
 0x34a   :  { %2582 = vmatpush1.bf16.msra.mxu1 %v6463_v6  ;;  %v6528_v6 = vcombine.high %v995_v0, %v999_v1 }
 0x34b   :  { %2664 = vmatpush1.bf16.msra.mxu0 %v6465_v7  ;;  %2592 = vmatprep.subr.bf16.mxu1 %v6472_v8  ;;  %v6530_v7 = vcombine.high %v996_v2, %v1000_v3  ;;  %v1003_v8 = vld [vmem:[#allocation10 + $0x610] sm:$0xff]  ;;  %v6577_v3 = vcombine.low %v1044_v60, %v1048_v44 }
 0x34c   :  { %2674 = vmatprep.subr.bf16.mxu0 %v6474_v9  ;;  %v1007_v9 = vld [vmem:[#allocation10 + $0x630] sm:$0xff] }
 0x34d   :  { %2584 = vmatmul.mubr.bf16.vlgmr.msra.gmra.mrb[8].mxu1 %v8435_v39  ;;  %v6536_v14 = vcombine.high %v1003_v8, %v1007_v9 }
 0x34e   :  { %2666 = vmatmul.mubr.bf16.vlgmr.msra.gmra.mrb[16].mxu0 %v8435_v39  ;;  %2593 = vmatpush1.bf16.msra.mxu1 %v6471_v12  ;;  %v6489_v39 = vcombine.low %v956_v38, %v960_v25  ;;  %v6527_v12 = vcombine.low %v995_v0, %v999_v1  ;;  %v6535_v38 = vcombine.low %v1003_v8, %v1007_v9  ;;  %v1052_v0 = vld [vmem:[#allocation10 + $0x798] sm:$0xff] }
 0x34f   :  { %2624 = vmatprep.mubr.bf16.mxu1 %v8457_v53  ;;  %2675 = vmatpush1.bf16.msra.mxu0 %v6473_v15  ;;  %v6538_v15 = vcombine.high %v1004_v10, %v1008_v11  ;;  %v6537_v25 = vcombine.low %v1004_v10, %v1008_v11  ;;  %v1056_v1 = vld [vmem:[#allocation10 + $0x7b8] sm:$0xff] }
 0x350   :  { %2706 = vmatprep.mubr.bf16.mxu0 %v8457_v53  ;;  %2594 = vmatprep.subr.bf16.mxu1 %v6480_v16  ;;  %v6495_v53 = vcombine.low %v963_v32, %v967_v33  ;;  %v1011_v16 = vld [vmem:[#allocation10 + $0x650] sm:$0xff]  ;;  %v1020_v32 = vld [vmem:[#allocation10 + $0x698] sm:$0xff]  ;;  %v6585_v11 = vcombine.low %v1052_v0, %v1056_v1 }
 0x351   :  { %2676 = vmatprep.subr.bf16.mxu0 %v6482_v24  ;;  %v1016_v24 = vld [vmem:[#allocation10 + $0x678] sm:$0xff]  ;;  %v6543_v34 = vcombine.low %v1011_v16, %v1015_v17 }
 0x352   :  { %2595 = vmatpush1.bf16.msra.mxu1 %v6479_v27  ;;  %v6544_v27 = vcombine.high %v1011_v16, %v1015_v17  ;;  %v1024_v33 = vld [vmem:[#allocation10 + $0x6b8] sm:$0xff]  ;;  %v6545_v35 = vcombine.low %v1012_v18, %v1016_v24  ;;  %v7348_v16 = vld [vmem:[#allocation13 + $0x4] ss:$28 sps:$4 sm:$0xff]   ;;  %v7351_v17 = vld [vmem:[#allocation13 + $0xc] ss:$28 sps:$4 sm:$0xff]  }
 0x353   :  { %2677 = vmatpush1.bf16.msra.mxu0 %v6481_v28  ;;  %2596 = vmatprep.subr.bf16.mxu1 %v6488_v57  ;;  %v6546_v28 = vcombine.high %v1012_v18, %v1016_v24  ;;  %v1019_v57 = vld [vmem:[#allocation10 + $0x690] sm:$0xff]  ;;  %v6553_v42 = vcombine.low %v1020_v32, %v1024_v33  ;;  %v1060_v8 = vld [vmem:[#allocation10 + $0x7d8] sm:$0xff]  ;;  %v7346_v18 = vld [vmem:[#allocation13] ss:$28 sps:$4 sm:$0xff]  }
 0x354   :  { %2678 = vmatprep.subr.bf16.mxu0 %v6490_v31  ;;  %v1023_v31 = vld [vmem:[#allocation10 + $0x6b0] sm:$0xff]  ;;  %v1064_v9 = vld [vmem:[#allocation10 + $0x7f8] sm:$0xff] }
 0x355   :  { %v6551_v41 = vcombine.low %v1019_v57, %v1023_v31  ;;  %v7349_v24 = vld [vmem:[#allocation13 + $0x8] ss:$28 sps:$4 sm:$0xff]  }
 0x356   :  { %2597 = vmatpush1.bf16.msra.mxu1 %v6487_v36  ;;  %v6552_v36 = vcombine.high %v1019_v57, %v1023_v31  ;;  %v7360_v57 = vld [vmem:[#allocation13 + $0x74] ss:$28 sps:$4 sm:$0xff]   ;;  %v7363_v31 = vld [vmem:[#allocation13 + $0x7c] ss:$28 sps:$4 sm:$0xff]  }
 0x357   :  { %2679 = vmatpush1.bf16.msra.mxu0 %v6489_v39  ;;  %2598 = vmatprep.subr.bf16.mxu1 %v6496_v37  ;;  %v6554_v39 = vcombine.high %v1020_v32, %v1024_v33  ;;  %v1027_v37 = vld [vmem:[#allocation10 + $0x6d0] sm:$0xff]  ;;  %v7361_v33 = vld [vmem:[#allocation13 + $0x78] ss:$28 sps:$4 sm:$0xff]  }
 0x358   :  { %2680 = vmatprep.subr.bf16.mxu0 %v6498_v29  ;;  %v1031_v29 = vld [vmem:[#allocation10 + $0x6f0] sm:$0xff] }
 0x359   :  { %v6559_v54 = vcombine.low %v1027_v37, %v1031_v29  ;;  %v7358_v32 = vld [vmem:[#allocation13 + $0x70] ss:$28 sps:$4 sm:$0xff]  }
 0x35a   :  { %2599 = vmatpush1.bf16.msra.mxu1 %v6495_v53  ;;  %v6560_v53 = vcombine.high %v1027_v37, %v1031_v29  ;;  %v7375_v37 = vld [vmem:[#allocation13 + $0xec] ss:$28 sps:$4 sm:$0xff]   ;;  %v7370_v29 = vld [vmem:[#allocation13 + $0xe0] ss:$28 sps:$4 sm:$0xff]  }
 0x35b   :  { %2681 = vmatpush1.bf16.msra.mxu0 %v6497_v43  ;;  %2600 = vmatprep.subr.bf16.mxu1 %v6504_v47  ;;  %v6562_v43 = vcombine.high %v1028_v40, %v1032_v30  ;;  %v1035_v47 = vld [vmem:[#allocation10 + $0x710] sm:$0xff]  ;;  %v7378_v30 = vld [vmem:[#allocation13 + $0x11c] ss:$28 sps:$4 sm:$0xff]  }
 0x35c   :  { %2682 = vmatprep.subr.bf16.mxu0 %v6506_v48  ;;  %v1039_v48 = vld [vmem:[#allocation10 + $0x730] sm:$0xff] }
 0x35d   :  { %v6567_v45 = vcombine.low %v1035_v47, %v1039_v48  ;;  %v7373_v40 = vld [vmem:[#allocation13 + $0xe8] ss:$28 sps:$4 sm:$0xff]  }
 0x35e   :  { %2601 = vmatpush1.bf16.msra.mxu1 %v6503_v56  ;;  %v6568_v56 = vcombine.high %v1035_v47, %v1039_v48  ;;  %v7387_v47 = vld [vmem:[#allocation13 + $0x15c] ss:$28 sps:$4 sm:$0xff]   ;;  %v7382_v48 = vld [vmem:[#allocation13 + $0x150] ss:$28 sps:$4 sm:$0xff]  }
 0x35f   :  { %2683 = vmatpush1.bf16.msra.mxu0 %v6505_v21  ;;  %2602 = vmatprep.subr.bf16.mxu1 %v6512_v58  ;;  %v6570_v21 = vcombine.high %v1036_v50, %v1040_v51  ;;  %v1043_v58 = vld [vmem:[#allocation10 + $0x750] sm:$0xff]  ;;  %v7385_v50 = vld [vmem:[#allocation13 + $0x158] ss:$28 sps:$4 sm:$0xff]  }
 0x360   :  { %2684 = vmatprep.subr.bf16.mxu0 %v6514_v59  ;;  %v1047_v59 = vld [vmem:[#allocation10 + $0x770] sm:$0xff] }
 0x361   :  { %v6575_v2 = vcombine.low %v1043_v58, %v1047_v59  ;;  %v7390_v51 = vld [vmem:[#allocation13 + $0x18c] ss:$28 sps:$4 sm:$0xff]  }
 0x362   :  { %2603 = vmatpush1.bf16.msra.mxu1 %v6511_v49  ;;  %v6576_v49 = vcombine.high %v1043_v58, %v1047_v59  ;;  %v7399_v58 = vld [vmem:[#allocation13 + $0x1cc] ss:$28 sps:$4 sm:$0xff]   ;;  %v7394_v59 = vld [vmem:[#allocation13 + $0x1c0] ss:$28 sps:$4 sm:$0xff]  }
 0x363   :  { %2685 = vmatpush1.bf16.msra.mxu0 %v6513_v52  ;;  %2604 = vmatprep.subr.bf16.mxu1 %v6520_v61  ;;  %v6578_v52 = vcombine.high %v1044_v60, %v1048_v44  ;;  %v1051_v61 = vld [vmem:[#allocation10 + $0x790] sm:$0xff]  ;;  %v7402_v44 = vld [vmem:[#allocation13 + $0x1fc] ss:$28 sps:$4 sm:$0xff]  }
 0x364   :  { %2686 = vmatprep.subr.bf16.mxu0 %v6522_v63  ;;  %v1055_v63 = vld [vmem:[#allocation10 + $0x7b0] sm:$0xff] }
 0x365   :  { %v6583_v10 = vcombine.low %v1051_v61, %v1055_v63  ;;  %v7397_v60 = vld [vmem:[#allocation13 + $0x1c8] ss:$28 sps:$4 sm:$0xff]  }
 0x366   :  { %2605 = vmatpush1.bf16.msra.mxu1 %v6519_v4  ;;  %v6584_v4 = vcombine.high %v1051_v61, %v1055_v63  ;;  %v7411_v61 = vld [vmem:[#allocation13 + $0x23c] ss:$28 sps:$4 sm:$0xff]   ;;  %v7406_v63 = vld [vmem:[#allocation13 + $0x230] ss:$28 sps:$4 sm:$0xff]  }
 0x367   :  { %2687 = vmatpush1.bf16.msra.mxu0 %v6521_v5  ;;  %2606 = vmatprep.subr.bf16.mxu1 %v6528_v6  ;;  %v6586_v5 = vcombine.high %v1052_v0, %v1056_v1  ;;  %v1059_v6 = vld [vmem:[#allocation10 + $0x7d0] sm:$0xff]  ;;  %v7409_v0 = vld [vmem:[#allocation13 + $0x238] ss:$28 sps:$4 sm:$0xff]  }
 0x368   :  { %2688 = vmatprep.subr.bf16.mxu0 %v6530_v7  ;;  %v1063_v7 = vld [vmem:[#allocation10 + $0x7f0] sm:$0xff] }
 0x369   :  { %v7414_v1 = vld [vmem:[#allocation13 + $0x26c] ss:$28 sps:$4 sm:$0xff]  }
 0x36a   :  { %2607 = vmatpush1.bf16.msra.mxu1 %v6527_v12  ;;  %v6592_v12 = vcombine.high %v1059_v6, %v1063_v7 }
 0x36b   :  { %2689 = vmatpush1.bf16.msra.mxu0 %v6529_v13  ;;  %2608 = vmatprep.subr.bf16.mxu1 %v6536_v14  ;;  %v6594_v13 = vcombine.high %v1060_v8, %v1064_v9  ;;  %v6591_v14 = vcombine.low %v1059_v6, %v1063_v7  ;;  %v7423_v6 = vld [vmem:[#allocation13 + $0x2ac] ss:$28 sps:$4 sm:$0xff]   ;;  %v7418_v7 = vld [vmem:[#allocation13 + $0x2a0] ss:$28 sps:$4 sm:$0xff]  }
 0x36c   :  { %2690 = vmatprep.subr.bf16.mxu0 %v6538_v15  ;;  %v6593_v15 = vcombine.low %v1060_v8, %v1064_v9  ;;  %v7421_v8 = vld [vmem:[#allocation13 + $0x2a8] ss:$28 sps:$4 sm:$0xff]   ;;  %v7426_v9 = vld [vmem:[#allocation13 + $0x2dc] ss:$28 sps:$4 sm:$0xff]  }
 0x36e   :  { %2609 = vmatpush1.bf16.msra.mxu1 %v6535_v38  ;;  %v7354_v38 = vld [vmem:[#allocation13 + $0x3c] ss:$28 sps:$4 sm:$0xff]  }
 0x36f   :  { %2691 = vmatpush1.bf16.msra.mxu0 %v6537_v25  ;;  %2610 = vmatprep.subr.bf16.mxu1 %v6544_v27  ;;  %v7357_v25 = vld [vmem:[#allocation13 + $0x44] ss:$28 sps:$4 sm:$0xff]   ;;  %v7352_v27 = vld [vmem:[#allocation13 + $0x38] ss:$28 sps:$4 sm:$0xff]  }
 0x370   :  { %2692 = vmatprep.subr.bf16.mxu0 %v6546_v28  ;;  %v7355_v28 = vld [vmem:[#allocation13 + $0x40] ss:$28 sps:$4 sm:$0xff]  }
 0x372   :  { %2611 = vmatpush1.bf16.msra.mxu1 %v6543_v34  ;;  %v7366_v34 = vld [vmem:[#allocation13 + $0xac] ss:$28 sps:$4 sm:$0xff]  }
 0x373   :  { %2693 = vmatpush1.bf16.msra.mxu0 %v6545_v35  ;;  %2612 = vmatprep.subr.bf16.mxu1 %v6552_v36  ;;  %v7369_v35 = vld [vmem:[#allocation13 + $0xb4] ss:$28 sps:$4 sm:$0xff]   ;;  %v7364_v36 = vld [vmem:[#allocation13 + $0xa8] ss:$28 sps:$4 sm:$0xff]  }
 0x374   :  { %2694 = vmatprep.subr.bf16.mxu0 %v6554_v39  ;;  %v7372_v39 = vld [vmem:[#allocation13 + $0xe4] ss:$28 sps:$4 sm:$0xff]  }
 0x376   :  { %2613 = vmatpush1.bf16.msra.mxu1 %v6551_v41  ;;  %v7381_v41 = vld [vmem:[#allocation13 + $0x124] ss:$28 sps:$4 sm:$0xff]  }
 0x377   :  { %2695 = vmatpush1.bf16.msra.mxu0 %v6553_v42  ;;  %2614 = vmatprep.subr.bf16.mxu1 %v6560_v53  ;;  %v7376_v42 = vld [vmem:[#allocation13 + $0x118] ss:$28 sps:$4 sm:$0xff]   ;;  %v7379_v53 = vld [vmem:[#allocation13 + $0x120] ss:$28 sps:$4 sm:$0xff]  }
 0x378   :  { %2696 = vmatprep.subr.bf16.mxu0 %v6562_v43  ;;  %v7384_v43 = vld [vmem:[#allocation13 + $0x154] ss:$28 sps:$4 sm:$0xff]  }
 0x37a   :  { %2615 = vmatpush1.bf16.msra.mxu1 %v6559_v54  ;;  %v7393_v54 = vld [vmem:[#allocation13 + $0x194] ss:$28 sps:$4 sm:$0xff]  }
 0x37b   :  { %2697 = vmatpush1.bf16.msra.mxu0 %v6561_v55  ;;  %2616 = vmatprep.subr.bf16.mxu1 %v6568_v56  ;;  %v7388_v55 = vld [vmem:[#allocation13 + $0x188] ss:$28 sps:$4 sm:$0xff]   ;;  %v7391_v56 = vld [vmem:[#allocation13 + $0x190] ss:$28 sps:$4 sm:$0xff]  }
 0x37c   :  { %2698 = vmatprep.subr.bf16.mxu0 %v6570_v21  ;;  %v7396_v21 = vld [vmem:[#allocation13 + $0x1c4] ss:$28 sps:$4 sm:$0xff]  }
 0x37e   :  { %2617 = vmatpush1.bf16.msra.mxu1 %v6567_v45  ;;  %v7405_v45 = vld [vmem:[#allocation13 + $0x204] ss:$28 sps:$4 sm:$0xff]  }
 0x37f   :  { %2699 = vmatpush1.bf16.msra.mxu0 %v6569_v46  ;;  %2618 = vmatprep.subr.bf16.mxu1 %v6576_v49  ;;  %v7400_v46 = vld [vmem:[#allocation13 + $0x1f8] ss:$28 sps:$4 sm:$0xff]   ;;  %v7403_v49 = vld [vmem:[#allocation13 + $0x200] ss:$28 sps:$4 sm:$0xff]  }
 0x380   :  { %2700 = vmatprep.subr.bf16.mxu0 %v6578_v52  ;;  %v7408_v52 = vld [vmem:[#allocation13 + $0x234] ss:$28 sps:$4 sm:$0xff]  }
 0x382   :  { %2619 = vmatpush1.bf16.msra.mxu1 %v6575_v2  ;;  %v7417_v2 = vld [vmem:[#allocation13 + $0x274] ss:$28 sps:$4 sm:$0xff]  }
 0x383   :  { %2701 = vmatpush1.bf16.msra.mxu0 %v6577_v3  ;;  %2620 = vmatprep.subr.bf16.mxu1 %v6584_v4  ;;  %v7412_v3 = vld [vmem:[#allocation13 + $0x268] ss:$28 sps:$4 sm:$0xff]   ;;  %v7415_v4 = vld [vmem:[#allocation13 + $0x270] ss:$28 sps:$4 sm:$0xff]  }
 0x384   :  { %2702 = vmatprep.subr.bf16.mxu0 %v6586_v5  ;;  %v7420_v5 = vld [vmem:[#allocation13 + $0x2a4] ss:$28 sps:$4 sm:$0xff]  }
 0x386   :  { %2621 = vmatpush1.bf16.msra.mxu1 %v6583_v10  ;;  %v7429_v10 = vld [vmem:[#allocation13 + $0x2e4] ss:$28 sps:$4 sm:$0xff]  }
 0x387   :  { %2703 = vmatpush1.bf16.msra.mxu0 %v6585_v11  ;;  %2622 = vmatprep.subr.bf16.mxu1 %v6592_v12  ;;  %v7424_v11 = vld [vmem:[#allocation13 + $0x2d8] ss:$28 sps:$4 sm:$0xff]   ;;  %v7427_v12 = vld [vmem:[#allocation13 + $0x2e0] ss:$28 sps:$4 sm:$0xff]  }
 0x388   :  { %2704 = vmatprep.subr.bf16.mxu0 %v6594_v13  ;;  %v7432_v13 = vld [vmem:[#allocation13 + $0x314] ss:$28 sps:$4 sm:$0xff]  }
 0x38a   :  { %2623 = vmatpush1.bf16.msra.mxu1 %v6591_v14  ;;  %v7435_v14 = vld [vmem:[#allocation13 + $0x31c] ss:$28 sps:$4 sm:$0xff]  }
 0x38b   :  { %2705 = vmatpush1.bf16.msra.mxu0 %v6593_v15  ;;  %5584 = vmatprep.subr.bf16.mxu1 %v7348_v16  ;;  %v7430_v15 = vld [vmem:[#allocation13 + $0x310] ss:$28 sps:$4 sm:$0xff]   ;;  %v7433_v16 = vld [vmem:[#allocation13 + $0x318] ss:$28 sps:$4 sm:$0xff]  }
 0x38c   :  { %5748 = vmatprep.subr.bf16.mxu0 %v7351_v17  ;;  %v7438_v17 = vld [vmem:[#allocation13 + $0x34c] ss:$28 sps:$4 sm:$0xff]  }
 0x38d   :  { %2625 = vmatmul.mubr.bf16.vlgmr.msra.gmra.mrb[8].mxu1 %v8459_v62 }
 0x38e   :  { %2707 = vmatmul.mubr.bf16.vlgmr.msra.gmra.mrb[16].mxu0 %v8459_v62  ;;  %5585 = vmatpush1.bf16.msra.mxu1 %v7346_v18  ;;  %v7367_v62 = vld [vmem:[#allocation13 + $0xb0] ss:$28 sps:$4 sm:$0xff]  }
 0x38f   :  { %5749 = vmatpush1.bf16.msra.mxu0 %v7349_v24  ;;  %5586 = vmatprep.subr.bf16.mxu1 %v7354_v38  ;;  %v7441_v18 = vld [vmem:[#allocation13 + $0x354] ss:$28 sps:$4 sm:$0xff]   ;;  %v7436_v24 = vld [vmem:[#allocation13 + $0x348] ss:$28 sps:$4 sm:$0xff]  }
 0x390   :  { %5750 = vmatprep.subr.bf16.mxu0 %v7357_v25  ;;  %v7439_v38 = vld [vmem:[#allocation13 + $0x350] ss:$28 sps:$4 sm:$0xff]   ;;  %v7444_v25 = vld [vmem:[#allocation13 + $0x384] ss:$28 sps:$4 sm:$0xff]  }
 0x392   :  { %5587 = vmatpush1.bf16.msra.mxu1 %v7352_v27  ;;  %v7447_v27 = vld [vmem:[#allocation13 + $0x38c] ss:$28 sps:$4 sm:$0xff]  }
 0x393   :  { %5751 = vmatpush1.bf16.msra.mxu0 %v7355_v28  ;;  %5588 = vmatprep.subr.bf16.mxu1 %v7360_v57  ;;  %v8473_v28 = vld [vmem:[#allocation11] sm:$0xff] }
 0x394   :  { %5752 = vmatprep.subr.bf16.mxu0 %v7363_v31  ;;  %v1070_v57 = vrot.slane %v8473_v28, %v8422_v20  ;;  %v1074_v31 = vrot.slane %v8473_v28, %v8427_v22 }
 0x396   :  { %5589 = vmatpush1.bf16.msra.mxu1 %v7358_v32  ;;  %v1082_v32 = vrot.slane %v8473_v28, %v8451_v26 }
 0x397   :  { %5753 = vmatpush1.bf16.msra.mxu0 %v7361_v33  ;;  %5590 = vmatprep.subr.bf16.mxu1 %v7366_v34 }
 0x398   :  { %5754 = vmatprep.subr.bf16.mxu0 %v7369_v35 }
 0x39a   :  { %5591 = vmatpush1.bf16.msra.mxu1 %v7364_v36 }
 0x39b   :  { %5755 = vmatpush1.bf16.msra.mxu0 %v7367_v62  ;;  %5592 = vmatprep.subr.bf16.mxu1 %v7372_v39 }
 0x39c   :  { %5756 = vmatprep.subr.bf16.mxu0 %v7375_v37 }
 0x39e   :  { %5593 = vmatpush1.bf16.msra.mxu1 %v7370_v29 }
 0x39f   :  { %5757 = vmatpush1.bf16.msra.mxu0 %v7373_v40  ;;  %5594 = vmatprep.subr.bf16.mxu1 %v7378_v30 }
 0x3a0   :  { %5758 = vmatprep.subr.bf16.mxu0 %v7381_v41 }
 0x3a2   :  { %5595 = vmatpush1.bf16.msra.mxu1 %v7376_v42 }
 0x3a3   :  { %5759 = vmatpush1.bf16.msra.mxu0 %v7379_v53  ;;  %5596 = vmatprep.subr.bf16.mxu1 %v7384_v43 }
 0x3a4   :  { %5760 = vmatprep.subr.bf16.mxu0 %v7387_v47 }
 0x3a6   :  { %5597 = vmatpush1.bf16.msra.mxu1 %v7382_v48  ;;  %v7442_v48 = vld [vmem:[#allocation13 + $0x380] ss:$28 sps:$4 sm:$0xff]  }
 0x3a7   :  { %5761 = vmatpush1.bf16.msra.mxu0 %v7385_v50  ;;  %5598 = vmatprep.subr.bf16.mxu1 %v7390_v51  ;;  %v7445_v50 = vld [vmem:[#allocation13 + $0x388] ss:$28 sps:$4 sm:$0xff]  }
 0x3a8   :  { %5762 = vmatprep.subr.bf16.mxu0 %v7393_v54  ;;  %v7450_v54 = vld [vmem:[#allocation13 + $0x3bc] ss:$28 sps:$4 sm:$0xff]  }
 0x3aa   :  { %5599 = vmatpush1.bf16.msra.mxu1 %v7388_v55  ;;  %v7453_v55 = vld [vmem:[#allocation13 + $0x3c4] ss:$28 sps:$4 sm:$0xff]  }
 0x3ab   :  { %5763 = vmatpush1.bf16.msra.mxu0 %v7391_v56  ;;  %5600 = vmatprep.subr.bf16.mxu1 %v7396_v21  ;;  %v7448_v21 = vld [vmem:[#allocation13 + $0x3b8] ss:$28 sps:$4 sm:$0xff]  }
 0x3ac   :  { %5764 = vmatprep.subr.bf16.mxu0 %v7399_v58  ;;  %v7451_v58 = vld [vmem:[#allocation13 + $0x3c0] ss:$28 sps:$4 sm:$0xff]  }
 0x3ae   :  { %5601 = vmatpush1.bf16.msra.mxu1 %v7394_v59  ;;  %v7456_v59 = vld [vmem:[#allocation13 + $0x3f4] ss:$28 sps:$4 sm:$0xff]  }
 0x3af   :  { %5765 = vmatpush1.bf16.msra.mxu0 %v7397_v60  ;;  %5602 = vmatprep.subr.bf16.mxu1 %v7402_v44  ;;  %v7459_v60 = vld [vmem:[#allocation13 + $0x3fc] ss:$28 sps:$4 sm:$0xff]   ;;  %v7454_v44 = vld [vmem:[#allocation13 + $0x3f0] ss:$28 sps:$4 sm:$0xff]  }
 0x3b0   :  { %5766 = vmatprep.subr.bf16.mxu0 %v7405_v45  ;;  %v7457_v45 = vld [vmem:[#allocation13 + $0x3f8] ss:$28 sps:$4 sm:$0xff]  }
 0x3b2   :  { %5603 = vmatpush1.bf16.msra.mxu1 %v7400_v46  ;;  %v7462_v46 = vld [vmem:[#allocation13 + $0x42c] ss:$28 sps:$4 sm:$0xff]  }
 0x3b3   :  { %5767 = vmatpush1.bf16.msra.mxu0 %v7403_v49  ;;  %5604 = vmatprep.subr.bf16.mxu1 %v7408_v52  ;;  %v7465_v49 = vld [vmem:[#allocation13 + $0x434] ss:$28 sps:$4 sm:$0xff]   ;;  %v7460_v52 = vld [vmem:[#allocation13 + $0x428] ss:$28 sps:$4 sm:$0xff]  }
 0x3b4   :  { %5768 = vmatprep.subr.bf16.mxu0 %v7411_v61  ;;  %v7463_v61 = vld [vmem:[#allocation13 + $0x430] ss:$28 sps:$4 sm:$0xff]  }
 0x3b6   :  { %5605 = vmatpush1.bf16.msra.mxu1 %v7406_v63  ;;  %v7468_v63 = vld [vmem:[#allocation13 + $0x464] ss:$28 sps:$4 sm:$0xff]  }
 0x3b7   :  { %5769 = vmatpush1.bf16.msra.mxu0 %v7409_v0  ;;  %5606 = vmatprep.subr.bf16.mxu1 %v7414_v1  ;;  %v7471_v0 = vld [vmem:[#allocation13 + $0x46c] ss:$28 sps:$4 sm:$0xff]   ;;  %v7466_v1 = vld [vmem:[#allocation13 + $0x460] ss:$28 sps:$4 sm:$0xff]  }
 0x3b8   :  { %5770 = vmatprep.subr.bf16.mxu0 %v7417_v2  ;;  %v7469_v2 = vld [vmem:[#allocation13 + $0x468] ss:$28 sps:$4 sm:$0xff]  }
 0x3ba   :  { %5607 = vmatpush1.bf16.msra.mxu1 %v7412_v3  ;;  %v7474_v3 = vld [vmem:[#allocation13 + $0x49c] ss:$28 sps:$4 sm:$0xff]  }
 0x3bb   :  { %5771 = vmatpush1.bf16.msra.mxu0 %v7415_v4  ;;  %5608 = vmatprep.subr.bf16.mxu1 %v7420_v5  ;;  %v7477_v4 = vld [vmem:[#allocation13 + $0x4a4] ss:$28 sps:$4 sm:$0xff]   ;;  %v7472_v5 = vld [vmem:[#allocation13 + $0x498] ss:$28 sps:$4 sm:$0xff]  }
 0x3bc   :  { %5772 = vmatprep.subr.bf16.mxu0 %v7423_v6  ;;  %v7475_v6 = vld [vmem:[#allocation13 + $0x4a0] ss:$28 sps:$4 sm:$0xff]  }
 0x3be   :  { %5609 = vmatpush1.bf16.msra.mxu1 %v7418_v7  ;;  %v7480_v7 = vld [vmem:[#allocation13 + $0x4d4] ss:$28 sps:$4 sm:$0xff]  }
 0x3bf   :  { %5773 = vmatpush1.bf16.msra.mxu0 %v7421_v8  ;;  %5610 = vmatprep.subr.bf16.mxu1 %v7426_v9  ;;  %v7483_v8 = vld [vmem:[#allocation13 + $0x4dc] ss:$28 sps:$4 sm:$0xff]   ;;  %v7478_v9 = vld [vmem:[#allocation13 + $0x4d0] ss:$28 sps:$4 sm:$0xff]  }
 0x3c0   :  { %5774 = vmatprep.subr.bf16.mxu0 %v7429_v10  ;;  %v7481_v10 = vld [vmem:[#allocation13 + $0x4d8] ss:$28 sps:$4 sm:$0xff]  }
 0x3c2   :  { %5611 = vmatpush1.bf16.msra.mxu1 %v7424_v11  ;;  %v7486_v11 = vld [vmem:[#allocation13 + $0x50c] ss:$28 sps:$4 sm:$0xff]  }
 0x3c3   :  { %5775 = vmatpush1.bf16.msra.mxu0 %v7427_v12  ;;  %5612 = vmatprep.subr.bf16.mxu1 %v7432_v13  ;;  %v7489_v12 = vld [vmem:[#allocation13 + $0x514] ss:$28 sps:$4 sm:$0xff]   ;;  %v7484_v13 = vld [vmem:[#allocation13 + $0x508] ss:$28 sps:$4 sm:$0xff]  }
 0x3c4   :  { %5776 = vmatprep.subr.bf16.mxu0 %v7435_v14  ;;  %v7487_v14 = vld [vmem:[#allocation13 + $0x510] ss:$28 sps:$4 sm:$0xff]  }
 0x3c6   :  { %5613 = vmatpush1.bf16.msra.mxu1 %v7430_v15  ;;  %v7492_v15 = vld [vmem:[#allocation13 + $0x544] ss:$28 sps:$4 sm:$0xff]  }
 0x3c7   :  { %5777 = vmatpush1.bf16.msra.mxu0 %v7433_v16  ;;  %5614 = vmatprep.subr.bf16.mxu1 %v7438_v17  ;;  %v7495_v16 = vld [vmem:[#allocation13 + $0x54c] ss:$28 sps:$4 sm:$0xff]   ;;  %v7490_v17 = vld [vmem:[#allocation13 + $0x540] ss:$28 sps:$4 sm:$0xff]  }
 0x3c8   :  { %5778 = vmatprep.subr.bf16.mxu0 %v7441_v18  ;;  %v7493_v18 = vld [vmem:[#allocation13 + $0x548] ss:$28 sps:$4 sm:$0xff]  }
 0x3ca   :  { %5615 = vmatpush1.bf16.msra.mxu1 %v7436_v24  ;;  %v7498_v24 = vld [vmem:[#allocation13 + $0x57c] ss:$28 sps:$4 sm:$0xff]  }
 0x3cb   :  { %5779 = vmatpush1.bf16.msra.mxu0 %v7439_v38  ;;  %5625 = vmatprep.subr.bf16.mxu1 %v7444_v25  ;;  %v7501_v38 = vld [vmem:[#allocation13 + $0x584] ss:$28 sps:$4 sm:$0xff]   ;;  %v7496_v25 = vld [vmem:[#allocation13 + $0x578] ss:$28 sps:$4 sm:$0xff]  }
 0x3cc   :  { %5789 = vmatprep.subr.bf16.mxu0 %v7447_v27  ;;  %v7499_v27 = vld [vmem:[#allocation13 + $0x580] ss:$28 sps:$4 sm:$0xff]  }
 0x3e0   :  { %v2462_v33 = vpop.f32.mrb[4].mxu1  ;;  %v8481_v34 = vpop.f32.mrb[12].mxu0 }
 0x3e1   :  { %v7163_v35 = vadd.f32 %v2462_v33, %v1070_v57  ;;  %v2464_v36 = vpop.f32.mrb[5].mxu1  ;;  %v2546_v62 = vpop.f32.mrb[13].mxu0  ;;  %v7504_v57 = vld [vmem:[#allocation13 + $0x5b4] ss:$28 sps:$4 sm:$0xff]  }
 0x3e2   :  { %v7164_v39 = vadd.f32 %v2464_v36, %v1074_v31  ;;  %v7166_v37 = vadd.f32 %v2546_v62, %v1082_v32  ;;  %v2466_v29 = vpop.f32.mrb[6].mxu1  ;;  %v2548_v40 = vpop.f32.mrb[14].mxu0  ;;  %v7507_v31 = vld [vmem:[#allocation13 + $0x5bc] ss:$28 sps:$4 sm:$0xff]   ;;  %v7502_v32 = vld [vmem:[#allocation13 + $0x5b0] ss:$28 sps:$4 sm:$0xff]  }
 0x3e3   :  { %v2715_v30 = vmax.f32 %v7163_v35, 0.0  ;;  %v2467_v41 = vpop.f32.mrb[7].mxu1  ;;  %v2549_v42 = vpop.f32.mrb[15].mxu0  ;;  %v7505_v33 = vld [vmem:[#allocation13 + $0x5b8] ss:$28 sps:$4 sm:$0xff]  }
 0x3e4   :  { %v2716_v53 = vmax.f32 %v7164_v39, 0.0  ;;  %v2718_v43 = vmax.f32 %v7166_v37, 0.0  ;;  %v7510_v35 = vld [vmem:[#allocation13 + $0x5ec] ss:$28 sps:$4 sm:$0xff]   ;;  %v7513_v36 = vld [vmem:[#allocation13 + $0x5f4] ss:$28 sps:$4 sm:$0xff]  }
 0x3e5   :  { %v8485_v51 = vpack.c.bf16 %v2715_v30, %v2715_v30  ;;  %v7508_v62 = vld [vmem:[#allocation13 + $0x5e8] ss:$28 sps:$4 sm:$0xff]   ;;  %v7511_v39 = vld [vmem:[#allocation13 + $0x5f0] ss:$28 sps:$4 sm:$0xff]   ;;  %v7514_v40 = vld [vmem:[#allocation13 + $0x620] ss:$28 sps:$4 sm:$0xff]  }
 0x3e6   :  { %v8483_v47 = vpack.c.bf16 %v2716_v53, %v2716_v53  ;;  %v8489_v56 = vpack.c.bf16 %v2718_v43, %v2718_v43  ;;  %v7516_v37 = vld [vmem:[#allocation13 + $0x624] ss:$28 sps:$4 sm:$0xff]   ;;  %v7519_v29 = vld [vmem:[#allocation13 + $0x62c] ss:$28 sps:$4 sm:$0xff]   ;;  %v7522_v41 = vld [vmem:[#allocation13 + $0x65c] ss:$28 sps:$4 sm:$0xff]  }
 0x3e7   :  { %v7517_v30 = vld [vmem:[#allocation13 + $0x628] ss:$28 sps:$4 sm:$0xff]   ;;  %v7520_v53 = vld [vmem:[#allocation13 + $0x658] ss:$28 sps:$4 sm:$0xff]   ;;  %v7523_v43 = vld [vmem:[#allocation13 + $0x660] ss:$28 sps:$4 sm:$0xff]  }
 0x3e8   :  { %5616 = vmatprep.mubr.bf16.mxu1 %v8483_v47  ;;  %5780 = vmatprep.mubr.bf16.mxu0 %v8483_v47  ;;  %v7525_v42 = vld [vmem:[#allocation13 + $0x664] ss:$28 sps:$4 sm:$0xff]  }
 0x3e9   :  { %5617 = vmatmul.mubr.bf16.vlgmr.msra.gmra.mrb[12].mxu1 %v8485_v51  ;;  %5781 = vmatmul.mubr.bf16.vlgmr.msra.gmra.mrb[20].mxu0 %v8485_v51 }
 0x3ea   :  { %5626 = vmatpush1.bf16.msra.mxu1 %v7442_v48  ;;  %5790 = vmatpush1.bf16.msra.mxu0 %v7445_v50  ;;  %v1078_v48 = vrot.slane %v8473_v28, %v8448_v23  ;;  %v7528_v50 = vld [vmem:[#allocation13 + $0x694] ss:$28 sps:$4 sm:$0xff]  }
 0x3eb   :  { %5657 = vmatprep.mubr.bf16.mxu1 %v8489_v56  ;;  %5821 = vmatprep.mubr.bf16.mxu0 %v8489_v56 }
 0x3ec   :  { %5627 = vmatprep.subr.bf16.mxu1 %v7450_v54  ;;  %5791 = vmatprep.subr.bf16.mxu0 %v7453_v55  ;;  %v7531_v54 = vld [vmem:[#allocation13 + $0x69c] ss:$28 sps:$4 sm:$0xff]   ;;  %v7526_v55 = vld [vmem:[#allocation13 + $0x690] ss:$28 sps:$4 sm:$0xff]  }
 0x3ee   :  { %5628 = vmatpush1.bf16.msra.mxu1 %v7448_v21  ;;  %5792 = vmatpush1.bf16.msra.mxu0 %v7451_v58  ;;  %v7529_v21 = vld [vmem:[#allocation13 + $0x698] ss:$28 sps:$4 sm:$0xff]   ;;  %v7165_v58 = vadd.f32 %v8481_v34, %v1078_v48 }
 0x3ef   :  { %5629 = vmatprep.subr.bf16.mxu1 %v7456_v59  ;;  %5793 = vmatprep.subr.bf16.mxu0 %v7459_v60  ;;  %v7534_v59 = vld [vmem:[#allocation13 + $0x6cc] ss:$28 sps:$4 sm:$0xff]   ;;  %v7537_v60 = vld [vmem:[#allocation13 + $0x6d4] ss:$28 sps:$4 sm:$0xff]   ;;  %v7546_v34 = vld [vmem:[#allocation13 + $0x73c] ss:$28 sps:$4 sm:$0xff]  }
 0x3f0   :  { %v7601_v48 = vld [vmem:[#allocation13 + $0x938] ss:$28 sps:$4 sm:$0xff]  }
 0x3f2   :  { %5630 = vmatpush1.bf16.msra.mxu1 %v7454_v44  ;;  %5794 = vmatpush1.bf16.msra.mxu0 %v7457_v45  ;;  %v7532_v44 = vld [vmem:[#allocation13 + $0x6c8] ss:$28 sps:$4 sm:$0xff]   ;;  %v7535_v45 = vld [vmem:[#allocation13 + $0x6d0] ss:$28 sps:$4 sm:$0xff]  }
 0x3f3   :  { %5631 = vmatprep.subr.bf16.mxu1 %v7462_v46  ;;  %5795 = vmatprep.subr.bf16.mxu0 %v7465_v49  ;;  %v2717_v46 = vmax.f32 %v7165_v58, 0.0  ;;  %v7540_v49 = vld [vmem:[#allocation13 + $0x704] ss:$28 sps:$4 sm:$0xff]  }
 0x3f4   :  { %v7612_v58 = vld [vmem:[#allocation13 + $0x9a4] ss:$28 sps:$4 sm:$0xff]  }
 0x3f6   :  { %5632 = vmatpush1.bf16.msra.mxu1 %v7460_v52  ;;  %5796 = vmatpush1.bf16.msra.mxu0 %v7463_v61  ;;  %v7543_v52 = vld [vmem:[#allocation13 + $0x70c] ss:$28 sps:$4 sm:$0xff]   ;;  %v7538_v61 = vld [vmem:[#allocation13 + $0x700] ss:$28 sps:$4 sm:$0xff]  }
 0x3f7   :  { %5633 = vmatprep.subr.bf16.mxu1 %v7468_v63  ;;  %5797 = vmatprep.subr.bf16.mxu0 %v7471_v0  ;;  %v7541_v63 = vld [vmem:[#allocation13 + $0x708] ss:$28 sps:$4 sm:$0xff]   ;;  %v8498_v0 = vpack.c.bf16 %v2717_v46, %v2717_v46 }
 0x3f8   :  { %v7621_v46 = vld [vmem:[#allocation13 + $0x9e4] ss:$28 sps:$4 sm:$0xff]  }
 0x3fa   :  { %5634 = vmatpush1.bf16.msra.mxu1 %v7466_v1  ;;  %5798 = vmatpush1.bf16.msra.mxu0 %v7469_v2  ;;  %v7549_v1 = vld [vmem:[#allocation13 + $0x744] ss:$28 sps:$4 sm:$0xff]   ;;  %v7544_v2 = vld [vmem:[#allocation13 + $0x738] ss:$28 sps:$4 sm:$0xff]  }
 0x3fb   :  { %5635 = vmatprep.subr.bf16.mxu1 %v7474_v3  ;;  %5799 = vmatprep.subr.bf16.mxu0 %v7477_v4  ;;  %v7547_v3 = vld [vmem:[#allocation13 + $0x740] ss:$28 sps:$4 sm:$0xff]   ;;  %v7552_v4 = vld [vmem:[#allocation13 + $0x774] ss:$28 sps:$4 sm:$0xff]  }
 0x3fe   :  { %5636 = vmatpush1.bf16.msra.mxu1 %v7472_v5  ;;  %5800 = vmatpush1.bf16.msra.mxu0 %v7475_v6  ;;  %v7555_v5 = vld [vmem:[#allocation13 + $0x77c] ss:$28 sps:$4 sm:$0xff]   ;;  %v7550_v6 = vld [vmem:[#allocation13 + $0x770] ss:$28 sps:$4 sm:$0xff]  }
 0x3ff   :  { %5637 = vmatprep.subr.bf16.mxu1 %v7480_v7  ;;  %5801 = vmatprep.subr.bf16.mxu0 %v7483_v8  ;;  %v7553_v7 = vld [vmem:[#allocation13 + $0x778] ss:$28 sps:$4 sm:$0xff]   ;;  %v7558_v8 = vld [vmem:[#allocation13 + $0x7ac] ss:$28 sps:$4 sm:$0xff]  }
 0x402   :  { %5638 = vmatpush1.bf16.msra.mxu1 %v7478_v9  ;;  %5802 = vmatpush1.bf16.msra.mxu0 %v7481_v10  ;;  %v7561_v9 = vld [vmem:[#allocation13 + $0x7b4] ss:$28 sps:$4 sm:$0xff]   ;;  %v7556_v10 = vld [vmem:[#allocation13 + $0x7a8] ss:$28 sps:$4 sm:$0xff]  }
 0x403   :  { %5639 = vmatprep.subr.bf16.mxu1 %v7486_v11  ;;  %5803 = vmatprep.subr.bf16.mxu0 %v7489_v12  ;;  %v7559_v11 = vld [vmem:[#allocation13 + $0x7b0] ss:$28 sps:$4 sm:$0xff]   ;;  %v7564_v12 = vld [vmem:[#allocation13 + $0x7e4] ss:$28 sps:$4 sm:$0xff]  }
 0x406   :  { %5640 = vmatpush1.bf16.msra.mxu1 %v7484_v13  ;;  %5804 = vmatpush1.bf16.msra.mxu0 %v7487_v14  ;;  %v7567_v13 = vld [vmem:[#allocation13 + $0x7ec] ss:$28 sps:$4 sm:$0xff]   ;;  %v7562_v14 = vld [vmem:[#allocation13 + $0x7e0] ss:$28 sps:$4 sm:$0xff]  }
 0x407   :  { %5641 = vmatprep.subr.bf16.mxu1 %v7492_v15  ;;  %5805 = vmatprep.subr.bf16.mxu0 %v7495_v16  ;;  %v7565_v15 = vld [vmem:[#allocation13 + $0x7e8] ss:$28 sps:$4 sm:$0xff]   ;;  %v7570_v16 = vld [vmem:[#allocation13 + $0x81c] ss:$28 sps:$4 sm:$0xff]  }
 0x40a   :  { %5642 = vmatpush1.bf16.msra.mxu1 %v7490_v17  ;;  %5806 = vmatpush1.bf16.msra.mxu0 %v7493_v18  ;;  %v7573_v17 = vld [vmem:[#allocation13 + $0x824] ss:$28 sps:$4 sm:$0xff]   ;;  %v7568_v18 = vld [vmem:[#allocation13 + $0x818] ss:$28 sps:$4 sm:$0xff]  }
 0x40b   :  { %5643 = vmatprep.subr.bf16.mxu1 %v7498_v24  ;;  %5807 = vmatprep.subr.bf16.mxu0 %v7501_v38  ;;  %v7571_v24 = vld [vmem:[#allocation13 + $0x820] ss:$28 sps:$4 sm:$0xff]   ;;  %v7576_v38 = vld [vmem:[#allocation13 + $0x854] ss:$28 sps:$4 sm:$0xff]  }
 0x40e   :  { %5644 = vmatpush1.bf16.msra.mxu1 %v7496_v25  ;;  %5808 = vmatpush1.bf16.msra.mxu0 %v7499_v27  ;;  %v7579_v25 = vld [vmem:[#allocation13 + $0x85c] ss:$28 sps:$4 sm:$0xff]   ;;  %v7574_v27 = vld [vmem:[#allocation13 + $0x850] ss:$28 sps:$4 sm:$0xff]  }
 0x40f   :  { %5645 = vmatprep.subr.bf16.mxu1 %v7504_v57  ;;  %5809 = vmatprep.subr.bf16.mxu0 %v7507_v31  ;;  %v7577_v57 = vld [vmem:[#allocation13 + $0x858] ss:$28 sps:$4 sm:$0xff]   ;;  %v7582_v31 = vld [vmem:[#allocation13 + $0x88c] ss:$28 sps:$4 sm:$0xff]  }
 0x412   :  { %5646 = vmatpush1.bf16.msra.mxu1 %v7502_v32  ;;  %5810 = vmatpush1.bf16.msra.mxu0 %v7505_v33  ;;  %v7585_v32 = vld [vmem:[#allocation13 + $0x894] ss:$28 sps:$4 sm:$0xff]   ;;  %v7580_v33 = vld [vmem:[#allocation13 + $0x888] ss:$28 sps:$4 sm:$0xff]  }
 0x413   :  { %5647 = vmatprep.subr.bf16.mxu1 %v7510_v35  ;;  %5811 = vmatprep.subr.bf16.mxu0 %v7513_v36  ;;  %v7583_v35 = vld [vmem:[#allocation13 + $0x890] ss:$28 sps:$4 sm:$0xff]   ;;  %v7588_v36 = vld [vmem:[#allocation13 + $0x8c4] ss:$28 sps:$4 sm:$0xff]  }
 0x416   :  { %5648 = vmatpush1.bf16.msra.mxu1 %v7508_v62  ;;  %5812 = vmatpush1.bf16.msra.mxu0 %v7511_v39  ;;  %v7591_v62 = vld [vmem:[#allocation13 + $0x8cc] ss:$28 sps:$4 sm:$0xff]   ;;  %v7586_v39 = vld [vmem:[#allocation13 + $0x8c0] ss:$28 sps:$4 sm:$0xff]  }
 0x417   :  { %5649 = vmatprep.subr.bf16.mxu1 %v7516_v37  ;;  %5813 = vmatprep.subr.bf16.mxu0 %v7519_v29  ;;  %v7589_v37 = vld [vmem:[#allocation13 + $0x8c8] ss:$28 sps:$4 sm:$0xff]   ;;  %v7594_v29 = vld [vmem:[#allocation13 + $0x8fc] ss:$28 sps:$4 sm:$0xff]  }
 0x41a   :  { %5650 = vmatpush1.bf16.msra.mxu1 %v7514_v40  ;;  %5814 = vmatpush1.bf16.msra.mxu0 %v7517_v30  ;;  %v7597_v40 = vld [vmem:[#allocation13 + $0x904] ss:$28 sps:$4 sm:$0xff]   ;;  %v7592_v30 = vld [vmem:[#allocation13 + $0x8f8] ss:$28 sps:$4 sm:$0xff]  }
 0x41b   :  { %5651 = vmatprep.subr.bf16.mxu1 %v7522_v41  ;;  %5815 = vmatprep.subr.bf16.mxu0 %v7525_v42  ;;  %v7595_v41 = vld [vmem:[#allocation13 + $0x900] ss:$28 sps:$4 sm:$0xff]   ;;  %v7600_v42 = vld [vmem:[#allocation13 + $0x934] ss:$28 sps:$4 sm:$0xff]  }
 0x41e   :  { %5652 = vmatpush1.bf16.msra.mxu1 %v7520_v53  ;;  %5816 = vmatpush1.bf16.msra.mxu0 %v7523_v43  ;;  %v7603_v53 = vld [vmem:[#allocation13 + $0x93c] ss:$28 sps:$4 sm:$0xff]   ;;  %v7598_v43 = vld [vmem:[#allocation13 + $0x930] ss:$28 sps:$4 sm:$0xff]  }
 0x41f   :  { %5653 = vmatprep.subr.bf16.mxu1 %v7528_v50  ;;  %5817 = vmatprep.subr.bf16.mxu0 %v7531_v54  ;;  %v7606_v50 = vld [vmem:[#allocation13 + $0x96c] ss:$28 sps:$4 sm:$0xff]   ;;  %v7609_v54 = vld [vmem:[#allocation13 + $0x974] ss:$28 sps:$4 sm:$0xff]  }
 0x422   :  { %5654 = vmatpush1.bf16.msra.mxu1 %v7526_v55  ;;  %5818 = vmatpush1.bf16.msra.mxu0 %v7529_v21  ;;  %v7604_v55 = vld [vmem:[#allocation13 + $0x968] ss:$28 sps:$4 sm:$0xff]   ;;  %v7607_v21 = vld [vmem:[#allocation13 + $0x970] ss:$28 sps:$4 sm:$0xff]  }
 0x423   :  { %5655 = vmatprep.subr.bf16.mxu1 %v7534_v59  ;;  %5819 = vmatprep.subr.bf16.mxu0 %v7537_v60  ;;  %v7615_v59 = vld [vmem:[#allocation13 + $0x9ac] ss:$28 sps:$4 sm:$0xff]   ;;  %v7610_v60 = vld [vmem:[#allocation13 + $0x9a0] ss:$28 sps:$4 sm:$0xff]  }
 0x426   :  { %5656 = vmatpush1.bf16.msra.mxu1 %v7532_v44  ;;  %5820 = vmatpush1.bf16.msra.mxu0 %v7535_v45  ;;  %v7613_v44 = vld [vmem:[#allocation13 + $0x9a8] ss:$28 sps:$4 sm:$0xff]   ;;  %v7618_v45 = vld [vmem:[#allocation13 + $0x9dc] ss:$28 sps:$4 sm:$0xff]  }
 0x427   :  { %5666 = vmatprep.subr.bf16.mxu1 %v7540_v49  ;;  %5830 = vmatprep.subr.bf16.mxu0 %v7543_v52  ;;  %v1085_v49 = vsub.s32 4, %v8419_v19  ;;  %v7616_v52 = vld [vmem:[#allocation13 + $0x9d8] ss:$28 sps:$4 sm:$0xff]  }
 0x429   :  { %5658 = vmatmul.mubr.bf16.vlgmr.msra.gmra.mrb[12].mxu1 %v8498_v0  ;;  %5822 = vmatmul.mubr.bf16.vlgmr.msra.gmra.mrb[20].mxu0 %v8498_v0 }
 0x42a   :  { %5667 = vmatpush1.bf16.msra.mxu1 %v7538_v61  ;;  %5831 = vmatpush1.bf16.msra.mxu0 %v7541_v63  ;;  %v7619_v61 = vld [vmem:[#allocation13 + $0x9e0] ss:$28 sps:$4 sm:$0xff]   ;;  %v1089_v63 = vsub.s32 5, %v8419_v19 }
 0x42b   :  { %5668 = vmatprep.subr.bf16.mxu1 %v7546_v34  ;;  %5832 = vmatprep.subr.bf16.mxu0 %v7549_v1  ;;  %v7624_v34 = vld [vmem:[#allocation13 + $0xa14] ss:$28 sps:$4 sm:$0xff]   ;;  %v7627_v1 = vld [vmem:[#allocation13 + $0xa1c] ss:$28 sps:$4 sm:$0xff]  }
 0x42e   :  { %5669 = vmatpush1.bf16.msra.mxu1 %v7544_v2  ;;  %5833 = vmatpush1.bf16.msra.mxu0 %v7547_v3  ;;  %v1097_v2 = vsub.s32 7, %v8419_v19  ;;  %v1086_v3 = vrot.slane %v8473_v28, %v1085_v49 }
 0x42f   :  { %5670 = vmatprep.subr.bf16.mxu1 %v7552_v4  ;;  %5834 = vmatprep.subr.bf16.mxu0 %v7555_v5  ;;  %v7622_v4 = vld [vmem:[#allocation13 + $0xa10] ss:$28 sps:$4 sm:$0xff]   ;;  %v7625_v5 = vld [vmem:[#allocation13 + $0xa18] ss:$28 sps:$4 sm:$0xff]  }
 0x432   :  { %5671 = vmatpush1.bf16.msra.mxu1 %v7550_v6  ;;  %5835 = vmatpush1.bf16.msra.mxu0 %v7553_v7  ;;  %v1090_v6 = vrot.slane %v8473_v28, %v1089_v63  ;;  %v1098_v7 = vrot.slane %v8473_v28, %v1097_v2  ;;  %v7675_v2 = vld [vmem:[#allocation13 + $0xbdc] ss:$28 sps:$4 sm:$0xff]  }
 0x433   :  { %5672 = vmatprep.subr.bf16.mxu1 %v7558_v8  ;;  %5836 = vmatprep.subr.bf16.mxu0 %v7561_v9  ;;  %v7630_v8 = vld [vmem:[#allocation13 + $0xa4c] ss:$28 sps:$4 sm:$0xff]   ;;  %v7633_v9 = vld [vmem:[#allocation13 + $0xa54] ss:$28 sps:$4 sm:$0xff]  }
 0x436   :  { %5673 = vmatpush1.bf16.msra.mxu1 %v7556_v10  ;;  %5837 = vmatpush1.bf16.msra.mxu0 %v7559_v11 }
 0x437   :  { %5674 = vmatprep.subr.bf16.mxu1 %v7564_v12  ;;  %5838 = vmatprep.subr.bf16.mxu0 %v7567_v13 }
 0x43a   :  { %5675 = vmatpush1.bf16.msra.mxu1 %v7562_v14  ;;  %5839 = vmatpush1.bf16.msra.mxu0 %v7565_v15  ;;  %v7628_v14 = vld [vmem:[#allocation13 + $0xa48] ss:$28 sps:$4 sm:$0xff]  }
 0x43b   :  { %5676 = vmatprep.subr.bf16.mxu1 %v7570_v16  ;;  %5840 = vmatprep.subr.bf16.mxu0 %v7573_v17 }
 0x43e   :  { %5677 = vmatpush1.bf16.msra.mxu1 %v7568_v18  ;;  %5841 = vmatpush1.bf16.msra.mxu0 %v7571_v24  ;;  %v7631_v18 = vld [vmem:[#allocation13 + $0xa50] ss:$28 sps:$4 sm:$0xff]   ;;  %v7636_v24 = vld [vmem:[#allocation13 + $0xa84] ss:$28 sps:$4 sm:$0xff]  }
 0x43f   :  { %5678 = vmatprep.subr.bf16.mxu1 %v7576_v38  ;;  %5842 = vmatprep.subr.bf16.mxu0 %v7579_v25 }
 0x442   :  { %5679 = vmatpush1.bf16.msra.mxu1 %v7574_v27  ;;  %5843 = vmatpush1.bf16.msra.mxu0 %v7577_v57 }
 0x443   :  { %5680 = vmatprep.subr.bf16.mxu1 %v7582_v31  ;;  %5844 = vmatprep.subr.bf16.mxu0 %v7585_v32  ;;  %v7639_v31 = vld [vmem:[#allocation13 + $0xa8c] ss:$28 sps:$4 sm:$0xff]  }
 0x446   :  { %5681 = vmatpush1.bf16.msra.mxu1 %v7580_v33  ;;  %5845 = vmatpush1.bf16.msra.mxu0 %v7583_v35 }
 0x447   :  { %5682 = vmatprep.subr.bf16.mxu1 %v7588_v36  ;;  %5846 = vmatprep.subr.bf16.mxu0 %v7591_v62  ;;  %v7634_v62 = vld [vmem:[#allocation13 + $0xa80] ss:$28 sps:$4 sm:$0xff]  }
 0x44a   :  { %5683 = vmatpush1.bf16.msra.mxu1 %v7586_v39  ;;  %5847 = vmatpush1.bf16.msra.mxu0 %v7589_v37  ;;  %v7637_v39 = vld [vmem:[#allocation13 + $0xa88] ss:$28 sps:$4 sm:$0xff]  }
 0x44b   :  { %5684 = vmatprep.subr.bf16.mxu1 %v7594_v29  ;;  %5848 = vmatprep.subr.bf16.mxu0 %v7597_v40  ;;  %v7642_v29 = vld [vmem:[#allocation13 + $0xabc] ss:$28 sps:$4 sm:$0xff]   ;;  %v7645_v40 = vld [vmem:[#allocation13 + $0xac4] ss:$28 sps:$4 sm:$0xff]  }
 0x44e   :  { %5685 = vmatpush1.bf16.msra.mxu1 %v7592_v30  ;;  %5849 = vmatpush1.bf16.msra.mxu0 %v7595_v41  ;;  %v7640_v41 = vld [vmem:[#allocation13 + $0xab8] ss:$28 sps:$4 sm:$0xff]  }
 0x44f   :  { %5686 = vmatprep.subr.bf16.mxu1 %v7600_v42  ;;  %5850 = vmatprep.subr.bf16.mxu0 %v7603_v53  ;;  %v7643_v42 = vld [vmem:[#allocation13 + $0xac0] ss:$28 sps:$4 sm:$0xff]   ;;  %v7648_v53 = vld [vmem:[#allocation13 + $0xaf4] ss:$28 sps:$4 sm:$0xff]  }
 0x452   :  { %5687 = vmatpush1.bf16.msra.mxu1 %v7598_v43  ;;  %5851 = vmatpush1.bf16.msra.mxu0 %v7601_v48  ;;  %v7651_v43 = vld [vmem:[#allocation13 + $0xafc] ss:$28 sps:$4 sm:$0xff]   ;;  %v7646_v48 = vld [vmem:[#allocation13 + $0xaf0] ss:$28 sps:$4 sm:$0xff]  }
 0x453   :  { %5688 = vmatprep.subr.bf16.mxu1 %v7606_v50  ;;  %5852 = vmatprep.subr.bf16.mxu0 %v7609_v54  ;;  %v7649_v50 = vld [vmem:[#allocation13 + $0xaf8] ss:$28 sps:$4 sm:$0xff]   ;;  %v7654_v54 = vld [vmem:[#allocation13 + $0xb2c] ss:$28 sps:$4 sm:$0xff]  }
 0x456   :  { %5689 = vmatpush1.bf16.msra.mxu1 %v7604_v55  ;;  %5853 = vmatpush1.bf16.msra.mxu0 %v7607_v21  ;;  %v7657_v55 = vld [vmem:[#allocation13 + $0xb34] ss:$28 sps:$4 sm:$0xff]   ;;  %v7652_v21 = vld [vmem:[#allocation13 + $0xb28] ss:$28 sps:$4 sm:$0xff]  }
 0x457   :  { %5690 = vmatprep.subr.bf16.mxu1 %v7612_v58  ;;  %5854 = vmatprep.subr.bf16.mxu0 %v7615_v59  ;;  %v7655_v58 = vld [vmem:[#allocation13 + $0xb30] ss:$28 sps:$4 sm:$0xff]   ;;  %v7660_v59 = vld [vmem:[#allocation13 + $0xb64] ss:$28 sps:$4 sm:$0xff]  }
 0x45a   :  { %5691 = vmatpush1.bf16.msra.mxu1 %v7610_v60  ;;  %5855 = vmatpush1.bf16.msra.mxu0 %v7613_v44  ;;  %v7663_v60 = vld [vmem:[#allocation13 + $0xb6c] ss:$28 sps:$4 sm:$0xff]   ;;  %v7658_v44 = vld [vmem:[#allocation13 + $0xb60] ss:$28 sps:$4 sm:$0xff]  }
 0x45b   :  { %5692 = vmatprep.subr.bf16.mxu1 %v7618_v45  ;;  %5856 = vmatprep.subr.bf16.mxu0 %v7621_v46  ;;  %v7661_v45 = vld [vmem:[#allocation13 + $0xb68] ss:$28 sps:$4 sm:$0xff]   ;;  %v7666_v46 = vld [vmem:[#allocation13 + $0xb9c] ss:$28 sps:$4 sm:$0xff]  }
 0x45e   :  { %5693 = vmatpush1.bf16.msra.mxu1 %v7616_v52  ;;  %5857 = vmatpush1.bf16.msra.mxu0 %v7619_v61  ;;  %v7669_v52 = vld [vmem:[#allocation13 + $0xba4] ss:$28 sps:$4 sm:$0xff]   ;;  %v7664_v61 = vld [vmem:[#allocation13 + $0xb98] ss:$28 sps:$4 sm:$0xff]  }
 0x45f   :  { %5694 = vmatprep.subr.bf16.mxu1 %v7624_v34  ;;  %5858 = vmatprep.subr.bf16.mxu0 %v7627_v1  ;;  %v7667_v34 = vld [vmem:[#allocation13 + $0xba0] ss:$28 sps:$4 sm:$0xff]   ;;  %v7672_v1 = vld [vmem:[#allocation13 + $0xbd4] ss:$28 sps:$4 sm:$0xff]  }
 0x460   :  { %v2626_v10 = vpop.f32.mrb[8].mxu1 }
 0x461   :  { %v7167_v11 = vadd.f32 %v2626_v10, %v1086_v3  ;;  %v8512_v12 = vpop.f32.mrb[16].mxu0  ;;  %v2628_v13 = vpop.f32.mrb[9].mxu1  ;;  %v7670_v3 = vld [vmem:[#allocation13 + $0xbd0] ss:$28 sps:$4 sm:$0xff]  }
 0x462   :  { %v7168_v15 = vadd.f32 %v2628_v13, %v1090_v6  ;;  %v2710_v16 = vpop.f32.mrb[17].mxu0  ;;  %5695 = vmatpush1.bf16.msra.mxu1 %v7622_v4  ;;  %5859 = vmatpush1.bf16.msra.mxu0 %v7625_v5  ;;  %v2630_v17 = vpop.f32.mrb[10].mxu1  ;;  %v7673_v4 = vld [vmem:[#allocation13 + $0xbd8] ss:$28 sps:$4 sm:$0xff]   ;;  %v7678_v5 = vld [vmem:[#allocation13 + $0xc0c] ss:$28 sps:$4 sm:$0xff]  }
 0x463   :  { %v2719_v38 = vmax.f32 %v7167_v11, 0.0  ;;  %v7170_v25 = vadd.f32 %v2710_v16, %v1098_v7  ;;  %v2712_v27 = vpop.f32.mrb[18].mxu0  ;;  %v2631_v57 = vpop.f32.mrb[11].mxu1  ;;  %5696 = vmatprep.subr.bf16.mxu1 %v7630_v8  ;;  %5860 = vmatprep.subr.bf16.mxu0 %v7633_v9  ;;  %v7681_v6 = vld [vmem:[#allocation13 + $0xc14] ss:$28 sps:$4 sm:$0xff]  }
 0x464   :  { %v2720_v32 = vmax.f32 %v7168_v15, 0.0  ;;  %v2713_v33 = vpop.f32.mrb[19].mxu0  ;;  %v7676_v7 = vld [vmem:[#allocation13 + $0xc08] ss:$28 sps:$4 sm:$0xff]   ;;  %v7679_v8 = vld [vmem:[#allocation13 + $0xc10] ss:$28 sps:$4 sm:$0xff]  }
 0x465   :  { %v2722_v35 = vmax.f32 %v7170_v25, 0.0  ;;  %v8516_v37 = vpack.c.bf16 %v2719_v38, %v2719_v38  ;;  %v7684_v9 = vld [vmem:[#allocation13 + $0xc44] ss:$28 sps:$4 sm:$0xff]   ;;  %v7687_v10 = vld [vmem:[#allocation13 + $0xc4c] ss:$28 sps:$4 sm:$0xff]  }
 0x466   :  { %v8514_v36 = vpack.c.bf16 %v2720_v32, %v2720_v32  ;;  %5697 = vmatpush1.bf16.msra.mxu1 %v7628_v14  ;;  %5861 = vmatpush1.bf16.msra.mxu0 %v7631_v18  ;;  %v7682_v11 = vld [vmem:[#allocation13 + $0xc40] ss:$28 sps:$4 sm:$0xff]   ;;  %v7685_v13 = vld [vmem:[#allocation13 + $0xc48] ss:$28 sps:$4 sm:$0xff]   ;;  %v7688_v16 = vld [vmem:[#allocation13 + $0xc78] ss:$28 sps:$4 sm:$0xff]  }
 0x467   :  { %5707 = vmatprep.subr.bf16.mxu1 %v7636_v24  ;;  %5871 = vmatprep.subr.bf16.mxu0 %v7639_v31  ;;  %v8520_v30 = vpack.c.bf16 %v2722_v35, %v2722_v35  ;;  %v7690_v14 = vld [vmem:[#allocation13 + $0xc7c] ss:$28 sps:$4 sm:$0xff]   ;;  %v7693_v15 = vld [vmem:[#allocation13 + $0xc84] ss:$28 sps:$4 sm:$0xff]   ;;  %v7696_v18 = vld [vmem:[#allocation13 + $0xcb4] ss:$28 sps:$4 sm:$0xff]  }
 0x468   :  { %5698 = vmatprep.mubr.bf16.mxu1 %v8514_v36  ;;  %5862 = vmatprep.mubr.bf16.mxu0 %v8514_v36  ;;  %v7691_v17 = vld [vmem:[#allocation13 + $0xc80] ss:$28 sps:$4 sm:$0xff]   ;;  %v7694_v38 = vld [vmem:[#allocation13 + $0xcb0] ss:$28 sps:$4 sm:$0xff]   ;;  %v7697_v25 = vld [vmem:[#allocation13 + $0xcb8] ss:$28 sps:$4 sm:$0xff]  }
 0x469   :  { %5699 = vmatmul.mubr.bf16.vlgmr.msra.gmra.mrb[12].mxu1 %v8516_v37  ;;  %5863 = vmatmul.mubr.bf16.vlgmr.msra.gmra.mrb[20].mxu0 %v8516_v37  ;;  %v7699_v24 = vld [vmem:[#allocation13 + $0xcbc] ss:$28 sps:$4 sm:$0xff]   ;;  %v7702_v27 = vld [vmem:[#allocation13 + $0xcec] ss:$28 sps:$4 sm:$0xff]   ;;  %v7705_v57 = vld [vmem:[#allocation13 + $0xcf4] ss:$28 sps:$4 sm:$0xff]  }
 0x46a   :  { %5708 = vmatpush1.bf16.msra.mxu1 %v7634_v62  ;;  %5872 = vmatpush1.bf16.msra.mxu0 %v7637_v39  ;;  %v7700_v31 = vld [vmem:[#allocation13 + $0xce8] ss:$28 sps:$4 sm:$0xff]   ;;  %v7703_v32 = vld [vmem:[#allocation13 + $0xcf0] ss:$28 sps:$4 sm:$0xff]   ;;  %v7706_v62 = vld [vmem:[#allocation13 + $0xd20] ss:$28 sps:$4 sm:$0xff]  }
 0x46b   :  { %5739 = vmatprep.mubr.bf16.mxu1 %v8520_v30  ;;  %5903 = vmatprep.mubr.bf16.mxu0 %v8520_v30  ;;  %v7708_v33 = vld [vmem:[#allocation13 + $0xd24] ss:$28 sps:$4 sm:$0xff]   ;;  %v7711_v35 = vld [vmem:[#allocation13 + $0xd2c] ss:$28 sps:$4 sm:$0xff]  }
 0x46c   :  { %5709 = vmatprep.subr.bf16.mxu1 %v7642_v29  ;;  %5873 = vmatprep.subr.bf16.mxu0 %v7645_v40  ;;  %v7709_v39 = vld [vmem:[#allocation13 + $0xd28] ss:$28 sps:$4 sm:$0xff]   ;;  %v1093_v29 = vsub.s32 6, %v8419_v19  ;;  %v7714_v40 = vld [vmem:[#allocation13 + $0xd5c] ss:$28 sps:$4 sm:$0xff]  }
 0x46e   :  { %5710 = vmatpush1.bf16.msra.mxu1 %v7640_v41  ;;  %5874 = vmatpush1.bf16.msra.mxu0 %v7643_v42  ;;  %v7717_v41 = vld [vmem:[#allocation13 + $0xd64] ss:$28 sps:$4 sm:$0xff]   ;;  %v7712_v42 = vld [vmem:[#allocation13 + $0xd58] ss:$28 sps:$4 sm:$0xff]  }
 0x46f   :  { %5711 = vmatprep.subr.bf16.mxu1 %v7648_v53  ;;  %5875 = vmatprep.subr.bf16.mxu0 %v7651_v43  ;;  %v7715_v53 = vld [vmem:[#allocation13 + $0xd60] ss:$28 sps:$4 sm:$0xff]   ;;  %v1094_v43 = vrot.slane %v8473_v28, %v1093_v29  ;;  %v7732_v28 = vld [vmem:[#allocation13 + $0x14] ss:$28 sps:$4 sm:$0xff]  }
 0x472   :  { %5712 = vmatpush1.bf16.msra.mxu1 %v7646_v48  ;;  %5876 = vmatpush1.bf16.msra.mxu0 %v7649_v50  ;;  %v7720_v48 = vld [vmem:[#allocation13 + $0xd94] ss:$28 sps:$4 sm:$0xff]   ;;  %v7723_v50 = vld [vmem:[#allocation13 + $0xd9c] ss:$28 sps:$4 sm:$0xff]  }
 0x473   :  { %5713 = vmatprep.subr.bf16.mxu1 %v7654_v54  ;;  %5877 = vmatprep.subr.bf16.mxu0 %v7657_v55  ;;  %v7718_v54 = vld [vmem:[#allocation13 + $0xd90] ss:$28 sps:$4 sm:$0xff]   ;;  %v7721_v55 = vld [vmem:[#allocation13 + $0xd98] ss:$28 sps:$4 sm:$0xff]  }
 0x476   :  { %5714 = vmatpush1.bf16.msra.mxu1 %v7652_v21  ;;  %5878 = vmatpush1.bf16.msra.mxu0 %v7655_v58  ;;  %v7169_v21 = vadd.f32 %v8512_v12, %v1094_v43  ;;  %v7726_v58 = vld [vmem:[#allocation13 + $0xdcc] ss:$28 sps:$4 sm:$0xff]   ;;  %v7734_v12 = vld [vmem:[#allocation13 + $0x18] ss:$28 sps:$4 sm:$0xff]  }
 0x477   :  { %5715 = vmatprep.subr.bf16.mxu1 %v7660_v59  ;;  %5879 = vmatprep.subr.bf16.mxu0 %v7663_v60  ;;  %v7729_v59 = vld [vmem:[#allocation13 + $0xdd4] ss:$28 sps:$4 sm:$0xff]   ;;  %v7724_v60 = vld [vmem:[#allocation13 + $0xdc8] ss:$28 sps:$4 sm:$0xff]  }
 0x478   :  { %v7775_v43 = vld [vmem:[#allocation13 + $0x208] ss:$28 sps:$4 sm:$0xff]  }
 0x47a   :  { %5716 = vmatpush1.bf16.msra.mxu1 %v7658_v44  ;;  %5880 = vmatpush1.bf16.msra.mxu0 %v7661_v45  ;;  %v7727_v44 = vld [vmem:[#allocation13 + $0xdd0] ss:$28 sps:$4 sm:$0xff]   ;;  %v2721_v45 = vmax.f32 %v7169_v21, 0.0  ;;  %v7784_v21 = vld [vmem:[#allocation13 + $0x408] ss:$28 sps:$4 sm:$0xff]  }
 0x47b   :  { %5717 = vmatprep.subr.bf16.mxu1 %v7666_v46  ;;  %5881 = vmatprep.subr.bf16.mxu0 %v7669_v52  ;;  %v7733_v46 = vld [vmem:[#allocation13 + $0x1d8] ss:$28 sps:$4 sm:$0xff]   ;;  %v7730_v52 = vld [vmem:[#allocation13 + $0x10] ss:$28 sps:$4 sm:$0xff]  }
 0x47e   :  { %5718 = vmatpush1.bf16.msra.mxu1 %v7664_v61  ;;  %5882 = vmatpush1.bf16.msra.mxu0 %v7667_v34  ;;  %v8531_v61 = vpack.c.bf16 %v2721_v45, %v2721_v45  ;;  %v7737_v34 = vld [vmem:[#allocation13 + $0x4c] ss:$28 sps:$4 sm:$0xff]   ;;  %v7792_v45 = vld [vmem:[#allocation13 + $0x2b4] ss:$28 sps:$4 sm:$0xff]  }
 0x47f   :  { %5719 = vmatprep.subr.bf16.mxu1 %v7672_v1  ;;  %5883 = vmatprep.subr.bf16.mxu0 %v7675_v2  ;;  %v7738_v1 = vld [vmem:[#allocation13 + $0x210] ss:$28 sps:$4 sm:$0xff]   ;;  %v7735_v2 = vld [vmem:[#allocation13 + $0x48] ss:$28 sps:$4 sm:$0xff]  }
 0x482   :  { %5720 = vmatpush1.bf16.msra.mxu1 %v7670_v3  ;;  %5884 = vmatpush1.bf16.msra.mxu0 %v7673_v4  ;;  %v7739_v3 = vld [vmem:[#allocation13 + $0x50] ss:$28 sps:$4 sm:$0xff]   ;;  %v7742_v4 = vld [vmem:[#allocation13 + $0x84] ss:$28 sps:$4 sm:$0xff]  }
 0x483   :  { %5721 = vmatprep.subr.bf16.mxu1 %v7678_v5  ;;  %5885 = vmatprep.subr.bf16.mxu0 %v7681_v6  ;;  %v7743_v5 = vld [vmem:[#allocation13 + $0x248] ss:$28 sps:$4 sm:$0xff]   ;;  %v7740_v6 = vld [vmem:[#allocation13 + $0x80] ss:$28 sps:$4 sm:$0xff]  }
 0x486   :  { %5722 = vmatpush1.bf16.msra.mxu1 %v7676_v7  ;;  %5886 = vmatpush1.bf16.msra.mxu0 %v7679_v8  ;;  %v7744_v7 = vld [vmem:[#allocation13 + $0x88] ss:$28 sps:$4 sm:$0xff]   ;;  %v7747_v8 = vld [vmem:[#allocation13 + $0xbc] ss:$28 sps:$4 sm:$0xff]  }
 0x487   :  { %5723 = vmatprep.subr.bf16.mxu1 %v7684_v9  ;;  %5887 = vmatprep.subr.bf16.mxu0 %v7687_v10  ;;  %v7748_v9 = vld [vmem:[#allocation13 + $0x280] ss:$28 sps:$4 sm:$0xff]   ;;  %v7745_v10 = vld [vmem:[#allocation13 + $0xb8] ss:$28 sps:$4 sm:$0xff]  }
 0x48a   :  { %5724 = vmatpush1.bf16.msra.mxu1 %v7682_v11  ;;  %5888 = vmatpush1.bf16.msra.mxu0 %v7685_v13  ;;  %v7749_v11 = vld [vmem:[#allocation13 + $0xc0] ss:$28 sps:$4 sm:$0xff]   ;;  %v7752_v13 = vld [vmem:[#allocation13 + $0xf4] ss:$28 sps:$4 sm:$0xff]  }
 0x48b   :  { %5725 = vmatprep.subr.bf16.mxu1 %v7690_v14  ;;  %5889 = vmatprep.subr.bf16.mxu0 %v7693_v15  ;;  %v7750_v14 = vld [vmem:[#allocation13 + $0xf0] ss:$28 sps:$4 sm:$0xff]   ;;  %v7754_v15 = vld [vmem:[#allocation13 + $0xf8] ss:$28 sps:$4 sm:$0xff]  }
 0x48e   :  { %5726 = vmatpush1.bf16.msra.mxu1 %v7688_v16  ;;  %5890 = vmatpush1.bf16.msra.mxu0 %v7691_v17  ;;  %v7757_v16 = vld [vmem:[#allocation13 + $0x12c] ss:$28 sps:$4 sm:$0xff]  }
 0x48f   :  { %5727 = vmatprep.subr.bf16.mxu1 %v7696_v18  ;;  %5891 = vmatprep.subr.bf16.mxu0 %v7699_v24  ;;  %v7758_v17 = vld [vmem:[#allocation13 + $0x2f0] ss:$28 sps:$4 sm:$0xff]   ;;  %v7755_v18 = vld [vmem:[#allocation13 + $0x128] ss:$28 sps:$4 sm:$0xff]  }
 0x490   :  { %v7759_v24 = vld [vmem:[#allocation13 + $0x130] ss:$28 sps:$4 sm:$0xff]  }
 0x492   :  { %5728 = vmatpush1.bf16.msra.mxu1 %v7694_v38  ;;  %5892 = vmatpush1.bf16.msra.mxu0 %v7697_v25  ;;  %v7762_v38 = vld [vmem:[#allocation13 + $0x164] ss:$28 sps:$4 sm:$0xff]  }
 0x493   :  { %5729 = vmatprep.subr.bf16.mxu1 %v7702_v27  ;;  %5893 = vmatprep.subr.bf16.mxu0 %v7705_v57  ;;  %v7763_v25 = vld [vmem:[#allocation13 + $0x328] ss:$28 sps:$4 sm:$0xff]   ;;  %v7760_v27 = vld [vmem:[#allocation13 + $0x160] ss:$28 sps:$4 sm:$0xff]  }
 0x494   :  { %v7764_v57 = vld [vmem:[#allocation13 + $0x168] ss:$28 sps:$4 sm:$0xff]  }
 0x496   :  { %5730 = vmatpush1.bf16.msra.mxu1 %v7700_v31  ;;  %5894 = vmatpush1.bf16.msra.mxu0 %v7703_v32  ;;  %v7767_v31 = vld [vmem:[#allocation13 + $0x19c] ss:$28 sps:$4 sm:$0xff]  }
 0x497   :  { %5731 = vmatprep.subr.bf16.mxu1 %v7708_v33  ;;  %5895 = vmatprep.subr.bf16.mxu0 %v7711_v35  ;;  %v7768_v32 = vld [vmem:[#allocation13 + $0x360] ss:$28 sps:$4 sm:$0xff]   ;;  %v7765_v33 = vld [vmem:[#allocation13 + $0x198] ss:$28 sps:$4 sm:$0xff]  }
 0x498   :  { %v7769_v35 = vld [vmem:[#allocation13 + $0x1a0] ss:$28 sps:$4 sm:$0xff]  }
 0x49a   :  { %5732 = vmatpush1.bf16.msra.mxu1 %v7706_v62  ;;  %5896 = vmatpush1.bf16.msra.mxu0 %v7709_v39  ;;  %v7772_v62 = vld [vmem:[#allocation13 + $0x1d4] ss:$28 sps:$4 sm:$0xff]  }
 0x49b   :  { %5733 = vmatprep.subr.bf16.mxu1 %v7714_v40  ;;  %5897 = vmatprep.subr.bf16.mxu0 %v7717_v41  ;;  %v7773_v39 = vld [vmem:[#allocation13 + $0x558] ss:$28 sps:$4 sm:$0xff]   ;;  %v7770_v40 = vld [vmem:[#allocation13 + $0x1d0] ss:$28 sps:$4 sm:$0xff]  }
 0x49c   :  { %v7774_v41 = vld [vmem:[#allocation13 + $0x398] ss:$28 sps:$4 sm:$0xff]  }
 0x49e   :  { %5734 = vmatpush1.bf16.msra.mxu1 %v7712_v42  ;;  %5898 = vmatpush1.bf16.msra.mxu0 %v7715_v53  ;;  %v7777_v42 = vld [vmem:[#allocation13 + $0x20c] ss:$28 sps:$4 sm:$0xff]  }
 0x49f   :  { %5735 = vmatprep.subr.bf16.mxu1 %v7720_v48  ;;  %5899 = vmatprep.subr.bf16.mxu0 %v7723_v50  ;;  %v7778_v53 = vld [vmem:[#allocation13 + $0x590] ss:$28 sps:$4 sm:$0xff]   ;;  %v7782_v50 = vld [vmem:[#allocation13 + $0x244] ss:$28 sps:$4 sm:$0xff]  }
 0x4a0   :  { %v7779_v48 = vld [vmem:[#allocation13 + $0x3d0] ss:$28 sps:$4 sm:$0xff]  }
 0x4a2   :  { %5736 = vmatpush1.bf16.msra.mxu1 %v7718_v54  ;;  %5900 = vmatpush1.bf16.msra.mxu0 %v7721_v55  ;;  %v7783_v54 = vld [vmem:[#allocation13 + $0x5c8] ss:$28 sps:$4 sm:$0xff]   ;;  %v7780_v55 = vld [vmem:[#allocation13 + $0x240] ss:$28 sps:$4 sm:$0xff]  }
 0x4a3   :  { %5737 = vmatprep.subr.bf16.mxu1 %v7726_v58  ;;  %5901 = vmatprep.subr.bf16.mxu0 %v7729_v59  ;;  %v7787_v58 = vld [vmem:[#allocation13 + $0x27c] ss:$28 sps:$4 sm:$0xff]  }
 0x4a4   :  { %v7788_v59 = vld [vmem:[#allocation13 + $0x600] ss:$28 sps:$4 sm:$0xff]  }
 0x4a6   :  { %5738 = vmatpush1.bf16.msra.mxu1 %v7724_v60  ;;  %5902 = vmatpush1.bf16.msra.mxu0 %v7727_v44  ;;  %v7785_v60 = vld [vmem:[#allocation13 + $0x278] ss:$28 sps:$4 sm:$0xff]   ;;  %v7789_v44 = vld [vmem:[#allocation13 + $0x440] ss:$28 sps:$4 sm:$0xff]  }
 0x4a7   :  { %5912 = vmatprep.subr.bf16.mxu1 %v7732_v28  ;;  %7043 = vmatprep.subr.bf16.mxu0 %v7733_v46  ;;  %v7793_v28 = vld [vmem:[#allocation13 + $0x638] ss:$28 sps:$4 sm:$0xff]   ;;  %v7790_v46 = vld [vmem:[#allocation13 + $0x2b0] ss:$28 sps:$4 sm:$0xff]  }
 0x4a9   :  { %5740 = vmatmul.mubr.bf16.vlgmr.msra.gmra.mrb[12].mxu1 %v8531_v61  ;;  %5904 = vmatmul.mubr.bf16.vlgmr.msra.gmra.mrb[20].mxu0 %v8531_v61 }
 0x4aa   :  { %5913 = vmatpush1.bf16.msra.mxu1 %v7730_v52  ;;  %5944 = vmatprep.mubr.bf16.mxu1 %v8483_v47  ;;  %v7794_v52 = vld [vmem:[#allocation13 + $0x478] ss:$28 sps:$4 sm:$0xff]  }
 0x4ab   :  { %7044 = vmatpush3.bf16.msra.mxu0 %v7734_v12  ;;  %6108 = vmatprep.mubr.bf16.mxu0 %v8483_v47  ;;  %v7753_v47 = vld [vmem:[#allocation13 + $0x2b8] ss:$28 sps:$4 sm:$0xff]   ;;  %v7797_v12 = vld [vmem:[#allocation13 + $0x2ec] ss:$28 sps:$4 sm:$0xff]  }
 0x4ac   :  { %5914 = vmatprep.subr.bf16.mxu1 %v7737_v34  ;;  %7045 = vmatprep.subr.bf16.mxu0 %v7738_v1  ;;  %v7798_v34 = vld [vmem:[#allocation13 + $0x670] ss:$28 sps:$4 sm:$0xff]   ;;  %v7795_v1 = vld [vmem:[#allocation13 + $0x2e8] ss:$28 sps:$4 sm:$0xff]  }
 0x4ae   :  { %5915 = vmatpush1.bf16.msra.mxu1 %v7735_v2  ;;  %v7799_v2 = vld [vmem:[#allocation13 + $0x4b0] ss:$28 sps:$4 sm:$0xff]  }
 0x4af   :  { %7046 = vmatpush3.bf16.msra.mxu0 %v7739_v3  ;;  %5916 = vmatprep.subr.bf16.mxu1 %v7742_v4  ;;  %v7802_v3 = vld [vmem:[#allocation13 + $0x324] ss:$28 sps:$4 sm:$0xff]  }
 0x4b0   :  { %7047 = vmatprep.subr.bf16.mxu0 %v7743_v5  ;;  %v7803_v4 = vld [vmem:[#allocation13 + $0x6a8] ss:$28 sps:$4 sm:$0xff]   ;;  %v7800_v5 = vld [vmem:[#allocation13 + $0x320] ss:$28 sps:$4 sm:$0xff]  }
 0x4b2   :  { %5917 = vmatpush1.bf16.msra.mxu1 %v7740_v6  ;;  %v7804_v6 = vld [vmem:[#allocation13 + $0x4e8] ss:$28 sps:$4 sm:$0xff]  }
 0x4b3   :  { %7048 = vmatpush3.bf16.msra.mxu0 %v7744_v7  ;;  %5918 = vmatprep.subr.bf16.mxu1 %v7747_v8  ;;  %v7807_v7 = vld [vmem:[#allocation13 + $0x35c] ss:$28 sps:$4 sm:$0xff]  }
 0x4b4   :  { %7049 = vmatprep.subr.bf16.mxu0 %v7748_v9  ;;  %v7808_v8 = vld [vmem:[#allocation13 + $0x6e0] ss:$28 sps:$4 sm:$0xff]   ;;  %v7805_v9 = vld [vmem:[#allocation13 + $0x358] ss:$28 sps:$4 sm:$0xff]  }
 0x4b6   :  { %5919 = vmatpush1.bf16.msra.mxu1 %v7745_v10  ;;  %v7809_v10 = vld [vmem:[#allocation13 + $0x520] ss:$28 sps:$4 sm:$0xff]  }
 0x4b7   :  { %7050 = vmatpush3.bf16.msra.mxu0 %v7749_v11  ;;  %5920 = vmatprep.subr.bf16.mxu1 %v7752_v13  ;;  %v7812_v11 = vld [vmem:[#allocation13 + $0x394] ss:$28 sps:$4 sm:$0xff]  }
 0x4b8   :  { %7051 = vmatprep.subr.bf16.mxu0 %v7753_v47  ;;  %v7813_v13 = vld [vmem:[#allocation13 + $0x8d8] ss:$28 sps:$4 sm:$0xff]   ;;  %v7810_v47 = vld [vmem:[#allocation13 + $0x390] ss:$28 sps:$4 sm:$0xff]  }
 0x4ba   :  { %5921 = vmatpush1.bf16.msra.mxu1 %v7750_v14  ;;  %v7814_v14 = vld [vmem:[#allocation13 + $0x718] ss:$28 sps:$4 sm:$0xff]  }
 0x4bb   :  { %7052 = vmatpush3.bf16.msra.mxu0 %v7754_v15  ;;  %5922 = vmatprep.subr.bf16.mxu1 %v7757_v16  ;;  %v7817_v15 = vld [vmem:[#allocation13 + $0x3cc] ss:$28 sps:$4 sm:$0xff]  }
 0x4bc   :  { %7053 = vmatprep.subr.bf16.mxu0 %v7758_v17  ;;  %v7818_v16 = vld [vmem:[#allocation13 + $0x910] ss:$28 sps:$4 sm:$0xff]   ;;  %v7815_v17 = vld [vmem:[#allocation13 + $0x3c8] ss:$28 sps:$4 sm:$0xff]  }
 0x4be   :  { %5923 = vmatpush1.bf16.msra.mxu1 %v7755_v18  ;;  %v7819_v18 = vld [vmem:[#allocation13 + $0x750] ss:$28 sps:$4 sm:$0xff]  }
 0x4bf   :  { %7054 = vmatpush3.bf16.msra.mxu0 %v7759_v24  ;;  %5924 = vmatprep.subr.bf16.mxu1 %v7762_v38  ;;  %v7822_v24 = vld [vmem:[#allocation13 + $0x404] ss:$28 sps:$4 sm:$0xff]  }
 0x4c0   :  { %7055 = vmatprep.subr.bf16.mxu0 %v7763_v25  ;;  %v7823_v38 = vld [vmem:[#allocation13 + $0x948] ss:$28 sps:$4 sm:$0xff]   ;;  %v7820_v25 = vld [vmem:[#allocation13 + $0x400] ss:$28 sps:$4 sm:$0xff]  }
 0x4c2   :  { %5925 = vmatpush1.bf16.msra.mxu1 %v7760_v27  ;;  %v7827_v27 = vld [vmem:[#allocation13 + $0x43c] ss:$28 sps:$4 sm:$0xff]  }
 0x4c3   :  { %7056 = vmatpush3.bf16.msra.mxu0 %v7764_v57  ;;  %5926 = vmatprep.subr.bf16.mxu1 %v7767_v31  ;;  %v7828_v57 = vld [vmem:[#allocation13 + $0x980] ss:$28 sps:$4 sm:$0xff]   ;;  %v7825_v31 = vld [vmem:[#allocation13 + $0x438] ss:$28 sps:$4 sm:$0xff]  }
 0x4c4   :  { %7057 = vmatprep.subr.bf16.mxu0 %v7768_v32  ;;  %v7832_v32 = vld [vmem:[#allocation13 + $0x474] ss:$28 sps:$4 sm:$0xff]  }
 0x4c6   :  { %5927 = vmatpush1.bf16.msra.mxu1 %v7765_v33  ;;  %v7833_v33 = vld [vmem:[#allocation13 + $0x9b8] ss:$28 sps:$4 sm:$0xff]  }
 0x4c7   :  { %7058 = vmatpush3.bf16.msra.mxu0 %v7769_v35  ;;  %5928 = vmatprep.subr.bf16.mxu1 %v7772_v62  ;;  %v7830_v35 = vld [vmem:[#allocation13 + $0x470] ss:$28 sps:$4 sm:$0xff]   ;;  %v7834_v62 = vld [vmem:[#allocation13 + $0x7f8] ss:$28 sps:$4 sm:$0xff]  }
 0x4c8   :  { %7065 = vmatprep.subr.bf16.mxu0 %v7773_v39  ;;  %v7837_v39 = vld [vmem:[#allocation13 + $0x4ac] ss:$28 sps:$4 sm:$0xff]  }
 0x4ca   :  { %6109 = vmatmul.mubr.bf16.vlgmr.msra.gmra.mrb[24].mxu0 %v8485_v51  ;;  %5929 = vmatpush1.bf16.msra.mxu1 %v7770_v40  ;;  %v7838_v40 = vld [vmem:[#allocation13 + $0x9f0] ss:$28 sps:$4 sm:$0xff]  }
 0x4cb   :  { %7066 = vmatpush3.bf16.msra.mxu0 %v7774_v41  ;;  %6148 = vmatprep.mubr.bf16.mxu0 %v8489_v56  ;;  %v7835_v41 = vld [vmem:[#allocation13 + $0x4a8] ss:$28 sps:$4 sm:$0xff]  }
 0x4cc   :  { %5930 = vmatprep.subr.bf16.mxu1 %v7777_v42  ;;  %7067 = vmatprep.subr.bf16.mxu0 %v7778_v53  ;;  %v7839_v42 = vld [vmem:[#allocation13 + $0x830] ss:$28 sps:$4 sm:$0xff]   ;;  %v7842_v53 = vld [vmem:[#allocation13 + $0x4e4] ss:$28 sps:$4 sm:$0xff]  }
 0x4ce   :  { %5931 = vmatpush1.bf16.msra.mxu1 %v7775_v43  ;;  %v7843_v43 = vld [vmem:[#allocation13 + $0xa28] ss:$28 sps:$4 sm:$0xff]  }
 0x4cf   :  { %7068 = vmatpush3.bf16.msra.mxu0 %v7779_v48  ;;  %5932 = vmatprep.subr.bf16.mxu1 %v7782_v50  ;;  %v7840_v48 = vld [vmem:[#allocation13 + $0x4e0] ss:$28 sps:$4 sm:$0xff]   ;;  %v7844_v50 = vld [vmem:[#allocation13 + $0x868] ss:$28 sps:$4 sm:$0xff]  }
 0x4d0   :  { %7069 = vmatprep.subr.bf16.mxu0 %v7783_v54  ;;  %v7847_v54 = vld [vmem:[#allocation13 + $0x51c] ss:$28 sps:$4 sm:$0xff]  }
 0x4d2   :  { %5933 = vmatpush1.bf16.msra.mxu1 %v7780_v55  ;;  %v7848_v55 = vld [vmem:[#allocation13 + $0xa60] ss:$28 sps:$4 sm:$0xff]  }
 0x4d3   :  { %7070 = vmatpush3.bf16.msra.mxu0 %v7784_v21  ;;  %5934 = vmatprep.subr.bf16.mxu1 %v7787_v58  ;;  %v7845_v21 = vld [vmem:[#allocation13 + $0x518] ss:$28 sps:$4 sm:$0xff]   ;;  %v7849_v58 = vld [vmem:[#allocation13 + $0x8a0] ss:$28 sps:$4 sm:$0xff]  }
 0x4d4   :  { %7071 = vmatprep.subr.bf16.mxu0 %v7788_v59  ;;  %v7852_v59 = vld [vmem:[#allocation13 + $0x554] ss:$28 sps:$4 sm:$0xff]  }
 0x4d6   :  { %5935 = vmatpush1.bf16.msra.mxu1 %v7785_v60  ;;  %v7853_v60 = vld [vmem:[#allocation13 + $0xc58] ss:$28 sps:$4 sm:$0xff]  }
 0x4d7   :  { %7072 = vmatpush3.bf16.msra.mxu0 %v7789_v44  ;;  %5936 = vmatprep.subr.bf16.mxu1 %v7792_v45  ;;  %v7850_v44 = vld [vmem:[#allocation13 + $0x550] ss:$28 sps:$4 sm:$0xff]   ;;  %v7854_v45 = vld [vmem:[#allocation13 + $0xa98] ss:$28 sps:$4 sm:$0xff]  }
 0x4d8   :  { %7073 = vmatprep.subr.bf16.mxu0 %v7793_v28  ;;  %v7857_v28 = vld [vmem:[#allocation13 + $0x58c] ss:$28 sps:$4 sm:$0xff]  }
 0x4da   :  { %5937 = vmatpush1.bf16.msra.mxu1 %v7790_v46  ;;  %v7858_v46 = vld [vmem:[#allocation13 + $0xc90] ss:$28 sps:$4 sm:$0xff]  }
 0x4db   :  { %7074 = vmatpush3.bf16.msra.mxu0 %v7794_v52  ;;  %5938 = vmatprep.subr.bf16.mxu1 %v7797_v12  ;;  %v7855_v52 = vld [vmem:[#allocation13 + $0x588] ss:$28 sps:$4 sm:$0xff]   ;;  %v7859_v12 = vld [vmem:[#allocation13 + $0xad0] ss:$28 sps:$4 sm:$0xff]  }
 0x4dc   :  { %7075 = vmatprep.subr.bf16.mxu0 %v7798_v34  ;;  %v7862_v34 = vld [vmem:[#allocation13 + $0x5c4] ss:$28 sps:$4 sm:$0xff]  }
 0x4de   :  { %5939 = vmatpush1.bf16.msra.mxu1 %v7795_v1  ;;  %v7863_v1 = vld [vmem:[#allocation13 + $0xcc8] ss:$28 sps:$4 sm:$0xff]  }
 0x4df   :  { %7076 = vmatpush3.bf16.msra.mxu0 %v7799_v2  ;;  %5940 = vmatprep.subr.bf16.mxu1 %v7802_v3  ;;  %v7860_v2 = vld [vmem:[#allocation13 + $0x5c0] ss:$28 sps:$4 sm:$0xff]   ;;  %v7864_v3 = vld [vmem:[#allocation13 + $0xb08] ss:$28 sps:$4 sm:$0xff]  }
 0x4e0   :  { %7077 = vmatprep.subr.bf16.mxu0 %v7803_v4  ;;  %v7867_v4 = vld [vmem:[#allocation13 + $0x5fc] ss:$28 sps:$4 sm:$0xff]  }
 0x4e2   :  { %5941 = vmatpush1.bf16.msra.mxu1 %v7800_v5  ;;  %v7868_v5 = vld [vmem:[#allocation13 + $0xd00] ss:$28 sps:$4 sm:$0xff]  }
 0x4e3   :  { %7078 = vmatpush3.bf16.msra.mxu0 %v7804_v6  ;;  %5942 = vmatprep.subr.bf16.mxu1 %v7807_v7  ;;  %v7865_v6 = vld [vmem:[#allocation13 + $0x5f8] ss:$28 sps:$4 sm:$0xff]   ;;  %v7869_v7 = vld [vmem:[#allocation13 + $0xb40] ss:$28 sps:$4 sm:$0xff]  }
 0x4e4   :  { %7079 = vmatprep.subr.bf16.mxu0 %v7808_v8  ;;  %v7872_v8 = vld [vmem:[#allocation13 + $0x634] ss:$28 sps:$4 sm:$0xff]  }
 0x4e6   :  { %5943 = vmatpush1.bf16.msra.mxu1 %v7805_v9  ;;  %v7873_v9 = vld [vmem:[#allocation13 + $0xd38] ss:$28 sps:$4 sm:$0xff]  }
 0x4e7   :  { %7080 = vmatpush3.bf16.msra.mxu0 %v7809_v10  ;;  %5953 = vmatprep.subr.bf16.mxu1 %v7812_v11  ;;  %v7870_v10 = vld [vmem:[#allocation13 + $0x630] ss:$28 sps:$4 sm:$0xff]   ;;  %v7874_v11 = vld [vmem:[#allocation13 + $0xb78] ss:$28 sps:$4 sm:$0xff]  }
 0x4e8   :  { %7087 = vmatprep.subr.bf16.mxu0 %v7813_v13  ;;  %v7877_v13 = vld [vmem:[#allocation13 + $0x66c] ss:$28 sps:$4 sm:$0xff]  }
 0x4e9   :  { %5945 = vmatmul.mubr.bf16.vlgmr.msra.gmra.mrb[16].mxu1 %v8485_v51  ;;  %v7824_v51 = vld [vmem:[#allocation13 + $0x788] ss:$28 sps:$4 sm:$0xff]  }
 0x4ea   :  { %6149 = vmatmul.mubr.bf16.vlgmr.msra.gmra.mrb[28].mxu0 %v8498_v0  ;;  %5954 = vmatpush1.bf16.msra.mxu1 %v7810_v47  ;;  %v7878_v47 = vld [vmem:[#allocation13 + $0xd70] ss:$28 sps:$4 sm:$0xff]  }
 0x4eb   :  { %5985 = vmatprep.mubr.bf16.mxu1 %v8489_v56  ;;  %7088 = vmatpush3.bf16.msra.mxu0 %v7814_v14  ;;  %v7829_v56 = vld [vmem:[#allocation13 + $0x7c0] ss:$28 sps:$4 sm:$0xff]   ;;  %v7875_v14 = vld [vmem:[#allocation13 + $0x668] ss:$28 sps:$4 sm:$0xff]  }
 0x4ec   :  { %6188 = vmatprep.mubr.bf16.mxu0 %v8514_v36  ;;  %5955 = vmatprep.subr.bf16.mxu1 %v7817_v15  ;;  %v7879_v15 = vld [vmem:[#allocation13 + $0xbb0] ss:$28 sps:$4 sm:$0xff]  }
 0x4ed   :  { %7089 = vmatprep.subr.bf16.mxu0 %v7818_v16  ;;  %v7882_v16 = vld [vmem:[#allocation13 + $0x6a4] ss:$28 sps:$4 sm:$0xff]  }
 0x4ee   :  { %5956 = vmatpush1.bf16.msra.mxu1 %v7815_v17  ;;  %v7883_v17 = vld [vmem:[#allocation13 + $0xda8] ss:$28 sps:$4 sm:$0xff]  }
 0x4ef   :  { %7090 = vmatpush3.bf16.msra.mxu0 %v7819_v18  ;;  %5957 = vmatprep.subr.bf16.mxu1 %v7822_v24  ;;  %v7880_v18 = vld [vmem:[#allocation13 + $0x6a0] ss:$28 sps:$4 sm:$0xff]   ;;  %v7884_v24 = vld [vmem:[#allocation13 + $0xbe8] ss:$28 sps:$4 sm:$0xff]  }
 0x4f0   :  { %7091 = vmatprep.subr.bf16.mxu0 %v7823_v38  ;;  %v7887_v38 = vld [vmem:[#allocation13 + $0x6dc] ss:$28 sps:$4 sm:$0xff]  }
 0x4f2   :  { %5958 = vmatpush1.bf16.msra.mxu1 %v7820_v25  ;;  %v7888_v25 = vld [vmem:[#allocation13 + $0xde0] ss:$28 sps:$4 sm:$0xff]  }
 0x4f3   :  { %7092 = vmatpush3.bf16.msra.mxu0 %v7824_v51  ;;  %5959 = vmatprep.subr.bf16.mxu1 %v7827_v27  ;;  %v7885_v51 = vld [vmem:[#allocation13 + $0x6d8] ss:$28 sps:$4 sm:$0xff]   ;;  %v7889_v27 = vld [vmem:[#allocation13 + $0xc20] ss:$28 sps:$4 sm:$0xff]  }
 0x4f4   :  { %7093 = vmatprep.subr.bf16.mxu0 %v7828_v57  ;;  %v7892_v57 = vld [vmem:[#allocation13 + $0x714] ss:$28 sps:$4 sm:$0xff]  }
 0x4f6   :  { %5960 = vmatpush1.bf16.msra.mxu1 %v7825_v31  ;;  %v7890_v31 = vld [vmem:[#allocation13 + $0x710] ss:$28 sps:$4 sm:$0xff]  }
 0x4f7   :  { %7094 = vmatpush3.bf16.msra.mxu0 %v7829_v56  ;;  %5961 = vmatprep.subr.bf16.mxu1 %v7832_v32  ;;  %v7895_v56 = vld [vmem:[#allocation13 + $0x74c] ss:$28 sps:$4 sm:$0xff]  }
 0x4f8   :  { %7095 = vmatprep.subr.bf16.mxu0 %v7833_v33  ;;  %v7893_v32 = vld [vmem:[#allocation13 + $0x748] ss:$28 sps:$4 sm:$0xff]  }
 0x4f9   :  { %v7898_v33 = vld [vmem:[#allocation13 + $0x784] ss:$28 sps:$4 sm:$0xff]  }
 0x4fa   :  { %5962 = vmatpush1.bf16.msra.mxu1 %v7830_v35  ;;  %v7896_v35 = vld [vmem:[#allocation13 + $0x780] ss:$28 sps:$4 sm:$0xff]  }
 0x4fb   :  { %7096 = vmatpush3.bf16.msra.mxu0 %v7834_v62  ;;  %5963 = vmatprep.subr.bf16.mxu1 %v7837_v39  ;;  %v7901_v62 = vld [vmem:[#allocation13 + $0x7bc] ss:$28 sps:$4 sm:$0xff]  }
 0x4fc   :  { %7097 = vmatprep.subr.bf16.mxu0 %v7838_v40  ;;  %v7899_v39 = vld [vmem:[#allocation13 + $0x7b8] ss:$28 sps:$4 sm:$0xff]  }
 0x4fd   :  { %v7904_v40 = vld [vmem:[#allocation13 + $0x7f4] ss:$28 sps:$4 sm:$0xff]  }
 0x4fe   :  { %5964 = vmatpush1.bf16.msra.mxu1 %v7835_v41  ;;  %v7902_v41 = vld [vmem:[#allocation13 + $0x7f0] ss:$28 sps:$4 sm:$0xff]  }
 0x4ff   :  { %7098 = vmatpush3.bf16.msra.mxu0 %v7839_v42  ;;  %5965 = vmatprep.subr.bf16.mxu1 %v7842_v53  ;;  %v7905_v42 = vld [vmem:[#allocation13 + $0x828] ss:$28 sps:$4 sm:$0xff]  }
 0x500   :  { %7099 = vmatprep.subr.bf16.mxu0 %v7843_v43  ;;  %v7910_v53 = vld [vmem:[#allocation13 + $0x864] ss:$28 sps:$4 sm:$0xff]   ;;  %v7913_v43 = vld [vmem:[#allocation13 + $0x89c] ss:$28 sps:$4 sm:$0xff]  }
 0x502   :  { %5966 = vmatpush1.bf16.msra.mxu1 %v7840_v48  ;;  %v7911_v48 = vld [vmem:[#allocation13 + $0x898] ss:$28 sps:$4 sm:$0xff]  }
 0x503   :  { %7100 = vmatpush3.bf16.msra.mxu0 %v7844_v50  ;;  %5967 = vmatprep.subr.bf16.mxu1 %v7847_v54  ;;  %v7916_v50 = vld [vmem:[#allocation13 + $0x8d4] ss:$28 sps:$4 sm:$0xff]  }
 0x504   :  { %7101 = vmatprep.subr.bf16.mxu0 %v7848_v55  ;;  %v7914_v54 = vld [vmem:[#allocation13 + $0x8d0] ss:$28 sps:$4 sm:$0xff]  }
 0x505   :  { %v7919_v55 = vld [vmem:[#allocation13 + $0x90c] ss:$28 sps:$4 sm:$0xff]  }
 0x506   :  { %5968 = vmatpush1.bf16.msra.mxu1 %v7845_v21  ;;  %v7917_v21 = vld [vmem:[#allocation13 + $0x908] ss:$28 sps:$4 sm:$0xff]  }
 0x507   :  { %7102 = vmatpush3.bf16.msra.mxu0 %v7849_v58  ;;  %5969 = vmatprep.subr.bf16.mxu1 %v7852_v59  ;;  %v7922_v58 = vld [vmem:[#allocation13 + $0x944] ss:$28 sps:$4 sm:$0xff]  }
 0x508   :  { %7109 = vmatprep.subr.bf16.mxu0 %v7853_v60  ;;  %v7920_v59 = vld [vmem:[#allocation13 + $0x940] ss:$28 sps:$4 sm:$0xff]  }
 0x509   :  { %v7925_v60 = vld [vmem:[#allocation13 + $0x97c] ss:$28 sps:$4 sm:$0xff]  }
 0x50a   :  { %6189 = vmatmul.mubr.bf16.vlgmr.msra.gmra.mrb[32].mxu0 %v8516_v37  ;;  %5970 = vmatpush1.bf16.msra.mxu1 %v7850_v44  ;;  %v7923_v44 = vld [vmem:[#allocation13 + $0x978] ss:$28 sps:$4 sm:$0xff]  }
 0x50b   :  { %7110 = vmatpush3.bf16.msra.mxu0 %v7854_v45  ;;  %6228 = vmatprep.mubr.bf16.mxu0 %v8520_v30  ;;  %v7928_v45 = vld [vmem:[#allocation13 + $0x9b4] ss:$28 sps:$4 sm:$0xff]  }
 0x50c   :  { %5971 = vmatprep.subr.bf16.mxu1 %v7857_v28  ;;  %7111 = vmatprep.subr.bf16.mxu0 %v7858_v46  ;;  %v7926_v28 = vld [vmem:[#allocation13 + $0x9b0] ss:$28 sps:$4 sm:$0xff]  }
 0x50d   :  { %v7931_v46 = vld [vmem:[#allocation13 + $0x9ec] ss:$28 sps:$4 sm:$0xff]  }
 0x50e   :  { %5972 = vmatpush1.bf16.msra.mxu1 %v7855_v52  ;;  %v7929_v52 = vld [vmem:[#allocation13 + $0x9e8] ss:$28 sps:$4 sm:$0xff]  }
 0x50f   :  { %7112 = vmatpush3.bf16.msra.mxu0 %v7859_v12  ;;  %5973 = vmatprep.subr.bf16.mxu1 %v7862_v34  ;;  %v7934_v12 = vld [vmem:[#allocation13 + $0xa24] ss:$28 sps:$4 sm:$0xff]  }
 0x510   :  { %7113 = vmatprep.subr.bf16.mxu0 %v7863_v1  ;;  %v7932_v34 = vld [vmem:[#allocation13 + $0xa20] ss:$28 sps:$4 sm:$0xff]  }
 0x511   :  { %v7937_v1 = vld [vmem:[#allocation13 + $0xa5c] ss:$28 sps:$4 sm:$0xff]  }
 0x512   :  { %5974 = vmatpush1.bf16.msra.mxu1 %v7860_v2  ;;  %v7935_v2 = vld [vmem:[#allocation13 + $0xa58] ss:$28 sps:$4 sm:$0xff]  }
 0x513   :  { %7114 = vmatpush3.bf16.msra.mxu0 %v7864_v3  ;;  %5975 = vmatprep.subr.bf16.mxu1 %v7867_v4  ;;  %v7940_v3 = vld [vmem:[#allocation13 + $0xa94] ss:$28 sps:$4 sm:$0xff]  }
 0x514   :  { %7115 = vmatprep.subr.bf16.mxu0 %v7868_v5  ;;  %v7938_v4 = vld [vmem:[#allocation13 + $0xa90] ss:$28 sps:$4 sm:$0xff]  }
 0x515   :  { %v7943_v5 = vld [vmem:[#allocation13 + $0xacc] ss:$28 sps:$4 sm:$0xff]  }
 0x516   :  { %5976 = vmatpush1.bf16.msra.mxu1 %v7865_v6  ;;  %v7941_v6 = vld [vmem:[#allocation13 + $0xac8] ss:$28 sps:$4 sm:$0xff]  }
 0x517   :  { %7116 = vmatpush3.bf16.msra.mxu0 %v7869_v7  ;;  %5977 = vmatprep.subr.bf16.mxu1 %v7872_v8  ;;  %v7946_v7 = vld [vmem:[#allocation13 + $0xb04] ss:$28 sps:$4 sm:$0xff]  }
 0x518   :  { %7117 = vmatprep.subr.bf16.mxu0 %v7873_v9  ;;  %v7944_v8 = vld [vmem:[#allocation13 + $0xb00] ss:$28 sps:$4 sm:$0xff]  }
 0x519   :  { %v7949_v9 = vld [vmem:[#allocation13 + $0xb3c] ss:$28 sps:$4 sm:$0xff]  }
 0x51a   :  { %5978 = vmatpush1.bf16.msra.mxu1 %v7870_v10  ;;  %v7947_v10 = vld [vmem:[#allocation13 + $0xb38] ss:$28 sps:$4 sm:$0xff]  }
 0x51b   :  { %7118 = vmatpush3.bf16.msra.mxu0 %v7874_v11  ;;  %5979 = vmatprep.subr.bf16.mxu1 %v7877_v13  ;;  %v7952_v11 = vld [vmem:[#allocation13 + $0xb74] ss:$28 sps:$4 sm:$0xff]  }
 0x51c   :  { %7119 = vmatprep.subr.bf16.mxu0 %v7878_v47  ;;  %v7950_v13 = vld [vmem:[#allocation13 + $0xb70] ss:$28 sps:$4 sm:$0xff]   ;;  %v8550_v47 = vld [vmem:[#allocation14] sm:$0xff] }
 0x51e   :  { %5980 = vmatpush1.bf16.msra.mxu1 %v7875_v14  ;;  %v3256_v14 = vrot.slane %v8550_v47, %v8448_v23 }
 0x51f   :  { %7120 = vmatpush3.bf16.msra.mxu0 %v7879_v15  ;;  %5981 = vmatprep.subr.bf16.mxu1 %v7882_v16  ;;  %v3252_v15 = vrot.slane %v8550_v47, %v8427_v22  ;;  %v3260_v16 = vrot.slane %v8550_v47, %v8451_v26  ;;  %v7961_v26 = vld [vmem:[#allocation13 + $0xc1c] ss:$28 sps:$4 sm:$0xff]  }
 0x520   :  { %7121 = vmatprep.subr.bf16.mxu0 %v7883_v17  ;;  %v7953_v17 = vld [vmem:[#allocation13 + $0xba8] ss:$28 sps:$4 sm:$0xff]  }
 0x522   :  { %5982 = vmatpush1.bf16.msra.mxu1 %v7880_v18  ;;  %v7958_v18 = vld [vmem:[#allocation13 + $0xbe4] ss:$28 sps:$4 sm:$0xff]  }
 0x523   :  { %7122 = vmatpush3.bf16.msra.mxu0 %v7884_v24  ;;  %5983 = vmatprep.subr.bf16.mxu1 %v7887_v38 }
 0x524   :  { %7123 = vmatprep.subr.bf16.mxu0 %v7888_v25 }
 0x526   :  { %5984 = vmatpush1.bf16.msra.mxu1 %v7885_v51 }
 0x527   :  { %7124 = vmatpush3.bf16.msra.mxu0 %v7889_v27  ;;  %5994 = vmatprep.subr.bf16.mxu1 %v7892_v57 }
 0x529   :  { %5986 = vmatmul.mubr.bf16.vlgmr.msra.gmra.mrb[16].mxu1 %v8498_v0  ;;  %v7907_v0 = vld [vmem:[#allocation13 + $0x82c] ss:$28 sps:$4 sm:$0xff]  }
 0x52a   :  { %6229 = vmatmul.mubr.bf16.vlgmr.msra.gmra.mrb[36].mxu0 %v8531_v61  ;;  %5995 = vmatpush1.bf16.msra.mxu1 %v7890_v31 }
 0x52b   :  { %6026 = vmatprep.mubr.bf16.mxu1 %v8514_v36  ;;  %5996 = vmatprep.subr.bf16.mxu1 %v7895_v56  ;;  %v7908_v36 = vld [vmem:[#allocation13 + $0x860] ss:$28 sps:$4 sm:$0xff]  }
 0x52e   :  { %5997 = vmatpush1.bf16.msra.mxu1 %v7893_v32  ;;  %v7956_v32 = vld [vmem:[#allocation13 + $0xbe0] ss:$28 sps:$4 sm:$0xff]  }
 0x52f   :  { %5998 = vmatprep.subr.bf16.mxu1 %v7898_v33 }
 0x532   :  { %5999 = vmatpush1.bf16.msra.mxu1 %v7896_v35  ;;  %v7959_v35 = vld [vmem:[#allocation13 + $0xc18] ss:$28 sps:$4 sm:$0xff]  }
 0x533   :  { %6000 = vmatprep.subr.bf16.mxu1 %v7901_v62  ;;  %v7964_v62 = vld [vmem:[#allocation13 + $0xc54] ss:$28 sps:$4 sm:$0xff]  }
 0x536   :  { %6001 = vmatpush1.bf16.msra.mxu1 %v7899_v39  ;;  %v7962_v39 = vld [vmem:[#allocation13 + $0xc50] ss:$28 sps:$4 sm:$0xff]  }
 0x537   :  { %6002 = vmatprep.subr.bf16.mxu1 %v7904_v40  ;;  %v7967_v40 = vld [vmem:[#allocation13 + $0xc8c] ss:$28 sps:$4 sm:$0xff]  }
 0x53a   :  { %6003 = vmatpush1.bf16.msra.mxu1 %v7902_v41 }
 0x53b   :  { %6004 = vmatprep.subr.bf16.mxu1 %v7907_v0 }
 0x53e   :  { %6005 = vmatpush1.bf16.msra.mxu1 %v7905_v42  ;;  %v7965_v42 = vld [vmem:[#allocation13 + $0xc88] ss:$28 sps:$4 sm:$0xff]  }
 0x53f   :  { %6006 = vmatprep.subr.bf16.mxu1 %v7910_v53 }
 0x542   :  { %6007 = vmatpush1.bf16.msra.mxu1 %v7908_v36  ;;  %v7970_v36 = vld [vmem:[#allocation13 + $0xcc4] ss:$28 sps:$4 sm:$0xff]  }
 0x543   :  { %6008 = vmatprep.subr.bf16.mxu1 %v7913_v43 }
 0x546   :  { %6009 = vmatpush1.bf16.msra.mxu1 %v7911_v48  ;;  %v7968_v48 = vld [vmem:[#allocation13 + $0xcc0] ss:$28 sps:$4 sm:$0xff]  }
 0x547   :  { %6010 = vmatprep.subr.bf16.mxu1 %v7916_v50  ;;  %v7973_v50 = vld [vmem:[#allocation13 + $0xcfc] ss:$28 sps:$4 sm:$0xff]  }
 0x54a   :  { %6011 = vmatpush1.bf16.msra.mxu1 %v7914_v54  ;;  %v7971_v54 = vld [vmem:[#allocation13 + $0xcf8] ss:$28 sps:$4 sm:$0xff]  }
 0x54b   :  { %6012 = vmatprep.subr.bf16.mxu1 %v7919_v55  ;;  %v7976_v55 = vld [vmem:[#allocation13 + $0xd34] ss:$28 sps:$4 sm:$0xff]  }
 0x54e   :  { %6013 = vmatpush1.bf16.msra.mxu1 %v7917_v21  ;;  %v7974_v21 = vld [vmem:[#allocation13 + $0xd30] ss:$28 sps:$4 sm:$0xff]  }
 0x54f   :  { %6014 = vmatprep.subr.bf16.mxu1 %v7922_v58  ;;  %v7979_v58 = vld [vmem:[#allocation13 + $0xd6c] ss:$28 sps:$4 sm:$0xff]  }
 0x552   :  { %6015 = vmatpush1.bf16.msra.mxu1 %v7920_v59  ;;  %v7977_v59 = vld [vmem:[#allocation13 + $0xd68] ss:$28 sps:$4 sm:$0xff]  }
 0x553   :  { %6016 = vmatprep.subr.bf16.mxu1 %v7925_v60  ;;  %v7982_v60 = vld [vmem:[#allocation13 + $0xda4] ss:$28 sps:$4 sm:$0xff]  }
 0x556   :  { %6017 = vmatpush1.bf16.msra.mxu1 %v7923_v44 }
 0x557   :  { %6018 = vmatprep.subr.bf16.mxu1 %v7928_v45 }
 0x55a   :  { %6019 = vmatpush1.bf16.msra.mxu1 %v7926_v28  ;;  %v7980_v28 = vld [vmem:[#allocation13 + $0xda0] ss:$28 sps:$4 sm:$0xff]  }
 0x55b   :  { %6020 = vmatprep.subr.bf16.mxu1 %v7931_v46 }
 0x55e   :  { %6021 = vmatpush1.bf16.msra.mxu1 %v7929_v52 }
 0x55f   :  { %6022 = vmatprep.subr.bf16.mxu1 %v7934_v12  ;;  %v7985_v12 = vld [vmem:[#allocation13 + $0xddc] ss:$28 sps:$4 sm:$0xff]  }
 0x562   :  { %6023 = vmatpush1.bf16.msra.mxu1 %v7932_v34 }
 0x563   :  { %6024 = vmatprep.subr.bf16.mxu1 %v7937_v1  ;;  %v7983_v1 = vld [vmem:[#allocation13 + $0xdd8] ss:$28 sps:$4 sm:$0xff]  }
 0x566   :  { %6025 = vmatpush1.bf16.msra.mxu1 %v7935_v2  ;;  %v3272_v2 = vrot.slane %v8550_v47, %v1093_v29 }
 0x567   :  { %6035 = vmatprep.subr.bf16.mxu1 %v7940_v3 }
 0x569   :  { %6027 = vmatmul.mubr.bf16.vlgmr.msra.gmra.mrb[16].mxu1 %v8516_v37  ;;  %v7955_v37 = vld [vmem:[#allocation13 + $0xbac] ss:$28 sps:$4 sm:$0xff]  }
 0x56a   :  { %6036 = vmatpush1.bf16.msra.mxu1 %v7938_v4  ;;  %6067 = vmatprep.mubr.bf16.mxu1 %v8520_v30  ;;  %v3248_v30 = vrot.slane %v8550_v47, %v8422_v20 }
 0x56b   :  { %6037 = vmatprep.subr.bf16.mxu1 %v7943_v5 }
 0x56e   :  { %6038 = vmatpush1.bf16.msra.mxu1 %v7941_v6 }
 0x56f   :  { %6039 = vmatprep.subr.bf16.mxu1 %v7946_v7 }
 0x572   :  { %6040 = vmatpush1.bf16.msra.mxu1 %v7944_v8 }
 0x573   :  { %6041 = vmatprep.subr.bf16.mxu1 %v7949_v9 }
 0x576   :  { %6042 = vmatpush1.bf16.msra.mxu1 %v7947_v10 }
 0x577   :  { %6043 = vmatprep.subr.bf16.mxu1 %v7952_v11 }
 0x57a   :  { %6044 = vmatpush1.bf16.msra.mxu1 %v7950_v13 }
 0x57b   :  { %6045 = vmatprep.subr.bf16.mxu1 %v7955_v37 }
 0x57c   :  { %v5741_v24 = vpop.f32.mrb[12].mxu1  ;;  %v5905_v38 = vpop.f32.mrb[20].mxu0 }
 0x57d   :  { %v7171_v25 = vadd.f32 %v5741_v24, %v3248_v30  ;;  %v7173_v51 = vadd.f32 %v5905_v38, %v3256_v14  ;;  %v5743_v27 = vpop.f32.mrb[13].mxu1  ;;  %v5907_v57 = vpop.f32.mrb[21].mxu0  ;;  %v3264_v38 = vrot.slane %v8550_v47, %v1085_v49 }
 0x57e   :  { %v7172_v20 = vadd.f32 %v5743_v27, %v3252_v15  ;;  %v7174_v31 = vadd.f32 %v5907_v57, %v3260_v16  ;;  %v5745_v56 = vpop.f32.mrb[14].mxu1  ;;  %v5909_v23 = vpop.f32.mrb[22].mxu0  ;;  %6046 = vmatpush1.bf16.msra.mxu1 %v7953_v17 }
 0x57f   :  { %7986 = vtanh.f32 %v7171_v25  ;;  %v5746_v22 = vpop.f32.mrb[15].mxu1  ;;  %v5910_v33 = vpop.f32.mrb[23].mxu0  ;;  %6047 = vmatprep.subr.bf16.mxu1 %v7958_v18  ;;  %v3268_v25 = vrot.slane %v8550_v47, %v1089_v63 }
 0x580   :  { %7988 = vtanh.f32 %v7173_v51 }
 0x581   :  { %7990 = vtanh.f32 %v7172_v20 }
 0x582   :  { %7992 = vtanh.f32 %v7174_v31  ;;  %6048 = vmatpush1.bf16.msra.mxu1 %v7956_v32 }
 0x583   :  { %6049 = vmatprep.subr.bf16.mxu1 %v7961_v26 }
 0x586   :  { %6050 = vmatpush1.bf16.msra.mxu1 %v7959_v35 }
 0x587   :  { %6051 = vmatprep.subr.bf16.mxu1 %v7964_v62 }
 0x589   :  { %v7987_v41 = vpop.eup %7986 }
 0x58a   :  { %v7989_v0 = vpop.eup %7988  ;;  %6243 = vst [vmem:[#allocation16] sm:$0xff] %v7987_v41  ;;  %6052 = vmatpush1.bf16.msra.mxu1 %v7962_v39 }
 0x58b   :  { %v7991_v53 = vpop.eup %7990  ;;  %6245 = vst [vmem:[#allocation16 + $0x10] sm:$0xff] %v7989_v0  ;;  %6053 = vmatprep.subr.bf16.mxu1 %v7967_v40 }
 0x58c   :  { %v7993_v43 = vpop.eup %7992  ;;  %6244 = vst [vmem:[#allocation16 + $0x8] sm:$0xff] %v7991_v53 }
 0x58d   :  { %6246 = vst [vmem:[#allocation16 + $0x18] sm:$0xff] %v7993_v43 }
 0x58e   :  { %6054 = vmatpush1.bf16.msra.mxu1 %v7965_v42 }
 0x58f   :  { %6055 = vmatprep.subr.bf16.mxu1 %v7970_v36 }
 0x592   :  { %6056 = vmatpush1.bf16.msra.mxu1 %v7968_v48 }
 0x593   :  { %6057 = vmatprep.subr.bf16.mxu1 %v7973_v50 }
 0x596   :  { %6058 = vmatpush1.bf16.msra.mxu1 %v7971_v54 }
 0x597   :  { %6059 = vmatprep.subr.bf16.mxu1 %v7976_v55 }
 0x59a   :  { %6060 = vmatpush1.bf16.msra.mxu1 %v7974_v21 }
 0x59b   :  { %6061 = vmatprep.subr.bf16.mxu1 %v7979_v58 }
 0x59d   :  { %v7059_v44 = vpop.f32.mrb[24].mxu0 }
 0x59e   :  { %v7060_v45 = vpop.f32.mrb[25].mxu0  ;;  %6062 = vmatpush1.bf16.msra.mxu1 %v7977_v59 }
 0x59f   :  { %v7061_v46 = vadd.f32 %v7060_v45, %v7059_v44  ;;  %v7062_v52 = vpop.f32.mrb[26].mxu0  ;;  %6063 = vmatprep.subr.bf16.mxu1 %v7982_v60 }
 0x5a0   :  { %v7063_v34 = vpop.f32.mrb[27].mxu0 }
 0x5a1   :  { %v6111_v5 = vadd.f32 %v7061_v46, %v3272_v2 }
 0x5a2   :  { %6064 = vmatpush1.bf16.msra.mxu1 %v7980_v28 }
 0x5a3   :  { %6065 = vmatprep.subr.bf16.mxu1 %v7985_v12 }
 0x5a6   :  { %6066 = vmatpush1.bf16.msra.mxu1 %v7983_v1 }
 0x5a9   :  { %6068 = vmatmul.mubr.bf16.vlgmr.msra.gmra.mrb[16].mxu1 %v8531_v61 }
 0x5bd   :  { %v7081_v3 = vpop.f32.mrb[28].mxu0 }
 0x5be   :  { %v7082_v4 = vpop.f32.mrb[29].mxu0 }
 0x5bf   :  { %v7083_v6 = vadd.f32 %v7082_v4, %v7081_v3  ;;  %v7084_v7 = vpop.f32.mrb[30].mxu0 }
 0x5c0   :  { %v7085_v8 = vpop.f32.mrb[31].mxu0 }
 0x5c1   :  { %v6151_v9 = vadd.f32 %v7083_v6, %v6111_v5 }
 0x5dd   :  { %v7103_v10 = vpop.f32.mrb[32].mxu0 }
 0x5de   :  { %v7104_v11 = vpop.f32.mrb[33].mxu0 }
 0x5df   :  { %v7105_v13 = vadd.f32 %v7104_v11, %v7103_v10  ;;  %v7106_v37 = vpop.f32.mrb[34].mxu0 }
 0x5e0   :  { %v7107_v30 = vpop.f32.mrb[35].mxu0 }
 0x5e1   :  { %v6191_v14 = vadd.f32 %v7105_v13, %v6151_v9 }
 0x5fd   :  { %v7125_v15 = vpop.f32.mrb[36].mxu0 }
 0x5fe   :  { %v7126_v16 = vpop.f32.mrb[37].mxu0 }
 0x5ff   :  { %v7127_v61 = vadd.f32 %v7126_v16, %v7125_v15  ;;  %v7128_v17 = vpop.f32.mrb[38].mxu0 }
 0x600   :  { %v7129_v18 = vpop.f32.mrb[39].mxu0 }
 0x601   :  { %v6231_v24 = vadd.f32 %v7127_v61, %v6191_v14 }
 0x603   :  { %7994 = vtanh.f32 %v6231_v24 }
 0x60d   :  { %v7995_v29 = vpop.eup %7994 }
 0x60e   :  { %6249 = vst [vmem:[#allocation16 + $0x30] sm:$0xff] %v7995_v29 }
 0x67c   :  { %v6069_v51 = vpop.f32.mrb[16].mxu1 }
 0x67d   :  { %v7175_v27 = vadd.f32 %v6069_v51, %v3264_v38  ;;  %v6071_v57 = vpop.f32.mrb[17].mxu1 }
 0x67e   :  { %v7176_v20 = vadd.f32 %v6071_v57, %v3268_v25  ;;  %v6073_v31 = vpop.f32.mrb[18].mxu1 }
 0x67f   :  { %7996 = vtanh.f32 %v7175_v27  ;;  %v6074_v56 = vpop.f32.mrb[19].mxu1 }
 0x680   :  { %7998 = vtanh.f32 %v7176_v20 }
 0x689   :  { %v7997_v23 = vpop.eup %7996 }
 0x68a   :  { %v7999_v32 = vpop.eup %7998  ;;  %6247 = vst [vmem:[#allocation16 + $0x20] sm:$0xff] %v7997_v23 }
 0x68b   :  { %6248 = vst [vmem:[#allocation16 + $0x28] sm:$0xff] %v7999_v32 }
 0x68c   :  { %8187 = shalt.err (!%p8184_p12)
}
 0x68d   :  { %s8188_s5 = scalar_lea.hbm %s8592_s10, 896 }
 0x68e   :  { %p8189_p13 = scmp.ne.s32.totalorder %s8592_s10, %s8188_s5  ;;  %p8192_p0 = scmp.lt.u32.totalorder %s8188_s5, %s8592_s10 }
 0x690   :  { %p8194_p1 = pnand %p8192_p0, %p8189_p13 }
 0x692   :  { %8197 = shalt.err (!%p8194_p1)
}
 0x693   :  { %6259 = dma.vmem_to_hbm [thread:$0]  %s6257_s26, 896, %s8592_s10, [#allocation4]  }
 0x694   :  { %8208 = dma.done.wait [#allocation4], 896  }
 0x695   :  { %8209 = vsyncadd [#allocation4], 4294966400 }
 0x696   :  { %6263 = vsyncpa [#allocation3], 1 }
 0x697   :  { %6264 = vsyncpa [#allocation6], 1 }
 0x698   :  { %6265 = vsyncpa [#allocation9], 1 }
 0x699   :  { %6266 = vsyncpa [#allocation12], 1 }
 0x69a   :  { %6267 = vsyncpa [#allocation15], 1 }
 0x69b   :  { %6268 = vsyncpa [#allocation4], 1 }

// kernel: cdecoder_forward.1
= control target key start
LH: loop header
LB: loop body
LE: loop exit
PB: predicated region body
PF: predicated region fallthrough
CT: control target
= control target key end

     0   :  { %15 = vsyncpa [#allocation3], 0  ;;  %s8582_s0 = inlined_call_operand.vmem [shape: bf16[8,8], index: 0, kind: input, shape index: {}]   ;;  %s8583_s1 = inlined_call_operand.vmem [shape: s32[8,1], index: 1, kind: input, shape index: {}]   ;;  %s8584_s2 = inlined_call_operand.hbm [shape: bf16[8,256], index: 2, kind: input, shape index: {}]   ;;  %s8585_s3 = inlined_call_operand.hbm [shape: f32[128,256], index: 3, kind: input, shape index: {}]   ;;  %s8586_s4 = inlined_call_operand.hbm [shape: bf16[256,512], index: 4, kind: input, shape index: {}]   ;;  %s8587_s5 = inlined_call_operand.hbm [shape: f32[1,512], index: 5, kind: input, shape index: {}]   ;;  %s8588_s6 = inlined_call_operand.hbm [shape: bf16[512,1024], index: 6, kind: input, shape index: {}]   ;;  %s8589_s7 = inlined_call_operand.hbm [shape: f32[1,1024], index: 7, kind: input, shape index: {}]   ;;  %s8590_s8 = inlined_call_operand.hbm [shape: bf16[1024,896], index: 8, kind: input, shape index: {}]   ;;  %s8591_s9 = inlined_call_operand.hbm [shape: f32[1,896], index: 9, kind: input, shape index: {}]   ;;  %s8592_s10 = inlined_call_operand.hbm [shape: f32[8,896], index: 10, kind: output, shape index: {}]  }
   0x1   :  { %16 = vsyncpa [#allocation6], 0 }
   0x2   :  { %17 = vsyncpa [#allocation9], 0 }
   0x3   :  { %18 = vsyncpa [#allocation12], 0 }
   0x4   :  { %19 = vsyncpa [#allocation15], 0 }
   0x5   :  { %20 = vsyncpa [#allocation4], 0  ;;  %s8210_s13 = smov [#allocation5]   ;;  %s8000_s17 = scalar_lea.hbm %s8585_s3, 4096 }
   0x6   :  { %s40_s14 = sshll.u32 %s8210_s13, 4  ;;  %p8001_p0 = scmp.ne.s32.totalorder %s8585_s3, %s8000_s17  ;;  %s41_s14 = int_to_ptr.vmem [resolvable:$true] %s40_s14 }
   0x7   :  { %p8004_p1 = scmp.lt.u32.totalorder %s8000_s17, %s8585_s3 }
   0x9   :  { %p8006_p2 = pnand %p8004_p1, %p8001_p0 }
   0xb   :  { %8009 = shalt.err (!%p8006_p2)
}
   0xc   :  { %s8010_s22 = scalar_lea.vmem %s41_s14, 4096  ;;  %p8015_p4 = scmp.lt.s32.totalorder %s41_s14, %s41_s14 }
   0xd   :  { %p8011_p3 = scmp.ne.s32.totalorder %s41_s14, %s8010_s22  ;;  %p8016_p5 = scmp.lt.s32.totalorder %s8010_s22, %s8010_s22 }
   0xf   :  { %p8017_p6 = por %p8016_p5, %p8015_p4 }
  0x11   :  { %p8018_p7 = pnand %p8017_p6, %p8011_p3 }
  0x13   :  { %8021 = shalt.err (!%p8018_p7)
}
  0x14   :  { %s8211_s23 = smov 256   ;;  %s8212_s24 = smov 16  }
  0x15   :  { %46 = dma.hbm_to_vmem [thread:$0]  %s8585_s3, 4096, %s41_s14, [#allocation6], %s8211_s23, %s8211_s23, %s8212_s24  }
  0x16   :  { %s8213_s27 = smov [#allocation8]   ;;  %s8214_s29 = smov [#allocation11]  }
  0x17   :  { %s65_s28 = sshll.u32 %s8213_s27, 4  ;;  %s87_s30 = sshll.u32 %s8214_s29, 4  ;;  %s66_s28 = int_to_ptr.vmem [resolvable:$true] %s65_s28  ;;  %s88_s30 = int_to_ptr.vmem [resolvable:$true] %s87_s30 }
  0x18   :  { %s8022_s13 = scalar_lea.hbm %s8587_s5, 64 }
  0x19   :  { %p8023_p8 = scmp.ne.s32.totalorder %s8587_s5, %s8022_s13  ;;  %p8026_p9 = scmp.lt.u32.totalorder %s8022_s13, %s8587_s5 }
  0x1b   :  { %p8028_p10 = pnand %p8026_p9, %p8023_p8 }
  0x1d   :  { %8031 = shalt.err (!%p8028_p10)
}
  0x1e   :  { %s8032_s3 = scalar_lea.vmem %s66_s28, 64  ;;  %p8037_p12 = scmp.lt.s32.totalorder %s66_s28, %s66_s28 }
  0x1f   :  { %p8033_p11 = scmp.ne.s32.totalorder %s66_s28, %s8032_s3  ;;  %p8038_p13 = scmp.lt.s32.totalorder %s8032_s3, %s8032_s3 }
  0x21   :  { %p8039_p0 = por %p8038_p13, %p8037_p12 }
  0x23   :  { %p8040_p1 = pnand %p8039_p0, %p8033_p11 }
  0x25   :  { %8043 = shalt.err (!%p8040_p1)
}
  0x26   :  { %68 = dma.hbm_to_vmem [thread:$0]  %s8587_s5, 64, %s66_s28, [#allocation9]  }
  0x27   :  { %s8044_s22 = scalar_lea.hbm %s8589_s7, 128 }
  0x28   :  { %p8045_p2 = scmp.ne.s32.totalorder %s8589_s7, %s8044_s22  ;;  %p8048_p3 = scmp.lt.u32.totalorder %s8044_s22, %s8589_s7 }
  0x2a   :  { %p8050_p4 = pnand %p8048_p3, %p8045_p2 }
  0x2c   :  { %8053 = shalt.err (!%p8050_p4)
}
  0x2d   :  { %s8054_s11 = scalar_lea.vmem %s88_s30, 128  ;;  %p8059_p6 = scmp.lt.s32.totalorder %s88_s30, %s88_s30 }
  0x2e   :  { %p8055_p5 = scmp.ne.s32.totalorder %s88_s30, %s8054_s11  ;;  %p8060_p7 = scmp.lt.s32.totalorder %s8054_s11, %s8054_s11 }
  0x30   :  { %p8061_p8 = por %p8060_p7, %p8059_p6 }
  0x32   :  { %p8062_p9 = pnand %p8061_p8, %p8055_p5 }
  0x34   :  { %8065 = shalt.err (!%p8062_p9)
}
  0x35   :  { %90 = dma.hbm_to_vmem [thread:$0]  %s8589_s7, 128, %s88_s30, [#allocation12]  }
  0x36   :  { %s8215_s12 = smov [#allocation2]   ;;  %s8216_s15 = smov [#allocation7]  }
  0x37   :  { %s31_s13 = sshll.u32 %s8215_s12, 4  ;;  %s52_s16 = sshll.u32 %s8216_s15, 4  ;;  %s32_s13 = int_to_ptr.vmem [resolvable:$true] %s31_s13  ;;  %s53_s16 = int_to_ptr.vmem [resolvable:$true] %s52_s16 }
  0x38   :  { %s8066_s3 = scalar_lea.hbm %s8584_s2, 128 }
  0x39   :  { %p8067_p10 = scmp.ne.s32.totalorder %s8584_s2, %s8066_s3  ;;  %p8070_p11 = scmp.lt.u32.totalorder %s8066_s3, %s8584_s2 }
  0x3b   :  { %p8072_p12 = pnand %p8070_p11, %p8067_p10 }
  0x3d   :  { %8075 = shalt.err (!%p8072_p12)
}
  0x3e   :  { %s8076_s7 = scalar_lea.vmem %s32_s13, 128  ;;  %p8081_p0 = scmp.lt.s32.totalorder %s32_s13, %s32_s13 }
  0x3f   :  { %p8077_p13 = scmp.ne.s32.totalorder %s32_s13, %s8076_s7  ;;  %p8082_p1 = scmp.lt.s32.totalorder %s8076_s7, %s8076_s7 }
  0x41   :  { %p8083_p2 = por %p8082_p1, %p8081_p0 }
  0x43   :  { %p8084_p3 = pnand %p8083_p2, %p8077_p13 }
  0x45   :  { %8087 = shalt.err (!%p8084_p3)
}
  0x46   :  { %34 = dma.hbm_to_vmem [thread:$0]  %s8584_s2, 128, %s32_s13, [#allocation3]  }
  0x47   :  { %s8088_s27 = scalar_lea.hbm %s8586_s4, 8192 }
  0x48   :  { %p8089_p4 = scmp.ne.s32.totalorder %s8586_s4, %s8088_s27  ;;  %p8092_p5 = scmp.lt.u32.totalorder %s8088_s27, %s8586_s4 }
  0x4a   :  { %p8094_p6 = pnand %p8092_p5, %p8089_p4 }
  0x4c   :  { %8097 = shalt.err (!%p8094_p6)
}
  0x4d   :  { %s8098_s12 = scalar_lea.vmem %s53_s16, 8192  ;;  %p8103_p8 = scmp.lt.s32.totalorder %s53_s16, %s53_s16 }
  0x4e   :  { %p8099_p7 = scmp.ne.s32.totalorder %s53_s16, %s8098_s12  ;;  %p8104_p9 = scmp.lt.s32.totalorder %s8098_s12, %s8098_s12 }
  0x50   :  { %p8105_p10 = por %p8104_p9, %p8103_p8 }
  0x52   :  { %p8106_p11 = pnand %p8105_p10, %p8099_p7 }
  0x54   :  { %8109 = shalt.err (!%p8106_p11)
}
  0x55   :  { %58 = dma.hbm_to_vmem [thread:$0]  %s8586_s4, 8192, %s53_s16, [#allocation6], %s8211_s23, %s8211_s23, %s8212_s24  }
  0x56   :  { %s8217_s15 = smov [#allocation10]   ;;  %s8110_s14 = scalar_lea.hbm %s8588_s6, 32768 }
  0x57   :  { %s74_s17 = sshll.u32 %s8217_s15, 4  ;;  %p8111_p12 = scmp.ne.s32.totalorder %s8588_s6, %s8110_s14  ;;  %s75_s17 = int_to_ptr.vmem [resolvable:$true] %s74_s17 }
  0x58   :  { %p8114_p13 = scmp.lt.u32.totalorder %s8110_s14, %s8588_s6 }
  0x5a   :  { %p8116_p0 = pnand %p8114_p13, %p8111_p12 }
  0x5c   :  { %8119 = shalt.err (!%p8116_p0)
}
  0x5d   :  { %s8120_s30 = scalar_lea.vmem %s75_s17, 32768  ;;  %p8125_p2 = scmp.lt.s32.totalorder %s75_s17, %s75_s17 }
  0x5e   :  { %p8121_p1 = scmp.ne.s32.totalorder %s75_s17, %s8120_s30  ;;  %p8126_p3 = scmp.lt.s32.totalorder %s8120_s30, %s8120_s30 }
  0x60   :  { %p8127_p4 = por %p8126_p3, %p8125_p2 }
  0x62   :  { %p8128_p5 = pnand %p8127_p4, %p8121_p1 }
  0x64   :  { %8131 = shalt.err (!%p8128_p5)
}
  0x65   :  { %s8218_s4 = smov 512   ;;  %s8219_s23 = smov 32  }
  0x66   :  { %80 = dma.hbm_to_vmem [thread:$0]  %s8588_s6, 32768, %s75_s17, [#allocation9], %s8218_s4, %s8218_s4, %s8219_s23  }
  0x67   :  { %s8220_s22 = smov [#allocation13]   ;;  %s8132_s29 = scalar_lea.hbm %s8590_s8, 57344 }
  0x68   :  { %s96_s25 = sshll.u32 %s8220_s22, 4  ;;  %p8133_p6 = scmp.ne.s32.totalorder %s8590_s8, %s8132_s29  ;;  %s97_s25 = int_to_ptr.vmem [resolvable:$true] %s96_s25 }
  0x69   :  { %p8136_p7 = scmp.lt.u32.totalorder %s8132_s29, %s8590_s8 }
  0x6b   :  { %p8138_p8 = pnand %p8136_p7, %p8133_p6 }
  0x6d   :  { %8141 = shalt.err (!%p8138_p8)
}
  0x6e   :  { %s8142_s2 = scalar_lea.vmem %s97_s25, 57344  ;;  %p8147_p10 = scmp.lt.s32.totalorder %s97_s25, %s97_s25 }
  0x6f   :  { %p8143_p9 = scmp.ne.s32.totalorder %s97_s25, %s8142_s2  ;;  %p8148_p11 = scmp.lt.s32.totalorder %s8142_s2, %s8142_s2 }
  0x71   :  { %p8149_p12 = por %p8148_p11, %p8147_p10 }
  0x73   :  { %p8150_p13 = pnand %p8149_p12, %p8143_p9 }
  0x75   :  { %8153 = shalt.err (!%p8150_p13)
}
  0x76   :  { %s8221_s6 = smov 448   ;;  %s8222_s13 = smov 28  }
  0x77   :  { %102 = dma.hbm_to_vmem [thread:$0]  %s8590_s8, 57344, %s97_s25, [#allocation12], %s8221_s6, %s8221_s6, %s8222_s13  }
  0x78   :  { %s8223_s18 = smov [#allocation14]   ;;  %s8154_s20 = scalar_lea.hbm %s8591_s9, 112 }
  0x79   :  { %s109_s3 = sshll.u32 %s8223_s18, 4  ;;  %p8155_p0 = scmp.ne.s32.totalorder %s8591_s9, %s8154_s20  ;;  %s110_s3 = int_to_ptr.vmem [resolvable:$true] %s109_s3 }
  0x7a   :  { %p8158_p1 = scmp.lt.u32.totalorder %s8154_s20, %s8591_s9 }
  0x7c   :  { %p8160_p2 = pnand %p8158_p1, %p8155_p0 }
  0x7e   :  { %8163 = shalt.err (!%p8160_p2)
}
  0x7f   :  { %s8164_s23 = scalar_lea.vmem %s110_s3, 112  ;;  %s8168_s8 = scalar_lea.vmem %s110_s3, 128 }
  0x80   :  { %p8165_p3 = scmp.ne.s32.totalorder %s110_s3, %s8164_s23  ;;  %p8169_p4 = scmp.lt.s32.totalorder %s110_s3, %s110_s3 }
  0x81   :  { %p8170_p5 = scmp.lt.s32.totalorder %s8168_s8, %s8164_s23 }
  0x83   :  { %p8171_p6 = por %p8170_p5, %p8169_p4 }
  0x85   :  { %p8172_p7 = pnand %p8171_p6, %p8165_p3 }
  0x87   :  { %8175 = shalt.err (!%p8172_p7)
}
  0x88   :  { %112 = dma.hbm_to_vmem [thread:$0]  %s8591_s9, 112, %s110_s3, [#allocation15]  }
  0x89   :  { %8198 = dma.done.wait [#allocation3], 128  }
  0x8a   :  { %8199 = vsyncadd [#allocation3], 4294967168 }
  0x8b   :  { %8200 = dma.done.wait [#allocation6], 12288  }
  0x8c   :  { %8201 = vsyncadd [#allocation6], 4294955008 }
  0x8d   :  { %8202 = dma.done.wait [#allocation9], 32832  }
  0x8e   :  { %8203 = vsyncadd [#allocation9], 4294934464 }
  0x8f   :  { %8204 = dma.done.wait [#allocation12], 57472  }
  0x90   :  { %8205 = vsyncadd [#allocation12], 4294909824 }
  0x91   :  { %8206 = dma.done.wait [#allocation15], 112  }
  0x92   :  { %8207 = vsyncadd [#allocation15], 4294967184  ;;  %v8224_v0 = vmov 0   ;;  %v140_v1 = vld [vmem:[%s8583_s1] sm:$0xff]  ;;  %v150_v2 = vld [vmem:[#allocation5 + $0x8] sm:$0xff]  ;;  %v8225_v8 = vmov 0.0   ;;  %v138_v57 = vlaneseq }
  0x93   :  { %7247 = vset.pattern.permute.xlu0 %v8224_v0  ;;  %300 = vmatprep.mubr.bf16.mxu1 %v8224_v0  ;;  %v152_v3 = vld [vmem:[#allocation5 + $0x18] sm:$0xff]  ;;  %v149_v5 = vld [vmem:[#allocation5] sm:$0xff]  ;;  %v151_v6 = vld [vmem:[#allocation5 + $0x10] sm:$0xff]  ;;  %vm261_vm0 = vcmask 1043456   ;;  %vm257_vm1 = vcmask 64512   ;;  %v8226_v63 = vmov 1.0  }
  0x94   :  { %142 = vperm.xlu0 %7247, %v140_v1   ;;  %v7131_v4 = vpack.c.bf16 %v152_v3, %v150_v2  ;;  %v154_v7 = vld [vmem:[#allocation5 + $0x28] sm:$0xff]  ;;  %245 = vmatprep.mubr.f32.mxu0 %v8225_v8  ;;  %v7133_v9 = vpack.c.bf16 %v151_v6, %v149_v5  ;;  %v156_v10 = vld [vmem:[#allocation5 + $0x38] sm:$0xff]  ;;  %v153_v11 = vld [vmem:[#allocation5 + $0x20] sm:$0xff]  ;;  %v139_v58 = vand.u32 127, %v138_v57 }
  0x95   :  { %v155_v12 = vld [vmem:[#allocation5 + $0x30] sm:$0xff]  ;;  %v7135_v13 = vpack.c.bf16 %v156_v10, %v154_v7  ;;  %v158_v14 = vld [vmem:[#allocation5 + $0x48] sm:$0xff]  ;;  %v160_v15 = vld [vmem:[#allocation5 + $0x58] sm:$0xff] }
  0x96   :  { %7132 = vmatprep.subr.bf16.mxu0 %v7131_v4  ;;  %v7137_v16 = vpack.c.bf16 %v155_v12, %v153_v11  ;;  %v7139_v17 = vpack.c.bf16 %v160_v15, %v158_v14  ;;  %v157_v18 = vld [vmem:[#allocation5 + $0x40] sm:$0xff]  ;;  %v159_v19 = vld [vmem:[#allocation5 + $0x50] sm:$0xff]  ;;  %v162_v20 = vld [vmem:[#allocation5 + $0x68] sm:$0xff] }
  0x97   :  { %7134 = vmatpush1.bf16.msra.mxu0 %v7133_v9  ;;  %v164_v21 = vld [vmem:[#allocation5 + $0x78] sm:$0xff]  ;;  %v7141_v22 = vpack.c.bf16 %v159_v19, %v157_v18  ;;  %v161_v24 = vld [vmem:[#allocation5 + $0x60] sm:$0xff]  ;;  %v163_v25 = vld [vmem:[#allocation5 + $0x70] sm:$0xff] }
  0x98   :  { %7136 = vmatprep.subr.bf16.mxu0 %v7135_v13  ;;  %v7143_v23 = vpack.c.bf16 %v164_v21, %v162_v20  ;;  %v148_v26 = vld [vmem:[#allocation2] sm:$0xff]  ;;  %v166_v27 = vld [vmem:[#allocation5 + $0x88] sm:$0xff]  ;;  %v165_v31 = vld [vmem:[#allocation5 + $0x80] sm:$0xff]  ;;  %v7145_v32 = vpack.c.bf16 %v163_v25, %v161_v24 }
  0x99   :  { %v168_v28 = vld [vmem:[#allocation5 + $0x98] sm:$0xff]  ;;  %v6272_v29 = vcombine.high %v148_v26, %v148_v26  ;;  %v6271_v30 = vcombine.low %v148_v26, %v148_v26  ;;  %v167_v33 = vld [vmem:[#allocation5 + $0x90] sm:$0xff]  ;;  %v170_v34 = vld [vmem:[#allocation5 + $0xa8] sm:$0xff] }
  0x9a   :  { %v7147_v36 = vpack.c.bf16 %v168_v28, %v166_v27  ;;  %v147_v37 = vld [vmem:[%s8582_s0] sm:$0xf]  ;;  %v7149_v39 = vpack.c.bf16 %v167_v33, %v165_v31  ;;  %v169_v40 = vld [vmem:[#allocation5 + $0xa0] sm:$0xff]  ;;  %v171_v41 = vld [vmem:[#allocation5 + $0xb0] sm:$0xff]  ;;  %s8227_s0 = smov [#allocation16]  }
  0x9b   :  { %7138 = vmatpush1.bf16.msra.mxu0 %v7137_v16  ;;  %6273 = vmatprep.subr.msk.bf16.mxu1 %vm261_vm0, %v6272_v29  ;;  %v263_v35 = vsel %vm261_vm0, %v6271_v30, 0  ;;  %v172_v38 = vld [vmem:[#allocation5 + $0xb8] sm:$0xff]  ;;  %v174_v43 = vld [vmem:[#allocation5 + $0xc8] sm:$0xff]  ;;  %v173_v45 = vld [vmem:[#allocation5 + $0xc0] sm:$0xff]  ;;  %v7153_v47 = vpack.c.bf16 %v171_v41, %v169_v40  ;;  %s6256_s26 = sshll.u32 %s8227_s0, 4  ;;  %s6257_s26 = int_to_ptr.vmem [resolvable:$true] %s6256_s26 }
  0x9c   :  { %7140 = vmatprep.subr.bf16.mxu0 %v7139_v17  ;;  %269 = vmatpush1.bf16.msra.mxu1 %v263_v35  ;;  %v7151_v42 = vpack.c.bf16 %v172_v38, %v170_v34  ;;  %v176_v44 = vld [vmem:[#allocation5 + $0xd8] sm:$0xff]  ;;  %v175_v46 = vld [vmem:[#allocation5 + $0xd0] sm:$0xff]  ;;  %v178_v48 = vld [vmem:[#allocation5 + $0xe8] sm:$0xff]  ;;  %s8176_s27 = scalar_lea.vmem %s6257_s26, 896  ;;  %p8181_p9 = scmp.lt.s32.totalorder %s6257_s26, %s6257_s26 }
  0x9d   :  { %v180_v49 = vld [vmem:[#allocation5 + $0xf8] sm:$0xff]  ;;  %v7155_v50 = vpack.c.bf16 %v176_v44, %v174_v43  ;;  %v177_v51 = vld [vmem:[#allocation5 + $0xe0] sm:$0xff]  ;;  %v179_v52 = vld [vmem:[#allocation5 + $0xf0] sm:$0xff]  ;;  %v7157_v53 = vpack.c.bf16 %v175_v46, %v173_v45  ;;  %p8177_p8 = scmp.ne.s32.totalorder %s6257_s26, %s8176_s27  ;;  %p8182_p10 = scmp.lt.s32.totalorder %s8176_s27, %s8176_s27 }
  0x9e   :  { %v7159_v54 = vpack.c.bf16 %v180_v49, %v178_v48  ;;  %v7252_v55 = vld [vmem:[#allocation7 + $0x4] ss:$16 sps:$4 sm:$0xff]   ;;  %v7161_v56 = vpack.c.bf16 %v179_v52, %v177_v51  ;;  %v7250_v59 = vld [vmem:[#allocation7] ss:$16 sps:$4 sm:$0xff]   ;;  %v7300_v28 = vld [vmem:[#allocation7 + $0xc] ss:$16 sps:$4 sm:$0xff]  }
  0x9f   :  { %7142 = vmatpush1.bf16.msra.mxu0 %v7141_v22  ;;  %6274 = vmatmul.mubr.msk.bf16.vlgmr.msra.gmra.mrb[0].mxu1 %vm257_vm1, %v147_v37  ;;  %v7255_v60 = vld [vmem:[#allocation7 + $0x24] ss:$16 sps:$4 sm:$0xff]   ;;  %v7253_v62 = vld [vmem:[#allocation7 + $0x20] ss:$16 sps:$4 sm:$0xff]   ;;  %p8183_p11 = por %p8182_p10, %p8181_p9 }
  0xa0   :  { %7144 = vmatprep.subr.bf16.mxu0 %v7143_v23  ;;  %v7258_v0 = vld [vmem:[#allocation7 + $0x44] ss:$16 sps:$4 sm:$0xff]   ;;  %v7256_v1 = vld [vmem:[#allocation7 + $0x40] ss:$16 sps:$4 sm:$0xff]  }
  0xa1   :  { %v7261_v2 = vld [vmem:[#allocation7 + $0x64] ss:$16 sps:$4 sm:$0xff]   ;;  %v7259_v3 = vld [vmem:[#allocation7 + $0x60] ss:$16 sps:$4 sm:$0xff]   ;;  %p8184_p12 = pnand %p8183_p11, %p8177_p8 }
  0xa2   :  { %v7264_v4 = vld [vmem:[#allocation7 + $0x84] ss:$16 sps:$4 sm:$0xff]   ;;  %v7262_v5 = vld [vmem:[#allocation7 + $0x80] ss:$16 sps:$4 sm:$0xff]  }
  0xa3   :  { %7146 = vmatpush1.bf16.msra.mxu0 %v7145_v32  ;;  %v7267_v6 = vld [vmem:[#allocation7 + $0xa4] ss:$16 sps:$4 sm:$0xff]   ;;  %v7265_v7 = vld [vmem:[#allocation7 + $0xa0] ss:$16 sps:$4 sm:$0xff]  }
  0xa4   :  { %7148 = vmatprep.subr.bf16.mxu0 %v7147_v36  ;;  %v7270_v8 = vld [vmem:[#allocation7 + $0xc4] ss:$16 sps:$4 sm:$0xff]   ;;  %v7268_v9 = vld [vmem:[#allocation7 + $0xc0] ss:$16 sps:$4 sm:$0xff]  }
  0xa5   :  { %v7273_v10 = vld [vmem:[#allocation7 + $0xe4] ss:$16 sps:$4 sm:$0xff]   ;;  %v7271_v11 = vld [vmem:[#allocation7 + $0xe0] ss:$16 sps:$4 sm:$0xff]  }
  0xa6   :  { %v7276_v12 = vld [vmem:[#allocation7 + $0x104] ss:$16 sps:$4 sm:$0xff]   ;;  %v7274_v13 = vld [vmem:[#allocation7 + $0x100] ss:$16 sps:$4 sm:$0xff]  }
  0xa7   :  { %7150 = vmatpush1.bf16.msra.mxu0 %v7149_v39  ;;  %v7279_v14 = vld [vmem:[#allocation7 + $0x124] ss:$16 sps:$4 sm:$0xff]   ;;  %v7277_v15 = vld [vmem:[#allocation7 + $0x120] ss:$16 sps:$4 sm:$0xff]  }
  0xa8   :  { %7152 = vmatprep.subr.bf16.mxu0 %v7151_v42  ;;  %v7282_v16 = vld [vmem:[#allocation7 + $0x144] ss:$16 sps:$4 sm:$0xff]   ;;  %v7280_v17 = vld [vmem:[#allocation7 + $0x140] ss:$16 sps:$4 sm:$0xff]  }
  0xa9   :  { %v7285_v18 = vld [vmem:[#allocation7 + $0x164] ss:$16 sps:$4 sm:$0xff]   ;;  %v7283_v19 = vld [vmem:[#allocation7 + $0x160] ss:$16 sps:$4 sm:$0xff]  }
  0xaa   :  { %v7288_v20 = vld [vmem:[#allocation7 + $0x184] ss:$16 sps:$4 sm:$0xff]   ;;  %v7286_v21 = vld [vmem:[#allocation7 + $0x180] ss:$16 sps:$4 sm:$0xff]  }
  0xab   :  { %7154 = vmatpush1.bf16.msra.mxu0 %v7153_v47  ;;  %v7291_v22 = vld [vmem:[#allocation7 + $0x1a4] ss:$16 sps:$4 sm:$0xff]   ;;  %v7289_v23 = vld [vmem:[#allocation7 + $0x1a0] ss:$16 sps:$4 sm:$0xff]  }
  0xac   :  { %7156 = vmatprep.subr.bf16.mxu0 %v7155_v50  ;;  %v7294_v24 = vld [vmem:[#allocation7 + $0x1c4] ss:$16 sps:$4 sm:$0xff]   ;;  %v7292_v25 = vld [vmem:[#allocation7 + $0x1c0] ss:$16 sps:$4 sm:$0xff]  }
  0xad   :  { %v7297_v26 = vld [vmem:[#allocation7 + $0x1e4] ss:$16 sps:$4 sm:$0xff]   ;;  %v7295_v27 = vld [vmem:[#allocation7 + $0x1e0] ss:$16 sps:$4 sm:$0xff]  }
  0xae   :  { %v809_v33 = vld [vmem:[#allocation10] sm:$0xff] }
  0xaf   :  { %7158 = vmatpush1.bf16.msra.mxu0 %v7157_v53  ;;  %v813_v34 = vld [vmem:[#allocation10 + $0x20] sm:$0xff] }
  0xb0   :  { %7160 = vmatprep.subr.bf16.mxu0 %v7159_v54  ;;  %v6339_v35 = vcombine.low %v809_v33, %v813_v34  ;;  %v6340_v36 = vcombine.high %v809_v33, %v813_v34  ;;  %v817_v37 = vld [vmem:[#allocation10 + $0x40] sm:$0xff] }
  0xb1   :  { %v821_v38 = vld [vmem:[#allocation10 + $0x60] sm:$0xff] }
  0xb2   :  { %v6348_v39 = vcombine.high %v817_v37, %v821_v38  ;;  %2387 = vmatprep.subr.bf16.mxu1 %v6340_v36  ;;  %v6347_v40 = vcombine.low %v817_v37, %v821_v38  ;;  %v825_v41 = vld [vmem:[#allocation10 + $0x80] sm:$0xff]  ;;  %v7303_v37 = vld [vmem:[#allocation7 + $0x2c] ss:$16 sps:$4 sm:$0xff]  }
  0xb3   :  { %7162 = vmatpush1.bf16.msra.mxu0 %v7161_v56  ;;  %2388 = vmatpush1.bf16.msra.mxu1 %v6339_v35  ;;  %v829_v42 = vld [vmem:[#allocation10 + $0xa0] sm:$0xff] }
  0xb4   :  { %719 = vmatprep.subr.bf16.mxu0 %v7252_v55  ;;  %2389 = vmatprep.subr.bf16.mxu1 %v6348_v39  ;;  %v6356_v43 = vcombine.high %v825_v41, %v829_v42  ;;  %v6355_v44 = vcombine.low %v825_v41, %v829_v42  ;;  %v833_v45 = vld [vmem:[#allocation10 + $0xc0] sm:$0xff]  ;;  %v7306_v39 = vld [vmem:[#allocation7 + $0x4c] ss:$16 sps:$4 sm:$0xff]  }
  0xb5   :  { %v837_v46 = vld [vmem:[#allocation10 + $0xe0] sm:$0xff]  ;;  %v7312_v41 = vld [vmem:[#allocation7 + $0x8c] ss:$16 sps:$4 sm:$0xff]  }
  0xb6   :  { %v6364_v47 = vcombine.high %v833_v45, %v837_v46  ;;  %v6363_v48 = vcombine.low %v833_v45, %v837_v46  ;;  %v841_v49 = vld [vmem:[#allocation10 + $0x100] sm:$0xff]  ;;  %v7318_v45 = vld [vmem:[#allocation7 + $0xcc] ss:$16 sps:$4 sm:$0xff]  }
  0xb7   :  { %2390 = vmatpush1.bf16.msra.mxu1 %v6347_v40  ;;  %v845_v50 = vld [vmem:[#allocation10 + $0x120] sm:$0xff]  ;;  %v7309_v40 = vld [vmem:[#allocation7 + $0x6c] ss:$16 sps:$4 sm:$0xff]  }
  0xb8   :  { %2391 = vmatprep.subr.bf16.mxu1 %v6356_v43  ;;  %v6372_v51 = vcombine.high %v841_v49, %v845_v50  ;;  %v6371_v52 = vcombine.low %v841_v49, %v845_v50  ;;  %v849_v53 = vld [vmem:[#allocation10 + $0x140] sm:$0xff]  ;;  %v7315_v43 = vld [vmem:[#allocation7 + $0xac] ss:$16 sps:$4 sm:$0xff]  }
  0xb9   :  { %v853_v54 = vld [vmem:[#allocation10 + $0x160] sm:$0xff]  ;;  %v7324_v49 = vld [vmem:[#allocation7 + $0x10c] ss:$16 sps:$4 sm:$0xff]  }
  0xba   :  { %v6380_v55 = vcombine.high %v849_v53, %v853_v54  ;;  %v6379_v56 = vcombine.low %v849_v53, %v853_v54  ;;  %v7298_v35 = vld [vmem:[#allocation7 + $0x8] ss:$16 sps:$4 sm:$0xff]   ;;  %v7330_v53 = vld [vmem:[#allocation7 + $0x14c] ss:$16 sps:$4 sm:$0xff]  }
  0xbb   :  { %2392 = vmatpush1.bf16.msra.mxu1 %v6355_v44  ;;  %v7301_v38 = vld [vmem:[#allocation7 + $0x28] ss:$16 sps:$4 sm:$0xff]  }
  0xbc   :  { %2393 = vmatprep.subr.bf16.mxu1 %v6364_v47  ;;  %v7310_v42 = vld [vmem:[#allocation7 + $0x88] ss:$16 sps:$4 sm:$0xff]   ;;  %v7321_v47 = vld [vmem:[#allocation7 + $0xec] ss:$16 sps:$4 sm:$0xff]  }
  0xbd   :  { %v7313_v44 = vld [vmem:[#allocation7 + $0xa8] ss:$16 sps:$4 sm:$0xff]  }
  0xbe   :  { %v7316_v46 = vld [vmem:[#allocation7 + $0xc8] ss:$16 sps:$4 sm:$0xff]  }
  0xbf   :  { %2394 = vmatpush1.bf16.msra.mxu1 %v6363_v48  ;;  %v7319_v48 = vld [vmem:[#allocation7 + $0xe8] ss:$16 sps:$4 sm:$0xff]  }
  0xc0   :  { %2395 = vmatprep.subr.bf16.mxu1 %v6372_v51  ;;  %v7322_v50 = vld [vmem:[#allocation7 + $0x108] ss:$16 sps:$4 sm:$0xff]   ;;  %v7327_v51 = vld [vmem:[#allocation7 + $0x12c] ss:$16 sps:$4 sm:$0xff]  }
  0xc1   :  { %v7328_v54 = vld [vmem:[#allocation7 + $0x148] ss:$16 sps:$4 sm:$0xff]  }
  0xc3   :  { %2396 = vmatpush1.bf16.msra.mxu1 %v6371_v52  ;;  %v7325_v52 = vld [vmem:[#allocation7 + $0x128] ss:$16 sps:$4 sm:$0xff]  }
  0xc4   :  { %2397 = vmatprep.subr.bf16.mxu1 %v6380_v55  ;;  %v7333_v55 = vld [vmem:[#allocation7 + $0x16c] ss:$16 sps:$4 sm:$0xff]  }
  0xc7   :  { %2398 = vmatpush1.bf16.msra.mxu1 %v6379_v56  ;;  %v7331_v56 = vld [vmem:[#allocation7 + $0x168] ss:$16 sps:$4 sm:$0xff]  }
 0x113   :  { %v143_v61 = vpop.permute.xlu0 %142 }
 0x114   :  { %vm144_vm2 = vcmp.eq.s32.totalorder %v139_v58, %v143_v61  ;;  %v857_v58 = vld [vmem:[#allocation10 + $0x180] sm:$0xff] }
 0x115   :  { %6270 = vmatmul.mubr.msk.f32.vlgmr.msra.gmra.mrb[0].mxu0 %vm144_vm2, %v8226_v63  ;;  %v869_v63 = vld [vmem:[#allocation10 + $0x1e0] sm:$0xff] }
 0x116   :  { %720 = vmatpush1.bf16.msra.mxu0 %v7250_v59  ;;  %v861_v59 = vld [vmem:[#allocation10 + $0x1a0] sm:$0xff] }
 0x117   :  { %721 = vmatprep.subr.bf16.mxu0 %v7255_v60  ;;  %v6388_v60 = vcombine.high %v857_v58, %v861_v59  ;;  %v6387_v61 = vcombine.low %v857_v58, %v861_v59  ;;  %v7336_v58 = vld [vmem:[#allocation7 + $0x18c] ss:$16 sps:$4 sm:$0xff]   ;;  %v7334_v59 = vld [vmem:[#allocation7 + $0x188] ss:$16 sps:$4 sm:$0xff]  }
 0x119   :  { %2399 = vmatprep.subr.bf16.mxu1 %v6388_v60  ;;  %v7339_v60 = vld [vmem:[#allocation7 + $0x1ac] ss:$16 sps:$4 sm:$0xff]  }
 0x11a   :  { %722 = vmatpush1.bf16.msra.mxu0 %v7253_v62  ;;  %v865_v62 = vld [vmem:[#allocation10 + $0x1c0] sm:$0xff]  ;;  %2400 = vmatpush1.bf16.msra.mxu1 %v6387_v61 }
 0x11b   :  { %723 = vmatprep.subr.bf16.mxu0 %v7258_v0  ;;  %v6396_v0 = vcombine.high %v865_v62, %v869_v63  ;;  %v7337_v61 = vld [vmem:[#allocation7 + $0x1a8] ss:$16 sps:$4 sm:$0xff]  }
 0x11d   :  { %2401 = vmatprep.subr.bf16.mxu1 %v6396_v0  ;;  %v7345_v0 = vld [vmem:[#allocation7 + $0x1ec] ss:$16 sps:$4 sm:$0xff]  }
 0x11e   :  { %724 = vmatpush1.bf16.msra.mxu0 %v7256_v1  ;;  %v6395_v1 = vcombine.low %v865_v62, %v869_v63  ;;  %v7342_v62 = vld [vmem:[#allocation7 + $0x1cc] ss:$16 sps:$4 sm:$0xff]   ;;  %v7340_v63 = vld [vmem:[#allocation7 + $0x1c8] ss:$16 sps:$4 sm:$0xff]  }
 0x11f   :  { %725 = vmatprep.subr.bf16.mxu0 %v7261_v2  ;;  %v873_v2 = vld [vmem:[#allocation10 + $0x200] sm:$0xff] }
 0x120   :  { %2402 = vmatpush1.bf16.msra.mxu1 %v6395_v1  ;;  %v810_v1 = vld [vmem:[#allocation10 + $0x8] sm:$0xff] }
 0x122   :  { %726 = vmatpush1.bf16.msra.mxu0 %v7259_v3  ;;  %v877_v3 = vld [vmem:[#allocation10 + $0x220] sm:$0xff] }
 0x123   :  { %727 = vmatprep.subr.bf16.mxu0 %v7264_v4  ;;  %v6404_v4 = vcombine.high %v873_v2, %v877_v3 }
 0x125   :  { %2403 = vmatprep.subr.bf16.mxu1 %v6404_v4 }
 0x126   :  { %728 = vmatpush1.bf16.msra.mxu0 %v7262_v5  ;;  %v6403_v5 = vcombine.low %v873_v2, %v877_v3  ;;  %v814_v2 = vld [vmem:[#allocation10 + $0x28] sm:$0xff]  ;;  %v7343_v3 = vld [vmem:[#allocation7 + $0x1e8] ss:$16 sps:$4 sm:$0xff]  }
 0x127   :  { %729 = vmatprep.subr.bf16.mxu0 %v7267_v6  ;;  %v881_v6 = vld [vmem:[#allocation10 + $0x240] sm:$0xff]  ;;  %v6342_v4 = vcombine.high %v810_v1, %v814_v2 }
 0x128   :  { %2404 = vmatpush1.bf16.msra.mxu1 %v6403_v5  ;;  %v818_v5 = vld [vmem:[#allocation10 + $0x48] sm:$0xff] }
 0x12a   :  { %730 = vmatpush1.bf16.msra.mxu0 %v7265_v7  ;;  %v885_v7 = vld [vmem:[#allocation10 + $0x260] sm:$0xff] }
 0x12b   :  { %731 = vmatprep.subr.bf16.mxu0 %v7270_v8  ;;  %v6412_v8 = vcombine.high %v881_v6, %v885_v7 }
 0x12d   :  { %2405 = vmatprep.subr.bf16.mxu1 %v6412_v8 }
 0x12e   :  { %732 = vmatpush1.bf16.msra.mxu0 %v7268_v9  ;;  %v6411_v9 = vcombine.low %v881_v6, %v885_v7  ;;  %v822_v6 = vld [vmem:[#allocation10 + $0x68] sm:$0xff]  ;;  %v6341_v7 = vcombine.low %v810_v1, %v814_v2 }
 0x12f   :  { %733 = vmatprep.subr.bf16.mxu0 %v7273_v10  ;;  %v889_v10 = vld [vmem:[#allocation10 + $0x280] sm:$0xff]  ;;  %v6350_v8 = vcombine.high %v818_v5, %v822_v6  ;;  %v906_v1 = vld [vmem:[#allocation10 + $0x308] sm:$0xff] }
 0x130   :  { %2406 = vmatpush1.bf16.msra.mxu1 %v6411_v9  ;;  %v826_v9 = vld [vmem:[#allocation10 + $0x88] sm:$0xff] }
 0x131   :  { %v910_v2 = vld [vmem:[#allocation10 + $0x328] sm:$0xff] }
 0x132   :  { %734 = vmatpush1.bf16.msra.mxu0 %v7271_v11  ;;  %v893_v11 = vld [vmem:[#allocation10 + $0x2a0] sm:$0xff] }
 0x133   :  { %735 = vmatprep.subr.bf16.mxu0 %v7276_v12  ;;  %v6420_v12 = vcombine.high %v889_v10, %v893_v11 }
 0x135   :  { %2407 = vmatprep.subr.bf16.mxu1 %v6420_v12 }
 0x136   :  { %736 = vmatpush1.bf16.msra.mxu0 %v7274_v13  ;;  %v6419_v13 = vcombine.low %v889_v10, %v893_v11  ;;  %v830_v10 = vld [vmem:[#allocation10 + $0xa8] sm:$0xff]  ;;  %v6349_v11 = vcombine.low %v818_v5, %v822_v6 }
 0x137   :  { %737 = vmatprep.subr.bf16.mxu0 %v7279_v14  ;;  %v897_v14 = vld [vmem:[#allocation10 + $0x2c0] sm:$0xff]  ;;  %v6358_v12 = vcombine.high %v826_v9, %v830_v10  ;;  %v914_v5 = vld [vmem:[#allocation10 + $0x348] sm:$0xff] }
 0x138   :  { %2408 = vmatpush1.bf16.msra.mxu1 %v6419_v13  ;;  %v834_v13 = vld [vmem:[#allocation10 + $0xc8] sm:$0xff] }
 0x139   :  { %v918_v6 = vld [vmem:[#allocation10 + $0x368] sm:$0xff] }
 0x13a   :  { %738 = vmatpush1.bf16.msra.mxu0 %v7277_v15  ;;  %v901_v15 = vld [vmem:[#allocation10 + $0x2e0] sm:$0xff] }
 0x13b   :  { %739 = vmatprep.subr.bf16.mxu0 %v7282_v16  ;;  %v6428_v16 = vcombine.high %v897_v14, %v901_v15 }
 0x13d   :  { %2409 = vmatprep.subr.bf16.mxu1 %v6428_v16 }
 0x13e   :  { %740 = vmatpush1.bf16.msra.mxu0 %v7280_v17  ;;  %v6427_v17 = vcombine.low %v897_v14, %v901_v15  ;;  %v838_v14 = vld [vmem:[#allocation10 + $0xe8] sm:$0xff]  ;;  %v6357_v15 = vcombine.low %v826_v9, %v830_v10 }
 0x13f   :  { %741 = vmatprep.subr.bf16.mxu0 %v7285_v18  ;;  %v905_v18 = vld [vmem:[#allocation10 + $0x300] sm:$0xff]  ;;  %v6366_v16 = vcombine.high %v834_v13, %v838_v14  ;;  %v922_v9 = vld [vmem:[#allocation10 + $0x388] sm:$0xff] }
 0x140   :  { %2410 = vmatpush1.bf16.msra.mxu1 %v6427_v17  ;;  %v842_v17 = vld [vmem:[#allocation10 + $0x108] sm:$0xff] }
 0x141   :  { %v926_v10 = vld [vmem:[#allocation10 + $0x3a8] sm:$0xff] }
 0x142   :  { %742 = vmatpush1.bf16.msra.mxu0 %v7283_v19  ;;  %v909_v19 = vld [vmem:[#allocation10 + $0x320] sm:$0xff] }
 0x143   :  { %743 = vmatprep.subr.bf16.mxu0 %v7288_v20  ;;  %v6436_v20 = vcombine.high %v905_v18, %v909_v19 }
 0x145   :  { %2411 = vmatprep.subr.bf16.mxu1 %v6436_v20 }
 0x146   :  { %744 = vmatpush1.bf16.msra.mxu0 %v7286_v21  ;;  %v6435_v21 = vcombine.low %v905_v18, %v909_v19  ;;  %v846_v18 = vld [vmem:[#allocation10 + $0x128] sm:$0xff]  ;;  %v6365_v19 = vcombine.low %v834_v13, %v838_v14 }
 0x147   :  { %745 = vmatprep.subr.bf16.mxu0 %v7291_v22  ;;  %v913_v22 = vld [vmem:[#allocation10 + $0x340] sm:$0xff]  ;;  %v6374_v20 = vcombine.high %v842_v17, %v846_v18  ;;  %v930_v13 = vld [vmem:[#allocation10 + $0x3c8] sm:$0xff] }
 0x148   :  { %2412 = vmatpush1.bf16.msra.mxu1 %v6435_v21  ;;  %v850_v21 = vld [vmem:[#allocation10 + $0x148] sm:$0xff] }
 0x149   :  { %v934_v14 = vld [vmem:[#allocation10 + $0x3e8] sm:$0xff] }
 0x14a   :  { %746 = vmatpush1.bf16.msra.mxu0 %v7289_v23  ;;  %v917_v23 = vld [vmem:[#allocation10 + $0x360] sm:$0xff] }
 0x14b   :  { %747 = vmatprep.subr.bf16.mxu0 %v7294_v24  ;;  %v6444_v24 = vcombine.high %v913_v22, %v917_v23 }
 0x14d   :  { %2413 = vmatprep.subr.bf16.mxu1 %v6444_v24 }
 0x14e   :  { %748 = vmatpush1.bf16.msra.mxu0 %v7292_v25  ;;  %v6443_v25 = vcombine.low %v913_v22, %v917_v23  ;;  %v854_v22 = vld [vmem:[#allocation10 + $0x168] sm:$0xff]  ;;  %v6373_v23 = vcombine.low %v842_v17, %v846_v18  ;;  %v6461_v17 = vcombine.low %v930_v13, %v934_v14 }
 0x14f   :  { %749 = vmatprep.subr.bf16.mxu0 %v7297_v26  ;;  %v6382_v24 = vcombine.high %v850_v21, %v854_v22 }
 0x150   :  { %2414 = vmatpush1.bf16.msra.mxu1 %v6443_v25  ;;  %v858_v25 = vld [vmem:[#allocation10 + $0x188] sm:$0xff] }
 0x152   :  { %750 = vmatpush1.bf16.msra.mxu0 %v7295_v27 }
 0x153   :  { %760 = vmatprep.subr.bf16.mxu0 %v7300_v28 }
 0x172   :  { %v8392_v29 = vpop.f32.mrb[0].mxu1 }
 0x173   :  { %v8394_v30 = vpop.f32.mrb[1].mxu1 }
 0x174   :  { %v306_v31 = vpop.f32.mrb[2].mxu1 }
 0x175   :  { %v307_v32 = vpop.f32.mrb[3].mxu1 }
 0x1e8   :  { %v247_v26 = vpop.f32.mrb[0].mxu0 }
 0x1e9   :  { %v303_v27 = vadd.f32 %v8392_v29, %v247_v26  ;;  %v249_v28 = vpop.f32.mrb[1].mxu0  ;;  %v7304_v29 = vld [vmem:[#allocation7 + $0x48] ss:$16 sps:$4 sm:$0xff]   ;;  %v862_v26 = vld [vmem:[#allocation10 + $0x1a8] sm:$0xff] }
 0x1ea   :  { %v305_v31 = vadd.f32 %v8394_v30, %v249_v28  ;;  %v7307_v30 = vld [vmem:[#allocation7 + $0x68] ss:$16 sps:$4 sm:$0xff]  }
 0x1eb   :  { %v309_v32 = vmax.f32 %v303_v27, 0.0  ;;  %v6381_v27 = vcombine.low %v850_v21, %v854_v22  ;;  %v921_v28 = vld [vmem:[#allocation10 + $0x380] sm:$0xff]  ;;  %v8424_v21 = vld [vmem:[#allocation8] sm:$0xf] }
 0x1ec   :  { %v310_v33 = vmax.f32 %v305_v31, 0.0  ;;  %v925_v31 = vld [vmem:[#allocation10 + $0x3a0] sm:$0xff] }
 0x1ed   :  { %v8398_v36 = vpack.c.bf16 %v309_v32, %v309_v32  ;;  %v6390_v32 = vcombine.high %v858_v25, %v862_v26 }
 0x1ee   :  { %v312_v34 = vpack.c.bf16 %v310_v33, %v310_v33  ;;  %v6452_v33 = vcombine.high %v921_v28, %v925_v31 }
 0x1f0   :  { %751 = vmatprep.mubr.bf16.mxu0 %v312_v34  ;;  %2415 = vmatprep.subr.bf16.mxu1 %v6452_v33  ;;  %v945_v33 = vld [vmem:[#allocation10 + $0x440] sm:$0xff] }
 0x1f1   :  { %752 = vmatmul.mubr.bf16.vlgmr.msra.gmra.mrb[4].mxu0 %v8398_v36 }
 0x1f2   :  { %761 = vmatpush1.bf16.msra.mxu0 %v7298_v35  ;;  %792 = vmatprep.mubr.bf16.mxu0 %v312_v34  ;;  %v866_v34 = vld [vmem:[#allocation10 + $0x1c8] sm:$0xff] }
 0x1f3   :  { %762 = vmatprep.subr.bf16.mxu0 %v7303_v37  ;;  %v870_v35 = vld [vmem:[#allocation10 + $0x1e8] sm:$0xff]  ;;  %v6389_v37 = vcombine.low %v858_v25, %v862_v26 }
 0x1f6   :  { %763 = vmatpush1.bf16.msra.mxu0 %v7301_v38  ;;  %v929_v38 = vld [vmem:[#allocation10 + $0x3c0] sm:$0xff] }
 0x1f7   :  { %764 = vmatprep.subr.bf16.mxu0 %v7306_v39  ;;  %v933_v39 = vld [vmem:[#allocation10 + $0x3e0] sm:$0xff] }
 0x1fa   :  { %765 = vmatpush1.bf16.msra.mxu0 %v7304_v29  ;;  %v6398_v29 = vcombine.high %v866_v34, %v870_v35 }
 0x1fb   :  { %766 = vmatprep.subr.bf16.mxu0 %v7309_v40  ;;  %v6460_v40 = vcombine.high %v929_v38, %v933_v39 }
 0x1fe   :  { %767 = vmatpush1.bf16.msra.mxu0 %v7307_v30  ;;  %v874_v30 = vld [vmem:[#allocation10 + $0x208] sm:$0xff] }
 0x1ff   :  { %768 = vmatprep.subr.bf16.mxu0 %v7312_v41  ;;  %v878_v41 = vld [vmem:[#allocation10 + $0x228] sm:$0xff] }
 0x202   :  { %769 = vmatpush1.bf16.msra.mxu0 %v7310_v42  ;;  %v6459_v42 = vcombine.low %v929_v38, %v933_v39 }
 0x203   :  { %770 = vmatprep.subr.bf16.mxu0 %v7315_v43  ;;  %v6397_v43 = vcombine.low %v866_v34, %v870_v35  ;;  %v949_v35 = vld [vmem:[#allocation10 + $0x460] sm:$0xff] }
 0x206   :  { %771 = vmatpush1.bf16.msra.mxu0 %v7313_v44  ;;  %v8402_v44 = vld [vmem:[#allocation10 + $0x400] sm:$0xff] }
 0x207   :  { %772 = vmatprep.subr.bf16.mxu0 %v7318_v45  ;;  %v8404_v45 = vld [vmem:[#allocation10 + $0x420] sm:$0xff] }
 0x20a   :  { %773 = vmatpush1.bf16.msra.mxu0 %v7316_v46  ;;  %v8406_v46 = vld [vmem:[#allocation10 + $0x408] sm:$0xff] }
 0x20b   :  { %774 = vmatprep.subr.bf16.mxu0 %v7321_v47  ;;  %v6406_v47 = vcombine.high %v874_v30, %v878_v41 }
 0x20e   :  { %775 = vmatpush1.bf16.msra.mxu0 %v7319_v48  ;;  %v6468_v48 = vcombine.high %v8402_v44, %v8404_v45 }
 0x20f   :  { %776 = vmatprep.subr.bf16.mxu0 %v7324_v49  ;;  %v8410_v49 = vld [vmem:[#allocation10 + $0x428] sm:$0xff] }
 0x210   :  { %v6470_v18 = vcombine.high %v8406_v46, %v8410_v49 }
 0x212   :  { %777 = vmatpush1.bf16.msra.mxu0 %v7322_v50  ;;  %v882_v50 = vld [vmem:[#allocation10 + $0x248] sm:$0xff] }
 0x213   :  { %778 = vmatprep.subr.bf16.mxu0 %v7327_v51  ;;  %v886_v51 = vld [vmem:[#allocation10 + $0x268] sm:$0xff] }
 0x216   :  { %779 = vmatpush1.bf16.msra.mxu0 %v7325_v52  ;;  %v6467_v52 = vcombine.low %v8402_v44, %v8404_v45 }
 0x217   :  { %780 = vmatprep.subr.bf16.mxu0 %v7330_v53  ;;  %v6469_v53 = vcombine.low %v8406_v46, %v8410_v49  ;;  %v969_v46 = vld [vmem:[#allocation10 + $0x500] sm:$0xff] }
 0x218   :  { %v973_v49 = vld [vmem:[#allocation10 + $0x520] sm:$0xff] }
 0x21a   :  { %781 = vmatpush1.bf16.msra.mxu0 %v7328_v54  ;;  %v6405_v54 = vcombine.low %v874_v30, %v878_v41  ;;  %v953_v30 = vld [vmem:[#allocation10 + $0x480] sm:$0xff] }
 0x21b   :  { %782 = vmatprep.subr.bf16.mxu0 %v7333_v55  ;;  %v6414_v55 = vcombine.high %v882_v50, %v886_v51  ;;  %v957_v41 = vld [vmem:[#allocation10 + $0x4a0] sm:$0xff] }
 0x21e   :  { %783 = vmatpush1.bf16.msra.mxu0 %v7331_v56  ;;  %v890_v56 = vld [vmem:[#allocation10 + $0x288] sm:$0xff] }
 0x21f   :  { %784 = vmatprep.subr.bf16.mxu0 %v7336_v58  ;;  %v894_v58 = vld [vmem:[#allocation10 + $0x2a8] sm:$0xff] }
 0x222   :  { %785 = vmatpush1.bf16.msra.mxu0 %v7334_v59  ;;  %v6413_v59 = vcombine.low %v882_v50, %v886_v51  ;;  %v6484_v50 = vcombine.high %v953_v30, %v957_v41 }
 0x223   :  { %786 = vmatprep.subr.bf16.mxu0 %v7339_v60  ;;  %v6422_v60 = vcombine.high %v890_v56, %v894_v58 }
 0x226   :  { %787 = vmatpush1.bf16.msra.mxu0 %v7337_v61  ;;  %v898_v61 = vld [vmem:[#allocation10 + $0x2c8] sm:$0xff] }
 0x227   :  { %788 = vmatprep.subr.bf16.mxu0 %v7342_v62  ;;  %v902_v62 = vld [vmem:[#allocation10 + $0x2e8] sm:$0xff] }
 0x22a   :  { %789 = vmatpush1.bf16.msra.mxu0 %v7340_v63  ;;  %v6421_v63 = vcombine.low %v890_v56, %v894_v58  ;;  %v962_v56 = vld [vmem:[#allocation10 + $0x4c8] sm:$0xff] }
 0x22b   :  { %790 = vmatprep.subr.bf16.mxu0 %v7345_v0  ;;  %v6430_v0 = vcombine.high %v898_v61, %v902_v62  ;;  %v966_v58 = vld [vmem:[#allocation10 + $0x4e8] sm:$0xff] }
 0x22c   :  { %v6494_v45 = vcombine.high %v962_v56, %v966_v58 }
 0x22e   :  { %791 = vmatpush1.bf16.msra.mxu0 %v7343_v3  ;;  %v6429_v3 = vcombine.low %v898_v61, %v902_v62  ;;  %v6493_v62 = vcombine.low %v962_v56, %v966_v58 }
 0x22f   :  { %2469 = vmatprep.subr.bf16.mxu0 %v6342_v4  ;;  %v6438_v4 = vcombine.high %v906_v1, %v910_v2 }
 0x231   :  { %793 = vmatmul.mubr.bf16.vlgmr.msra.gmra.mrb[8].mxu0 %v8398_v36  ;;  %v6451_v36 = vcombine.low %v921_v28, %v925_v31 }
 0x232   :  { %2470 = vmatpush1.bf16.msra.mxu0 %v6341_v7  ;;  %v6437_v7 = vcombine.low %v906_v1, %v910_v2  ;;  %v977_v1 = vld [vmem:[#allocation10 + $0x540] sm:$0xff] }
 0x233   :  { %2471 = vmatprep.subr.bf16.mxu0 %v6350_v8  ;;  %2416 = vmatpush1.bf16.msra.mxu1 %v6451_v36  ;;  %v6446_v8 = vcombine.high %v914_v5, %v918_v6  ;;  %v946_v36 = vld [vmem:[#allocation10 + $0x448] sm:$0xff]  ;;  %v981_v2 = vld [vmem:[#allocation10 + $0x560] sm:$0xff] }
 0x234   :  { %2417 = vmatprep.subr.bf16.mxu1 %v6460_v40 }
 0x236   :  { %2472 = vmatpush1.bf16.msra.mxu0 %v6349_v11  ;;  %v6445_v11 = vcombine.low %v914_v5, %v918_v6  ;;  %v6499_v5 = vcombine.low %v969_v46, %v973_v49 }
 0x237   :  { %2473 = vmatprep.subr.bf16.mxu0 %v6358_v12  ;;  %2418 = vmatpush1.bf16.msra.mxu1 %v6459_v42  ;;  %v6454_v12 = vcombine.high %v922_v9, %v926_v10  ;;  %v954_v42 = vld [vmem:[#allocation10 + $0x488] sm:$0xff] }
 0x238   :  { %2428 = vmatprep.subr.bf16.mxu1 %v6468_v48 }
 0x23a   :  { %2474 = vmatpush1.bf16.msra.mxu0 %v6357_v15  ;;  %v6453_v15 = vcombine.low %v922_v9, %v926_v10  ;;  %v985_v9 = vld [vmem:[#allocation10 + $0x580] sm:$0xff] }
 0x23b   :  { %2475 = vmatprep.subr.bf16.mxu0 %v6366_v16  ;;  %v6462_v16 = vcombine.high %v930_v13, %v934_v14  ;;  %v989_v10 = vld [vmem:[#allocation10 + $0x5a0] sm:$0xff]  ;;  %v6507_v13 = vcombine.low %v977_v1, %v981_v2 }
 0x23e   :  { %2476 = vmatpush1.bf16.msra.mxu0 %v6365_v19  ;;  %v8419_v19 = vshrl.u32 %v138_v57, 7 }
 0x23f   :  { %2477 = vmatprep.subr.bf16.mxu0 %v6374_v20 }
 0x240   :  { %v8422_v20 = vsub.s32 0, %v8419_v19  ;;  %v8427_v22 = vsub.s32 1, %v8419_v19 }
 0x242   :  { %2478 = vmatpush1.bf16.msra.mxu0 %v6373_v23  ;;  %v382_v23 = vrot.slane %v8424_v21, %v8422_v20 }
 0x243   :  { %2479 = vmatprep.subr.bf16.mxu0 %v6382_v24  ;;  %v386_v24 = vrot.slane %v8424_v21, %v8427_v22 }
 0x246   :  { %2480 = vmatpush1.bf16.msra.mxu0 %v6381_v27 }
 0x247   :  { %2481 = vmatprep.subr.bf16.mxu0 %v6390_v32 }
 0x24a   :  { %2482 = vmatpush1.bf16.msra.mxu0 %v6389_v37  ;;  %v950_v37 = vld [vmem:[#allocation10 + $0x468] sm:$0xff] }
 0x24b   :  { %2483 = vmatprep.subr.bf16.mxu0 %v6398_v29  ;;  %v6476_v29 = vcombine.high %v945_v33, %v949_v35  ;;  %v6478_v40 = vcombine.high %v946_v36, %v950_v37  ;;  %v6477_v48 = vcombine.low %v946_v36, %v950_v37 }
 0x24e   :  { %2484 = vmatpush1.bf16.msra.mxu0 %v6397_v43  ;;  %v958_v43 = vld [vmem:[#allocation10 + $0x4a8] sm:$0xff] }
 0x24f   :  { %2485 = vmatprep.subr.bf16.mxu0 %v6406_v47  ;;  %v6475_v47 = vcombine.low %v945_v33, %v949_v35  ;;  %v6486_v51 = vcombine.high %v954_v42, %v958_v43  ;;  %v1006_v33 = vld [vmem:[#allocation10 + $0x628] sm:$0xff] }
 0x252   :  { %2486 = vmatpush1.bf16.msra.mxu0 %v6405_v54  ;;  %v961_v54 = vld [vmem:[#allocation10 + $0x4c0] sm:$0xff] }
 0x253   :  { %2487 = vmatprep.subr.bf16.mxu0 %v6414_v55  ;;  %v965_v55 = vld [vmem:[#allocation10 + $0x4e0] sm:$0xff] }
 0x254   :  { %v6492_v44 = vcombine.high %v961_v54, %v965_v55  ;;  %v6491_v61 = vcombine.low %v961_v54, %v965_v55  ;;  %v1018_v54 = vld [vmem:[#allocation10 + $0x688] sm:$0xff] }
 0x255   :  { %v1022_v55 = vld [vmem:[#allocation10 + $0x6a8] sm:$0xff] }
 0x256   :  { %2488 = vmatpush1.bf16.msra.mxu0 %v6413_v59  ;;  %v6483_v59 = vcombine.low %v953_v30, %v957_v41  ;;  %v1010_v30 = vld [vmem:[#allocation10 + $0x648] sm:$0xff] }
 0x257   :  { %2489 = vmatprep.subr.bf16.mxu0 %v6422_v60  ;;  %v6485_v60 = vcombine.low %v954_v42, %v958_v43  ;;  %v1014_v41 = vld [vmem:[#allocation10 + $0x668] sm:$0xff] }
 0x258   :  { %v6541_v58 = vcombine.low %v1010_v30, %v1014_v41 }
 0x25a   :  { %2490 = vmatpush1.bf16.msra.mxu0 %v6421_v63  ;;  %v6500_v63 = vcombine.high %v969_v46, %v973_v49  ;;  %v1026_v46 = vld [vmem:[#allocation10 + $0x6c8] sm:$0xff] }
 0x25b   :  { %2491 = vmatprep.subr.bf16.mxu0 %v6430_v0  ;;  %v1030_v49 = vld [vmem:[#allocation10 + $0x6e8] sm:$0xff] }
 0x25e   :  { %2492 = vmatpush1.bf16.msra.mxu0 %v6429_v3  ;;  %v978_v3 = vld [vmem:[#allocation10 + $0x548] sm:$0xff] }
 0x25f   :  { %2493 = vmatprep.subr.bf16.mxu0 %v6438_v4  ;;  %v982_v4 = vld [vmem:[#allocation10 + $0x568] sm:$0xff] }
 0x260   :  { %v6509_v14 = vcombine.low %v978_v3, %v982_v4 }
 0x262   :  { %2494 = vmatpush1.bf16.msra.mxu0 %v6437_v7  ;;  %v6508_v7 = vcombine.high %v977_v1, %v981_v2  ;;  %v1034_v1 = vld [vmem:[#allocation10 + $0x708] sm:$0xff] }
 0x263   :  { %2495 = vmatprep.subr.bf16.mxu0 %v6446_v8  ;;  %v6510_v8 = vcombine.high %v978_v3, %v982_v4  ;;  %v1038_v2 = vld [vmem:[#allocation10 + $0x728] sm:$0xff]  ;;  %v6557_v4 = vcombine.low %v1026_v46, %v1030_v49 }
 0x266   :  { %2496 = vmatpush1.bf16.msra.mxu0 %v6445_v11  ;;  %v986_v11 = vld [vmem:[#allocation10 + $0x588] sm:$0xff] }
 0x267   :  { %2497 = vmatprep.subr.bf16.mxu0 %v6454_v12  ;;  %v990_v12 = vld [vmem:[#allocation10 + $0x5a8] sm:$0xff] }
 0x26a   :  { %2498 = vmatpush1.bf16.msra.mxu0 %v6453_v15  ;;  %v6516_v15 = vcombine.high %v985_v9, %v989_v10 }
 0x26b   :  { %2499 = vmatprep.subr.bf16.mxu0 %v6462_v16  ;;  %v6518_v16 = vcombine.high %v986_v11, %v990_v12 }
 0x26e   :  { %2500 = vmatpush1.bf16.msra.mxu0 %v6461_v17  ;;  %v993_v17 = vld [vmem:[#allocation10 + $0x5c0] sm:$0xff] }
 0x26f   :  { %2510 = vmatprep.subr.bf16.mxu0 %v6470_v18  ;;  %v997_v18 = vld [vmem:[#allocation10 + $0x5e0] sm:$0xff] }
 0x2c4   :  { %v753_v25 = vpop.f32.mrb[4].mxu0 }
 0x2c5   :  { %v754_v26 = vadd.f32 %v753_v25, %v382_v23  ;;  %v755_v27 = vpop.f32.mrb[5].mxu0  ;;  %v994_v23 = vld [vmem:[#allocation10 + $0x5c8] sm:$0xff]  ;;  %v6515_v25 = vcombine.low %v985_v9, %v989_v10 }
 0x2c6   :  { %v756_v28 = vadd.f32 %v755_v27, %v386_v24  ;;  %v757_v57 = vpop.f32.mrb[6].mxu0  ;;  %v998_v24 = vld [vmem:[#allocation10 + $0x5e8] sm:$0xff]  ;;  %v6524_v27 = vcombine.high %v993_v17, %v997_v18 }
 0x2c7   :  { %v801_v31 = vmax.f32 %v754_v26, 0.0  ;;  %v758_v32 = vpop.f32.mrb[7].mxu0  ;;  %v6517_v26 = vcombine.low %v986_v11, %v990_v12  ;;  %v1001_v57 = vld [vmem:[#allocation10 + $0x600] sm:$0xff]  ;;  %v6525_v35 = vcombine.low %v994_v23, %v998_v24  ;;  %v1042_v9 = vld [vmem:[#allocation10 + $0x748] sm:$0xff]  ;;  %v6565_v12 = vcombine.low %v1034_v1, %v1038_v2 }
 0x2c8   :  { %v802_v34 = vmax.f32 %v756_v28, 0.0  ;;  %v6526_v28 = vcombine.high %v994_v23, %v998_v24  ;;  %v1002_v32 = vld [vmem:[#allocation10 + $0x608] sm:$0xff]  ;;  %v8448_v23 = vsub.s32 2, %v8419_v19 }
 0x2c9   :  { %v8435_v39 = vpack.c.bf16 %v801_v31, %v801_v31  ;;  %v1005_v31 = vld [vmem:[#allocation10 + $0x620] sm:$0xff]  ;;  %v6534_v37 = vcombine.high %v1002_v32, %v1006_v33  ;;  %v6533_v43 = vcombine.low %v1002_v32, %v1006_v33  ;;  %v1046_v10 = vld [vmem:[#allocation10 + $0x768] sm:$0xff] }
 0x2ca   :  { %v8433_v38 = vpack.c.bf16 %v802_v34, %v802_v34  ;;  %v6523_v34 = vcombine.low %v993_v17, %v997_v18  ;;  %v6532_v36 = vcombine.high %v1001_v57, %v1005_v31  ;;  %v6531_v42 = vcombine.low %v1001_v57, %v1005_v31  ;;  %v1050_v17 = vld [vmem:[#allocation10 + $0x788] sm:$0xff]  ;;  %v1057_v57 = vld [vmem:[#allocation10 + $0x7c0] sm:$0xff] }
 0x2cb   :  { %v1054_v18 = vld [vmem:[#allocation10 + $0x7a8] sm:$0xff]  ;;  %v1061_v31 = vld [vmem:[#allocation10 + $0x7e0] sm:$0xff] }
 0x2cc   :  { %2419 = vmatprep.mubr.bf16.mxu1 %v8433_v38  ;;  %2501 = vmatprep.mubr.bf16.mxu0 %v8433_v38  ;;  %v1058_v32 = vld [vmem:[#allocation10 + $0x7c8] sm:$0xff] }
 0x2cd   :  { %2420 = vmatmul.mubr.bf16.vlgmr.msra.gmra.mrb[4].mxu1 %v8435_v39  ;;  %2502 = vmatmul.mubr.bf16.vlgmr.msra.gmra.mrb[12].mxu0 %v8435_v39  ;;  %v1062_v33 = vld [vmem:[#allocation10 + $0x7e8] sm:$0xff] }
 0x2ce   :  { %2429 = vmatpush1.bf16.msra.mxu1 %v6467_v52  ;;  %2511 = vmatpush1.bf16.msra.mxu0 %v6469_v53  ;;  %v970_v52 = vld [vmem:[#allocation10 + $0x508] sm:$0xff] }
 0x2cf   :  { %2430 = vmatprep.subr.bf16.mxu1 %v6476_v29  ;;  %2512 = vmatprep.subr.bf16.mxu0 %v6478_v40  ;;  %v974_v53 = vld [vmem:[#allocation10 + $0x528] sm:$0xff]  ;;  %v1009_v29 = vld [vmem:[#allocation10 + $0x640] sm:$0xff] }
 0x2d0   :  { %v6502_v0 = vcombine.high %v970_v52, %v974_v53  ;;  %v6501_v6 = vcombine.low %v970_v52, %v974_v53  ;;  %v1013_v40 = vld [vmem:[#allocation10 + $0x660] sm:$0xff]  ;;  %v6549_v53 = vcombine.low %v1018_v54, %v1022_v55 }
 0x2d1   :  { %v6539_v56 = vcombine.low %v1009_v29, %v1013_v40 }
 0x2d2   :  { %2431 = vmatpush1.bf16.msra.mxu1 %v6475_v47  ;;  %2513 = vmatpush1.bf16.msra.mxu0 %v6477_v48  ;;  %v6540_v47 = vcombine.high %v1009_v29, %v1013_v40  ;;  %v6542_v48 = vcombine.high %v1010_v30, %v1014_v41  ;;  %v6588_v29 = vcombine.high %v1057_v57, %v1061_v31  ;;  %v811_v30 = vld [vmem:[#allocation10 + $0x10] sm:$0xff] }
 0x2d3   :  { %2432 = vmatprep.subr.bf16.mxu1 %v6484_v50  ;;  %2514 = vmatprep.subr.bf16.mxu0 %v6486_v51  ;;  %v1017_v50 = vld [vmem:[#allocation10 + $0x680] sm:$0xff]  ;;  %v6590_v40 = vcombine.high %v1058_v32, %v1062_v33 }
 0x2d4   :  { %v1021_v51 = vld [vmem:[#allocation10 + $0x6a0] sm:$0xff] }
 0x2d5   :  { %v6547_v52 = vcombine.low %v1017_v50, %v1021_v51 }
 0x2d6   :  { %2433 = vmatpush1.bf16.msra.mxu1 %v6483_v59  ;;  %2515 = vmatpush1.bf16.msra.mxu0 %v6485_v60  ;;  %v6548_v59 = vcombine.high %v1017_v50, %v1021_v51  ;;  %v6550_v60 = vcombine.high %v1018_v54, %v1022_v55  ;;  %v6587_v55 = vcombine.low %v1057_v57, %v1061_v31 }
 0x2d7   :  { %2434 = vmatprep.subr.bf16.mxu1 %v6492_v44  ;;  %2516 = vmatprep.subr.bf16.mxu0 %v6494_v45  ;;  %v1025_v44 = vld [vmem:[#allocation10 + $0x6c0] sm:$0xff] }
 0x2d8   :  { %v1029_v45 = vld [vmem:[#allocation10 + $0x6e0] sm:$0xff] }
 0x2d9   :  { %v6555_v3 = vcombine.low %v1025_v44, %v1029_v45 }
 0x2da   :  { %2435 = vmatpush1.bf16.msra.mxu1 %v6491_v61  ;;  %2517 = vmatpush1.bf16.msra.mxu0 %v6493_v62  ;;  %v6556_v61 = vcombine.high %v1025_v44, %v1029_v45  ;;  %v6558_v62 = vcombine.high %v1026_v46, %v1030_v49  ;;  %v819_v45 = vld [vmem:[#allocation10 + $0x50] sm:$0xff]  ;;  %v820_v49 = vld [vmem:[#allocation10 + $0x58] sm:$0xff] }
 0x2db   :  { %2436 = vmatprep.subr.bf16.mxu1 %v6500_v63  ;;  %2518 = vmatprep.subr.bf16.mxu0 %v6502_v0  ;;  %v1033_v63 = vld [vmem:[#allocation10 + $0x700] sm:$0xff]  ;;  %v823_v46 = vld [vmem:[#allocation10 + $0x70] sm:$0xff] }
 0x2dc   :  { %v1037_v0 = vld [vmem:[#allocation10 + $0x720] sm:$0xff] }
 0x2dd   :  { %v6563_v11 = vcombine.low %v1033_v63, %v1037_v0 }
 0x2de   :  { %2437 = vmatpush1.bf16.msra.mxu1 %v6499_v5  ;;  %2519 = vmatpush1.bf16.msra.mxu0 %v6501_v6  ;;  %v6564_v5 = vcombine.high %v1033_v63, %v1037_v0  ;;  %v6566_v6 = vcombine.high %v1034_v1, %v1038_v2  ;;  %v6352_v0 = vcombine.high %v819_v45, %v823_v46  ;;  %v827_v2 = vld [vmem:[#allocation10 + $0x90] sm:$0xff] }
 0x2df   :  { %2438 = vmatprep.subr.bf16.mxu1 %v6508_v7  ;;  %2520 = vmatprep.subr.bf16.mxu0 %v6510_v8  ;;  %v1041_v7 = vld [vmem:[#allocation10 + $0x740] sm:$0xff] }
 0x2e0   :  { %v1045_v8 = vld [vmem:[#allocation10 + $0x760] sm:$0xff] }
 0x2e1   :  { %v6571_v24 = vcombine.low %v1041_v7, %v1045_v8 }
 0x2e2   :  { %2439 = vmatpush1.bf16.msra.mxu1 %v6507_v13  ;;  %2521 = vmatpush1.bf16.msra.mxu0 %v6509_v14  ;;  %v6572_v13 = vcombine.high %v1041_v7, %v1045_v8  ;;  %v6574_v14 = vcombine.high %v1042_v9, %v1046_v10 }
 0x2e3   :  { %2440 = vmatprep.subr.bf16.mxu1 %v6516_v15  ;;  %2522 = vmatprep.subr.bf16.mxu0 %v6518_v16  ;;  %v1049_v15 = vld [vmem:[#allocation10 + $0x780] sm:$0xff] }
 0x2e4   :  { %v1053_v16 = vld [vmem:[#allocation10 + $0x7a0] sm:$0xff] }
 0x2e6   :  { %2441 = vmatpush1.bf16.msra.mxu1 %v6515_v25  ;;  %2523 = vmatpush1.bf16.msra.mxu0 %v6517_v26  ;;  %v6573_v25 = vcombine.low %v1042_v9, %v1046_v10  ;;  %v8451_v26 = vsub.s32 3, %v8419_v19  ;;  %v835_v10 = vld [vmem:[#allocation10 + $0xd0] sm:$0xff] }
 0x2e7   :  { %2442 = vmatprep.subr.bf16.mxu1 %v6524_v27  ;;  %2524 = vmatprep.subr.bf16.mxu0 %v6526_v28  ;;  %v6580_v27 = vcombine.high %v1049_v15, %v1053_v16  ;;  %v6582_v28 = vcombine.high %v1050_v17, %v1054_v18 }
 0x2ea   :  { %2443 = vmatpush1.bf16.msra.mxu1 %v6523_v34  ;;  %2525 = vmatpush1.bf16.msra.mxu0 %v6525_v35  ;;  %v390_v34 = vrot.slane %v8424_v21, %v8448_v23  ;;  %v394_v35 = vrot.slane %v8424_v21, %v8451_v26 }
 0x2eb   :  { %2444 = vmatprep.subr.bf16.mxu1 %v6532_v36  ;;  %2526 = vmatprep.subr.bf16.mxu0 %v6534_v37  ;;  %v6579_v36 = vcombine.low %v1049_v15, %v1053_v16  ;;  %v6581_v37 = vcombine.low %v1050_v17, %v1054_v18  ;;  %v843_v18 = vld [vmem:[#allocation10 + $0x110] sm:$0xff] }
 0x2ee   :  { %2445 = vmatpush1.bf16.msra.mxu1 %v6531_v42  ;;  %2527 = vmatpush1.bf16.msra.mxu0 %v6533_v43  ;;  %v815_v42 = vld [vmem:[#allocation10 + $0x30] sm:$0xff]  ;;  %v812_v43 = vld [vmem:[#allocation10 + $0x18] sm:$0xff] }
 0x2ef   :  { %2446 = vmatprep.subr.bf16.mxu1 %v6540_v47  ;;  %2528 = vmatprep.subr.bf16.mxu0 %v6542_v48  ;;  %v816_v47 = vld [vmem:[#allocation10 + $0x38] sm:$0xff] }
 0x2f0   :  { %v6345_v63 = vcombine.low %v812_v43, %v816_v47 }
 0x2f2   :  { %2447 = vmatpush1.bf16.msra.mxu1 %v6539_v56  ;;  %2529 = vmatpush1.bf16.msra.mxu0 %v6541_v58  ;;  %v6589_v56 = vcombine.low %v1058_v32, %v1062_v33  ;;  %v851_v32 = vld [vmem:[#allocation10 + $0x150] sm:$0xff] }
 0x2f3   :  { %2448 = vmatprep.subr.bf16.mxu1 %v6548_v59  ;;  %2530 = vmatprep.subr.bf16.mxu0 %v6550_v60  ;;  %v6344_v59 = vcombine.high %v811_v30, %v815_v42  ;;  %v6346_v60 = vcombine.high %v812_v43, %v816_v47  ;;  %v855_v33 = vld [vmem:[#allocation10 + $0x170] sm:$0xff]  ;;  %v864_v43 = vld [vmem:[#allocation10 + $0x1b8] sm:$0xff] }
 0x2f4   :  { %v6383_v47 = vcombine.low %v851_v32, %v855_v33 }
 0x2f6   :  { %2449 = vmatpush1.bf16.msra.mxu1 %v6547_v52  ;;  %2531 = vmatpush1.bf16.msra.mxu0 %v6549_v53  ;;  %v824_v52 = vld [vmem:[#allocation10 + $0x78] sm:$0xff] }
 0x2f7   :  { %2450 = vmatprep.subr.bf16.mxu1 %v6556_v61  ;;  %2532 = vmatprep.subr.bf16.mxu0 %v6558_v62  ;;  %v6343_v61 = vcombine.low %v811_v30, %v815_v42  ;;  %v6354_v1 = vcombine.high %v820_v49, %v824_v52  ;;  %v6353_v7 = vcombine.low %v820_v49, %v824_v52  ;;  %v859_v30 = vld [vmem:[#allocation10 + $0x190] sm:$0xff]  ;;  %v860_v42 = vld [vmem:[#allocation10 + $0x198] sm:$0xff] }
 0x2f8   :  { %v876_v49 = vld [vmem:[#allocation10 + $0x218] sm:$0xff] }
 0x2f9   :  { %v880_v52 = vld [vmem:[#allocation10 + $0x238] sm:$0xff] }
 0x2fa   :  { %2451 = vmatpush1.bf16.msra.mxu1 %v6555_v3  ;;  %2533 = vmatpush1.bf16.msra.mxu0 %v6557_v4  ;;  %v831_v3 = vld [vmem:[#allocation10 + $0xb0] sm:$0xff]  ;;  %v828_v4 = vld [vmem:[#allocation10 + $0x98] sm:$0xff] }
 0x2fb   :  { %2452 = vmatprep.subr.bf16.mxu1 %v6564_v5  ;;  %2534 = vmatprep.subr.bf16.mxu0 %v6566_v6  ;;  %v832_v5 = vld [vmem:[#allocation10 + $0xb8] sm:$0xff]  ;;  %v6351_v6 = vcombine.low %v819_v45, %v823_v46  ;;  %v6360_v8 = vcombine.high %v827_v2, %v831_v3  ;;  %v875_v45 = vld [vmem:[#allocation10 + $0x210] sm:$0xff] }
 0x2fc   :  { %v6362_v9 = vcombine.high %v828_v4, %v832_v5  ;;  %v6361_v15 = vcombine.low %v828_v4, %v832_v5  ;;  %v879_v46 = vld [vmem:[#allocation10 + $0x230] sm:$0xff]  ;;  %v884_v4 = vld [vmem:[#allocation10 + $0x258] sm:$0xff] }
 0x2fd   :  { %v888_v5 = vld [vmem:[#allocation10 + $0x278] sm:$0xff] }
 0x2fe   :  { %2453 = vmatpush1.bf16.msra.mxu1 %v6563_v11  ;;  %2535 = vmatpush1.bf16.msra.mxu0 %v6565_v12  ;;  %v839_v11 = vld [vmem:[#allocation10 + $0xf0] sm:$0xff]  ;;  %v836_v12 = vld [vmem:[#allocation10 + $0xd8] sm:$0xff] }
 0x2ff   :  { %2454 = vmatprep.subr.bf16.mxu1 %v6572_v13  ;;  %2536 = vmatprep.subr.bf16.mxu0 %v6574_v14  ;;  %v840_v13 = vld [vmem:[#allocation10 + $0xf8] sm:$0xff]  ;;  %v6359_v14 = vcombine.low %v827_v2, %v831_v3  ;;  %v6368_v16 = vcombine.high %v835_v10, %v839_v11  ;;  %v883_v2 = vld [vmem:[#allocation10 + $0x250] sm:$0xff] }
 0x300   :  { %v6370_v17 = vcombine.high %v836_v12, %v840_v13  ;;  %v887_v3 = vld [vmem:[#allocation10 + $0x270] sm:$0xff] }
 0x302   :  { %2455 = vmatpush1.bf16.msra.mxu1 %v6571_v24  ;;  %2537 = vmatpush1.bf16.msra.mxu0 %v6573_v25  ;;  %v847_v24 = vld [vmem:[#allocation10 + $0x130] sm:$0xff]  ;;  %v848_v25 = vld [vmem:[#allocation10 + $0x138] sm:$0xff] }
 0x303   :  { %2456 = vmatprep.subr.bf16.mxu1 %v6580_v27  ;;  %2538 = vmatprep.subr.bf16.mxu0 %v6582_v28  ;;  %v6367_v27 = vcombine.low %v835_v10, %v839_v11  ;;  %v6369_v28 = vcombine.low %v836_v12, %v840_v13  ;;  %v6376_v57 = vcombine.high %v843_v18, %v847_v24  ;;  %v891_v10 = vld [vmem:[#allocation10 + $0x290] sm:$0xff]  ;;  %v892_v12 = vld [vmem:[#allocation10 + $0x298] sm:$0xff] }
 0x304   :  { %v794_v41 = vpop.f32.mrb[8].mxu0  ;;  %v895_v11 = vld [vmem:[#allocation10 + $0x2b0] sm:$0xff]  ;;  %v896_v13 = vld [vmem:[#allocation10 + $0x2b8] sm:$0xff] }
 0x305   :  { %v795_v48 = vadd.f32 %v794_v41, %v390_v34  ;;  %v796_v50 = vpop.f32.mrb[9].mxu0  ;;  %v852_v34 = vld [vmem:[#allocation10 + $0x158] sm:$0xff]  ;;  %v863_v41 = vld [vmem:[#allocation10 + $0x1b0] sm:$0xff] }
 0x306   :  { %v797_v51 = vadd.f32 %v796_v50, %v394_v35  ;;  %v798_v54 = vpop.f32.mrb[10].mxu0  ;;  %2457 = vmatpush1.bf16.msra.mxu1 %v6579_v36  ;;  %2539 = vmatpush1.bf16.msra.mxu0 %v6581_v37  ;;  %v856_v35 = vld [vmem:[#allocation10 + $0x178] sm:$0xff]  ;;  %v6375_v36 = vcombine.low %v843_v18, %v847_v24  ;;  %v6392_v50 = vcombine.high %v859_v30, %v863_v41  ;;  %v899_v18 = vld [vmem:[#allocation10 + $0x2d0] sm:$0xff] }
 0x307   :  { %v803_v21 = vmax.f32 %v795_v48, 0.0  ;;  %v799_v58 = vpop.f32.mrb[11].mxu0  ;;  %2458 = vmatprep.subr.bf16.mxu1 %v6588_v29  ;;  %2540 = vmatprep.subr.bf16.mxu0 %v6590_v40  ;;  %v6384_v29 = vcombine.high %v851_v32, %v855_v33  ;;  %v6386_v40 = vcombine.high %v852_v34, %v856_v35  ;;  %v6385_v48 = vcombine.low %v852_v34, %v856_v35  ;;  %v867_v54 = vld [vmem:[#allocation10 + $0x1d0] sm:$0xff]  ;;  %v908_v34 = vld [vmem:[#allocation10 + $0x318] sm:$0xff] }
 0x308   :  { %v804_v44 = vmax.f32 %v797_v51, 0.0  ;;  %v6394_v51 = vcombine.high %v860_v42, %v864_v43  ;;  %v6391_v58 = vcombine.low %v859_v30, %v863_v41  ;;  %v903_v24 = vld [vmem:[#allocation10 + $0x2f0] sm:$0xff]  ;;  %v912_v35 = vld [vmem:[#allocation10 + $0x338] sm:$0xff] }
 0x309   :  { %v8459_v62 = vpack.c.bf16 %v803_v21, %v803_v21  ;;  %v872_v21 = vld [vmem:[#allocation10 + $0x1f8] sm:$0xff]  ;;  %v907_v32 = vld [vmem:[#allocation10 + $0x310] sm:$0xff] }
 0x30a   :  { %v8457_v53 = vpack.c.bf16 %v804_v44, %v804_v44  ;;  %2459 = vmatpush1.bf16.msra.mxu1 %v6587_v55  ;;  %2541 = vmatpush1.bf16.msra.mxu0 %v6589_v56  ;;  %v871_v55 = vld [vmem:[#allocation10 + $0x1f0] sm:$0xff]  ;;  %v868_v56 = vld [vmem:[#allocation10 + $0x1d8] sm:$0xff] }
 0x30b   :  { %2551 = vmatprep.subr.bf16.mxu1 %v6344_v59  ;;  %2633 = vmatprep.subr.bf16.mxu0 %v6346_v60  ;;  %v6393_v59 = vcombine.low %v860_v42, %v864_v43  ;;  %v6400_v60 = vcombine.high %v867_v54, %v871_v55  ;;  %v6402_v44 = vcombine.high %v868_v56, %v872_v21  ;;  %v911_v33 = vld [vmem:[#allocation10 + $0x330] sm:$0xff]  ;;  %v916_v42 = vld [vmem:[#allocation10 + $0x358] sm:$0xff] }
 0x30c   :  { %2460 = vmatprep.mubr.bf16.mxu1 %v8457_v53  ;;  %2542 = vmatprep.mubr.bf16.mxu0 %v8457_v53  ;;  %v915_v30 = vld [vmem:[#allocation10 + $0x350] sm:$0xff]  ;;  %v920_v43 = vld [vmem:[#allocation10 + $0x378] sm:$0xff] }
 0x30d   :  { %2461 = vmatmul.mubr.bf16.vlgmr.msra.gmra.mrb[4].mxu1 %v8459_v62  ;;  %2543 = vmatmul.mubr.bf16.vlgmr.msra.gmra.mrb[12].mxu0 %v8459_v62  ;;  %v919_v41 = vld [vmem:[#allocation10 + $0x370] sm:$0xff] }
 0x30e   :  { %2552 = vmatpush1.bf16.msra.mxu1 %v6343_v61  ;;  %2583 = vmatprep.mubr.bf16.mxu1 %v8433_v38  ;;  %v6399_v61 = vcombine.low %v867_v54, %v871_v55  ;;  %v923_v54 = vld [vmem:[#allocation10 + $0x390] sm:$0xff] }
 0x30f   :  { %2634 = vmatpush1.bf16.msra.mxu0 %v6345_v63  ;;  %2665 = vmatprep.mubr.bf16.mxu0 %v8433_v38  ;;  %v844_v38 = vld [vmem:[#allocation10 + $0x118] sm:$0xff]  ;;  %v6401_v63 = vcombine.low %v868_v56, %v872_v21  ;;  %v927_v55 = vld [vmem:[#allocation10 + $0x3b0] sm:$0xff] }
 0x310   :  { %2553 = vmatprep.subr.bf16.mxu1 %v6352_v0  ;;  %2635 = vmatprep.subr.bf16.mxu0 %v6354_v1  ;;  %v6378_v31 = vcombine.high %v844_v38, %v848_v25  ;;  %v6377_v37 = vcombine.low %v844_v38, %v848_v25  ;;  %v6408_v0 = vcombine.high %v875_v45, %v879_v46  ;;  %v900_v38 = vld [vmem:[#allocation10 + $0x2d8] sm:$0xff] }
 0x311   :  { %v6410_v1 = vcombine.high %v876_v49, %v880_v52  ;;  %v904_v25 = vld [vmem:[#allocation10 + $0x2f8] sm:$0xff] }
 0x312   :  { %2554 = vmatpush1.bf16.msra.mxu1 %v6351_v6  ;;  %v6407_v6 = vcombine.low %v875_v45, %v879_v46  ;;  %v924_v56 = vld [vmem:[#allocation10 + $0x398] sm:$0xff]  ;;  %v931_v45 = vld [vmem:[#allocation10 + $0x3d0] sm:$0xff] }
 0x313   :  { %2636 = vmatpush1.bf16.msra.mxu0 %v6353_v7  ;;  %2555 = vmatprep.subr.bf16.mxu1 %v6360_v8  ;;  %v6409_v7 = vcombine.low %v876_v49, %v880_v52  ;;  %v6416_v8 = vcombine.high %v883_v2, %v887_v3  ;;  %v928_v21 = vld [vmem:[#allocation10 + $0x3b8] sm:$0xff]  ;;  %v935_v46 = vld [vmem:[#allocation10 + $0x3f0] sm:$0xff] }
 0x314   :  { %2637 = vmatprep.subr.bf16.mxu0 %v6362_v9  ;;  %v6418_v9 = vcombine.high %v884_v4, %v888_v5  ;;  %v932_v49 = vld [vmem:[#allocation10 + $0x3d8] sm:$0xff] }
 0x315   :  { %v936_v52 = vld [vmem:[#allocation10 + $0x3f8] sm:$0xff] }
 0x316   :  { %2556 = vmatpush1.bf16.msra.mxu1 %v6359_v14  ;;  %v6415_v14 = vcombine.low %v883_v2, %v887_v3  ;;  %v939_v2 = vld [vmem:[#allocation10 + $0x410] sm:$0xff] }
 0x317   :  { %2638 = vmatpush1.bf16.msra.mxu0 %v6361_v15  ;;  %2557 = vmatprep.subr.bf16.mxu1 %v6368_v16  ;;  %v6417_v15 = vcombine.low %v884_v4, %v888_v5  ;;  %v6424_v16 = vcombine.high %v891_v10, %v895_v11  ;;  %v943_v3 = vld [vmem:[#allocation10 + $0x430] sm:$0xff]  ;;  %v940_v4 = vld [vmem:[#allocation10 + $0x418] sm:$0xff] }
 0x318   :  { %2639 = vmatprep.subr.bf16.mxu0 %v6370_v17  ;;  %v6426_v17 = vcombine.high %v892_v12, %v896_v13  ;;  %v944_v5 = vld [vmem:[#allocation10 + $0x438] sm:$0xff] }
 0x31a   :  { %2558 = vmatpush1.bf16.msra.mxu1 %v6367_v27  ;;  %v6423_v27 = vcombine.low %v891_v10, %v895_v11  ;;  %v947_v10 = vld [vmem:[#allocation10 + $0x450] sm:$0xff] }
 0x31b   :  { %2640 = vmatpush1.bf16.msra.mxu0 %v6369_v28  ;;  %2559 = vmatprep.subr.bf16.mxu1 %v6376_v57  ;;  %v6425_v28 = vcombine.low %v892_v12, %v896_v13  ;;  %v6432_v57 = vcombine.high %v899_v18, %v903_v24  ;;  %v951_v11 = vld [vmem:[#allocation10 + $0x470] sm:$0xff]  ;;  %v6471_v12 = vcombine.low %v939_v2, %v943_v3  ;;  %v948_v13 = vld [vmem:[#allocation10 + $0x458] sm:$0xff] }
 0x31c   :  { %2641 = vmatprep.subr.bf16.mxu0 %v6378_v31  ;;  %v6434_v31 = vcombine.high %v900_v38, %v904_v25 }
 0x31e   :  { %2560 = vmatpush1.bf16.msra.mxu1 %v6375_v36  ;;  %v6431_v36 = vcombine.low %v899_v18, %v903_v24  ;;  %v959_v18 = vld [vmem:[#allocation10 + $0x4b0] sm:$0xff] }
 0x31f   :  { %2642 = vmatpush1.bf16.msra.mxu0 %v6377_v37  ;;  %2561 = vmatprep.subr.bf16.mxu1 %v6384_v29  ;;  %v6433_v37 = vcombine.low %v900_v38, %v904_v25  ;;  %v6440_v29 = vcombine.high %v907_v32, %v911_v33  ;;  %v956_v38 = vld [vmem:[#allocation10 + $0x498] sm:$0xff] }
 0x320   :  { %2643 = vmatprep.subr.bf16.mxu0 %v6386_v40  ;;  %v6442_v40 = vcombine.high %v908_v34, %v912_v35  ;;  %v960_v25 = vld [vmem:[#allocation10 + $0x4b8] sm:$0xff] }
 0x322   :  { %2562 = vmatpush1.bf16.msra.mxu1 %v6383_v47  ;;  %v6439_v47 = vcombine.low %v907_v32, %v911_v33  ;;  %v963_v32 = vld [vmem:[#allocation10 + $0x4d0] sm:$0xff] }
 0x323   :  { %2644 = vmatpush1.bf16.msra.mxu0 %v6385_v48  ;;  %2563 = vmatprep.subr.bf16.mxu1 %v6392_v50  ;;  %v6441_v48 = vcombine.low %v908_v34, %v912_v35  ;;  %v6448_v50 = vcombine.high %v915_v30, %v919_v41  ;;  %v967_v33 = vld [vmem:[#allocation10 + $0x4f0] sm:$0xff]  ;;  %v964_v34 = vld [vmem:[#allocation10 + $0x4d8] sm:$0xff] }
 0x324   :  { %2645 = vmatprep.subr.bf16.mxu0 %v6394_v51  ;;  %v6450_v51 = vcombine.high %v916_v42, %v920_v43  ;;  %v968_v35 = vld [vmem:[#allocation10 + $0x4f8] sm:$0xff] }
 0x326   :  { %2564 = vmatpush1.bf16.msra.mxu1 %v6391_v58  ;;  %v6447_v58 = vcombine.low %v915_v30, %v919_v41  ;;  %v975_v30 = vld [vmem:[#allocation10 + $0x530] sm:$0xff]  ;;  %v972_v41 = vld [vmem:[#allocation10 + $0x518] sm:$0xff] }
 0x327   :  { %2646 = vmatpush1.bf16.msra.mxu0 %v6393_v59  ;;  %2565 = vmatprep.subr.bf16.mxu1 %v6400_v60  ;;  %v6449_v59 = vcombine.low %v916_v42, %v920_v43  ;;  %v6456_v60 = vcombine.high %v923_v54, %v927_v55  ;;  %v976_v42 = vld [vmem:[#allocation10 + $0x538] sm:$0xff]  ;;  %v6497_v43 = vcombine.low %v964_v34, %v968_v35 }
 0x328   :  { %2647 = vmatprep.subr.bf16.mxu0 %v6402_v44  ;;  %v6458_v44 = vcombine.high %v924_v56, %v928_v21 }
 0x32a   :  { %2566 = vmatpush1.bf16.msra.mxu1 %v6399_v61  ;;  %v6455_v61 = vcombine.low %v923_v54, %v927_v55  ;;  %v980_v54 = vld [vmem:[#allocation10 + $0x558] sm:$0xff] }
 0x32b   :  { %2648 = vmatpush1.bf16.msra.mxu0 %v6401_v63  ;;  %2567 = vmatprep.subr.bf16.mxu1 %v6408_v0  ;;  %v6457_v63 = vcombine.low %v924_v56, %v928_v21  ;;  %v6464_v0 = vcombine.high %v931_v45, %v935_v46  ;;  %v984_v55 = vld [vmem:[#allocation10 + $0x578] sm:$0xff]  ;;  %v6505_v21 = vcombine.low %v972_v41, %v976_v42 }
 0x32c   :  { %2649 = vmatprep.subr.bf16.mxu0 %v6410_v1  ;;  %v6466_v1 = vcombine.high %v932_v49, %v936_v52 }
 0x32e   :  { %2568 = vmatpush1.bf16.msra.mxu1 %v6407_v6  ;;  %v6463_v6 = vcombine.low %v931_v45, %v935_v46  ;;  %v988_v45 = vld [vmem:[#allocation10 + $0x598] sm:$0xff] }
 0x32f   :  { %2650 = vmatpush1.bf16.msra.mxu0 %v6409_v7  ;;  %2569 = vmatprep.subr.bf16.mxu1 %v6416_v8  ;;  %v6465_v7 = vcombine.low %v932_v49, %v936_v52  ;;  %v6472_v8 = vcombine.high %v939_v2, %v943_v3  ;;  %v992_v46 = vld [vmem:[#allocation10 + $0x5b8] sm:$0xff]  ;;  %v6513_v52 = vcombine.low %v980_v54, %v984_v55 }
 0x330   :  { %2651 = vmatprep.subr.bf16.mxu0 %v6418_v9  ;;  %v6474_v9 = vcombine.high %v940_v4, %v944_v5  ;;  %v996_v2 = vld [vmem:[#allocation10 + $0x5d8] sm:$0xff] }
 0x331   :  { %v1000_v3 = vld [vmem:[#allocation10 + $0x5f8] sm:$0xff] }
 0x332   :  { %2570 = vmatpush1.bf16.msra.mxu1 %v6415_v14  ;;  %v952_v14 = vld [vmem:[#allocation10 + $0x478] sm:$0xff] }
 0x333   :  { %2652 = vmatpush1.bf16.msra.mxu0 %v6417_v15  ;;  %2571 = vmatprep.subr.bf16.mxu1 %v6424_v16  ;;  %v6473_v15 = vcombine.low %v940_v4, %v944_v5  ;;  %v6480_v16 = vcombine.high %v947_v10, %v951_v11  ;;  %v6482_v24 = vcombine.high %v948_v13, %v952_v14 }
 0x334   :  { %2653 = vmatprep.subr.bf16.mxu0 %v6426_v17  ;;  %v955_v17 = vld [vmem:[#allocation10 + $0x490] sm:$0xff]  ;;  %v6521_v5 = vcombine.low %v988_v45, %v992_v46 }
 0x336   :  { %2572 = vmatpush1.bf16.msra.mxu1 %v6423_v27  ;;  %v6479_v27 = vcombine.low %v947_v10, %v951_v11  ;;  %v1004_v10 = vld [vmem:[#allocation10 + $0x618] sm:$0xff] }
 0x337   :  { %2654 = vmatpush1.bf16.msra.mxu0 %v6425_v28  ;;  %2573 = vmatprep.subr.bf16.mxu1 %v6432_v57  ;;  %v6481_v28 = vcombine.low %v948_v13, %v952_v14  ;;  %v6488_v57 = vcombine.high %v955_v17, %v959_v18  ;;  %v1008_v11 = vld [vmem:[#allocation10 + $0x638] sm:$0xff]  ;;  %v6529_v13 = vcombine.low %v996_v2, %v1000_v3 }
 0x338   :  { %2655 = vmatprep.subr.bf16.mxu0 %v6434_v31  ;;  %v6490_v31 = vcombine.high %v956_v38, %v960_v25 }
 0x33a   :  { %2574 = vmatpush1.bf16.msra.mxu1 %v6431_v36  ;;  %v6487_v36 = vcombine.low %v955_v17, %v959_v18  ;;  %v1015_v17 = vld [vmem:[#allocation10 + $0x670] sm:$0xff]  ;;  %v1012_v18 = vld [vmem:[#allocation10 + $0x658] sm:$0xff] }
 0x33b   :  { %2656 = vmatpush1.bf16.msra.mxu0 %v6433_v37  ;;  %2575 = vmatprep.subr.bf16.mxu1 %v6440_v29  ;;  %v6496_v37 = vcombine.high %v963_v32, %v967_v33  ;;  %v6498_v29 = vcombine.high %v964_v34, %v968_v35 }
 0x33c   :  { %2657 = vmatprep.subr.bf16.mxu0 %v6442_v40  ;;  %v971_v40 = vld [vmem:[#allocation10 + $0x510] sm:$0xff] }
 0x33d   :  { %v6503_v56 = vcombine.low %v971_v40, %v975_v30 }
 0x33e   :  { %2576 = vmatpush1.bf16.msra.mxu1 %v6439_v47  ;;  %v6504_v47 = vcombine.high %v971_v40, %v975_v30  ;;  %v1028_v40 = vld [vmem:[#allocation10 + $0x6d8] sm:$0xff] }
 0x33f   :  { %2658 = vmatpush1.bf16.msra.mxu0 %v6441_v48  ;;  %2577 = vmatprep.subr.bf16.mxu1 %v6448_v50  ;;  %v6506_v48 = vcombine.high %v972_v41, %v976_v42  ;;  %v979_v50 = vld [vmem:[#allocation10 + $0x550] sm:$0xff]  ;;  %v1032_v30 = vld [vmem:[#allocation10 + $0x6f8] sm:$0xff] }
 0x340   :  { %2659 = vmatprep.subr.bf16.mxu0 %v6450_v51  ;;  %v983_v51 = vld [vmem:[#allocation10 + $0x570] sm:$0xff] }
 0x341   :  { %v6511_v49 = vcombine.low %v979_v50, %v983_v51 }
 0x342   :  { %2578 = vmatpush1.bf16.msra.mxu1 %v6447_v58  ;;  %v6512_v58 = vcombine.high %v979_v50, %v983_v51  ;;  %v1036_v50 = vld [vmem:[#allocation10 + $0x718] sm:$0xff] }
 0x343   :  { %2660 = vmatpush1.bf16.msra.mxu0 %v6449_v59  ;;  %2579 = vmatprep.subr.bf16.mxu1 %v6456_v60  ;;  %v6514_v59 = vcombine.high %v980_v54, %v984_v55  ;;  %v987_v60 = vld [vmem:[#allocation10 + $0x590] sm:$0xff]  ;;  %v1040_v51 = vld [vmem:[#allocation10 + $0x738] sm:$0xff]  ;;  %v6561_v55 = vcombine.low %v1028_v40, %v1032_v30 }
 0x344   :  { %2661 = vmatprep.subr.bf16.mxu0 %v6458_v44  ;;  %v991_v44 = vld [vmem:[#allocation10 + $0x5b0] sm:$0xff] }
 0x345   :  { %v6519_v4 = vcombine.low %v987_v60, %v991_v44 }
 0x346   :  { %2580 = vmatpush1.bf16.msra.mxu1 %v6455_v61  ;;  %v6520_v61 = vcombine.high %v987_v60, %v991_v44  ;;  %v1044_v60 = vld [vmem:[#allocation10 + $0x758] sm:$0xff] }
 0x347   :  { %2662 = vmatpush1.bf16.msra.mxu0 %v6457_v63  ;;  %2581 = vmatprep.subr.bf16.mxu1 %v6464_v0  ;;  %v6522_v63 = vcombine.high %v988_v45, %v992_v46  ;;  %v995_v0 = vld [vmem:[#allocation10 + $0x5d0] sm:$0xff]  ;;  %v1048_v44 = vld [vmem:[#allocation10 + $0x778] sm:$0xff]  ;;  %v6569_v46 = vcombine.low %v1036_v50, %v1040_v51 }
 0x348   :  { %2663 = vmatprep.subr.bf16.mxu0 %v6466_v1  ;;  %v999_v1 = vld [vmem:[#allocation10 + $0x5f0] sm:$0xff] }
 0x34a   :  { %2582 = vmatpush1.bf16.msra.mxu1 %v6463_v6  ;;  %v6528_v6 = vcombine.high %v995_v0, %v999_v1 }
 0x34b   :  { %2664 = vmatpush1.bf16.msra.mxu0 %v6465_v7  ;;  %2592 = vmatprep.subr.bf16.mxu1 %v6472_v8  ;;  %v6530_v7 = vcombine.high %v996_v2, %v1000_v3  ;;  %v1003_v8 = vld [vmem:[#allocation10 + $0x610] sm:$0xff]  ;;  %v6577_v3 = vcombine.low %v1044_v60, %v1048_v44 }
 0x34c   :  { %2674 = vmatprep.subr.bf16.mxu0 %v6474_v9  ;;  %v1007_v9 = vld [vmem:[#allocation10 + $0x630] sm:$0xff] }
 0x34d   :  { %2584 = vmatmul.mubr.bf16.vlgmr.msra.gmra.mrb[8].mxu1 %v8435_v39  ;;  %v6536_v14 = vcombine.high %v1003_v8, %v1007_v9 }
 0x34e   :  { %2666 = vmatmul.mubr.bf16.vlgmr.msra.gmra.mrb[16].mxu0 %v8435_v39  ;;  %2593 = vmatpush1.bf16.msra.mxu1 %v6471_v12  ;;  %v6489_v39 = vcombine.low %v956_v38, %v960_v25  ;;  %v6527_v12 = vcombine.low %v995_v0, %v999_v1  ;;  %v6535_v38 = vcombine.low %v1003_v8, %v1007_v9  ;;  %v1052_v0 = vld [vmem:[#allocation10 + $0x798] sm:$0xff] }
 0x34f   :  { %2624 = vmatprep.mubr.bf16.mxu1 %v8457_v53  ;;  %2675 = vmatpush1.bf16.msra.mxu0 %v6473_v15  ;;  %v6538_v15 = vcombine.high %v1004_v10, %v1008_v11  ;;  %v6537_v25 = vcombine.low %v1004_v10, %v1008_v11  ;;  %v1056_v1 = vld [vmem:[#allocation10 + $0x7b8] sm:$0xff] }
 0x350   :  { %2706 = vmatprep.mubr.bf16.mxu0 %v8457_v53  ;;  %2594 = vmatprep.subr.bf16.mxu1 %v6480_v16  ;;  %v6495_v53 = vcombine.low %v963_v32, %v967_v33  ;;  %v1011_v16 = vld [vmem:[#allocation10 + $0x650] sm:$0xff]  ;;  %v1020_v32 = vld [vmem:[#allocation10 + $0x698] sm:$0xff]  ;;  %v6585_v11 = vcombine.low %v1052_v0, %v1056_v1 }
 0x351   :  { %2676 = vmatprep.subr.bf16.mxu0 %v6482_v24  ;;  %v1016_v24 = vld [vmem:[#allocation10 + $0x678] sm:$0xff]  ;;  %v6543_v34 = vcombine.low %v1011_v16, %v1015_v17 }
 0x352   :  { %2595 = vmatpush1.bf16.msra.mxu1 %v6479_v27  ;;  %v6544_v27 = vcombine.high %v1011_v16, %v1015_v17  ;;  %v1024_v33 = vld [vmem:[#allocation10 + $0x6b8] sm:$0xff]  ;;  %v6545_v35 = vcombine.low %v1012_v18, %v1016_v24  ;;  %v7348_v16 = vld [vmem:[#allocation13 + $0x4] ss:$28 sps:$4 sm:$0xff]   ;;  %v7351_v17 = vld [vmem:[#allocation13 + $0xc] ss:$28 sps:$4 sm:$0xff]  }
 0x353   :  { %2677 = vmatpush1.bf16.msra.mxu0 %v6481_v28  ;;  %2596 = vmatprep.subr.bf16.mxu1 %v6488_v57  ;;  %v6546_v28 = vcombine.high %v1012_v18, %v1016_v24  ;;  %v1019_v57 = vld [vmem:[#allocation10 + $0x690] sm:$0xff]  ;;  %v6553_v42 = vcombine.low %v1020_v32, %v1024_v33  ;;  %v1060_v8 = vld [vmem:[#allocation10 + $0x7d8] sm:$0xff]  ;;  %v7346_v18 = vld [vmem:[#allocation13] ss:$28 sps:$4 sm:$0xff]  }
 0x354   :  { %2678 = vmatprep.subr.bf16.mxu0 %v6490_v31  ;;  %v1023_v31 = vld [vmem:[#allocation10 + $0x6b0] sm:$0xff]  ;;  %v1064_v9 = vld [vmem:[#allocation10 + $0x7f8] sm:$0xff] }
 0x355   :  { %v6551_v41 = vcombine.low %v1019_v57, %v1023_v31  ;;  %v7349_v24 = vld [vmem:[#allocation13 + $0x8] ss:$28 sps:$4 sm:$0xff]  }
 0x356   :  { %2597 = vmatpush1.bf16.msra.mxu1 %v6487_v36  ;;  %v6552_v36 = vcombine.high %v1019_v57, %v1023_v31  ;;  %v7360_v57 = vld [vmem:[#allocation13 + $0x74] ss:$28 sps:$4 sm:$0xff]   ;;  %v7363_v31 = vld [vmem:[#allocation13 + $0x7c] ss:$28 sps:$4 sm:$0xff]  }
 0x357   :  { %2679 = vmatpush1.bf16.msra.mxu0 %v6489_v39  ;;  %2598 = vmatprep.subr.bf16.mxu1 %v6496_v37  ;;  %v6554_v39 = vcombine.high %v1020_v32, %v1024_v33  ;;  %v1027_v37 = vld [vmem:[#allocation10 + $0x6d0] sm:$0xff]  ;;  %v7361_v33 = vld [vmem:[#allocation13 + $0x78] ss:$28 sps:$4 sm:$0xff]  }
 0x358   :  { %2680 = vmatprep.subr.bf16.mxu0 %v6498_v29  ;;  %v1031_v29 = vld [vmem:[#allocation10 + $0x6f0] sm:$0xff] }
 0x359   :  { %v6559_v54 = vcombine.low %v1027_v37, %v1031_v29  ;;  %v7358_v32 = vld [vmem:[#allocation13 + $0x70] ss:$28 sps:$4 sm:$0xff]  }
 0x35a   :  { %2599 = vmatpush1.bf16.msra.mxu1 %v6495_v53  ;;  %v6560_v53 = vcombine.high %v1027_v37, %v1031_v29  ;;  %v7375_v37 = vld [vmem:[#allocation13 + $0xec] ss:$28 sps:$4 sm:$0xff]   ;;  %v7370_v29 = vld [vmem:[#allocation13 + $0xe0] ss:$28 sps:$4 sm:$0xff]  }
 0x35b   :  { %2681 = vmatpush1.bf16.msra.mxu0 %v6497_v43  ;;  %2600 = vmatprep.subr.bf16.mxu1 %v6504_v47  ;;  %v6562_v43 = vcombine.high %v1028_v40, %v1032_v30  ;;  %v1035_v47 = vld [vmem:[#allocation10 + $0x710] sm:$0xff]  ;;  %v7378_v30 = vld [vmem:[#allocation13 + $0x11c] ss:$28 sps:$4 sm:$0xff]  }
 0x35c   :  { %2682 = vmatprep.subr.bf16.mxu0 %v6506_v48  ;;  %v1039_v48 = vld [vmem:[#allocation10 + $0x730] sm:$0xff] }
 0x35d   :  { %v6567_v45 = vcombine.low %v1035_v47, %v1039_v48  ;;  %v7373_v40 = vld [vmem:[#allocation13 + $0xe8] ss:$28 sps:$4 sm:$0xff]  }
 0x35e   :  { %2601 = vmatpush1.bf16.msra.mxu1 %v6503_v56  ;;  %v6568_v56 = vcombine.high %v1035_v47, %v1039_v48  ;;  %v7387_v47 = vld [vmem:[#allocation13 + $0x15c] ss:$28 sps:$4 sm:$0xff]   ;;  %v7382_v48 = vld [vmem:[#allocation13 + $0x150] ss:$28 sps:$4 sm:$0xff]  }
 0x35f   :  { %2683 = vmatpush1.bf16.msra.mxu0 %v6505_v21  ;;  %2602 = vmatprep.subr.bf16.mxu1 %v6512_v58  ;;  %v6570_v21 = vcombine.high %v1036_v50, %v1040_v51  ;;  %v1043_v58 = vld [vmem:[#allocation10 + $0x750] sm:$0xff]  ;;  %v7385_v50 = vld [vmem:[#allocation13 + $0x158] ss:$28 sps:$4 sm:$0xff]  }
 0x360   :  { %2684 = vmatprep.subr.bf16.mxu0 %v6514_v59  ;;  %v1047_v59 = vld [vmem:[#allocation10 + $0x770] sm:$0xff] }
 0x361   :  { %v6575_v2 = vcombine.low %v1043_v58, %v1047_v59  ;;  %v7390_v51 = vld [vmem:[#allocation13 + $0x18c] ss:$28 sps:$4 sm:$0xff]  }
 0x362   :  { %2603 = vmatpush1.bf16.msra.mxu1 %v6511_v49  ;;  %v6576_v49 = vcombine.high %v1043_v58, %v1047_v59  ;;  %v7399_v58 = vld [vmem:[#allocation13 + $0x1cc] ss:$28 sps:$4 sm:$0xff]   ;;  %v7394_v59 = vld [vmem:[#allocation13 + $0x1c0] ss:$28 sps:$4 sm:$0xff]  }
 0x363   :  { %2685 = vmatpush1.bf16.msra.mxu0 %v6513_v52  ;;  %2604 = vmatprep.subr.bf16.mxu1 %v6520_v61  ;;  %v6578_v52 = vcombine.high %v1044_v60, %v1048_v44  ;;  %v1051_v61 = vld [vmem:[#allocation10 + $0x790] sm:$0xff]  ;;  %v7402_v44 = vld [vmem:[#allocation13 + $0x1fc] ss:$28 sps:$4 sm:$0xff]  }
 0x364   :  { %2686 = vmatprep.subr.bf16.mxu0 %v6522_v63  ;;  %v1055_v63 = vld [vmem:[#allocation10 + $0x7b0] sm:$0xff] }
 0x365   :  { %v6583_v10 = vcombine.low %v1051_v61, %v1055_v63  ;;  %v7397_v60 = vld [vmem:[#allocation13 + $0x1c8] ss:$28 sps:$4 sm:$0xff]  }
 0x366   :  { %2605 = vmatpush1.bf16.msra.mxu1 %v6519_v4  ;;  %v6584_v4 = vcombine.high %v1051_v61, %v1055_v63  ;;  %v7411_v61 = vld [vmem:[#allocation13 + $0x23c] ss:$28 sps:$4 sm:$0xff]   ;;  %v7406_v63 = vld [vmem:[#allocation13 + $0x230] ss:$28 sps:$4 sm:$0xff]  }
 0x367   :  { %2687 = vmatpush1.bf16.msra.mxu0 %v6521_v5  ;;  %2606 = vmatprep.subr.bf16.mxu1 %v6528_v6  ;;  %v6586_v5 = vcombine.high %v1052_v0, %v1056_v1  ;;  %v1059_v6 = vld [vmem:[#allocation10 + $0x7d0] sm:$0xff]  ;;  %v7409_v0 = vld [vmem:[#allocation13 + $0x238] ss:$28 sps:$4 sm:$0xff]  }
 0x368   :  { %2688 = vmatprep.subr.bf16.mxu0 %v6530_v7  ;;  %v1063_v7 = vld [vmem:[#allocation10 + $0x7f0] sm:$0xff] }
 0x369   :  { %v7414_v1 = vld [vmem:[#allocation13 + $0x26c] ss:$28 sps:$4 sm:$0xff]  }
 0x36a   :  { %2607 = vmatpush1.bf16.msra.mxu1 %v6527_v12  ;;  %v6592_v12 = vcombine.high %v1059_v6, %v1063_v7 }
 0x36b   :  { %2689 = vmatpush1.bf16.msra.mxu0 %v6529_v13  ;;  %2608 = vmatprep.subr.bf16.mxu1 %v6536_v14  ;;  %v6594_v13 = vcombine.high %v1060_v8, %v1064_v9  ;;  %v6591_v14 = vcombine.low %v1059_v6, %v1063_v7  ;;  %v7423_v6 = vld [vmem:[#allocation13 + $0x2ac] ss:$28 sps:$4 sm:$0xff]   ;;  %v7418_v7 = vld [vmem:[#allocation13 + $0x2a0] ss:$28 sps:$4 sm:$0xff]  }
 0x36c   :  { %2690 = vmatprep.subr.bf16.mxu0 %v6538_v15  ;;  %v6593_v15 = vcombine.low %v1060_v8, %v1064_v9  ;;  %v7421_v8 = vld [vmem:[#allocation13 + $0x2a8] ss:$28 sps:$4 sm:$0xff]   ;;  %v7426_v9 = vld [vmem:[#allocation13 + $0x2dc] ss:$28 sps:$4 sm:$0xff]  }
 0x36e   :  { %2609 = vmatpush1.bf16.msra.mxu1 %v6535_v38  ;;  %v7354_v38 = vld [vmem:[#allocation13 + $0x3c] ss:$28 sps:$4 sm:$0xff]  }
 0x36f   :  { %2691 = vmatpush1.bf16.msra.mxu0 %v6537_v25  ;;  %2610 = vmatprep.subr.bf16.mxu1 %v6544_v27  ;;  %v7357_v25 = vld [vmem:[#allocation13 + $0x44] ss:$28 sps:$4 sm:$0xff]   ;;  %v7352_v27 = vld [vmem:[#allocation13 + $0x38] ss:$28 sps:$4 sm:$0xff]  }
 0x370   :  { %2692 = vmatprep.subr.bf16.mxu0 %v6546_v28  ;;  %v7355_v28 = vld [vmem:[#allocation13 + $0x40] ss:$28 sps:$4 sm:$0xff]  }
 0x372   :  { %2611 = vmatpush1.bf16.msra.mxu1 %v6543_v34  ;;  %v7366_v34 = vld [vmem:[#allocation13 + $0xac] ss:$28 sps:$4 sm:$0xff]  }
 0x373   :  { %2693 = vmatpush1.bf16.msra.mxu0 %v6545_v35  ;;  %2612 = vmatprep.subr.bf16.mxu1 %v6552_v36  ;;  %v7369_v35 = vld [vmem:[#allocation13 + $0xb4] ss:$28 sps:$4 sm:$0xff]   ;;  %v7364_v36 = vld [vmem:[#allocation13 + $0xa8] ss:$28 sps:$4 sm:$0xff]  }
 0x374   :  { %2694 = vmatprep.subr.bf16.mxu0 %v6554_v39  ;;  %v7372_v39 = vld [vmem:[#allocation13 + $0xe4] ss:$28 sps:$4 sm:$0xff]  }
 0x376   :  { %2613 = vmatpush1.bf16.msra.mxu1 %v6551_v41  ;;  %v7381_v41 = vld [vmem:[#allocation13 + $0x124] ss:$28 sps:$4 sm:$0xff]  }
 0x377   :  { %2695 = vmatpush1.bf16.msra.mxu0 %v6553_v42  ;;  %2614 = vmatprep.subr.bf16.mxu1 %v6560_v53  ;;  %v7376_v42 = vld [vmem:[#allocation13 + $0x118] ss:$28 sps:$4 sm:$0xff]   ;;  %v7379_v53 = vld [vmem:[#allocation13 + $0x120] ss:$28 sps:$4 sm:$0xff]  }
 0x378   :  { %2696 = vmatprep.subr.bf16.mxu0 %v6562_v43  ;;  %v7384_v43 = vld [vmem:[#allocation13 + $0x154] ss:$28 sps:$4 sm:$0xff]  }
 0x37a   :  { %2615 = vmatpush1.bf16.msra.mxu1 %v6559_v54  ;;  %v7393_v54 = vld [vmem:[#allocation13 + $0x194] ss:$28 sps:$4 sm:$0xff]  }
 0x37b   :  { %2697 = vmatpush1.bf16.msra.mxu0 %v6561_v55  ;;  %2616 = vmatprep.subr.bf16.mxu1 %v6568_v56  ;;  %v7388_v55 = vld [vmem:[#allocation13 + $0x188] ss:$28 sps:$4 sm:$0xff]   ;;  %v7391_v56 = vld [vmem:[#allocation13 + $0x190] ss:$28 sps:$4 sm:$0xff]  }
 0x37c   :  { %2698 = vmatprep.subr.bf16.mxu0 %v6570_v21  ;;  %v7396_v21 = vld [vmem:[#allocation13 + $0x1c4] ss:$28 sps:$4 sm:$0xff]  }
 0x37e   :  { %2617 = vmatpush1.bf16.msra.mxu1 %v6567_v45  ;;  %v7405_v45 = vld [vmem:[#allocation13 + $0x204] ss:$28 sps:$4 sm:$0xff]  }
 0x37f   :  { %2699 = vmatpush1.bf16.msra.mxu0 %v6569_v46  ;;  %2618 = vmatprep.subr.bf16.mxu1 %v6576_v49  ;;  %v7400_v46 = vld [vmem:[#allocation13 + $0x1f8] ss:$28 sps:$4 sm:$0xff]   ;;  %v7403_v49 = vld [vmem:[#allocation13 + $0x200] ss:$28 sps:$4 sm:$0xff]  }
 0x380   :  { %2700 = vmatprep.subr.bf16.mxu0 %v6578_v52  ;;  %v7408_v52 = vld [vmem:[#allocation13 + $0x234] ss:$28 sps:$4 sm:$0xff]  }
 0x382   :  { %2619 = vmatpush1.bf16.msra.mxu1 %v6575_v2  ;;  %v7417_v2 = vld [vmem:[#allocation13 + $0x274] ss:$28 sps:$4 sm:$0xff]  }
 0x383   :  { %2701 = vmatpush1.bf16.msra.mxu0 %v6577_v3  ;;  %2620 = vmatprep.subr.bf16.mxu1 %v6584_v4  ;;  %v7412_v3 = vld [vmem:[#allocation13 + $0x268] ss:$28 sps:$4 sm:$0xff]   ;;  %v7415_v4 = vld [vmem:[#allocation13 + $0x270] ss:$28 sps:$4 sm:$0xff]  }
 0x384   :  { %2702 = vmatprep.subr.bf16.mxu0 %v6586_v5  ;;  %v7420_v5 = vld [vmem:[#allocation13 + $0x2a4] ss:$28 sps:$4 sm:$0xff]  }
 0x386   :  { %2621 = vmatpush1.bf16.msra.mxu1 %v6583_v10  ;;  %v7429_v10 = vld [vmem:[#allocation13 + $0x2e4] ss:$28 sps:$4 sm:$0xff]  }
 0x387   :  { %2703 = vmatpush1.bf16.msra.mxu0 %v6585_v11  ;;  %2622 = vmatprep.subr.bf16.mxu1 %v6592_v12  ;;  %v7424_v11 = vld [vmem:[#allocation13 + $0x2d8] ss:$28 sps:$4 sm:$0xff]   ;;  %v7427_v12 = vld [vmem:[#allocation13 + $0x2e0] ss:$28 sps:$4 sm:$0xff]  }
 0x388   :  { %2704 = vmatprep.subr.bf16.mxu0 %v6594_v13  ;;  %v7432_v13 = vld [vmem:[#allocation13 + $0x314] ss:$28 sps:$4 sm:$0xff]  }
 0x38a   :  { %2623 = vmatpush1.bf16.msra.mxu1 %v6591_v14  ;;  %v7435_v14 = vld [vmem:[#allocation13 + $0x31c] ss:$28 sps:$4 sm:$0xff]  }
 0x38b   :  { %2705 = vmatpush1.bf16.msra.mxu0 %v6593_v15  ;;  %5584 = vmatprep.subr.bf16.mxu1 %v7348_v16  ;;  %v7430_v15 = vld [vmem:[#allocation13 + $0x310] ss:$28 sps:$4 sm:$0xff]   ;;  %v7433_v16 = vld [vmem:[#allocation13 + $0x318] ss:$28 sps:$4 sm:$0xff]  }
 0x38c   :  { %5748 = vmatprep.subr.bf16.mxu0 %v7351_v17  ;;  %v7438_v17 = vld [vmem:[#allocation13 + $0x34c] ss:$28 sps:$4 sm:$0xff]  }
 0x38d   :  { %2625 = vmatmul.mubr.bf16.vlgmr.msra.gmra.mrb[8].mxu1 %v8459_v62 }
 0x38e   :  { %2707 = vmatmul.mubr.bf16.vlgmr.msra.gmra.mrb[16].mxu0 %v8459_v62  ;;  %5585 = vmatpush1.bf16.msra.mxu1 %v7346_v18  ;;  %v7367_v62 = vld [vmem:[#allocation13 + $0xb0] ss:$28 sps:$4 sm:$0xff]  }
 0x38f   :  { %5749 = vmatpush1.bf16.msra.mxu0 %v7349_v24  ;;  %5586 = vmatprep.subr.bf16.mxu1 %v7354_v38  ;;  %v7441_v18 = vld [vmem:[#allocation13 + $0x354] ss:$28 sps:$4 sm:$0xff]   ;;  %v7436_v24 = vld [vmem:[#allocation13 + $0x348] ss:$28 sps:$4 sm:$0xff]  }
 0x390   :  { %5750 = vmatprep.subr.bf16.mxu0 %v7357_v25  ;;  %v7439_v38 = vld [vmem:[#allocation13 + $0x350] ss:$28 sps:$4 sm:$0xff]   ;;  %v7444_v25 = vld [vmem:[#allocation13 + $0x384] ss:$28 sps:$4 sm:$0xff]  }
 0x392   :  { %5587 = vmatpush1.bf16.msra.mxu1 %v7352_v27  ;;  %v7447_v27 = vld [vmem:[#allocation13 + $0x38c] ss:$28 sps:$4 sm:$0xff]  }
 0x393   :  { %5751 = vmatpush1.bf16.msra.mxu0 %v7355_v28  ;;  %5588 = vmatprep.subr.bf16.mxu1 %v7360_v57  ;;  %v8473_v28 = vld [vmem:[#allocation11] sm:$0xff] }
 0x394   :  { %5752 = vmatprep.subr.bf16.mxu0 %v7363_v31  ;;  %v1070_v57 = vrot.slane %v8473_v28, %v8422_v20  ;;  %v1074_v31 = vrot.slane %v8473_v28, %v8427_v22 }
 0x396   :  { %5589 = vmatpush1.bf16.msra.mxu1 %v7358_v32  ;;  %v1082_v32 = vrot.slane %v8473_v28, %v8451_v26 }
 0x397   :  { %5753 = vmatpush1.bf16.msra.mxu0 %v7361_v33  ;;  %5590 = vmatprep.subr.bf16.mxu1 %v7366_v34 }
 0x398   :  { %5754 = vmatprep.subr.bf16.mxu0 %v7369_v35 }
 0x39a   :  { %5591 = vmatpush1.bf16.msra.mxu1 %v7364_v36 }
 0x39b   :  { %5755 = vmatpush1.bf16.msra.mxu0 %v7367_v62  ;;  %5592 = vmatprep.subr.bf16.mxu1 %v7372_v39 }
 0x39c   :  { %5756 = vmatprep.subr.bf16.mxu0 %v7375_v37 }
 0x39e   :  { %5593 = vmatpush1.bf16.msra.mxu1 %v7370_v29 }
 0x39f   :  { %5757 = vmatpush1.bf16.msra.mxu0 %v7373_v40  ;;  %5594 = vmatprep.subr.bf16.mxu1 %v7378_v30 }
 0x3a0   :  { %5758 = vmatprep.subr.bf16.mxu0 %v7381_v41 }
 0x3a2   :  { %5595 = vmatpush1.bf16.msra.mxu1 %v7376_v42 }
 0x3a3   :  { %5759 = vmatpush1.bf16.msra.mxu0 %v7379_v53  ;;  %5596 = vmatprep.subr.bf16.mxu1 %v7384_v43 }
 0x3a4   :  { %5760 = vmatprep.subr.bf16.mxu0 %v7387_v47 }
 0x3a6   :  { %5597 = vmatpush1.bf16.msra.mxu1 %v7382_v48  ;;  %v7442_v48 = vld [vmem:[#allocation13 + $0x380] ss:$28 sps:$4 sm:$0xff]  }
 0x3a7   :  { %5761 = vmatpush1.bf16.msra.mxu0 %v7385_v50  ;;  %5598 = vmatprep.subr.bf16.mxu1 %v7390_v51  ;;  %v7445_v50 = vld [vmem:[#allocation13 + $0x388] ss:$28 sps:$4 sm:$0xff]  }
 0x3a8   :  { %5762 = vmatprep.subr.bf16.mxu0 %v7393_v54  ;;  %v7450_v54 = vld [vmem:[#allocation13 + $0x3bc] ss:$28 sps:$4 sm:$0xff]  }
 0x3aa   :  { %5599 = vmatpush1.bf16.msra.mxu1 %v7388_v55  ;;  %v7453_v55 = vld [vmem:[#allocation13 + $0x3c4] ss:$28 sps:$4 sm:$0xff]  }
 0x3ab   :  { %5763 = vmatpush1.bf16.msra.mxu0 %v7391_v56  ;;  %5600 = vmatprep.subr.bf16.mxu1 %v7396_v21  ;;  %v7448_v21 = vld [vmem:[#allocation13 + $0x3b8] ss:$28 sps:$4 sm:$0xff]  }
 0x3ac   :  { %5764 = vmatprep.subr.bf16.mxu0 %v7399_v58  ;;  %v7451_v58 = vld [vmem:[#allocation13 + $0x3c0] ss:$28 sps:$4 sm:$0xff]  }
 0x3ae   :  { %5601 = vmatpush1.bf16.msra.mxu1 %v7394_v59  ;;  %v7456_v59 = vld [vmem:[#allocation13 + $0x3f4] ss:$28 sps:$4 sm:$0xff]  }
 0x3af   :  { %5765 = vmatpush1.bf16.msra.mxu0 %v7397_v60  ;;  %5602 = vmatprep.subr.bf16.mxu1 %v7402_v44  ;;  %v7459_v60 = vld [vmem:[#allocation13 + $0x3fc] ss:$28 sps:$4 sm:$0xff]   ;;  %v7454_v44 = vld [vmem:[#allocation13 + $0x3f0] ss:$28 sps:$4 sm:$0xff]  }
 0x3b0   :  { %5766 = vmatprep.subr.bf16.mxu0 %v7405_v45  ;;  %v7457_v45 = vld [vmem:[#allocation13 + $0x3f8] ss:$28 sps:$4 sm:$0xff]  }
 0x3b2   :  { %5603 = vmatpush1.bf16.msra.mxu1 %v7400_v46  ;;  %v7462_v46 = vld [vmem:[#allocation13 + $0x42c] ss:$28 sps:$4 sm:$0xff]  }
 0x3b3   :  { %5767 = vmatpush1.bf16.msra.mxu0 %v7403_v49  ;;  %5604 = vmatprep.subr.bf16.mxu1 %v7408_v52  ;;  %v7465_v49 = vld [vmem:[#allocation13 + $0x434] ss:$28 sps:$4 sm:$0xff]   ;;  %v7460_v52 = vld [vmem:[#allocation13 + $0x428] ss:$28 sps:$4 sm:$0xff]  }
 0x3b4   :  { %5768 = vmatprep.subr.bf16.mxu0 %v7411_v61  ;;  %v7463_v61 = vld [vmem:[#allocation13 + $0x430] ss:$28 sps:$4 sm:$0xff]  }
 0x3b6   :  { %5605 = vmatpush1.bf16.msra.mxu1 %v7406_v63  ;;  %v7468_v63 = vld [vmem:[#allocation13 + $0x464] ss:$28 sps:$4 sm:$0xff]  }
 0x3b7   :  { %5769 = vmatpush1.bf16.msra.mxu0 %v7409_v0  ;;  %5606 = vmatprep.subr.bf16.mxu1 %v7414_v1  ;;  %v7471_v0 = vld [vmem:[#allocation13 + $0x46c] ss:$28 sps:$4 sm:$0xff]   ;;  %v7466_v1 = vld [vmem:[#allocation13 + $0x460] ss:$28 sps:$4 sm:$0xff]  }
 0x3b8   :  { %5770 = vmatprep.subr.bf16.mxu0 %v7417_v2  ;;  %v7469_v2 = vld [vmem:[#allocation13 + $0x468] ss:$28 sps:$4 sm:$0xff]  }
 0x3ba   :  { %5607 = vmatpush1.bf16.msra.mxu1 %v7412_v3  ;;  %v7474_v3 = vld [vmem:[#allocation13 + $0x49c] ss:$28 sps:$4 sm:$0xff]  }
 0x3bb   :  { %5771 = vmatpush1.bf16.msra.mxu0 %v7415_v4  ;;  %5608 = vmatprep.subr.bf16.mxu1 %v7420_v5  ;;  %v7477_v4 = vld [vmem:[#allocation13 + $0x4a4] ss:$28 sps:$4 sm:$0xff]   ;;  %v7472_v5 = vld [vmem:[#allocation13 + $0x498] ss:$28 sps:$4 sm:$0xff]  }
 0x3bc   :  { %5772 = vmatprep.subr.bf16.mxu0 %v7423_v6  ;;  %v7475_v6 = vld [vmem:[#allocation13 + $0x4a0] ss:$28 sps:$4 sm:$0xff]  }
 0x3be   :  { %5609 = vmatpush1.bf16.msra.mxu1 %v7418_v7  ;;  %v7480_v7 = vld [vmem:[#allocation13 + $0x4d4] ss:$28 sps:$4 sm:$0xff]  }
 0x3bf   :  { %5773 = vmatpush1.bf16.msra.mxu0 %v7421_v8  ;;  %5610 = vmatprep.subr.bf16.mxu1 %v7426_v9  ;;  %v7483_v8 = vld [vmem:[#allocation13 + $0x4dc] ss:$28 sps:$4 sm:$0xff]   ;;  %v7478_v9 = vld [vmem:[#allocation13 + $0x4d0] ss:$28 sps:$4 sm:$0xff]  }
 0x3c0   :  { %5774 = vmatprep.subr.bf16.mxu0 %v7429_v10  ;;  %v7481_v10 = vld [vmem:[#allocation13 + $0x4d8] ss:$28 sps:$4 sm:$0xff]  }
 0x3c2   :  { %5611 = vmatpush1.bf16.msra.mxu1 %v7424_v11  ;;  %v7486_v11 = vld [vmem:[#allocation13 + $0x50c] ss:$28 sps:$4 sm:$0xff]  }
 0x3c3   :  { %5775 = vmatpush1.bf16.msra.mxu0 %v7427_v12  ;;  %5612 = vmatprep.subr.bf16.mxu1 %v7432_v13  ;;  %v7489_v12 = vld [vmem:[#allocation13 + $0x514] ss:$28 sps:$4 sm:$0xff]   ;;  %v7484_v13 = vld [vmem:[#allocation13 + $0x508] ss:$28 sps:$4 sm:$0xff]  }
 0x3c4   :  { %5776 = vmatprep.subr.bf16.mxu0 %v7435_v14  ;;  %v7487_v14 = vld [vmem:[#allocation13 + $0x510] ss:$28 sps:$4 sm:$0xff]  }
 0x3c6   :  { %5613 = vmatpush1.bf16.msra.mxu1 %v7430_v15  ;;  %v7492_v15 = vld [vmem:[#allocation13 + $0x544] ss:$28 sps:$4 sm:$0xff]  }
 0x3c7   :  { %5777 = vmatpush1.bf16.msra.mxu0 %v7433_v16  ;;  %5614 = vmatprep.subr.bf16.mxu1 %v7438_v17  ;;  %v7495_v16 = vld [vmem:[#allocation13 + $0x54c] ss:$28 sps:$4 sm:$0xff]   ;;  %v7490_v17 = vld [vmem:[#allocation13 + $0x540] ss:$28 sps:$4 sm:$0xff]  }
 0x3c8   :  { %5778 = vmatprep.subr.bf16.mxu0 %v7441_v18  ;;  %v7493_v18 = vld [vmem:[#allocation13 + $0x548] ss:$28 sps:$4 sm:$0xff]  }
 0x3ca   :  { %5615 = vmatpush1.bf16.msra.mxu1 %v7436_v24  ;;  %v7498_v24 = vld [vmem:[#allocation13 + $0x57c] ss:$28 sps:$4 sm:$0xff]  }
 0x3cb   :  { %5779 = vmatpush1.bf16.msra.mxu0 %v7439_v38  ;;  %5625 = vmatprep.subr.bf16.mxu1 %v7444_v25  ;;  %v7501_v38 = vld [vmem:[#allocation13 + $0x584] ss:$28 sps:$4 sm:$0xff]   ;;  %v7496_v25 = vld [vmem:[#allocation13 + $0x578] ss:$28 sps:$4 sm:$0xff]  }
 0x3cc   :  { %5789 = vmatprep.subr.bf16.mxu0 %v7447_v27  ;;  %v7499_v27 = vld [vmem:[#allocation13 + $0x580] ss:$28 sps:$4 sm:$0xff]  }
 0x3e0   :  { %v2462_v33 = vpop.f32.mrb[4].mxu1  ;;  %v8481_v34 = vpop.f32.mrb[12].mxu0 }
 0x3e1   :  { %v7163_v35 = vadd.f32 %v2462_v33, %v1070_v57  ;;  %v2464_v36 = vpop.f32.mrb[5].mxu1  ;;  %v2546_v62 = vpop.f32.mrb[13].mxu0  ;;  %v7504_v57 = vld [vmem:[#allocation13 + $0x5b4] ss:$28 sps:$4 sm:$0xff]  }
 0x3e2   :  { %v7164_v39 = vadd.f32 %v2464_v36, %v1074_v31  ;;  %v7166_v37 = vadd.f32 %v2546_v62, %v1082_v32  ;;  %v2466_v29 = vpop.f32.mrb[6].mxu1  ;;  %v2548_v40 = vpop.f32.mrb[14].mxu0  ;;  %v7507_v31 = vld [vmem:[#allocation13 + $0x5bc] ss:$28 sps:$4 sm:$0xff]   ;;  %v7502_v32 = vld [vmem:[#allocation13 + $0x5b0] ss:$28 sps:$4 sm:$0xff]  }
 0x3e3   :  { %v2715_v30 = vmax.f32 %v7163_v35, 0.0  ;;  %v2467_v41 = vpop.f32.mrb[7].mxu1  ;;  %v2549_v42 = vpop.f32.mrb[15].mxu0  ;;  %v7505_v33 = vld [vmem:[#allocation13 + $0x5b8] ss:$28 sps:$4 sm:$0xff]  }
 0x3e4   :  { %v2716_v53 = vmax.f32 %v7164_v39, 0.0  ;;  %v2718_v43 = vmax.f32 %v7166_v37, 0.0  ;;  %v7510_v35 = vld [vmem:[#allocation13 + $0x5ec] ss:$28 sps:$4 sm:$0xff]   ;;  %v7513_v36 = vld [vmem:[#allocation13 + $0x5f4] ss:$28 sps:$4 sm:$0xff]  }
 0x3e5   :  { %v8485_v51 = vpack.c.bf16 %v2715_v30, %v2715_v30  ;;  %v7508_v62 = vld [vmem:[#allocation13 + $0x5e8] ss:$28 sps:$4 sm:$0xff]   ;;  %v7511_v39 = vld [vmem:[#allocation13 + $0x5f0] ss:$28 sps:$4 sm:$0xff]   ;;  %v7514_v40 = vld [vmem:[#allocation13 + $0x620] ss:$28 sps:$4 sm:$0xff]  }
 0x3e6   :  { %v8483_v47 = vpack.c.bf16 %v2716_v53, %v2716_v53  ;;  %v8489_v56 = vpack.c.bf16 %v2718_v43, %v2718_v43  ;;  %v7516_v37 = vld [vmem:[#allocation13 + $0x624] ss:$28 sps:$4 sm:$0xff]   ;;  %v7519_v29 = vld [vmem:[#allocation13 + $0x62c] ss:$28 sps:$4 sm:$0xff]   ;;  %v7522_v41 = vld [vmem:[#allocation13 + $0x65c] ss:$28 sps:$4 sm:$0xff]  }
 0x3e7   :  { %v7517_v30 = vld [vmem:[#allocation13 + $0x628] ss:$28 sps:$4 sm:$0xff]   ;;  %v7520_v53 = vld [vmem:[#allocation13 + $0x658] ss:$28 sps:$4 sm:$0xff]   ;;  %v7523_v43 = vld [vmem:[#allocation13 + $0x660] ss:$28 sps:$4 sm:$0xff]  }
 0x3e8   :  { %5616 = vmatprep.mubr.bf16.mxu1 %v8483_v47  ;;  %5780 = vmatprep.mubr.bf16.mxu0 %v8483_v47  ;;  %v7525_v42 = vld [vmem:[#allocation13 + $0x664] ss:$28 sps:$4 sm:$0xff]  }
 0x3e9   :  { %5617 = vmatmul.mubr.bf16.vlgmr.msra.gmra.mrb[12].mxu1 %v8485_v51  ;;  %5781 = vmatmul.mubr.bf16.vlgmr.msra.gmra.mrb[20].mxu0 %v8485_v51 }
 0x3ea   :  { %5626 = vmatpush1.bf16.msra.mxu1 %v7442_v48  ;;  %5790 = vmatpush1.bf16.msra.mxu0 %v7445_v50  ;;  %v1078_v48 = vrot.slane %v8473_v28, %v8448_v23  ;;  %v7528_v50 = vld [vmem:[#allocation13 + $0x694] ss:$28 sps:$4 sm:$0xff]  }
 0x3eb   :  { %5657 = vmatprep.mubr.bf16.mxu1 %v8489_v56  ;;  %5821 = vmatprep.mubr.bf16.mxu0 %v8489_v56 }
 0x3ec   :  { %5627 = vmatprep.subr.bf16.mxu1 %v7450_v54  ;;  %5791 = vmatprep.subr.bf16.mxu0 %v7453_v55  ;;  %v7531_v54 = vld [vmem:[#allocation13 + $0x69c] ss:$28 sps:$4 sm:$0xff]   ;;  %v7526_v55 = vld [vmem:[#allocation13 + $0x690] ss:$28 sps:$4 sm:$0xff]  }
 0x3ee   :  { %5628 = vmatpush1.bf16.msra.mxu1 %v7448_v21  ;;  %5792 = vmatpush1.bf16.msra.mxu0 %v7451_v58  ;;  %v7529_v21 = vld [vmem:[#allocation13 + $0x698] ss:$28 sps:$4 sm:$0xff]   ;;  %v7165_v58 = vadd.f32 %v8481_v34, %v1078_v48 }
 0x3ef   :  { %5629 = vmatprep.subr.bf16.mxu1 %v7456_v59  ;;  %5793 = vmatprep.subr.bf16.mxu0 %v7459_v60  ;;  %v7534_v59 = vld [vmem:[#allocation13 + $0x6cc] ss:$28 sps:$4 sm:$0xff]   ;;  %v7537_v60 = vld [vmem:[#allocation13 + $0x6d4] ss:$28 sps:$4 sm:$0xff]   ;;  %v7546_v34 = vld [vmem:[#allocation13 + $0x73c] ss:$28 sps:$4 sm:$0xff]  }
 0x3f0   :  { %v7601_v48 = vld [vmem:[#allocation13 + $0x938] ss:$28 sps:$4 sm:$0xff]  }
 0x3f2   :  { %5630 = vmatpush1.bf16.msra.mxu1 %v7454_v44  ;;  %5794 = vmatpush1.bf16.msra.mxu0 %v7457_v45  ;;  %v7532_v44 = vld [vmem:[#allocation13 + $0x6c8] ss:$28 sps:$4 sm:$0xff]   ;;  %v7535_v45 = vld [vmem:[#allocation13 + $0x6d0] ss:$28 sps:$4 sm:$0xff]  }
 0x3f3   :  { %5631 = vmatprep.subr.bf16.mxu1 %v7462_v46  ;;  %5795 = vmatprep.subr.bf16.mxu0 %v7465_v49  ;;  %v2717_v46 = vmax.f32 %v7165_v58, 0.0  ;;  %v7540_v49 = vld [vmem:[#allocation13 + $0x704] ss:$28 sps:$4 sm:$0xff]  }
 0x3f4   :  { %v7612_v58 = vld [vmem:[#allocation13 + $0x9a4] ss:$28 sps:$4 sm:$0xff]  }
 0x3f6   :  { %5632 = vmatpush1.bf16.msra.mxu1 %v7460_v52  ;;  %5796 = vmatpush1.bf16.msra.mxu0 %v7463_v61  ;;  %v7543_v52 = vld [vmem:[#allocation13 + $0x70c] ss:$28 sps:$4 sm:$0xff]   ;;  %v7538_v61 = vld [vmem:[#allocation13 + $0x700] ss:$28 sps:$4 sm:$0xff]  }
 0x3f7   :  { %5633 = vmatprep.subr.bf16.mxu1 %v7468_v63  ;;  %5797 = vmatprep.subr.bf16.mxu0 %v7471_v0  ;;  %v7541_v63 = vld [vmem:[#allocation13 + $0x708] ss:$28 sps:$4 sm:$0xff]   ;;  %v8498_v0 = vpack.c.bf16 %v2717_v46, %v2717_v46 }
 0x3f8   :  { %v7621_v46 = vld [vmem:[#allocation13 + $0x9e4] ss:$28 sps:$4 sm:$0xff]  }
 0x3fa   :  { %5634 = vmatpush1.bf16.msra.mxu1 %v7466_v1  ;;  %5798 = vmatpush1.bf16.msra.mxu0 %v7469_v2  ;;  %v7549_v1 = vld [vmem:[#allocation13 + $0x744] ss:$28 sps:$4 sm:$0xff]   ;;  %v7544_v2 = vld [vmem:[#allocation13 + $0x738] ss:$28 sps:$4 sm:$0xff]  }
 0x3fb   :  { %5635 = vmatprep.subr.bf16.mxu1 %v7474_v3  ;;  %5799 = vmatprep.subr.bf16.mxu0 %v7477_v4  ;;  %v7547_v3 = vld [vmem:[#allocation13 + $0x740] ss:$28 sps:$4 sm:$0xff]   ;;  %v7552_v4 = vld [vmem:[#allocation13 + $0x774] ss:$28 sps:$4 sm:$0xff]  }
 0x3fe   :  { %5636 = vmatpush1.bf16.msra.mxu1 %v7472_v5  ;;  %5800 = vmatpush1.bf16.msra.mxu0 %v7475_v6  ;;  %v7555_v5 = vld [vmem:[#allocation13 + $0x77c] ss:$28 sps:$4 sm:$0xff]   ;;  %v7550_v6 = vld [vmem:[#allocation13 + $0x770] ss:$28 sps:$4 sm:$0xff]  }
 0x3ff   :  { %5637 = vmatprep.subr.bf16.mxu1 %v7480_v7  ;;  %5801 = vmatprep.subr.bf16.mxu0 %v7483_v8  ;;  %v7553_v7 = vld [vmem:[#allocation13 + $0x778] ss:$28 sps:$4 sm:$0xff]   ;;  %v7558_v8 = vld [vmem:[#allocation13 + $0x7ac] ss:$28 sps:$4 sm:$0xff]  }
 0x402   :  { %5638 = vmatpush1.bf16.msra.mxu1 %v7478_v9  ;;  %5802 = vmatpush1.bf16.msra.mxu0 %v7481_v10  ;;  %v7561_v9 = vld [vmem:[#allocation13 + $0x7b4] ss:$28 sps:$4 sm:$0xff]   ;;  %v7556_v10 = vld [vmem:[#allocation13 + $0x7a8] ss:$28 sps:$4 sm:$0xff]  }
 0x403   :  { %5639 = vmatprep.subr.bf16.mxu1 %v7486_v11  ;;  %5803 = vmatprep.subr.bf16.mxu0 %v7489_v12  ;;  %v7559_v11 = vld [vmem:[#allocation13 + $0x7b0] ss:$28 sps:$4 sm:$0xff]   ;;  %v7564_v12 = vld [vmem:[#allocation13 + $0x7e4] ss:$28 sps:$4 sm:$0xff]  }
 0x406   :  { %5640 = vmatpush1.bf16.msra.mxu1 %v7484_v13  ;;  %5804 = vmatpush1.bf16.msra.mxu0 %v7487_v14  ;;  %v7567_v13 = vld [vmem:[#allocation13 + $0x7ec] ss:$28 sps:$4 sm:$0xff]   ;;  %v7562_v14 = vld [vmem:[#allocation13 + $0x7e0] ss:$28 sps:$4 sm:$0xff]  }
 0x407   :  { %5641 = vmatprep.subr.bf16.mxu1 %v7492_v15  ;;  %5805 = vmatprep.subr.bf16.mxu0 %v7495_v16  ;;  %v7565_v15 = vld [vmem:[#allocation13 + $0x7e8] ss:$28 sps:$4 sm:$0xff]   ;;  %v7570_v16 = vld [vmem:[#allocation13 + $0x81c] ss:$28 sps:$4 sm:$0xff]  }
 0x40a   :  { %5642 = vmatpush1.bf16.msra.mxu1 %v7490_v17  ;;  %5806 = vmatpush1.bf16.msra.mxu0 %v7493_v18  ;;  %v7573_v17 = vld [vmem:[#allocation13 + $0x824] ss:$28 sps:$4 sm:$0xff]   ;;  %v7568_v18 = vld [vmem:[#allocation13 + $0x818] ss:$28 sps:$4 sm:$0xff]  }
 0x40b   :  { %5643 = vmatprep.subr.bf16.mxu1 %v7498_v24  ;;  %5807 = vmatprep.subr.bf16.mxu0 %v7501_v38  ;;  %v7571_v24 = vld [vmem:[#allocation13 + $0x820] ss:$28 sps:$4 sm:$0xff]   ;;  %v7576_v38 = vld [vmem:[#allocation13 + $0x854] ss:$28 sps:$4 sm:$0xff]  }
 0x40e   :  { %5644 = vmatpush1.bf16.msra.mxu1 %v7496_v25  ;;  %5808 = vmatpush1.bf16.msra.mxu0 %v7499_v27  ;;  %v7579_v25 = vld [vmem:[#allocation13 + $0x85c] ss:$28 sps:$4 sm:$0xff]   ;;  %v7574_v27 = vld [vmem:[#allocation13 + $0x850] ss:$28 sps:$4 sm:$0xff]  }
 0x40f   :  { %5645 = vmatprep.subr.bf16.mxu1 %v7504_v57  ;;  %5809 = vmatprep.subr.bf16.mxu0 %v7507_v31  ;;  %v7577_v57 = vld [vmem:[#allocation13 + $0x858] ss:$28 sps:$4 sm:$0xff]   ;;  %v7582_v31 = vld [vmem:[#allocation13 + $0x88c] ss:$28 sps:$4 sm:$0xff]  }
 0x412   :  { %5646 = vmatpush1.bf16.msra.mxu1 %v7502_v32  ;;  %5810 = vmatpush1.bf16.msra.mxu0 %v7505_v33  ;;  %v7585_v32 = vld [vmem:[#allocation13 + $0x894] ss:$28 sps:$4 sm:$0xff]   ;;  %v7580_v33 = vld [vmem:[#allocation13 + $0x888] ss:$28 sps:$4 sm:$0xff]  }
 0x413   :  { %5647 = vmatprep.subr.bf16.mxu1 %v7510_v35  ;;  %5811 = vmatprep.subr.bf16.mxu0 %v7513_v36  ;;  %v7583_v35 = vld [vmem:[#allocation13 + $0x890] ss:$28 sps:$4 sm:$0xff]   ;;  %v7588_v36 = vld [vmem:[#allocation13 + $0x8c4] ss:$28 sps:$4 sm:$0xff]  }
 0x416   :  { %5648 = vmatpush1.bf16.msra.mxu1 %v7508_v62  ;;  %5812 = vmatpush1.bf16.msra.mxu0 %v7511_v39  ;;  %v7591_v62 = vld [vmem:[#allocation13 + $0x8cc] ss:$28 sps:$4 sm:$0xff]   ;;  %v7586_v39 = vld [vmem:[#allocation13 + $0x8c0] ss:$28 sps:$4 sm:$0xff]  }
 0x417   :  { %5649 = vmatprep.subr.bf16.mxu1 %v7516_v37  ;;  %5813 = vmatprep.subr.bf16.mxu0 %v7519_v29  ;;  %v7589_v37 = vld [vmem:[#allocation13 + $0x8c8] ss:$28 sps:$4 sm:$0xff]   ;;  %v7594_v29 = vld [vmem:[#allocation13 + $0x8fc] ss:$28 sps:$4 sm:$0xff]  }
 0x41a   :  { %5650 = vmatpush1.bf16.msra.mxu1 %v7514_v40  ;;  %5814 = vmatpush1.bf16.msra.mxu0 %v7517_v30  ;;  %v7597_v40 = vld [vmem:[#allocation13 + $0x904] ss:$28 sps:$4 sm:$0xff]   ;;  %v7592_v30 = vld [vmem:[#allocation13 + $0x8f8] ss:$28 sps:$4 sm:$0xff]  }
 0x41b   :  { %5651 = vmatprep.subr.bf16.mxu1 %v7522_v41  ;;  %5815 = vmatprep.subr.bf16.mxu0 %v7525_v42  ;;  %v7595_v41 = vld [vmem:[#allocation13 + $0x900] ss:$28 sps:$4 sm:$0xff]   ;;  %v7600_v42 = vld [vmem:[#allocation13 + $0x934] ss:$28 sps:$4 sm:$0xff]  }
 0x41e   :  { %5652 = vmatpush1.bf16.msra.mxu1 %v7520_v53  ;;  %5816 = vmatpush1.bf16.msra.mxu0 %v7523_v43  ;;  %v7603_v53 = vld [vmem:[#allocation13 + $0x93c] ss:$28 sps:$4 sm:$0xff]   ;;  %v7598_v43 = vld [vmem:[#allocation13 + $0x930] ss:$28 sps:$4 sm:$0xff]  }
 0x41f   :  { %5653 = vmatprep.subr.bf16.mxu1 %v7528_v50  ;;  %5817 = vmatprep.subr.bf16.mxu0 %v7531_v54  ;;  %v7606_v50 = vld [vmem:[#allocation13 + $0x96c] ss:$28 sps:$4 sm:$0xff]   ;;  %v7609_v54 = vld [vmem:[#allocation13 + $0x974] ss:$28 sps:$4 sm:$0xff]  }
 0x422   :  { %5654 = vmatpush1.bf16.msra.mxu1 %v7526_v55  ;;  %5818 = vmatpush1.bf16.msra.mxu0 %v7529_v21  ;;  %v7604_v55 = vld [vmem:[#allocation13 + $0x968] ss:$28 sps:$4 sm:$0xff]   ;;  %v7607_v21 = vld [vmem:[#allocation13 + $0x970] ss:$28 sps:$4 sm:$0xff]  }
 0x423   :  { %5655 = vmatprep.subr.bf16.mxu1 %v7534_v59  ;;  %5819 = vmatprep.subr.bf16.mxu0 %v7537_v60  ;;  %v7615_v59 = vld [vmem:[#allocation13 + $0x9ac] ss:$28 sps:$4 sm:$0xff]   ;;  %v7610_v60 = vld [vmem:[#allocation13 + $0x9a0] ss:$28 sps:$4 sm:$0xff]  }
 0x426   :  { %5656 = vmatpush1.bf16.msra.mxu1 %v7532_v44  ;;  %5820 = vmatpush1.bf16.msra.mxu0 %v7535_v45  ;;  %v7613_v44 = vld [vmem:[#allocation13 + $0x9a8] ss:$28 sps:$4 sm:$0xff]   ;;  %v7618_v45 = vld [vmem:[#allocation13 + $0x9dc] ss:$28 sps:$4 sm:$0xff]  }
 0x427   :  { %5666 = vmatprep.subr.bf16.mxu1 %v7540_v49  ;;  %5830 = vmatprep.subr.bf16.mxu0 %v7543_v52  ;;  %v1085_v49 = vsub.s32 4, %v8419_v19  ;;  %v7616_v52 = vld [vmem:[#allocation13 + $0x9d8] ss:$28 sps:$4 sm:$0xff]  }
 0x429   :  { %5658 = vmatmul.mubr.bf16.vlgmr.msra.gmra.mrb[12].mxu1 %v8498_v0  ;;  %5822 = vmatmul.mubr.bf16.vlgmr.msra.gmra.mrb[20].mxu0 %v8498_v0 }
 0x42a   :  { %5667 = vmatpush1.bf16.msra.mxu1 %v7538_v61  ;;  %5831 = vmatpush1.bf16.msra.mxu0 %v7541_v63  ;;  %v7619_v61 = vld [vmem:[#allocation13 + $0x9e0] ss:$28 sps:$4 sm:$0xff]   ;;  %v1089_v63 = vsub.s32 5, %v8419_v19 }
 0x42b   :  { %5668 = vmatprep.subr.bf16.mxu1 %v7546_v34  ;;  %5832 = vmatprep.subr.bf16.mxu0 %v7549_v1  ;;  %v7624_v34 = vld [vmem:[#allocation13 + $0xa14] ss:$28 sps:$4 sm:$0xff]   ;;  %v7627_v1 = vld [vmem:[#allocation13 + $0xa1c] ss:$28 sps:$4 sm:$0xff]  }
 0x42e   :  { %5669 = vmatpush1.bf16.msra.mxu1 %v7544_v2  ;;  %5833 = vmatpush1.bf16.msra.mxu0 %v7547_v3  ;;  %v1097_v2 = vsub.s32 7, %v8419_v19  ;;  %v1086_v3 = vrot.slane %v8473_v28, %v1085_v49 }
 0x42f   :  { %5670 = vmatprep.subr.bf16.mxu1 %v7552_v4  ;;  %5834 = vmatprep.subr.bf16.mxu0 %v7555_v5  ;;  %v7622_v4 = vld [vmem:[#allocation13 + $0xa10] ss:$28 sps:$4 sm:$0xff]   ;;  %v7625_v5 = vld [vmem:[#allocation13 + $0xa18] ss:$28 sps:$4 sm:$0xff]  }
 0x432   :  { %5671 = vmatpush1.bf16.msra.mxu1 %v7550_v6  ;;  %5835 = vmatpush1.bf16.msra.mxu0 %v7553_v7  ;;  %v1090_v6 = vrot.slane %v8473_v28, %v1089_v63  ;;  %v1098_v7 = vrot.slane %v8473_v28, %v1097_v2  ;;  %v7675_v2 = vld [vmem:[#allocation13 + $0xbdc] ss:$28 sps:$4 sm:$0xff]  }
 0x433   :  { %5672 = vmatprep.subr.bf16.mxu1 %v7558_v8  ;;  %5836 = vmatprep.subr.bf16.mxu0 %v7561_v9  ;;  %v7630_v8 = vld [vmem:[#allocation13 + $0xa4c] ss:$28 sps:$4 sm:$0xff]   ;;  %v7633_v9 = vld [vmem:[#allocation13 + $0xa54] ss:$28 sps:$4 sm:$0xff]  }
 0x436   :  { %5673 = vmatpush1.bf16.msra.mxu1 %v7556_v10  ;;  %5837 = vmatpush1.bf16.msra.mxu0 %v7559_v11 }
 0x437   :  { %5674 = vmatprep.subr.bf16.mxu1 %v7564_v12  ;;  %5838 = vmatprep.subr.bf16.mxu0 %v7567_v13 }
 0x43a   :  { %5675 = vmatpush1.bf16.msra.mxu1 %v7562_v14  ;;  %5839 = vmatpush1.bf16.msra.mxu0 %v7565_v15  ;;  %v7628_v14 = vld [vmem:[#allocation13 + $0xa48] ss:$28 sps:$4 sm:$0xff]  }
 0x43b   :  { %5676 = vmatprep.subr.bf16.mxu1 %v7570_v16  ;;  %5840 = vmatprep.subr.bf16.mxu0 %v7573_v17 }
 0x43e   :  { %5677 = vmatpush1.bf16.msra.mxu1 %v7568_v18  ;;  %5841 = vmatpush1.bf16.msra.mxu0 %v7571_v24  ;;  %v7631_v18 = vld [vmem:[#allocation13 + $0xa50] ss:$28 sps:$4 sm:$0xff]   ;;  %v7636_v24 = vld [vmem:[#allocation13 + $0xa84] ss:$28 sps:$4 sm:$0xff]  }
 0x43f   :  { %5678 = vmatprep.subr.bf16.mxu1 %v7576_v38  ;;  %5842 = vmatprep.subr.bf16.mxu0 %v7579_v25 }
 0x442   :  { %5679 = vmatpush1.bf16.msra.mxu1 %v7574_v27  ;;  %5843 = vmatpush1.bf16.msra.mxu0 %v7577_v57 }
 0x443   :  { %5680 = vmatprep.subr.bf16.mxu1 %v7582_v31  ;;  %5844 = vmatprep.subr.bf16.mxu0 %v7585_v32  ;;  %v7639_v31 = vld [vmem:[#allocation13 + $0xa8c] ss:$28 sps:$4 sm:$0xff]  }
 0x446   :  { %5681 = vmatpush1.bf16.msra.mxu1 %v7580_v33  ;;  %5845 = vmatpush1.bf16.msra.mxu0 %v7583_v35 }
 0x447   :  { %5682 = vmatprep.subr.bf16.mxu1 %v7588_v36  ;;  %5846 = vmatprep.subr.bf16.mxu0 %v7591_v62  ;;  %v7634_v62 = vld [vmem:[#allocation13 + $0xa80] ss:$28 sps:$4 sm:$0xff]  }
 0x44a   :  { %5683 = vmatpush1.bf16.msra.mxu1 %v7586_v39  ;;  %5847 = vmatpush1.bf16.msra.mxu0 %v7589_v37  ;;  %v7637_v39 = vld [vmem:[#allocation13 + $0xa88] ss:$28 sps:$4 sm:$0xff]  }
 0x44b   :  { %5684 = vmatprep.subr.bf16.mxu1 %v7594_v29  ;;  %5848 = vmatprep.subr.bf16.mxu0 %v7597_v40  ;;  %v7642_v29 = vld [vmem:[#allocation13 + $0xabc] ss:$28 sps:$4 sm:$0xff]   ;;  %v7645_v40 = vld [vmem:[#allocation13 + $0xac4] ss:$28 sps:$4 sm:$0xff]  }
 0x44e   :  { %5685 = vmatpush1.bf16.msra.mxu1 %v7592_v30  ;;  %5849 = vmatpush1.bf16.msra.mxu0 %v7595_v41  ;;  %v7640_v41 = vld [vmem:[#allocation13 + $0xab8] ss:$28 sps:$4 sm:$0xff]  }
 0x44f   :  { %5686 = vmatprep.subr.bf16.mxu1 %v7600_v42  ;;  %5850 = vmatprep.subr.bf16.mxu0 %v7603_v53  ;;  %v7643_v42 = vld [vmem:[#allocation13 + $0xac0] ss:$28 sps:$4 sm:$0xff]   ;;  %v7648_v53 = vld [vmem:[#allocation13 + $0xaf4] ss:$28 sps:$4 sm:$0xff]  }
 0x452   :  { %5687 = vmatpush1.bf16.msra.mxu1 %v7598_v43  ;;  %5851 = vmatpush1.bf16.msra.mxu0 %v7601_v48  ;;  %v7651_v43 = vld [vmem:[#allocation13 + $0xafc] ss:$28 sps:$4 sm:$0xff]   ;;  %v7646_v48 = vld [vmem:[#allocation13 + $0xaf0] ss:$28 sps:$4 sm:$0xff]  }
 0x453   :  { %5688 = vmatprep.subr.bf16.mxu1 %v7606_v50  ;;  %5852 = vmatprep.subr.bf16.mxu0 %v7609_v54  ;;  %v7649_v50 = vld [vmem:[#allocation13 + $0xaf8] ss:$28 sps:$4 sm:$0xff]   ;;  %v7654_v54 = vld [vmem:[#allocation13 + $0xb2c] ss:$28 sps:$4 sm:$0xff]  }
 0x456   :  { %5689 = vmatpush1.bf16.msra.mxu1 %v7604_v55  ;;  %5853 = vmatpush1.bf16.msra.mxu0 %v7607_v21  ;;  %v7657_v55 = vld [vmem:[#allocation13 + $0xb34] ss:$28 sps:$4 sm:$0xff]   ;;  %v7652_v21 = vld [vmem:[#allocation13 + $0xb28] ss:$28 sps:$4 sm:$0xff]  }
 0x457   :  { %5690 = vmatprep.subr.bf16.mxu1 %v7612_v58  ;;  %5854 = vmatprep.subr.bf16.mxu0 %v7615_v59  ;;  %v7655_v58 = vld [vmem:[#allocation13 + $0xb30] ss:$28 sps:$4 sm:$0xff]   ;;  %v7660_v59 = vld [vmem:[#allocation13 + $0xb64] ss:$28 sps:$4 sm:$0xff]  }
 0x45a   :  { %5691 = vmatpush1.bf16.msra.mxu1 %v7610_v60  ;;  %5855 = vmatpush1.bf16.msra.mxu0 %v7613_v44  ;;  %v7663_v60 = vld [vmem:[#allocation13 + $0xb6c] ss:$28 sps:$4 sm:$0xff]   ;;  %v7658_v44 = vld [vmem:[#allocation13 + $0xb60] ss:$28 sps:$4 sm:$0xff]  }
 0x45b   :  { %5692 = vmatprep.subr.bf16.mxu1 %v7618_v45  ;;  %5856 = vmatprep.subr.bf16.mxu0 %v7621_v46  ;;  %v7661_v45 = vld [vmem:[#allocation13 + $0xb68] ss:$28 sps:$4 sm:$0xff]   ;;  %v7666_v46 = vld [vmem:[#allocation13 + $0xb9c] ss:$28 sps:$4 sm:$0xff]  }
 0x45e   :  { %5693 = vmatpush1.bf16.msra.mxu1 %v7616_v52  ;;  %5857 = vmatpush1.bf16.msra.mxu0 %v7619_v61  ;;  %v7669_v52 = vld [vmem:[#allocation13 + $0xba4] ss:$28 sps:$4 sm:$0xff]   ;;  %v7664_v61 = vld [vmem:[#allocation13 + $0xb98] ss:$28 sps:$4 sm:$0xff]  }
 0x45f   :  { %5694 = vmatprep.subr.bf16.mxu1 %v7624_v34  ;;  %5858 = vmatprep.subr.bf16.mxu0 %v7627_v1  ;;  %v7667_v34 = vld [vmem:[#allocation13 + $0xba0] ss:$28 sps:$4 sm:$0xff]   ;;  %v7672_v1 = vld [vmem:[#allocation13 + $0xbd4] ss:$28 sps:$4 sm:$0xff]  }
 0x460   :  { %v2626_v10 = vpop.f32.mrb[8].mxu1 }
 0x461   :  { %v7167_v11 = vadd.f32 %v2626_v10, %v1086_v3  ;;  %v8512_v12 = vpop.f32.mrb[16].mxu0  ;;  %v2628_v13 = vpop.f32.mrb[9].mxu1  ;;  %v7670_v3 = vld [vmem:[#allocation13 + $0xbd0] ss:$28 sps:$4 sm:$0xff]  }
 0x462   :  { %v7168_v15 = vadd.f32 %v2628_v13, %v1090_v6  ;;  %v2710_v16 = vpop.f32.mrb[17].mxu0  ;;  %5695 = vmatpush1.bf16.msra.mxu1 %v7622_v4  ;;  %5859 = vmatpush1.bf16.msra.mxu0 %v7625_v5  ;;  %v2630_v17 = vpop.f32.mrb[10].mxu1  ;;  %v7673_v4 = vld [vmem:[#allocation13 + $0xbd8] ss:$28 sps:$4 sm:$0xff]   ;;  %v7678_v5 = vld [vmem:[#allocation13 + $0xc0c] ss:$28 sps:$4 sm:$0xff]  }
 0x463   :  { %v2719_v38 = vmax.f32 %v7167_v11, 0.0  ;;  %v7170_v25 = vadd.f32 %v2710_v16, %v1098_v7  ;;  %v2712_v27 = vpop.f32.mrb[18].mxu0  ;;  %v2631_v57 = vpop.f32.mrb[11].mxu1  ;;  %5696 = vmatprep.subr.bf16.mxu1 %v7630_v8  ;;  %5860 = vmatprep.subr.bf16.mxu0 %v7633_v9  ;;  %v7681_v6 = vld [vmem:[#allocation13 + $0xc14] ss:$28 sps:$4 sm:$0xff]  }
 0x464   :  { %v2720_v32 = vmax.f32 %v7168_v15, 0.0  ;;  %v2713_v33 = vpop.f32.mrb[19].mxu0  ;;  %v7676_v7 = vld [vmem:[#allocation13 + $0xc08] ss:$28 sps:$4 sm:$0xff]   ;;  %v7679_v8 = vld [vmem:[#allocation13 + $0xc10] ss:$28 sps:$4 sm:$0xff]  }
 0x465   :  { %v2722_v35 = vmax.f32 %v7170_v25, 0.0  ;;  %v8516_v37 = vpack.c.bf16 %v2719_v38, %v2719_v38  ;;  %v7684_v9 = vld [vmem:[#allocation13 + $0xc44] ss:$28 sps:$4 sm:$0xff]   ;;  %v7687_v10 = vld [vmem:[#allocation13 + $0xc4c] ss:$28 sps:$4 sm:$0xff]  }
 0x466   :  { %v8514_v36 = vpack.c.bf16 %v2720_v32, %v2720_v32  ;;  %5697 = vmatpush1.bf16.msra.mxu1 %v7628_v14  ;;  %5861 = vmatpush1.bf16.msra.mxu0 %v7631_v18  ;;  %v7682_v11 = vld [vmem:[#allocation13 + $0xc40] ss:$28 sps:$4 sm:$0xff]   ;;  %v7685_v13 = vld [vmem:[#allocation13 + $0xc48] ss:$28 sps:$4 sm:$0xff]   ;;  %v7688_v16 = vld [vmem:[#allocation13 + $0xc78] ss:$28 sps:$4 sm:$0xff]  }
 0x467   :  { %5707 = vmatprep.subr.bf16.mxu1 %v7636_v24  ;;  %5871 = vmatprep.subr.bf16.mxu0 %v7639_v31  ;;  %v8520_v30 = vpack.c.bf16 %v2722_v35, %v2722_v35  ;;  %v7690_v14 = vld [vmem:[#allocation13 + $0xc7c] ss:$28 sps:$4 sm:$0xff]   ;;  %v7693_v15 = vld [vmem:[#allocation13 + $0xc84] ss:$28 sps:$4 sm:$0xff]   ;;  %v7696_v18 = vld [vmem:[#allocation13 + $0xcb4] ss:$28 sps:$4 sm:$0xff]  }
 0x468   :  { %5698 = vmatprep.mubr.bf16.mxu1 %v8514_v36  ;;  %5862 = vmatprep.mubr.bf16.mxu0 %v8514_v36  ;;  %v7691_v17 = vld [vmem:[#allocation13 + $0xc80] ss:$28 sps:$4 sm:$0xff]   ;;  %v7694_v38 = vld [vmem:[#allocation13 + $0xcb0] ss:$28 sps:$4 sm:$0xff]   ;;  %v7697_v25 = vld [vmem:[#allocation13 + $0xcb8] ss:$28 sps:$4 sm:$0xff]  }
 0x469   :  { %5699 = vmatmul.mubr.bf16.vlgmr.msra.gmra.mrb[12].mxu1 %v8516_v37  ;;  %5863 = vmatmul.mubr.bf16.vlgmr.msra.gmra.mrb[20].mxu0 %v8516_v37  ;;  %v7699_v24 = vld [vmem:[#allocation13 + $0xcbc] ss:$28 sps:$4 sm:$0xff]   ;;  %v7702_v27 = vld [vmem:[#allocation13 + $0xcec] ss:$28 sps:$4 sm:$0xff]   ;;  %v7705_v57 = vld [vmem:[#allocation13 + $0xcf4] ss:$28 sps:$4 sm:$0xff]  }
 0x46a   :  { %5708 = vmatpush1.bf16.msra.mxu1 %v7634_v62  ;;  %5872 = vmatpush1.bf16.msra.mxu0 %v7637_v39  ;;  %v7700_v31 = vld [vmem:[#allocation13 + $0xce8] ss:$28 sps:$4 sm:$0xff]   ;;  %v7703_v32 = vld [vmem:[#allocation13 + $0xcf0] ss:$28 sps:$4 sm:$0xff]   ;;  %v7706_v62 = vld [vmem:[#allocation13 + $0xd20] ss:$28 sps:$4 sm:$0xff]  }
 0x46b   :  { %5739 = vmatprep.mubr.bf16.mxu1 %v8520_v30  ;;  %5903 = vmatprep.mubr.bf16.mxu0 %v8520_v30  ;;  %v7708_v33 = vld [vmem:[#allocation13 + $0xd24] ss:$28 sps:$4 sm:$0xff]   ;;  %v7711_v35 = vld [vmem:[#allocation13 + $0xd2c] ss:$28 sps:$4 sm:$0xff]  }
 0x46c   :  { %5709 = vmatprep.subr.bf16.mxu1 %v7642_v29  ;;  %5873 = vmatprep.subr.bf16.mxu0 %v7645_v40  ;;  %v7709_v39 = vld [vmem:[#allocation13 + $0xd28] ss:$28 sps:$4 sm:$0xff]   ;;  %v1093_v29 = vsub.s32 6, %v8419_v19  ;;  %v7714_v40 = vld [vmem:[#allocation13 + $0xd5c] ss:$28 sps:$4 sm:$0xff]  }
 0x46e   :  { %5710 = vmatpush1.bf16.msra.mxu1 %v7640_v41  ;;  %5874 = vmatpush1.bf16.msra.mxu0 %v7643_v42  ;;  %v7717_v41 = vld [vmem:[#allocation13 + $0xd64] ss:$28 sps:$4 sm:$0xff]   ;;  %v7712_v42 = vld [vmem:[#allocation13 + $0xd58] ss:$28 sps:$4 sm:$0xff]  }
 0x46f   :  { %5711 = vmatprep.subr.bf16.mxu1 %v7648_v53  ;;  %5875 = vmatprep.subr.bf16.mxu0 %v7651_v43  ;;  %v7715_v53 = vld [vmem:[#allocation13 + $0xd60] ss:$28 sps:$4 sm:$0xff]   ;;  %v1094_v43 = vrot.slane %v8473_v28, %v1093_v29  ;;  %v7732_v28 = vld [vmem:[#allocation13 + $0x14] ss:$28 sps:$4 sm:$0xff]  }
 0x472   :  { %5712 = vmatpush1.bf16.msra.mxu1 %v7646_v48  ;;  %5876 = vmatpush1.bf16.msra.mxu0 %v7649_v50  ;;  %v7720_v48 = vld [vmem:[#allocation13 + $0xd94] ss:$28 sps:$4 sm:$0xff]   ;;  %v7723_v50 = vld [vmem:[#allocation13 + $0xd9c] ss:$28 sps:$4 sm:$0xff]  }
 0x473   :  { %5713 = vmatprep.subr.bf16.mxu1 %v7654_v54  ;;  %5877 = vmatprep.subr.bf16.mxu0 %v7657_v55  ;;  %v7718_v54 = vld [vmem:[#allocation13 + $0xd90] ss:$28 sps:$4 sm:$0xff]   ;;  %v7721_v55 = vld [vmem:[#allocation13 + $0xd98] ss:$28 sps:$4 sm:$0xff]  }
 0x476   :  { %5714 = vmatpush1.bf16.msra.mxu1 %v7652_v21  ;;  %5878 = vmatpush1.bf16.msra.mxu0 %v7655_v58  ;;  %v7169_v21 = vadd.f32 %v8512_v12, %v1094_v43  ;;  %v7726_v58 = vld [vmem:[#allocation13 + $0xdcc] ss:$28 sps:$4 sm:$0xff]   ;;  %v7734_v12 = vld [vmem:[#allocation13 + $0x18] ss:$28 sps:$4 sm:$0xff]  }
 0x477   :  { %5715 = vmatprep.subr.bf16.mxu1 %v7660_v59  ;;  %5879 = vmatprep.subr.bf16.mxu0 %v7663_v60  ;;  %v7729_v59 = vld [vmem:[#allocation13 + $0xdd4] ss:$28 sps:$4 sm:$0xff]   ;;  %v7724_v60 = vld [vmem:[#allocation13 + $0xdc8] ss:$28 sps:$4 sm:$0xff]  }
 0x478   :  { %v7775_v43 = vld [vmem:[#allocation13 + $0x208] ss:$28 sps:$4 sm:$0xff]  }
 0x47a   :  { %5716 = vmatpush1.bf16.msra.mxu1 %v7658_v44  ;;  %5880 = vmatpush1.bf16.msra.mxu0 %v7661_v45  ;;  %v7727_v44 = vld [vmem:[#allocation13 + $0xdd0] ss:$28 sps:$4 sm:$0xff]   ;;  %v2721_v45 = vmax.f32 %v7169_v21, 0.0  ;;  %v7784_v21 = vld [vmem:[#allocation13 + $0x408] ss:$28 sps:$4 sm:$0xff]  }
 0x47b   :  { %5717 = vmatprep.subr.bf16.mxu1 %v7666_v46  ;;  %5881 = vmatprep.subr.bf16.mxu0 %v7669_v52  ;;  %v7733_v46 = vld [vmem:[#allocation13 + $0x1d8] ss:$28 sps:$4 sm:$0xff]   ;;  %v7730_v52 = vld [vmem:[#allocation13 + $0x10] ss:$28 sps:$4 sm:$0xff]  }
 0x47e   :  { %5718 = vmatpush1.bf16.msra.mxu1 %v7664_v61  ;;  %5882 = vmatpush1.bf16.msra.mxu0 %v7667_v34  ;;  %v8531_v61 = vpack.c.bf16 %v2721_v45, %v2721_v45  ;;  %v7737_v34 = vld [vmem:[#allocation13 + $0x4c] ss:$28 sps:$4 sm:$0xff]   ;;  %v7792_v45 = vld [vmem:[#allocation13 + $0x2b4] ss:$28 sps:$4 sm:$0xff]  }
 0x47f   :  { %5719 = vmatprep.subr.bf16.mxu1 %v7672_v1  ;;  %5883 = vmatprep.subr.bf16.mxu0 %v7675_v2  ;;  %v7738_v1 = vld [vmem:[#allocation13 + $0x210] ss:$28 sps:$4 sm:$0xff]   ;;  %v7735_v2 = vld [vmem:[#allocation13 + $0x48] ss:$28 sps:$4 sm:$0xff]  }
 0x482   :  { %5720 = vmatpush1.bf16.msra.mxu1 %v7670_v3  ;;  %5884 = vmatpush1.bf16.msra.mxu0 %v7673_v4  ;;  %v7739_v3 = vld [vmem:[#allocation13 + $0x50] ss:$28 sps:$4 sm:$0xff]   ;;  %v7742_v4 = vld [vmem:[#allocation13 + $0x84] ss:$28 sps:$4 sm:$0xff]  }
 0x483   :  { %5721 = vmatprep.subr.bf16.mxu1 %v7678_v5  ;;  %5885 = vmatprep.subr.bf16.mxu0 %v7681_v6  ;;  %v7743_v5 = vld [vmem:[#allocation13 + $0x248] ss:$28 sps:$4 sm:$0xff]   ;;  %v7740_v6 = vld [vmem:[#allocation13 + $0x80] ss:$28 sps:$4 sm:$0xff]  }
 0x486   :  { %5722 = vmatpush1.bf16.msra.mxu1 %v7676_v7  ;;  %5886 = vmatpush1.bf16.msra.mxu0 %v7679_v8  ;;  %v7744_v7 = vld [vmem:[#allocation13 + $0x88] ss:$28 sps:$4 sm:$0xff]   ;;  %v7747_v8 = vld [vmem:[#allocation13 + $0xbc] ss:$28 sps:$4 sm:$0xff]  }
 0x487   :  { %5723 = vmatprep.subr.bf16.mxu1 %v7684_v9  ;;  %5887 = vmatprep.subr.bf16.mxu0 %v7687_v10  ;;  %v7748_v9 = vld [vmem:[#allocation13 + $0x280] ss:$28 sps:$4 sm:$0xff]   ;;  %v7745_v10 = vld [vmem:[#allocation13 + $0xb8] ss:$28 sps:$4 sm:$0xff]  }
 0x48a   :  { %5724 = vmatpush1.bf16.msra.mxu1 %v7682_v11  ;;  %5888 = vmatpush1.bf16.msra.mxu0 %v7685_v13  ;;  %v7749_v11 = vld [vmem:[#allocation13 + $0xc0] ss:$28 sps:$4 sm:$0xff]   ;;  %v7752_v13 = vld [vmem:[#allocation13 + $0xf4] ss:$28 sps:$4 sm:$0xff]  }
 0x48b   :  { %5725 = vmatprep.subr.bf16.mxu1 %v7690_v14  ;;  %5889 = vmatprep.subr.bf16.mxu0 %v7693_v15  ;;  %v7750_v14 = vld [vmem:[#allocation13 + $0xf0] ss:$28 sps:$4 sm:$0xff]   ;;  %v7754_v15 = vld [vmem:[#allocation13 + $0xf8] ss:$28 sps:$4 sm:$0xff]  }
 0x48e   :  { %5726 = vmatpush1.bf16.msra.mxu1 %v7688_v16  ;;  %5890 = vmatpush1.bf16.msra.mxu0 %v7691_v17  ;;  %v7757_v16 = vld [vmem:[#allocation13 + $0x12c] ss:$28 sps:$4 sm:$0xff]  }
 0x48f   :  { %5727 = vmatprep.subr.bf16.mxu1 %v7696_v18  ;;  %5891 = vmatprep.subr.bf16.mxu0 %v7699_v24  ;;  %v7758_v17 = vld [vmem:[#allocation13 + $0x2f0] ss:$28 sps:$4 sm:$0xff]   ;;  %v7755_v18 = vld [vmem:[#allocation13 + $0x128] ss:$28 sps:$4 sm:$0xff]  }
 0x490   :  { %v7759_v24 = vld [vmem:[#allocation13 + $0x130] ss:$28 sps:$4 sm:$0xff]  }
 0x492   :  { %5728 = vmatpush1.bf16.msra.mxu1 %v7694_v38  ;;  %5892 = vmatpush1.bf16.msra.mxu0 %v7697_v25  ;;  %v7762_v38 = vld [vmem:[#allocation13 + $0x164] ss:$28 sps:$4 sm:$0xff]  }
 0x493   :  { %5729 = vmatprep.subr.bf16.mxu1 %v7702_v27  ;;  %5893 = vmatprep.subr.bf16.mxu0 %v7705_v57  ;;  %v7763_v25 = vld [vmem:[#allocation13 + $0x328] ss:$28 sps:$4 sm:$0xff]   ;;  %v7760_v27 = vld [vmem:[#allocation13 + $0x160] ss:$28 sps:$4 sm:$0xff]  }
 0x494   :  { %v7764_v57 = vld [vmem:[#allocation13 + $0x168] ss:$28 sps:$4 sm:$0xff]  }
 0x496   :  { %5730 = vmatpush1.bf16.msra.mxu1 %v7700_v31  ;;  %5894 = vmatpush1.bf16.msra.mxu0 %v7703_v32  ;;  %v7767_v31 = vld [vmem:[#allocation13 + $0x19c] ss:$28 sps:$4 sm:$0xff]  }
 0x497   :  { %5731 = vmatprep.subr.bf16.mxu1 %v7708_v33  ;;  %5895 = vmatprep.subr.bf16.mxu0 %v7711_v35  ;;  %v7768_v32 = vld [vmem:[#allocation13 + $0x360] ss:$28 sps:$4 sm:$0xff]   ;;  %v7765_v33 = vld [vmem:[#allocation13 + $0x198] ss:$28 sps:$4 sm:$0xff]  }
 0x498   :  { %v7769_v35 = vld [vmem:[#allocation13 + $0x1a0] ss:$28 sps:$4 sm:$0xff]  }
 0x49a   :  { %5732 = vmatpush1.bf16.msra.mxu1 %v7706_v62  ;;  %5896 = vmatpush1.bf16.msra.mxu0 %v7709_v39  ;;  %v7772_v62 = vld [vmem:[#allocation13 + $0x1d4] ss:$28 sps:$4 sm:$0xff]  }
 0x49b   :  { %5733 = vmatprep.subr.bf16.mxu1 %v7714_v40  ;;  %5897 = vmatprep.subr.bf16.mxu0 %v7717_v41  ;;  %v7773_v39 = vld [vmem:[#allocation13 + $0x558] ss:$28 sps:$4 sm:$0xff]   ;;  %v7770_v40 = vld [vmem:[#allocation13 + $0x1d0] ss:$28 sps:$4 sm:$0xff]  }
 0x49c   :  { %v7774_v41 = vld [vmem:[#allocation13 + $0x398] ss:$28 sps:$4 sm:$0xff]  }
 0x49e   :  { %5734 = vmatpush1.bf16.msra.mxu1 %v7712_v42  ;;  %5898 = vmatpush1.bf16.msra.mxu0 %v7715_v53  ;;  %v7777_v42 = vld [vmem:[#allocation13 + $0x20c] ss:$28 sps:$4 sm:$0xff]  }
 0x49f   :  { %5735 = vmatprep.subr.bf16.mxu1 %v7720_v48  ;;  %5899 = vmatprep.subr.bf16.mxu0 %v7723_v50  ;;  %v7778_v53 = vld [vmem:[#allocation13 + $0x590] ss:$28 sps:$4 sm:$0xff]   ;;  %v7782_v50 = vld [vmem:[#allocation13 + $0x244] ss:$28 sps:$4 sm:$0xff]  }
 0x4a0   :  { %v7779_v48 = vld [vmem:[#allocation13 + $0x3d0] ss:$28 sps:$4 sm:$0xff]  }
 0x4a2   :  { %5736 = vmatpush1.bf16.msra.mxu1 %v7718_v54  ;;  %5900 = vmatpush1.bf16.msra.mxu0 %v7721_v55  ;;  %v7783_v54 = vld [vmem:[#allocation13 + $0x5c8] ss:$28 sps:$4 sm:$0xff]   ;;  %v7780_v55 = vld [vmem:[#allocation13 + $0x240] ss:$28 sps:$4 sm:$0xff]  }
 0x4a3   :  { %5737 = vmatprep.subr.bf16.mxu1 %v7726_v58  ;;  %5901 = vmatprep.subr.bf16.mxu0 %v7729_v59  ;;  %v7787_v58 = vld [vmem:[#allocation13 + $0x27c] ss:$28 sps:$4 sm:$0xff]  }
 0x4a4   :  { %v7788_v59 = vld [vmem:[#allocation13 + $0x600] ss:$28 sps:$4 sm:$0xff]  }
 0x4a6   :  { %5738 = vmatpush1.bf16.msra.mxu1 %v7724_v60  ;;  %5902 = vmatpush1.bf16.msra.mxu0 %v7727_v44  ;;  %v7785_v60 = vld [vmem:[#allocation13 + $0x278] ss:$28 sps:$4 sm:$0xff]   ;;  %v7789_v44 = vld [vmem:[#allocation13 + $0x440] ss:$28 sps:$4 sm:$0xff]  }
 0x4a7   :  { %5912 = vmatprep.subr.bf16.mxu1 %v7732_v28  ;;  %7043 = vmatprep.subr.bf16.mxu0 %v7733_v46  ;;  %v7793_v28 = vld [vmem:[#allocation13 + $0x638] ss:$28 sps:$4 sm:$0xff]   ;;  %v7790_v46 = vld [vmem:[#allocation13 + $0x2b0] ss:$28 sps:$4 sm:$0xff]  }
 0x4a9   :  { %5740 = vmatmul.mubr.bf16.vlgmr.msra.gmra.mrb[12].mxu1 %v8531_v61  ;;  %5904 = vmatmul.mubr.bf16.vlgmr.msra.gmra.mrb[20].mxu0 %v8531_v61 }
 0x4aa   :  { %5913 = vmatpush1.bf16.msra.mxu1 %v7730_v52  ;;  %5944 = vmatprep.mubr.bf16.mxu1 %v8483_v47  ;;  %v7794_v52 = vld [vmem:[#allocation13 + $0x478] ss:$28 sps:$4 sm:$0xff]  }
 0x4ab   :  { %7044 = vmatpush3.bf16.msra.mxu0 %v7734_v12  ;;  %6108 = vmatprep.mubr.bf16.mxu0 %v8483_v47  ;;  %v7753_v47 = vld [vmem:[#allocation13 + $0x2b8] ss:$28 sps:$4 sm:$0xff]   ;;  %v7797_v12 = vld [vmem:[#allocation13 + $0x2ec] ss:$28 sps:$4 sm:$0xff]  }
 0x4ac   :  { %5914 = vmatprep.subr.bf16.mxu1 %v7737_v34  ;;  %7045 = vmatprep.subr.bf16.mxu0 %v7738_v1  ;;  %v7798_v34 = vld [vmem:[#allocation13 + $0x670] ss:$28 sps:$4 sm:$0xff]   ;;  %v7795_v1 = vld [vmem:[#allocation13 + $0x2e8] ss:$28 sps:$4 sm:$0xff]  }
 0x4ae   :  { %5915 = vmatpush1.bf16.msra.mxu1 %v7735_v2  ;;  %v7799_v2 = vld [vmem:[#allocation13 + $0x4b0] ss:$28 sps:$4 sm:$0xff]  }
 0x4af   :  { %7046 = vmatpush3.bf16.msra.mxu0 %v7739_v3  ;;  %5916 = vmatprep.subr.bf16.mxu1 %v7742_v4  ;;  %v7802_v3 = vld [vmem:[#allocation13 + $0x324] ss:$28 sps:$4 sm:$0xff]  }
 0x4b0   :  { %7047 = vmatprep.subr.bf16.mxu0 %v7743_v5  ;;  %v7803_v4 = vld [vmem:[#allocation13 + $0x6a8] ss:$28 sps:$4 sm:$0xff]   ;;  %v7800_v5 = vld [vmem:[#allocation13 + $0x320] ss:$28 sps:$4 sm:$0xff]  }
 0x4b2   :  { %5917 = vmatpush1.bf16.msra.mxu1 %v7740_v6  ;;  %v7804_v6 = vld [vmem:[#allocation13 + $0x4e8] ss:$28 sps:$4 sm:$0xff]  }
 0x4b3   :  { %7048 = vmatpush3.bf16.msra.mxu0 %v7744_v7  ;;  %5918 = vmatprep.subr.bf16.mxu1 %v7747_v8  ;;  %v7807_v7 = vld [vmem:[#allocation13 + $0x35c] ss:$28 sps:$4 sm:$0xff]  }
 0x4b4   :  { %7049 = vmatprep.subr.bf16.mxu0 %v7748_v9  ;;  %v7808_v8 = vld [vmem:[#allocation13 + $0x6e0] ss:$28 sps:$4 sm:$0xff]   ;;  %v7805_v9 = vld [vmem:[#allocation13 + $0x358] ss:$28 sps:$4 sm:$0xff]  }
 0x4b6   :  { %5919 = vmatpush1.bf16.msra.mxu1 %v7745_v10  ;;  %v7809_v10 = vld [vmem:[#allocation13 + $0x520] ss:$28 sps:$4 sm:$0xff]  }
 0x4b7   :  { %7050 = vmatpush3.bf16.msra.mxu0 %v7749_v11  ;;  %5920 = vmatprep.subr.bf16.mxu1 %v7752_v13  ;;  %v7812_v11 = vld [vmem:[#allocation13 + $0x394] ss:$28 sps:$4 sm:$0xff]  }
 0x4b8   :  { %7051 = vmatprep.subr.bf16.mxu0 %v7753_v47  ;;  %v7813_v13 = vld [vmem:[#allocation13 + $0x8d8] ss:$28 sps:$4 sm:$0xff]   ;;  %v7810_v47 = vld [vmem:[#allocation13 + $0x390] ss:$28 sps:$4 sm:$0xff]  }
 0x4ba   :  { %5921 = vmatpush1.bf16.msra.mxu1 %v7750_v14  ;;  %v7814_v14 = vld [vmem:[#allocation13 + $0x718] ss:$28 sps:$4 sm:$0xff]  }
 0x4bb   :  { %7052 = vmatpush3.bf16.msra.mxu0 %v7754_v15  ;;  %5922 = vmatprep.subr.bf16.mxu1 %v7757_v16  ;;  %v7817_v15 = vld [vmem:[#allocation13 + $0x3cc] ss:$28 sps:$4 sm:$0xff]  }
 0x4bc   :  { %7053 = vmatprep.subr.bf16.mxu0 %v7758_v17  ;;  %v7818_v16 = vld [vmem:[#allocation13 + $0x910] ss:$28 sps:$4 sm:$0xff]   ;;  %v7815_v17 = vld [vmem:[#allocation13 + $0x3c8] ss:$28 sps:$4 sm:$0xff]  }
 0x4be   :  { %5923 = vmatpush1.bf16.msra.mxu1 %v7755_v18  ;;  %v7819_v18 = vld [vmem:[#allocation13 + $0x750] ss:$28 sps:$4 sm:$0xff]  }
 0x4bf   :  { %7054 = vmatpush3.bf16.msra.mxu0 %v7759_v24  ;;  %5924 = vmatprep.subr.bf16.mxu1 %v7762_v38  ;;  %v7822_v24 = vld [vmem:[#allocation13 + $0x404] ss:$28 sps:$4 sm:$0xff]  }
 0x4c0   :  { %7055 = vmatprep.subr.bf16.mxu0 %v7763_v25  ;;  %v7823_v38 = vld [vmem:[#allocation13 + $0x948] ss:$28 sps:$4 sm:$0xff]   ;;  %v7820_v25 = vld [vmem:[#allocation13 + $0x400] ss:$28 sps:$4 sm:$0xff]  }
 0x4c2   :  { %5925 = vmatpush1.bf16.msra.mxu1 %v7760_v27  ;;  %v7827_v27 = vld [vmem:[#allocation13 + $0x43c] ss:$28 sps:$4 sm:$0xff]  }
 0x4c3   :  { %7056 = vmatpush3.bf16.msra.mxu0 %v7764_v57  ;;  %5926 = vmatprep.subr.bf16.mxu1 %v7767_v31  ;;  %v7828_v57 = vld [vmem:[#allocation13 + $0x980] ss:$28 sps:$4 sm:$0xff]   ;;  %v7825_v31 = vld [vmem:[#allocation13 + $0x438] ss:$28 sps:$4 sm:$0xff]  }
 0x4c4   :  { %7057 = vmatprep.subr.bf16.mxu0 %v7768_v32  ;;  %v7832_v32 = vld [vmem:[#allocation13 + $0x474] ss:$28 sps:$4 sm:$0xff]  }
 0x4c6   :  { %5927 = vmatpush1.bf16.msra.mxu1 %v7765_v33  ;;  %v7833_v33 = vld [vmem:[#allocation13 + $0x9b8] ss:$28 sps:$4 sm:$0xff]  }
 0x4c7   :  { %7058 = vmatpush3.bf16.msra.mxu0 %v7769_v35  ;;  %5928 = vmatprep.subr.bf16.mxu1 %v7772_v62  ;;  %v7830_v35 = vld [vmem:[#allocation13 + $0x470] ss:$28 sps:$4 sm:$0xff]   ;;  %v7834_v62 = vld [vmem:[#allocation13 + $0x7f8] ss:$28 sps:$4 sm:$0xff]  }
 0x4c8   :  { %7065 = vmatprep.subr.bf16.mxu0 %v7773_v39  ;;  %v7837_v39 = vld [vmem:[#allocation13 + $0x4ac] ss:$28 sps:$4 sm:$0xff]  }
 0x4ca   :  { %6109 = vmatmul.mubr.bf16.vlgmr.msra.gmra.mrb[24].mxu0 %v8485_v51  ;;  %5929 = vmatpush1.bf16.msra.mxu1 %v7770_v40  ;;  %v7838_v40 = vld [vmem:[#allocation13 + $0x9f0] ss:$28 sps:$4 sm:$0xff]  }
 0x4cb   :  { %7066 = vmatpush3.bf16.msra.mxu0 %v7774_v41  ;;  %6148 = vmatprep.mubr.bf16.mxu0 %v8489_v56  ;;  %v7835_v41 = vld [vmem:[#allocation13 + $0x4a8] ss:$28 sps:$4 sm:$0xff]  }
 0x4cc   :  { %5930 = vmatprep.subr.bf16.mxu1 %v7777_v42  ;;  %7067 = vmatprep.subr.bf16.mxu0 %v7778_v53  ;;  %v7839_v42 = vld [vmem:[#allocation13 + $0x830] ss:$28 sps:$4 sm:$0xff]   ;;  %v7842_v53 = vld [vmem:[#allocation13 + $0x4e4] ss:$28 sps:$4 sm:$0xff]  }
 0x4ce   :  { %5931 = vmatpush1.bf16.msra.mxu1 %v7775_v43  ;;  %v7843_v43 = vld [vmem:[#allocation13 + $0xa28] ss:$28 sps:$4 sm:$0xff]  }
 0x4cf   :  { %7068 = vmatpush3.bf16.msra.mxu0 %v7779_v48  ;;  %5932 = vmatprep.subr.bf16.mxu1 %v7782_v50  ;;  %v7840_v48 = vld [vmem:[#allocation13 + $0x4e0] ss:$28 sps:$4 sm:$0xff]   ;;  %v7844_v50 = vld [vmem:[#allocation13 + $0x868] ss:$28 sps:$4 sm:$0xff]  }
 0x4d0   :  { %7069 = vmatprep.subr.bf16.mxu0 %v7783_v54  ;;  %v7847_v54 = vld [vmem:[#allocation13 + $0x51c] ss:$28 sps:$4 sm:$0xff]  }
 0x4d2   :  { %5933 = vmatpush1.bf16.msra.mxu1 %v7780_v55  ;;  %v7848_v55 = vld [vmem:[#allocation13 + $0xa60] ss:$28 sps:$4 sm:$0xff]  }
 0x4d3   :  { %7070 = vmatpush3.bf16.msra.mxu0 %v7784_v21  ;;  %5934 = vmatprep.subr.bf16.mxu1 %v7787_v58  ;;  %v7845_v21 = vld [vmem:[#allocation13 + $0x518] ss:$28 sps:$4 sm:$0xff]   ;;  %v7849_v58 = vld [vmem:[#allocation13 + $0x8a0] ss:$28 sps:$4 sm:$0xff]  }
 0x4d4   :  { %7071 = vmatprep.subr.bf16.mxu0 %v7788_v59  ;;  %v7852_v59 = vld [vmem:[#allocation13 + $0x554] ss:$28 sps:$4 sm:$0xff]  }
 0x4d6   :  { %5935 = vmatpush1.bf16.msra.mxu1 %v7785_v60  ;;  %v7853_v60 = vld [vmem:[#allocation13 + $0xc58] ss:$28 sps:$4 sm:$0xff]  }
 0x4d7   :  { %7072 = vmatpush3.bf16.msra.mxu0 %v7789_v44  ;;  %5936 = vmatprep.subr.bf16.mxu1 %v7792_v45  ;;  %v7850_v44 = vld [vmem:[#allocation13 + $0x550] ss:$28 sps:$4 sm:$0xff]   ;;  %v7854_v45 = vld [vmem:[#allocation13 + $0xa98] ss:$28 sps:$4 sm:$0xff]  }
 0x4d8   :  { %7073 = vmatprep.subr.bf16.mxu0 %v7793_v28  ;;  %v7857_v28 = vld [vmem:[#allocation13 + $0x58c] ss:$28 sps:$4 sm:$0xff]  }
 0x4da   :  { %5937 = vmatpush1.bf16.msra.mxu1 %v7790_v46  ;;  %v7858_v46 = vld [vmem:[#allocation13 + $0xc90] ss:$28 sps:$4 sm:$0xff]  }
 0x4db   :  { %7074 = vmatpush3.bf16.msra.mxu0 %v7794_v52  ;;  %5938 = vmatprep.subr.bf16.mxu1 %v7797_v12  ;;  %v7855_v52 = vld [vmem:[#allocation13 + $0x588] ss:$28 sps:$4 sm:$0xff]   ;;  %v7859_v12 = vld [vmem:[#allocation13 + $0xad0] ss:$28 sps:$4 sm:$0xff]  }
 0x4dc   :  { %7075 = vmatprep.subr.bf16.mxu0 %v7798_v34  ;;  %v7862_v34 = vld [vmem:[#allocation13 + $0x5c4] ss:$28 sps:$4 sm:$0xff]  }
 0x4de   :  { %5939 = vmatpush1.bf16.msra.mxu1 %v7795_v1  ;;  %v7863_v1 = vld [vmem:[#allocation13 + $0xcc8] ss:$28 sps:$4 sm:$0xff]  }
 0x4df   :  { %7076 = vmatpush3.bf16.msra.mxu0 %v7799_v2  ;;  %5940 = vmatprep.subr.bf16.mxu1 %v7802_v3  ;;  %v7860_v2 = vld [vmem:[#allocation13 + $0x5c0] ss:$28 sps:$4 sm:$0xff]   ;;  %v7864_v3 = vld [vmem:[#allocation13 + $0xb08] ss:$28 sps:$4 sm:$0xff]  }
 0x4e0   :  { %7077 = vmatprep.subr.bf16.mxu0 %v7803_v4  ;;  %v7867_v4 = vld [vmem:[#allocation13 + $0x5fc] ss:$28 sps:$4 sm:$0xff]  }
 0x4e2   :  { %5941 = vmatpush1.bf16.msra.mxu1 %v7800_v5  ;;  %v7868_v5 = vld [vmem:[#allocation13 + $0xd00] ss:$28 sps:$4 sm:$0xff]  }
 0x4e3   :  { %7078 = vmatpush3.bf16.msra.mxu0 %v7804_v6  ;;  %5942 = vmatprep.subr.bf16.mxu1 %v7807_v7  ;;  %v7865_v6 = vld [vmem:[#allocation13 + $0x5f8] ss:$28 sps:$4 sm:$0xff]   ;;  %v7869_v7 = vld [vmem:[#allocation13 + $0xb40] ss:$28 sps:$4 sm:$0xff]  }
 0x4e4   :  { %7079 = vmatprep.subr.bf16.mxu0 %v7808_v8  ;;  %v7872_v8 = vld [vmem:[#allocation13 + $0x634] ss:$28 sps:$4 sm:$0xff]  }
 0x4e6   :  { %5943 = vmatpush1.bf16.msra.mxu1 %v7805_v9  ;;  %v7873_v9 = vld [vmem:[#allocation13 + $0xd38] ss:$28 sps:$4 sm:$0xff]  }
 0x4e7   :  { %7080 = vmatpush3.bf16.msra.mxu0 %v7809_v10  ;;  %5953 = vmatprep.subr.bf16.mxu1 %v7812_v11  ;;  %v7870_v10 = vld [vmem:[#allocation13 + $0x630] ss:$28 sps:$4 sm:$0xff]   ;;  %v7874_v11 = vld [vmem:[#allocation13 + $0xb78] ss:$28 sps:$4 sm:$0xff]  }
 0x4e8   :  { %7087 = vmatprep.subr.bf16.mxu0 %v7813_v13  ;;  %v7877_v13 = vld [vmem:[#allocation13 + $0x66c] ss:$28 sps:$4 sm:$0xff]  }
 0x4e9   :  { %5945 = vmatmul.mubr.bf16.vlgmr.msra.gmra.mrb[16].mxu1 %v8485_v51  ;;  %v7824_v51 = vld [vmem:[#allocation13 + $0x788] ss:$28 sps:$4 sm:$0xff]  }
 0x4ea   :  { %6149 = vmatmul.mubr.bf16.vlgmr.msra.gmra.mrb[28].mxu0 %v8498_v0  ;;  %5954 = vmatpush1.bf16.msra.mxu1 %v7810_v47  ;;  %v7878_v47 = vld [vmem:[#allocation13 + $0xd70] ss:$28 sps:$4 sm:$0xff]  }
 0x4eb   :  { %5985 = vmatprep.mubr.bf16.mxu1 %v8489_v56  ;;  %7088 = vmatpush3.bf16.msra.mxu0 %v7814_v14  ;;  %v7829_v56 = vld [vmem:[#allocation13 + $0x7c0] ss:$28 sps:$4 sm:$0xff]   ;;  %v7875_v14 = vld [vmem:[#allocation13 + $0x668] ss:$28 sps:$4 sm:$0xff]  }
 0x4ec   :  { %6188 = vmatprep.mubr.bf16.mxu0 %v8514_v36  ;;  %5955 = vmatprep.subr.bf16.mxu1 %v7817_v15  ;;  %v7879_v15 = vld [vmem:[#allocation13 + $0xbb0] ss:$28 sps:$4 sm:$0xff]  }
 0x4ed   :  { %7089 = vmatprep.subr.bf16.mxu0 %v7818_v16  ;;  %v7882_v16 = vld [vmem:[#allocation13 + $0x6a4] ss:$28 sps:$4 sm:$0xff]  }
 0x4ee   :  { %5956 = vmatpush1.bf16.msra.mxu1 %v7815_v17  ;;  %v7883_v17 = vld [vmem:[#allocation13 + $0xda8] ss:$28 sps:$4 sm:$0xff]  }
 0x4ef   :  { %7090 = vmatpush3.bf16.msra.mxu0 %v7819_v18  ;;  %5957 = vmatprep.subr.bf16.mxu1 %v7822_v24  ;;  %v7880_v18 = vld [vmem:[#allocation13 + $0x6a0] ss:$28 sps:$4 sm:$0xff]   ;;  %v7884_v24 = vld [vmem:[#allocation13 + $0xbe8] ss:$28 sps:$4 sm:$0xff]  }
 0x4f0   :  { %7091 = vmatprep.subr.bf16.mxu0 %v7823_v38  ;;  %v7887_v38 = vld [vmem:[#allocation13 + $0x6dc] ss:$28 sps:$4 sm:$0xff]  }
 0x4f2   :  { %5958 = vmatpush1.bf16.msra.mxu1 %v7820_v25  ;;  %v7888_v25 = vld [vmem:[#allocation13 + $0xde0] ss:$28 sps:$4 sm:$0xff]  }
 0x4f3   :  { %7092 = vmatpush3.bf16.msra.mxu0 %v7824_v51  ;;  %5959 = vmatprep.subr.bf16.mxu1 %v7827_v27  ;;  %v7885_v51 = vld [vmem:[#allocation13 + $0x6d8] ss:$28 sps:$4 sm:$0xff]   ;;  %v7889_v27 = vld [vmem:[#allocation13 + $0xc20] ss:$28 sps:$4 sm:$0xff]  }
 0x4f4   :  { %7093 = vmatprep.subr.bf16.mxu0 %v7828_v57  ;;  %v7892_v57 = vld [vmem:[#allocation13 + $0x714] ss:$28 sps:$4 sm:$0xff]  }
 0x4f6   :  { %5960 = vmatpush1.bf16.msra.mxu1 %v7825_v31  ;;  %v7890_v31 = vld [vmem:[#allocation13 + $0x710] ss:$28 sps:$4 sm:$0xff]  }
 0x4f7   :  { %7094 = vmatpush3.bf16.msra.mxu0 %v7829_v56  ;;  %5961 = vmatprep.subr.bf16.mxu1 %v7832_v32  ;;  %v7895_v56 = vld [vmem:[#allocation13 + $0x74c] ss:$28 sps:$4 sm:$0xff]  }
 0x4f8   :  { %7095 = vmatprep.subr.bf16.mxu0 %v7833_v33  ;;  %v7893_v32 = vld [vmem:[#allocation13 + $0x748] ss:$28 sps:$4 sm:$0xff]  }
 0x4f9   :  { %v7898_v33 = vld [vmem:[#allocation13 + $0x784] ss:$28 sps:$4 sm:$0xff]  }
 0x4fa   :  { %5962 = vmatpush1.bf16.msra.mxu1 %v7830_v35  ;;  %v7896_v35 = vld [vmem:[#allocation13 + $0x780] ss:$28 sps:$4 sm:$0xff]  }
 0x4fb   :  { %7096 = vmatpush3.bf16.msra.mxu0 %v7834_v62  ;;  %5963 = vmatprep.subr.bf16.mxu1 %v7837_v39  ;;  %v7901_v62 = vld [vmem:[#allocation13 + $0x7bc] ss:$28 sps:$4 sm:$0xff]  }
 0x4fc   :  { %7097 = vmatprep.subr.bf16.mxu0 %v7838_v40  ;;  %v7899_v39 = vld [vmem:[#allocation13 + $0x7b8] ss:$28 sps:$4 sm:$0xff]  }
 0x4fd   :  { %v7904_v40 = vld [vmem:[#allocation13 + $0x7f4] ss:$28 sps:$4 sm:$0xff]  }
 0x4fe   :  { %5964 = vmatpush1.bf16.msra.mxu1 %v7835_v41  ;;  %v7902_v41 = vld [vmem:[#allocation13 + $0x7f0] ss:$28 sps:$4 sm:$0xff]  }
 0x4ff   :  { %7098 = vmatpush3.bf16.msra.mxu0 %v7839_v42  ;;  %5965 = vmatprep.subr.bf16.mxu1 %v7842_v53  ;;  %v7905_v42 = vld [vmem:[#allocation13 + $0x828] ss:$28 sps:$4 sm:$0xff]  }
 0x500   :  { %7099 = vmatprep.subr.bf16.mxu0 %v7843_v43  ;;  %v7910_v53 = vld [vmem:[#allocation13 + $0x864] ss:$28 sps:$4 sm:$0xff]   ;;  %v7913_v43 = vld [vmem:[#allocation13 + $0x89c] ss:$28 sps:$4 sm:$0xff]  }
 0x502   :  { %5966 = vmatpush1.bf16.msra.mxu1 %v7840_v48  ;;  %v7911_v48 = vld [vmem:[#allocation13 + $0x898] ss:$28 sps:$4 sm:$0xff]  }
 0x503   :  { %7100 = vmatpush3.bf16.msra.mxu0 %v7844_v50  ;;  %5967 = vmatprep.subr.bf16.mxu1 %v7847_v54  ;;  %v7916_v50 = vld [vmem:[#allocation13 + $0x8d4] ss:$28 sps:$4 sm:$0xff]  }
 0x504   :  { %7101 = vmatprep.subr.bf16.mxu0 %v7848_v55  ;;  %v7914_v54 = vld [vmem:[#allocation13 + $0x8d0] ss:$28 sps:$4 sm:$0xff]  }
 0x505   :  { %v7919_v55 = vld [vmem:[#allocation13 + $0x90c] ss:$28 sps:$4 sm:$0xff]  }
 0x506   :  { %5968 = vmatpush1.bf16.msra.mxu1 %v7845_v21  ;;  %v7917_v21 = vld [vmem:[#allocation13 + $0x908] ss:$28 sps:$4 sm:$0xff]  }
 0x507   :  { %7102 = vmatpush3.bf16.msra.mxu0 %v7849_v58  ;;  %5969 = vmatprep.subr.bf16.mxu1 %v7852_v59  ;;  %v7922_v58 = vld [vmem:[#allocation13 + $0x944] ss:$28 sps:$4 sm:$0xff]  }
 0x508   :  { %7109 = vmatprep.subr.bf16.mxu0 %v7853_v60  ;;  %v7920_v59 = vld [vmem:[#allocation13 + $0x940] ss:$28 sps:$4 sm:$0xff]  }
 0x509   :  { %v7925_v60 = vld [vmem:[#allocation13 + $0x97c] ss:$28 sps:$4 sm:$0xff]  }
 0x50a   :  { %6189 = vmatmul.mubr.bf16.vlgmr.msra.gmra.mrb[32].mxu0 %v8516_v37  ;;  %5970 = vmatpush1.bf16.msra.mxu1 %v7850_v44  ;;  %v7923_v44 = vld [vmem:[#allocation13 + $0x978] ss:$28 sps:$4 sm:$0xff]  }
 0x50b   :  { %7110 = vmatpush3.bf16.msra.mxu0 %v7854_v45  ;;  %6228 = vmatprep.mubr.bf16.mxu0 %v8520_v30  ;;  %v7928_v45 = vld [vmem:[#allocation13 + $0x9b4] ss:$28 sps:$4 sm:$0xff]  }
 0x50c   :  { %5971 = vmatprep.subr.bf16.mxu1 %v7857_v28  ;;  %7111 = vmatprep.subr.bf16.mxu0 %v7858_v46  ;;  %v7926_v28 = vld [vmem:[#allocation13 + $0x9b0] ss:$28 sps:$4 sm:$0xff]  }
 0x50d   :  { %v7931_v46 = vld [vmem:[#allocation13 + $0x9ec] ss:$28 sps:$4 sm:$0xff]  }
 0x50e   :  { %5972 = vmatpush1.bf16.msra.mxu1 %v7855_v52  ;;  %v7929_v52 = vld [vmem:[#allocation13 + $0x9e8] ss:$28 sps:$4 sm:$0xff]  }
 0x50f   :  { %7112 = vmatpush3.bf16.msra.mxu0 %v7859_v12  ;;  %5973 = vmatprep.subr.bf16.mxu1 %v7862_v34  ;;  %v7934_v12 = vld [vmem:[#allocation13 + $0xa24] ss:$28 sps:$4 sm:$0xff]  }
 0x510   :  { %7113 = vmatprep.subr.bf16.mxu0 %v7863_v1  ;;  %v7932_v34 = vld [vmem:[#allocation13 + $0xa20] ss:$28 sps:$4 sm:$0xff]  }
 0x511   :  { %v7937_v1 = vld [vmem:[#allocation13 + $0xa5c] ss:$28 sps:$4 sm:$0xff]  }
 0x512   :  { %5974 = vmatpush1.bf16.msra.mxu1 %v7860_v2  ;;  %v7935_v2 = vld [vmem:[#allocation13 + $0xa58] ss:$28 sps:$4 sm:$0xff]  }
 0x513   :  { %7114 = vmatpush3.bf16.msra.mxu0 %v7864_v3  ;;  %5975 = vmatprep.subr.bf16.mxu1 %v7867_v4  ;;  %v7940_v3 = vld [vmem:[#allocation13 + $0xa94] ss:$28 sps:$4 sm:$0xff]  }
 0x514   :  { %7115 = vmatprep.subr.bf16.mxu0 %v7868_v5  ;;  %v7938_v4 = vld [vmem:[#allocation13 + $0xa90] ss:$28 sps:$4 sm:$0xff]  }
 0x515   :  { %v7943_v5 = vld [vmem:[#allocation13 + $0xacc] ss:$28 sps:$4 sm:$0xff]  }
 0x516   :  { %5976 = vmatpush1.bf16.msra.mxu1 %v7865_v6  ;;  %v7941_v6 = vld [vmem:[#allocation13 + $0xac8] ss:$28 sps:$4 sm:$0xff]  }
 0x517   :  { %7116 = vmatpush3.bf16.msra.mxu0 %v7869_v7  ;;  %5977 = vmatprep.subr.bf16.mxu1 %v7872_v8  ;;  %v7946_v7 = vld [vmem:[#allocation13 + $0xb04] ss:$28 sps:$4 sm:$0xff]  }
 0x518   :  { %7117 = vmatprep.subr.bf16.mxu0 %v7873_v9  ;;  %v7944_v8 = vld [vmem:[#allocation13 + $0xb00] ss:$28 sps:$4 sm:$0xff]  }
 0x519   :  { %v7949_v9 = vld [vmem:[#allocation13 + $0xb3c] ss:$28 sps:$4 sm:$0xff]  }
 0x51a   :  { %5978 = vmatpush1.bf16.msra.mxu1 %v7870_v10  ;;  %v7947_v10 = vld [vmem:[#allocation13 + $0xb38] ss:$28 sps:$4 sm:$0xff]  }
 0x51b   :  { %7118 = vmatpush3.bf16.msra.mxu0 %v7874_v11  ;;  %5979 = vmatprep.subr.bf16.mxu1 %v7877_v13  ;;  %v7952_v11 = vld [vmem:[#allocation13 + $0xb74] ss:$28 sps:$4 sm:$0xff]  }
 0x51c   :  { %7119 = vmatprep.subr.bf16.mxu0 %v7878_v47  ;;  %v7950_v13 = vld [vmem:[#allocation13 + $0xb70] ss:$28 sps:$4 sm:$0xff]   ;;  %v8550_v47 = vld [vmem:[#allocation14] sm:$0xff] }
 0x51e   :  { %5980 = vmatpush1.bf16.msra.mxu1 %v7875_v14  ;;  %v3256_v14 = vrot.slane %v8550_v47, %v8448_v23 }
 0x51f   :  { %7120 = vmatpush3.bf16.msra.mxu0 %v7879_v15  ;;  %5981 = vmatprep.subr.bf16.mxu1 %v7882_v16  ;;  %v3252_v15 = vrot.slane %v8550_v47, %v8427_v22  ;;  %v3260_v16 = vrot.slane %v8550_v47, %v8451_v26  ;;  %v7961_v26 = vld [vmem:[#allocation13 + $0xc1c] ss:$28 sps:$4 sm:$0xff]  }
 0x520   :  { %7121 = vmatprep.subr.bf16.mxu0 %v7883_v17  ;;  %v7953_v17 = vld [vmem:[#allocation13 + $0xba8] ss:$28 sps:$4 sm:$0xff]  }
 0x522   :  { %5982 = vmatpush1.bf16.msra.mxu1 %v7880_v18  ;;  %v7958_v18 = vld [vmem:[#allocation13 + $0xbe4] ss:$28 sps:$4 sm:$0xff]  }
 0x523   :  { %7122 = vmatpush3.bf16.msra.mxu0 %v7884_v24  ;;  %5983 = vmatprep.subr.bf16.mxu1 %v7887_v38 }
 0x524   :  { %7123 = vmatprep.subr.bf16.mxu0 %v7888_v25 }
 0x526   :  { %5984 = vmatpush1.bf16.msra.mxu1 %v7885_v51 }
 0x527   :  { %7124 = vmatpush3.bf16.msra.mxu0 %v7889_v27  ;;  %5994 = vmatprep.subr.bf16.mxu1 %v7892_v57 }
 0x529   :  { %5986 = vmatmul.mubr.bf16.vlgmr.msra.gmra.mrb[16].mxu1 %v8498_v0  ;;  %v7907_v0 = vld [vmem:[#allocation13 + $0x82c] ss:$28 sps:$4 sm:$0xff]  }
 0x52a   :  { %6229 = vmatmul.mubr.bf16.vlgmr.msra.gmra.mrb[36].mxu0 %v8531_v61  ;;  %5995 = vmatpush1.bf16.msra.mxu1 %v7890_v31 }
 0x52b   :  { %6026 = vmatprep.mubr.bf16.mxu1 %v8514_v36  ;;  %5996 = vmatprep.subr.bf16.mxu1 %v7895_v56  ;;  %v7908_v36 = vld [vmem:[#allocation13 + $0x860] ss:$28 sps:$4 sm:$0xff]  }
 0x52e   :  { %5997 = vmatpush1.bf16.msra.mxu1 %v7893_v32  ;;  %v7956_v32 = vld [vmem:[#allocation13 + $0xbe0] ss:$28 sps:$4 sm:$0xff]  }
 0x52f   :  { %5998 = vmatprep.subr.bf16.mxu1 %v7898_v33 }
 0x532   :  { %5999 = vmatpush1.bf16.msra.mxu1 %v7896_v35  ;;  %v7959_v35 = vld [vmem:[#allocation13 + $0xc18] ss:$28 sps:$4 sm:$0xff]  }
 0x533   :  { %6000 = vmatprep.subr.bf16.mxu1 %v7901_v62  ;;  %v7964_v62 = vld [vmem:[#allocation13 + $0xc54] ss:$28 sps:$4 sm:$0xff]  }
 0x536   :  { %6001 = vmatpush1.bf16.msra.mxu1 %v7899_v39  ;;  %v7962_v39 = vld [vmem:[#allocation13 + $0xc50] ss:$28 sps:$4 sm:$0xff]  }
 0x537   :  { %6002 = vmatprep.subr.bf16.mxu1 %v7904_v40  ;;  %v7967_v40 = vld [vmem:[#allocation13 + $0xc8c] ss:$28 sps:$4 sm:$0xff]  }
 0x53a   :  { %6003 = vmatpush1.bf16.msra.mxu1 %v7902_v41 }
 0x53b   :  { %6004 = vmatprep.subr.bf16.mxu1 %v7907_v0 }
 0x53e   :  { %6005 = vmatpush1.bf16.msra.mxu1 %v7905_v42  ;;  %v7965_v42 = vld [vmem:[#allocation13 + $0xc88] ss:$28 sps:$4 sm:$0xff]  }
 0x53f   :  { %6006 = vmatprep.subr.bf16.mxu1 %v7910_v53 }
 0x542   :  { %6007 = vmatpush1.bf16.msra.mxu1 %v7908_v36  ;;  %v7970_v36 = vld [vmem:[#allocation13 + $0xcc4] ss:$28 sps:$4 sm:$0xff]  }
 0x543   :  { %6008 = vmatprep.subr.bf16.mxu1 %v7913_v43 }
 0x546   :  { %6009 = vmatpush1.bf16.msra.mxu1 %v7911_v48  ;;  %v7968_v48 = vld [vmem:[#allocation13 + $0xcc0] ss:$28 sps:$4 sm:$0xff]  }
 0x547   :  { %6010 = vmatprep.subr.bf16.mxu1 %v7916_v50  ;;  %v7973_v50 = vld [vmem:[#allocation13 + $0xcfc] ss:$28 sps:$4 sm:$0xff]  }
 0x54a   :  { %6011 = vmatpush1.bf16.msra.mxu1 %v7914_v54  ;;  %v7971_v54 = vld [vmem:[#allocation13 + $0xcf8] ss:$28 sps:$4 sm:$0xff]  }
 0x54b   :  { %6012 = vmatprep.subr.bf16.mxu1 %v7919_v55  ;;  %v7976_v55 = vld [vmem:[#allocation13 + $0xd34] ss:$28 sps:$4 sm:$0xff]  }
 0x54e   :  { %6013 = vmatpush1.bf16.msra.mxu1 %v7917_v21  ;;  %v7974_v21 = vld [vmem:[#allocation13 + $0xd30] ss:$28 sps:$4 sm:$0xff]  }
 0x54f   :  { %6014 = vmatprep.subr.bf16.mxu1 %v7922_v58  ;;  %v7979_v58 = vld [vmem:[#allocation13 + $0xd6c] ss:$28 sps:$4 sm:$0xff]  }
 0x552   :  { %6015 = vmatpush1.bf16.msra.mxu1 %v7920_v59  ;;  %v7977_v59 = vld [vmem:[#allocation13 + $0xd68] ss:$28 sps:$4 sm:$0xff]  }
 0x553   :  { %6016 = vmatprep.subr.bf16.mxu1 %v7925_v60  ;;  %v7982_v60 = vld [vmem:[#allocation13 + $0xda4] ss:$28 sps:$4 sm:$0xff]  }
 0x556   :  { %6017 = vmatpush1.bf16.msra.mxu1 %v7923_v44 }
 0x557   :  { %6018 = vmatprep.subr.bf16.mxu1 %v7928_v45 }
 0x55a   :  { %6019 = vmatpush1.bf16.msra.mxu1 %v7926_v28  ;;  %v7980_v28 = vld [vmem:[#allocation13 + $0xda0] ss:$28 sps:$4 sm:$0xff]  }
 0x55b   :  { %6020 = vmatprep.subr.bf16.mxu1 %v7931_v46 }
 0x55e   :  { %6021 = vmatpush1.bf16.msra.mxu1 %v7929_v52 }
 0x55f   :  { %6022 = vmatprep.subr.bf16.mxu1 %v7934_v12  ;;  %v7985_v12 = vld [vmem:[#allocation13 + $0xddc] ss:$28 sps:$4 sm:$0xff]  }
 0x562   :  { %6023 = vmatpush1.bf16.msra.mxu1 %v7932_v34 }
 0x563   :  { %6024 = vmatprep.subr.bf16.mxu1 %v7937_v1  ;;  %v7983_v1 = vld [vmem:[#allocation13 + $0xdd8] ss:$28 sps:$4 sm:$0xff]  }
 0x566   :  { %6025 = vmatpush1.bf16.msra.mxu1 %v7935_v2  ;;  %v3272_v2 = vrot.slane %v8550_v47, %v1093_v29 }
 0x567   :  { %6035 = vmatprep.subr.bf16.mxu1 %v7940_v3 }
 0x569   :  { %6027 = vmatmul.mubr.bf16.vlgmr.msra.gmra.mrb[16].mxu1 %v8516_v37  ;;  %v7955_v37 = vld [vmem:[#allocation13 + $0xbac] ss:$28 sps:$4 sm:$0xff]  }
 0x56a   :  { %6036 = vmatpush1.bf16.msra.mxu1 %v7938_v4  ;;  %6067 = vmatprep.mubr.bf16.mxu1 %v8520_v30  ;;  %v3248_v30 = vrot.slane %v8550_v47, %v8422_v20 }
 0x56b   :  { %6037 = vmatprep.subr.bf16.mxu1 %v7943_v5 }
 0x56e   :  { %6038 = vmatpush1.bf16.msra.mxu1 %v7941_v6 }
 0x56f   :  { %6039 = vmatprep.subr.bf16.mxu1 %v7946_v7 }
 0x572   :  { %6040 = vmatpush1.bf16.msra.mxu1 %v7944_v8 }
 0x573   :  { %6041 = vmatprep.subr.bf16.mxu1 %v7949_v9 }
 0x576   :  { %6042 = vmatpush1.bf16.msra.mxu1 %v7947_v10 }
 0x577   :  { %6043 = vmatprep.subr.bf16.mxu1 %v7952_v11 }
 0x57a   :  { %6044 = vmatpush1.bf16.msra.mxu1 %v7950_v13 }
 0x57b   :  { %6045 = vmatprep.subr.bf16.mxu1 %v7955_v37 }
 0x57c   :  { %v5741_v24 = vpop.f32.mrb[12].mxu1  ;;  %v5905_v38 = vpop.f32.mrb[20].mxu0 }
 0x57d   :  { %v7171_v25 = vadd.f32 %v5741_v24, %v3248_v30  ;;  %v7173_v51 = vadd.f32 %v5905_v38, %v3256_v14  ;;  %v5743_v27 = vpop.f32.mrb[13].mxu1  ;;  %v5907_v57 = vpop.f32.mrb[21].mxu0  ;;  %v3264_v38 = vrot.slane %v8550_v47, %v1085_v49 }
 0x57e   :  { %v7172_v20 = vadd.f32 %v5743_v27, %v3252_v15  ;;  %v7174_v31 = vadd.f32 %v5907_v57, %v3260_v16  ;;  %v5745_v56 = vpop.f32.mrb[14].mxu1  ;;  %v5909_v23 = vpop.f32.mrb[22].mxu0  ;;  %6046 = vmatpush1.bf16.msra.mxu1 %v7953_v17 }
 0x57f   :  { %7986 = vtanh.f32 %v7171_v25  ;;  %v5746_v22 = vpop.f32.mrb[15].mxu1  ;;  %v5910_v33 = vpop.f32.mrb[23].mxu0  ;;  %6047 = vmatprep.subr.bf16.mxu1 %v7958_v18  ;;  %v3268_v25 = vrot.slane %v8550_v47, %v1089_v63 }
 0x580   :  { %7988 = vtanh.f32 %v7173_v51 }
 0x581   :  { %7990 = vtanh.f32 %v7172_v20 }
 0x582   :  { %7992 = vtanh.f32 %v7174_v31  ;;  %6048 = vmatpush1.bf16.msra.mxu1 %v7956_v32 }
 0x583   :  { %6049 = vmatprep.subr.bf16.mxu1 %v7961_v26 }
 0x586   :  { %6050 = vmatpush1.bf16.msra.mxu1 %v7959_v35 }
 0x587   :  { %6051 = vmatprep.subr.bf16.mxu1 %v7964_v62 }
 0x589   :  { %v7987_v41 = vpop.eup %7986 }
 0x58a   :  { %v7989_v0 = vpop.eup %7988  ;;  %6243 = vst [vmem:[#allocation16] sm:$0xff] %v7987_v41  ;;  %6052 = vmatpush1.bf16.msra.mxu1 %v7962_v39 }
 0x58b   :  { %v7991_v53 = vpop.eup %7990  ;;  %6245 = vst [vmem:[#allocation16 + $0x10] sm:$0xff] %v7989_v0  ;;  %6053 = vmatprep.subr.bf16.mxu1 %v7967_v40 }
 0x58c   :  { %v7993_v43 = vpop.eup %7992  ;;  %6244 = vst [vmem:[#allocation16 + $0x8] sm:$0xff] %v7991_v53 }
 0x58d   :  { %6246 = vst [vmem:[#allocation16 + $0x18] sm:$0xff] %v7993_v43 }
 0x58e   :  { %6054 = vmatpush1.bf16.msra.mxu1 %v7965_v42 }
 0x58f   :  { %6055 = vmatprep.subr.bf16.mxu1 %v7970_v36 }
 0x592   :  { %6056 = vmatpush1.bf16.msra.mxu1 %v7968_v48 }
 0x593   :  { %6057 = vmatprep.subr.bf16.mxu1 %v7973_v50 }
 0x596   :  { %6058 = vmatpush1.bf16.msra.mxu1 %v7971_v54 }
 0x597   :  { %6059 = vmatprep.subr.bf16.mxu1 %v7976_v55 }
 0x59a   :  { %6060 = vmatpush1.bf16.msra.mxu1 %v7974_v21 }
 0x59b   :  { %6061 = vmatprep.subr.bf16.mxu1 %v7979_v58 }
 0x59d   :  { %v7059_v44 = vpop.f32.mrb[24].mxu0 }
 0x59e   :  { %v7060_v45 = vpop.f32.mrb[25].mxu0  ;;  %6062 = vmatpush1.bf16.msra.mxu1 %v7977_v59 }
 0x59f   :  { %v7061_v46 = vadd.f32 %v7060_v45, %v7059_v44  ;;  %v7062_v52 = vpop.f32.mrb[26].mxu0  ;;  %6063 = vmatprep.subr.bf16.mxu1 %v7982_v60 }
 0x5a0   :  { %v7063_v34 = vpop.f32.mrb[27].mxu0 }
 0x5a1   :  { %v6111_v5 = vadd.f32 %v7061_v46, %v3272_v2 }
 0x5a2   :  { %6064 = vmatpush1.bf16.msra.mxu1 %v7980_v28 }
 0x5a3   :  { %6065 = vmatprep.subr.bf16.mxu1 %v7985_v12 }
 0x5a6   :  { %6066 = vmatpush1.bf16.msra.mxu1 %v7983_v1 }
 0x5a9   :  { %6068 = vmatmul.mubr.bf16.vlgmr.msra.gmra.mrb[16].mxu1 %v8531_v61 }
 0x5bd   :  { %v7081_v3 = vpop.f32.mrb[28].mxu0 }
 0x5be   :  { %v7082_v4 = vpop.f32.mrb[29].mxu0 }
 0x5bf   :  { %v7083_v6 = vadd.f32 %v7082_v4, %v7081_v3  ;;  %v7084_v7 = vpop.f32.mrb[30].mxu0 }
 0x5c0   :  { %v7085_v8 = vpop.f32.mrb[31].mxu0 }
 0x5c1   :  { %v6151_v9 = vadd.f32 %v7083_v6, %v6111_v5 }
 0x5dd   :  { %v7103_v10 = vpop.f32.mrb[32].mxu0 }
 0x5de   :  { %v7104_v11 = vpop.f32.mrb[33].mxu0 }
 0x5df   :  { %v7105_v13 = vadd.f32 %v7104_v11, %v7103_v10  ;;  %v7106_v37 = vpop.f32.mrb[34].mxu0 }
 0x5e0   :  { %v7107_v30 = vpop.f32.mrb[35].mxu0 }
 0x5e1   :  { %v6191_v14 = vadd.f32 %v7105_v13, %v6151_v9 }
 0x5fd   :  { %v7125_v15 = vpop.f32.mrb[36].mxu0 }
 0x5fe   :  { %v7126_v16 = vpop.f32.mrb[37].mxu0 }
 0x5ff   :  { %v7127_v61 = vadd.f32 %v7126_v16, %v7125_v15  ;;  %v7128_v17 = vpop.f32.mrb[38].mxu0 }
 0x600   :  { %v7129_v18 = vpop.f32.mrb[39].mxu0 }
 0x601   :  { %v6231_v24 = vadd.f32 %v7127_v61, %v6191_v14 }
 0x603   :  { %7994 = vtanh.f32 %v6231_v24 }
 0x60d   :  { %v7995_v29 = vpop.eup %7994 }
 0x60e   :  { %6249 = vst [vmem:[#allocation16 + $0x30] sm:$0xff] %v7995_v29 }
 0x67c   :  { %v6069_v51 = vpop.f32.mrb[16].mxu1 }
 0x67d   :  { %v7175_v27 = vadd.f32 %v6069_v51, %v3264_v38  ;;  %v6071_v57 = vpop.f32.mrb[17].mxu1 }
 0x67e   :  { %v7176_v20 = vadd.f32 %v6071_v57, %v3268_v25  ;;  %v6073_v31 = vpop.f32.mrb[18].mxu1 }
 0x67f   :  { %7996 = vtanh.f32 %v7175_v27  ;;  %v6074_v56 = vpop.f32.mrb[19].mxu1 }
 0x680   :  { %7998 = vtanh.f32 %v7176_v20 }
 0x689   :  { %v7997_v23 = vpop.eup %7996 }
 0x68a   :  { %v7999_v32 = vpop.eup %7998  ;;  %6247 = vst [vmem:[#allocation16 + $0x20] sm:$0xff] %v7997_v23 }
 0x68b   :  { %6248 = vst [vmem:[#allocation16 + $0x28] sm:$0xff] %v7999_v32 }
 0x68c   :  { %8187 = shalt.err (!%p8184_p12)
}
 0x68d   :  { %s8188_s5 = scalar_lea.hbm %s8592_s10, 896 }
 0x68e   :  { %p8189_p13 = scmp.ne.s32.totalorder %s8592_s10, %s8188_s5  ;;  %p8192_p0 = scmp.lt.u32.totalorder %s8188_s5, %s8592_s10 }
 0x690   :  { %p8194_p1 = pnand %p8192_p0, %p8189_p13 }
 0x692   :  { %8197 = shalt.err (!%p8194_p1)
}
 0x693   :  { %6259 = dma.vmem_to_hbm [thread:$0]  %s6257_s26, 896, %s8592_s10, [#allocation4]  }
 0x694   :  { %8208 = dma.done.wait [#allocation4], 896  }
 0x695   :  { %8209 = vsyncadd [#allocation4], 4294966400 }
 0x696   :  { %6263 = vsyncpa [#allocation3], 1 }
 0x697   :  { %6264 = vsyncpa [#allocation6], 1 }
 0x698   :  { %6265 = vsyncpa [#allocation9], 1 }
 0x699   :  { %6266 = vsyncpa [#allocation12], 1 }
 0x69a   :  { %6267 = vsyncpa [#allocation15], 1 }
 0x69b   :  { %6268 = vsyncpa [#allocation4], 1 }

</bundles_post_ra>
